<compile_context>
chip_gen: v7x
topology: tpu7x:2x2x1
jax: 0.10.0
libtpu: 0.0.40
codegen_flags: <defaults>
</compile_context>

<pallas_src>
import math
from functools import partial

import jax
import jax.numpy as jnp
from jax.experimental import pallas as pl
from jax.experimental.pallas import tpu as pltpu


# ----------------------------------------------------------------------------
# In-kernel numeric helpers (pure value -> value)
# ----------------------------------------------------------------------------

def _layernorm(x, g, b, eps):
    # LayerNorm over the last dim.  Works for (N, C3) with (1, C3) params and
    # for (3, N, C3) with (3, 1, C3) params (per-stream norm1 of Block).
    mean = jnp.mean(x, axis=-1, keepdims=True)
    xc = x - mean
    var = jnp.mean(xc * xc, axis=-1, keepdims=True)
    return xc * jax.lax.rsqrt(var + eps) * g + b


def _layernorm_full(x, g, b, eps):
    # LayerNorm over the FULL concatenated channel dim (all 3 streams jointly),
    # computed directly on the (3, N, C3) layout.  g, b: (3, 1, C3).
    c_total = x.shape[0] * x.shape[2]
    mean = jnp.sum(jnp.sum(x, axis=2, keepdims=True), axis=0, keepdims=True) / c_total
    xc = x - mean
    var = jnp.sum(jnp.sum(xc * xc, axis=2, keepdims=True), axis=0, keepdims=True) / c_total
    return xc * jax.lax.rsqrt(var + eps) * g + b


def _gelu(h):
    # exact (erf) GELU, matches nn.GELU default
    return 0.5 * h * (1.0 + jax.lax.erf(h * (1.0 / math.sqrt(2.0))))


# ----------------------------------------------------------------------------
# Single fused kernel: pos-add -> 2x Block -> Part_Block
# ----------------------------------------------------------------------------

def _transformer_kernel(*refs, num_heads, eps, depth):
    (x_ref, pos_ref, mask_ref,
     b_n1_g, b_n1_b, b_wq, b_bq, b_wk, b_bk, b_wv, b_bv, b_pw, b_pb,
     b_n2_g, b_n2_b, b_w1, b_b1, b_w2, b_b2,
     p_n_g, p_n_b, p_wq, p_bq, p_wk, p_bk, p_wv, p_bv, p_pw, p_pb,
     p_n2_g, p_n2_b, p_w1, p_b1, p_w2, p_b2,
     o_ref) = refs

    _, _, N, C3 = x_ref.shape
    head_dim = C3 // num_heads
    scale = float(head_dim) ** -0.5
    mask = mask_ref[...]                                   # (H, 1, C3) head selector

    def attn_heads(q, k, v):
        """All-heads attention on (N, C3) q/k/v values.

        Heads are handled by tiling q along sublanes with a per-head channel
        mask (block-diagonal trick): one (H*N, C3)x(C3, N) logits matmul, ONE
        softmax pass covering all heads (heads live on sublanes), and one
        (H*N, N)x(N, C3) context matmul -- no per-head slicing or stores."""
        H = mask.shape[0]
        qm = ((q * scale)[None, :, :] * mask).reshape(H * N, C3)
        logits = jax.lax.dot_general(qm, k, (((1,), (1,)), ((), ())),
                                     preferred_element_type=jnp.float32)   # (H*N, N)
        logits = logits - jnp.max(logits, axis=-1, keepdims=True)
        p = jnp.exp(logits)
        p = p / jnp.sum(p, axis=-1, keepdims=True)          # exact softmax (parity)
        y = jnp.dot(p, v, preferred_element_type=jnp.float32)              # (H*N, C3)
        return jnp.sum(y.reshape(H, N, C3) * mask, axis=0)                 # (N, C3)

    def mlp(xn, w1, b1, w2, b2):
        # xn: (3,N,C3); w1: (3,C3,Hm); b1: (1,Hm); w2: (3,Hm,C3); b2: (3,1,C3)
        h = (jnp.dot(xn[0], w1[0], preferred_element_type=jnp.float32)
             + jnp.dot(xn[1], w1[1], preferred_element_type=jnp.float32)
             + jnp.dot(xn[2], w1[2], preferred_element_type=jnp.float32) + b1)
        h = _gelu(h)
        y = jnp.stack([jnp.dot(h, w2[s], preferred_element_type=jnp.float32)
                       for s in range(3)], axis=0)
        return y + b2

    # pos-embed add fused; Dropout / DropPath are identity in eval mode.
    x = x_ref[0].astype(jnp.float32) + pos_ref[0].astype(jnp.float32)       # (3, N, C3)

    # ----------------------------- 2x Block ------------------------------
    for L in range(depth):
        xn = _layernorm(x, b_n1_g[L], b_n1_b[L], eps)                       # (3, N, C3)
        # QKV projections batched over the 3 streams (leading batch dim).
        q = jnp.einsum('snc,sco->sno', xn, b_wq[L],
                       preferred_element_type=jnp.float32) + b_bq[L]
        k = jnp.einsum('snc,sco->sno', xn, b_wk[L],
                       preferred_element_type=jnp.float32) + b_bk[L]
        v = jnp.einsum('snc,sco->sno', xn, b_wv[L],
                       preferred_element_type=jnp.float32) + b_bv[L]
        ctx = jnp.stack([attn_heads(q[s], k[s], v[s]) for s in range(3)], axis=0)
        att = jnp.einsum('snc,sco->sno', ctx, b_pw[L],
                         preferred_element_type=jnp.float32) + b_pb[L]
        x = x + att                                                          # residual
        x = x + mlp(_layernorm_full(x, b_n2_g[L], b_n2_b[L], eps),
                    b_w1[L], b_b1[L], b_w2[L], b_b2[L])                      # residual

    # ---------------------------- Part_Block -----------------------------
    png = p_n_g[...]
    pnb = p_n_b[...]
    qw = p_wq[...]
    qb = p_bq[...]
    kw = p_wk[...]
    kb = p_bk[...]
    vw = p_wv[...]
    vb = p_bv[...]
    pw = p_pw[...]
    pb = p_pb[...]

    def ln(z, i):
        return _layernorm(z, png[i], pnb[i], eps)

    def part_attn(xq, xk, xv, i):
        q = jnp.dot(xq, qw[i], preferred_element_type=jnp.float32) + qb[i]
        k = jnp.dot(xk, kw[i], preferred_element_type=jnp.float32) + kb[i]
        v = jnp.dot(xv, vw[i], preferred_element_type=jnp.float32) + vb[i]
        return jnp.dot(attn_heads(q, k, v), pw[i],
                       preferred_element_type=jnp.float32) + pb[i]

    x1, x2, x3 = x[0], x[1], x[2]
    # stream 1: q <- LN(x2), k <- LN(x3), v <- LN(x1)
    x1 = x1 + part_attn(ln(x2, 0), ln(x3, 1), ln(x1, 2), 0)
    # stream 2 uses the UPDATED x1
    x2 = x2 + part_attn(ln(x1, 3), ln(x3, 4), ln(x2, 5), 1)
    # stream 3 uses the UPDATED x1 and x2
    x3 = x3 + part_attn(ln(x1, 6), ln(x2, 7), ln(x3, 8), 2)

    x = jnp.stack([x1, x2, x3], axis=0)
    x = x + mlp(_layernorm_full(x, p_n2_g[...], p_n2_b[...], eps),
                p_w1[...], p_b1[...], p_w2[...], p_b2[...])

    # TODO(synk): Temporal_norm is declared in the reference __init__ but never
    # used in forward; intentionally omitted.
    o_ref[0] = x.astype(o_ref.dtype)


# ----------------------------------------------------------------------------
# Wrapper: one pallas_call for the whole forward
# ----------------------------------------------------------------------------

_BLOCK_WEIGHT_NAMES = ("b_n1_g", "b_n1_b", "b_wq", "b_bq", "b_wk", "b_bk",
                       "b_wv", "b_bv", "b_pw", "b_pb", "b_n2_g", "b_n2_b",
                       "b_w1", "b_b1", "b_w2", "b_b2")
_PART_WEIGHT_NAMES = ("p_n_g", "p_n_b", "p_wq", "p_bq", "p_wk", "p_bk",
                      "p_wv", "p_bv", "p_pw", "p_pb", "p_n2_g", "p_n2_b",
                      "p_w1", "p_b1", "p_w2", "p_b2")


def _const_spec(shape):
    n = len(shape)
    return pl.BlockSpec(tuple(shape), lambda b, _n=n: (0,) * _n)


def transformer_forward(x1, x2, x3, params, num_heads, eps=1e-6):
    """Whole Transformer forward (pos-add + 2x Block + Part_Block) in ONE kernel."""
    B, N, C3 = x1.shape
    depth = params["b_wq"].shape[0]
    head_dim = C3 // num_heads

    # Streams stacked along a leading axis -> stream slicing inside the kernel
    # is a free leading-dim index (no lane-offset slicing / channel concats).
    x = jnp.stack([x1, x2, x3], axis=1)                                    # (B, 3, N, C3)
    pos = jnp.stack([params["pos1"], params["pos2"], params["pos3"]], axis=1)  # (1,3,N,C3)
    head_mask = (jnp.arange(C3)[None, :] // head_dim
                 == jnp.arange(num_heads)[:, None]
                 ).astype(jnp.float32)[:, None, :]                         # (H, 1, C3)

    weights = [params[n] for n in _BLOCK_WEIGHT_NAMES + _PART_WEIGHT_NAMES]

    in_specs = [pl.BlockSpec((1, 3, N, C3), lambda b: (b, 0, 0, 0)),
                _const_spec(pos.shape),
                _const_spec(head_mask.shape)]
    in_specs += [_const_spec(w.shape) for w in weights]

    out = pl.pallas_call(
        partial(_transformer_kernel, num_heads=num_heads, eps=eps, depth=depth),
        out_shape=jax.ShapeDtypeStruct((B, 3, N, C3), x1.dtype),
        grid=(B,),
        in_specs=in_specs,
        out_specs=pl.BlockSpec((1, 3, N, C3), lambda b: (b, 0, 0, 0)),
        compiler_params=pltpu.CompilerParams(dimension_semantics=("parallel",)),
    )(x, pos, head_mask, *weights)

    return out[:, 0], out[:, 1], out[:, 2]


# ----------------------------------------------------------------------------
# Deterministic parameter initialization.  Shapes follow the module __init__:
#   * per-stream weights stacked on a leading 3 axis (streams),
#   * the 2 Blocks stacked on a leading `depth` axis,
#   * Part_Block LN params stacked on 9 in order [11,12,13,21,22,23,31,32,33],
#   * norm2 / MLP fc1(in) / fc2(out) params pre-split per stream so the kernel
#     never needs a channel concat.
# ----------------------------------------------------------------------------

def init_params(key, embed_dim, num_heads, mlp_hidden, length, depth=2):
    C3 = embed_dim // 3
    keys = iter(jax.random.split(key, 64))

    def rnd(shape, scale=0.02):
        return (scale * jax.random.normal(next(keys), shape)).astype(jnp.float32)

    return dict(
        pos1=rnd((1, length, C3)),
        pos2=rnd((1, length, C3)),
        pos3=rnd((1, length, C3)),
        # ------ 2x Block (stacked on leading depth axis) ------
        b_n1_g=jnp.ones((depth, 3, 1, C3), jnp.float32),
        b_n1_b=jnp.zeros((depth, 3, 1, C3), jnp.float32),
        b_wq=rnd((depth, 3, C3, C3)), b_bq=rnd((depth, 3, 1, C3)),
        b_wk=rnd((depth, 3, C3, C3)), b_bk=rnd((depth, 3, 1, C3)),
        b_wv=rnd((depth, 3, C3, C3)), b_bv=rnd((depth, 3, 1, C3)),
        b_pw=rnd((depth, 3, C3, C3)), b_pb=rnd((depth, 3, 1, C3)),
        b_n2_g=jnp.ones((depth, 3, 1, C3), jnp.float32),
        b_n2_b=jnp.zeros((depth, 3, 1, C3), jnp.float32),
        b_w1=rnd((depth, 3, C3, mlp_hidden)), b_b1=rnd((depth, 1, mlp_hidden)),
        b_w2=rnd((depth, 3, mlp_hidden, C3)), b_b2=rnd((depth, 3, 1, C3)),
        # ------ Part_Block ------
        p_n_g=jnp.ones((9, 1, C3), jnp.float32),
        p_n_b=jnp.zeros((9, 1, C3), jnp.float32),
        p_wq=rnd((3, C3, C3)), p_bq=rnd((3, 1, C3)),
        p_wk=rnd((3, C3, C3)), p_bk=rnd((3, 1, C3)),
        p_wv=rnd((3, C3, C3)), p_bv=rnd((3, 1, C3)),
        p_pw=rnd((3, C3, C3)), p_pb=rnd((3, 1, C3)),
        p_n2_g=jnp.ones((3, 1, C3), jnp.float32),
        p_n2_b=jnp.zeros((3, 1, C3), jnp.float32),
        p_w1=rnd((3, C3, mlp_hidden)), p_b1=rnd((1, mlp_hidden)),
        p_w2=rnd((3, mlp_hidden, C3)), p_b2=rnd((3, 1, C3)),
    )


# ----------------------------------------------------------------------------
# Main
# ----------------------------------------------------------------------------

if __name__ == "__main__":
    # small consistent config: embed_dim=96 (dim//3 = 32), 8 heads (head_dim=4),
    # mlp_hidden=64, seq length N=8, batch B=2
    B, N = 2, 8
    EMBED_DIM, NUM_HEADS, MLP_HIDDEN = 96, 8, 64
    C3 = EMBED_DIM // 3

    key = jax.random.PRNGKey(0)
    kp, k1, k2, k3 = jax.random.split(key, 4)
    params = init_params(kp, EMBED_DIM, NUM_HEADS, MLP_HIDDEN, N)

    x_1 = jax.random.normal(k1, (B, N, C3), jnp.float32)
    x_2 = jax.random.normal(k2, (B, N, C3), jnp.float32)
    x_3 = jax.random.normal(k3, (B, N, C3), jnp.float32)

    fwd = jax.jit(partial(transformer_forward, num_heads=NUM_HEADS))
    y_1, y_2, y_3 = fwd(x_1, x_2, x_3, params)
    jax.block_until_ready((y_1, y_2, y_3))

    assert y_1.shape == (B, N, C3) and y_2.shape == (B, N, C3) and y_3.shape == (B, N, C3)
    assert bool(jnp.all(jnp.isfinite(y_1)))
    assert bool(jnp.all(jnp.isfinite(y_2)))
    assert bool(jnp.all(jnp.isfinite(y_3)))
    print("KERNEL_OK")
</pallas_src>

<mosaic_0001>
module attributes {stable_mosaic.version = 11 : i64} {
  func.func @_transformer_kernel(%arg0: i32, %arg1: memref<1x3x8x32xf32, #tpu.memory_space<vmem>>, %arg2: memref<1x3x8x32xf32, #tpu.memory_space<vmem>>, %arg3: memref<8x1x32xf32, #tpu.memory_space<vmem>>, %arg4: memref<2x3x1x32xf32, #tpu.memory_space<vmem>>, %arg5: memref<2x3x1x32xf32, #tpu.memory_space<vmem>>, %arg6: memref<2x3x32x32xf32, #tpu.memory_space<vmem>>, %arg7: memref<2x3x1x32xf32, #tpu.memory_space<vmem>>, %arg8: memref<2x3x32x32xf32, #tpu.memory_space<vmem>>, %arg9: memref<2x3x1x32xf32, #tpu.memory_space<vmem>>, %arg10: memref<2x3x32x32xf32, #tpu.memory_space<vmem>>, %arg11: memref<2x3x1x32xf32, #tpu.memory_space<vmem>>, %arg12: memref<2x3x32x32xf32, #tpu.memory_space<vmem>>, %arg13: memref<2x3x1x32xf32, #tpu.memory_space<vmem>>, %arg14: memref<2x3x1x32xf32, #tpu.memory_space<vmem>>, %arg15: memref<2x3x1x32xf32, #tpu.memory_space<vmem>>, %arg16: memref<2x3x32x64xf32, #tpu.memory_space<vmem>>, %arg17: memref<2x1x64xf32, #tpu.memory_space<vmem>>, %arg18: memref<2x3x64x32xf32, #tpu.memory_space<vmem>>, %arg19: memref<2x3x1x32xf32, #tpu.memory_space<vmem>>, %arg20: memref<9x1x32xf32, #tpu.memory_space<vmem>>, %arg21: memref<9x1x32xf32, #tpu.memory_space<vmem>>, %arg22: memref<3x32x32xf32, #tpu.memory_space<vmem>>, %arg23: memref<3x1x32xf32, #tpu.memory_space<vmem>>, %arg24: memref<3x32x32xf32, #tpu.memory_space<vmem>>, %arg25: memref<3x1x32xf32, #tpu.memory_space<vmem>>, %arg26: memref<3x32x32xf32, #tpu.memory_space<vmem>>, %arg27: memref<3x1x32xf32, #tpu.memory_space<vmem>>, %arg28: memref<3x32x32xf32, #tpu.memory_space<vmem>>, %arg29: memref<3x1x32xf32, #tpu.memory_space<vmem>>, %arg30: memref<3x1x32xf32, #tpu.memory_space<vmem>>, %arg31: memref<3x1x32xf32, #tpu.memory_space<vmem>>, %arg32: memref<3x32x64xf32, #tpu.memory_space<vmem>>, %arg33: memref<1x64xf32, #tpu.memory_space<vmem>>, %arg34: memref<3x64x32xf32, #tpu.memory_space<vmem>>, %arg35: memref<3x1x32xf32, #tpu.memory_space<vmem>>, %arg36: memref<1x3x8x32xf32, #tpu.memory_space<vmem>>) attributes {dimension_semantics = [#tpu.dimension_semantics<parallel>], iteration_bounds = array<i64: 2>, scalar_prefetch = 0 : i64, scratch_operands = 0 : i64, tpu.core_type = #tpu.core_type<tc>, window_params = [{transform_indices = @transform_0, window_bounds = array<i64: 1, 3, 8, 32>}, {pipeline_mode = #tpu.pipeline_mode<synchronous>, transform_indices = @transform_1, window_bounds = array<i64: 1, 3, 8, 32>}, {pipeline_mode = #tpu.pipeline_mode<synchronous>, transform_indices = @transform_2, window_bounds = array<i64: 8, 1, 32>}, {pipeline_mode = #tpu.pipeline_mode<synchronous>, transform_indices = @transform_3, window_bounds = array<i64: 2, 3, 1, 32>}, {pipeline_mode = #tpu.pipeline_mode<synchronous>, transform_indices = @transform_4, window_bounds = array<i64: 2, 3, 1, 32>}, {pipeline_mode = #tpu.pipeline_mode<synchronous>, transform_indices = @transform_5, window_bounds = array<i64: 2, 3, 32, 32>}, {pipeline_mode = #tpu.pipeline_mode<synchronous>, transform_indices = @transform_6, window_bounds = array<i64: 2, 3, 1, 32>}, {pipeline_mode = #tpu.pipeline_mode<synchronous>, transform_indices = @transform_7, window_bounds = array<i64: 2, 3, 32, 32>}, {pipeline_mode = #tpu.pipeline_mode<synchronous>, transform_indices = @transform_8, window_bounds = array<i64: 2, 3, 1, 32>}, {pipeline_mode = #tpu.pipeline_mode<synchronous>, transform_indices = @transform_9, window_bounds = array<i64: 2, 3, 32, 32>}, {pipeline_mode = #tpu.pipeline_mode<synchronous>, transform_indices = @transform_10, window_bounds = array<i64: 2, 3, 1, 32>}, {pipeline_mode = #tpu.pipeline_mode<synchronous>, transform_indices = @transform_11, window_bounds = array<i64: 2, 3, 32, 32>}, {pipeline_mode = #tpu.pipeline_mode<synchronous>, transform_indices = @transform_12, window_bounds = array<i64: 2, 3, 1, 32>}, {pipeline_mode = #tpu.pipeline_mode<synchronous>, transform_indices = @transform_13, window_bounds = array<i64: 2, 3, 1, 32>}, {pipeline_mode = #tpu.pipeline_mode<synchronous>, transform_indices = @transform_14, window_bounds = array<i64: 2, 3, 1, 32>}, {pipeline_mode = #tpu.pipeline_mode<synchronous>, transform_indices = @transform_15, window_bounds = array<i64: 2, 3, 32, 64>}, {pipeline_mode = #tpu.pipeline_mode<synchronous>, transform_indices = @transform_16, window_bounds = array<i64: 2, 1, 64>}, {pipeline_mode = #tpu.pipeline_mode<synchronous>, transform_indices = @transform_17, window_bounds = array<i64: 2, 3, 64, 32>}, {pipeline_mode = #tpu.pipeline_mode<synchronous>, transform_indices = @transform_18, window_bounds = array<i64: 2, 3, 1, 32>}, {pipeline_mode = #tpu.pipeline_mode<synchronous>, transform_indices = @transform_19, window_bounds = array<i64: 9, 1, 32>}, {pipeline_mode = #tpu.pipeline_mode<synchronous>, transform_indices = @transform_20, window_bounds = array<i64: 9, 1, 32>}, {pipeline_mode = #tpu.pipeline_mode<synchronous>, transform_indices = @transform_21, window_bounds = array<i64: 3, 32, 32>}, {pipeline_mode = #tpu.pipeline_mode<synchronous>, transform_indices = @transform_22, window_bounds = array<i64: 3, 1, 32>}, {pipeline_mode = #tpu.pipeline_mode<synchronous>, transform_indices = @transform_23, window_bounds = array<i64: 3, 32, 32>}, {pipeline_mode = #tpu.pipeline_mode<synchronous>, transform_indices = @transform_24, window_bounds = array<i64: 3, 1, 32>}, {pipeline_mode = #tpu.pipeline_mode<synchronous>, transform_indices = @transform_25, window_bounds = array<i64: 3, 32, 32>}, {pipeline_mode = #tpu.pipeline_mode<synchronous>, transform_indices = @transform_26, window_bounds = array<i64: 3, 1, 32>}, {pipeline_mode = #tpu.pipeline_mode<synchronous>, transform_indices = @transform_27, window_bounds = array<i64: 3, 32, 32>}, {pipeline_mode = #tpu.pipeline_mode<synchronous>, transform_indices = @transform_28, window_bounds = array<i64: 3, 1, 32>}, {pipeline_mode = #tpu.pipeline_mode<synchronous>, transform_indices = @transform_29, window_bounds = array<i64: 3, 1, 32>}, {pipeline_mode = #tpu.pipeline_mode<synchronous>, transform_indices = @transform_30, window_bounds = array<i64: 3, 1, 32>}, {pipeline_mode = #tpu.pipeline_mode<synchronous>, transform_indices = @transform_31, window_bounds = array<i64: 3, 32, 64>}, {pipeline_mode = #tpu.pipeline_mode<synchronous>, transform_indices = @transform_32, window_bounds = array<i64: 1, 64>}, {pipeline_mode = #tpu.pipeline_mode<synchronous>, transform_indices = @transform_33, window_bounds = array<i64: 3, 64, 32>}, {pipeline_mode = #tpu.pipeline_mode<synchronous>, transform_indices = @transform_34, window_bounds = array<i64: 3, 1, 32>}, {transform_indices = @transform_35, window_bounds = array<i64: 1, 3, 8, 32>}]} {
    %c0 = arith.constant 0 : index
    %c0_0 = arith.constant 0 : index
    %c0_1 = arith.constant 0 : index
    %0 = vector.load %arg3[%c0, %c0_0, %c0_1] : memref<8x1x32xf32, #tpu.memory_space<vmem>>, vector<8x1x32xf32>
    %c0_2 = arith.constant 0 : index
    %c0_3 = arith.constant 0 : index
    %c0_4 = arith.constant 0 : index
    %c0_5 = arith.constant 0 : index
    %1 = vector.load %arg1[%c0_2, %c0_3, %c0_4, %c0_5] : memref<1x3x8x32xf32, #tpu.memory_space<vmem>>, vector<1x3x8x32xf32>
    %2 = vector.shape_cast %1 : vector<1x3x8x32xf32> to vector<3x8x32xf32>
    %c0_6 = arith.constant 0 : index
    %c0_7 = arith.constant 0 : index
    %c0_8 = arith.constant 0 : index
    %c0_9 = arith.constant 0 : index
    %3 = vector.load %arg2[%c0_6, %c0_7, %c0_8, %c0_9] : memref<1x3x8x32xf32, #tpu.memory_space<vmem>>, vector<1x3x8x32xf32>
    %4 = vector.shape_cast %3 : vector<1x3x8x32xf32> to vector<3x8x32xf32>
    %5 = arith.addf %2, %4 : vector<3x8x32xf32>
    %c0_10 = arith.constant 0 : index
    %c0_11 = arith.constant 0 : index
    %c0_12 = arith.constant 0 : index
    %c0_13 = arith.constant 0 : index
    %6 = vector.load %arg4[%c0_10, %c0_11, %c0_12, %c0_13] : memref<2x3x1x32xf32, #tpu.memory_space<vmem>>, vector<1x3x1x32xf32>
    %7 = vector.shape_cast %6 : vector<1x3x1x32xf32> to vector<3x1x32xf32>
    %c0_14 = arith.constant 0 : index
    %c0_15 = arith.constant 0 : index
    %c0_16 = arith.constant 0 : index
    %c0_17 = arith.constant 0 : index
    %8 = vector.load %arg5[%c0_14, %c0_15, %c0_16, %c0_17] : memref<2x3x1x32xf32, #tpu.memory_space<vmem>>, vector<1x3x1x32xf32>
    %9 = vector.shape_cast %8 : vector<1x3x1x32xf32> to vector<3x1x32xf32>
    %cst = arith.constant dense<0.000000e+00> : vector<3x8xf32>
    %10 = vector.multi_reduction <add>, %5, %cst [2] : vector<3x8x32xf32> to vector<3x8xf32>
    %11 = vector.shape_cast %10 : vector<3x8xf32> to vector<3x8x1xf32>
    %cst_18 = arith.constant 3.200000e+01 : f32
    %12 = vector.broadcast %cst_18 : f32 to vector<3x8x1xf32>
    %13 = arith.divf %11, %12 : vector<3x8x1xf32>
    %14 = vector.broadcast %13 : vector<3x8x1xf32> to vector<3x8x32xf32>
    %15 = arith.subf %5, %14 : vector<3x8x32xf32>
    %16 = arith.mulf %15, %15 : vector<3x8x32xf32>
    %cst_19 = arith.constant dense<0.000000e+00> : vector<3x8xf32>
    %17 = vector.multi_reduction <add>, %16, %cst_19 [2] : vector<3x8x32xf32> to vector<3x8xf32>
    %18 = vector.shape_cast %17 : vector<3x8xf32> to vector<3x8x1xf32>
    %cst_20 = arith.constant 3.200000e+01 : f32
    %19 = vector.broadcast %cst_20 : f32 to vector<3x8x1xf32>
    %20 = arith.divf %18, %19 : vector<3x8x1xf32>
    %cst_21 = arith.constant 9.99999997E-7 : f32
    %21 = vector.broadcast %cst_21 : f32 to vector<3x8x1xf32>
    %22 = arith.addf %20, %21 : vector<3x8x1xf32>
    %23 = math.rsqrt %22 : vector<3x8x1xf32>
    %24 = vector.broadcast %23 : vector<3x8x1xf32> to vector<3x8x32xf32>
    %25 = arith.mulf %15, %24 : vector<3x8x32xf32>
    %26 = vector.broadcast %7 : vector<3x1x32xf32> to vector<3x8x32xf32>
    %27 = arith.mulf %25, %26 : vector<3x8x32xf32>
    %28 = vector.broadcast %9 : vector<3x1x32xf32> to vector<3x8x32xf32>
    %29 = arith.addf %27, %28 : vector<3x8x32xf32>
    %c0_22 = arith.constant 0 : index
    %c0_23 = arith.constant 0 : index
    %c0_24 = arith.constant 0 : index
    %c0_25 = arith.constant 0 : index
    %30 = vector.load %arg6[%c0_22, %c0_23, %c0_24, %c0_25] : memref<2x3x32x32xf32, #tpu.memory_space<vmem>>, vector<1x3x32x32xf32>
    %31 = vector.shape_cast %30 : vector<1x3x32x32xf32> to vector<3x32x32xf32>
    "tpu.trace_start"() <{level = 10 : i32, message = "snc,sco->sno"}> : () -> ()
    %cst_26 = arith.constant dense<0.000000e+00> : vector<3x8x32xf32>
    %32 = tpu.matmul %29, %31, %cst_26 {dimension_numbers = #tpu.dot_dimension_numbers<[2], [1], [1], [2], [0, 0, 0, 1, 1, 2], [0], [0]>} : vector<3x8x32xf32>, vector<3x32x32xf32>, vector<3x8x32xf32> -> vector<3x8x32xf32>
    "tpu.trace_stop"() : () -> ()
    %c0_27 = arith.constant 0 : index
    %c0_28 = arith.constant 0 : index
    %c0_29 = arith.constant 0 : index
    %c0_30 = arith.constant 0 : index
    %33 = vector.load %arg7[%c0_27, %c0_28, %c0_29, %c0_30] : memref<2x3x1x32xf32, #tpu.memory_space<vmem>>, vector<1x3x1x32xf32>
    %34 = vector.shape_cast %33 : vector<1x3x1x32xf32> to vector<3x1x32xf32>
    %35 = vector.broadcast %34 : vector<3x1x32xf32> to vector<3x8x32xf32>
    %36 = arith.addf %32, %35 : vector<3x8x32xf32>
    %c0_31 = arith.constant 0 : index
    %c0_32 = arith.constant 0 : index
    %c0_33 = arith.constant 0 : index
    %c0_34 = arith.constant 0 : index
    %37 = vector.load %arg8[%c0_31, %c0_32, %c0_33, %c0_34] : memref<2x3x32x32xf32, #tpu.memory_space<vmem>>, vector<1x3x32x32xf32>
    %38 = vector.shape_cast %37 : vector<1x3x32x32xf32> to vector<3x32x32xf32>
    "tpu.trace_start"() <{level = 10 : i32, message = "snc,sco->sno"}> : () -> ()
    %cst_35 = arith.constant dense<0.000000e+00> : vector<3x8x32xf32>
    %39 = tpu.matmul %29, %38, %cst_35 {dimension_numbers = #tpu.dot_dimension_numbers<[2], [1], [1], [2], [0, 0, 0, 1, 1, 2], [0], [0]>} : vector<3x8x32xf32>, vector<3x32x32xf32>, vector<3x8x32xf32> -> vector<3x8x32xf32>
    "tpu.trace_stop"() : () -> ()
    %c0_36 = arith.constant 0 : index
    %c0_37 = arith.constant 0 : index
    %c0_38 = arith.constant 0 : index
    %c0_39 = arith.constant 0 : index
    %40 = vector.load %arg9[%c0_36, %c0_37, %c0_38, %c0_39] : memref<2x3x1x32xf32, #tpu.memory_space<vmem>>, vector<1x3x1x32xf32>
    %41 = vector.shape_cast %40 : vector<1x3x1x32xf32> to vector<3x1x32xf32>
    %42 = vector.broadcast %41 : vector<3x1x32xf32> to vector<3x8x32xf32>
    %43 = arith.addf %39, %42 : vector<3x8x32xf32>
    %c0_40 = arith.constant 0 : index
    %c0_41 = arith.constant 0 : index
    %c0_42 = arith.constant 0 : index
    %c0_43 = arith.constant 0 : index
    %44 = vector.load %arg10[%c0_40, %c0_41, %c0_42, %c0_43] : memref<2x3x32x32xf32, #tpu.memory_space<vmem>>, vector<1x3x32x32xf32>
    %45 = vector.shape_cast %44 : vector<1x3x32x32xf32> to vector<3x32x32xf32>
    "tpu.trace_start"() <{level = 10 : i32, message = "snc,sco->sno"}> : () -> ()
    %cst_44 = arith.constant dense<0.000000e+00> : vector<3x8x32xf32>
    %46 = tpu.matmul %29, %45, %cst_44 {dimension_numbers = #tpu.dot_dimension_numbers<[2], [1], [1], [2], [0, 0, 0, 1, 1, 2], [0], [0]>} : vector<3x8x32xf32>, vector<3x32x32xf32>, vector<3x8x32xf32> -> vector<3x8x32xf32>
    "tpu.trace_stop"() : () -> ()
    %c0_45 = arith.constant 0 : index
    %c0_46 = arith.constant 0 : index
    %c0_47 = arith.constant 0 : index
    %c0_48 = arith.constant 0 : index
    %47 = vector.load %arg11[%c0_45, %c0_46, %c0_47, %c0_48] : memref<2x3x1x32xf32, #tpu.memory_space<vmem>>, vector<1x3x1x32xf32>
    %48 = vector.shape_cast %47 : vector<1x3x1x32xf32> to vector<3x1x32xf32>
    %49 = vector.broadcast %48 : vector<3x1x32xf32> to vector<3x8x32xf32>
    %50 = arith.addf %46, %49 : vector<3x8x32xf32>
    %51 = vector.extract_strided_slice %36 {offsets = [0, 0, 0], sizes = [1, 8, 32], strides = [1, 1, 1]} : vector<3x8x32xf32> to vector<1x8x32xf32>
    %52 = vector.shape_cast %51 : vector<1x8x32xf32> to vector<8x32xf32>
    %53 = vector.extract_strided_slice %43 {offsets = [0, 0, 0], sizes = [1, 8, 32], strides = [1, 1, 1]} : vector<3x8x32xf32> to vector<1x8x32xf32>
    %54 = vector.shape_cast %53 : vector<1x8x32xf32> to vector<8x32xf32>
    %55 = vector.extract_strided_slice %50 {offsets = [0, 0, 0], sizes = [1, 8, 32], strides = [1, 1, 1]} : vector<3x8x32xf32> to vector<1x8x32xf32>
    %56 = vector.shape_cast %55 : vector<1x8x32xf32> to vector<8x32xf32>
    %cst_49 = arith.constant 5.000000e-01 : f32
    %57 = vector.broadcast %cst_49 : f32 to vector<8x32xf32>
    %58 = arith.mulf %52, %57 : vector<8x32xf32>
    %59 = vector.shape_cast %58 : vector<8x32xf32> to vector<1x8x32xf32>
    %60 = vector.broadcast %59 : vector<1x8x32xf32> to vector<8x8x32xf32>
    %61 = vector.broadcast %0 : vector<8x1x32xf32> to vector<8x8x32xf32>
    %62 = arith.mulf %60, %61 : vector<8x8x32xf32>
    %63 = vector.shape_cast %62 : vector<8x8x32xf32> to vector<64x32xf32>
    %cst_50 = arith.constant dense<0.000000e+00> : vector<64x8xf32>
    %64 = tpu.matmul %63, %54, %cst_50 {dimension_numbers = #tpu.dot_dimension_numbers<[1], [1], [0], [0], [0, 0, 1, 0], [], []>} : vector<64x32xf32>, vector<8x32xf32>, vector<64x8xf32> -> vector<64x8xf32>
    %cst_51 = arith.constant dense<0xFF800000> : vector<64xf32>
    %65 = vector.multi_reduction <maximumf>, %64, %cst_51 [1] : vector<64x8xf32> to vector<64xf32>
    %66 = vector.shape_cast %65 : vector<64xf32> to vector<64x1xf32>
    %67 = vector.broadcast %66 : vector<64x1xf32> to vector<64x8xf32>
    %68 = arith.subf %64, %67 : vector<64x8xf32>
    %69 = math.exp %68 : vector<64x8xf32>
    %cst_52 = arith.constant dense<0.000000e+00> : vector<64xf32>
    %70 = vector.multi_reduction <add>, %69, %cst_52 [1] : vector<64x8xf32> to vector<64xf32>
    %71 = vector.shape_cast %70 : vector<64xf32> to vector<64x1xf32>
    %72 = vector.broadcast %71 : vector<64x1xf32> to vector<64x8xf32>
    %73 = arith.divf %69, %72 : vector<64x8xf32>
    %cst_53 = arith.constant dense<0.000000e+00> : vector<64x32xf32>
    %74 = tpu.matmul %73, %56, %cst_53 {dimension_numbers = #tpu.dot_dimension_numbers<[1], [0], [0], [1], [0, 0, 1, 1], [], []>} : vector<64x8xf32>, vector<8x32xf32>, vector<64x32xf32> -> vector<64x32xf32>
    %75 = vector.shape_cast %74 : vector<64x32xf32> to vector<8x8x32xf32>
    %76 = vector.broadcast %0 : vector<8x1x32xf32> to vector<8x8x32xf32>
    %77 = arith.mulf %75, %76 : vector<8x8x32xf32>
    %cst_54 = arith.constant dense<0.000000e+00> : vector<8x32xf32>
    %78 = vector.multi_reduction <add>, %77, %cst_54 [0] : vector<8x8x32xf32> to vector<8x32xf32>
    %79 = vector.extract_strided_slice %36 {offsets = [1, 0, 0], sizes = [1, 8, 32], strides = [1, 1, 1]} : vector<3x8x32xf32> to vector<1x8x32xf32>
    %80 = vector.shape_cast %79 : vector<1x8x32xf32> to vector<8x32xf32>
    %81 = vector.extract_strided_slice %43 {offsets = [1, 0, 0], sizes = [1, 8, 32], strides = [1, 1, 1]} : vector<3x8x32xf32> to vector<1x8x32xf32>
    %82 = vector.shape_cast %81 : vector<1x8x32xf32> to vector<8x32xf32>
    %83 = vector.extract_strided_slice %50 {offsets = [1, 0, 0], sizes = [1, 8, 32], strides = [1, 1, 1]} : vector<3x8x32xf32> to vector<1x8x32xf32>
    %84 = vector.shape_cast %83 : vector<1x8x32xf32> to vector<8x32xf32>
    %cst_55 = arith.constant 5.000000e-01 : f32
    %85 = vector.broadcast %cst_55 : f32 to vector<8x32xf32>
    %86 = arith.mulf %80, %85 : vector<8x32xf32>
    %87 = vector.shape_cast %86 : vector<8x32xf32> to vector<1x8x32xf32>
    %88 = vector.broadcast %87 : vector<1x8x32xf32> to vector<8x8x32xf32>
    %89 = vector.broadcast %0 : vector<8x1x32xf32> to vector<8x8x32xf32>
    %90 = arith.mulf %88, %89 : vector<8x8x32xf32>
    %91 = vector.shape_cast %90 : vector<8x8x32xf32> to vector<64x32xf32>
    %cst_56 = arith.constant dense<0.000000e+00> : vector<64x8xf32>
    %92 = tpu.matmul %91, %82, %cst_56 {dimension_numbers = #tpu.dot_dimension_numbers<[1], [1], [0], [0], [0, 0, 1, 0], [], []>} : vector<64x32xf32>, vector<8x32xf32>, vector<64x8xf32> -> vector<64x8xf32>
    %cst_57 = arith.constant dense<0xFF800000> : vector<64xf32>
    %93 = vector.multi_reduction <maximumf>, %92, %cst_57 [1] : vector<64x8xf32> to vector<64xf32>
    %94 = vector.shape_cast %93 : vector<64xf32> to vector<64x1xf32>
    %95 = vector.broadcast %94 : vector<64x1xf32> to vector<64x8xf32>
    %96 = arith.subf %92, %95 : vector<64x8xf32>
    %97 = math.exp %96 : vector<64x8xf32>
    %cst_58 = arith.constant dense<0.000000e+00> : vector<64xf32>
    %98 = vector.multi_reduction <add>, %97, %cst_58 [1] : vector<64x8xf32> to vector<64xf32>
    %99 = vector.shape_cast %98 : vector<64xf32> to vector<64x1xf32>
    %100 = vector.broadcast %99 : vector<64x1xf32> to vector<64x8xf32>
    %101 = arith.divf %97, %100 : vector<64x8xf32>
    %cst_59 = arith.constant dense<0.000000e+00> : vector<64x32xf32>
    %102 = tpu.matmul %101, %84, %cst_59 {dimension_numbers = #tpu.dot_dimension_numbers<[1], [0], [0], [1], [0, 0, 1, 1], [], []>} : vector<64x8xf32>, vector<8x32xf32>, vector<64x32xf32> -> vector<64x32xf32>
    %103 = vector.shape_cast %102 : vector<64x32xf32> to vector<8x8x32xf32>
    %104 = vector.broadcast %0 : vector<8x1x32xf32> to vector<8x8x32xf32>
    %105 = arith.mulf %103, %104 : vector<8x8x32xf32>
    %cst_60 = arith.constant dense<0.000000e+00> : vector<8x32xf32>
    %106 = vector.multi_reduction <add>, %105, %cst_60 [0] : vector<8x8x32xf32> to vector<8x32xf32>
    %107 = vector.extract_strided_slice %36 {offsets = [2, 0, 0], sizes = [1, 8, 32], strides = [1, 1, 1]} : vector<3x8x32xf32> to vector<1x8x32xf32>
    %108 = vector.shape_cast %107 : vector<1x8x32xf32> to vector<8x32xf32>
    %109 = vector.extract_strided_slice %43 {offsets = [2, 0, 0], sizes = [1, 8, 32], strides = [1, 1, 1]} : vector<3x8x32xf32> to vector<1x8x32xf32>
    %110 = vector.shape_cast %109 : vector<1x8x32xf32> to vector<8x32xf32>
    %111 = vector.extract_strided_slice %50 {offsets = [2, 0, 0], sizes = [1, 8, 32], strides = [1, 1, 1]} : vector<3x8x32xf32> to vector<1x8x32xf32>
    %112 = vector.shape_cast %111 : vector<1x8x32xf32> to vector<8x32xf32>
    %cst_61 = arith.constant 5.000000e-01 : f32
    %113 = vector.broadcast %cst_61 : f32 to vector<8x32xf32>
    %114 = arith.mulf %108, %113 : vector<8x32xf32>
    %115 = vector.shape_cast %114 : vector<8x32xf32> to vector<1x8x32xf32>
    %116 = vector.broadcast %115 : vector<1x8x32xf32> to vector<8x8x32xf32>
    %117 = vector.broadcast %0 : vector<8x1x32xf32> to vector<8x8x32xf32>
    %118 = arith.mulf %116, %117 : vector<8x8x32xf32>
    %119 = vector.shape_cast %118 : vector<8x8x32xf32> to vector<64x32xf32>
    %cst_62 = arith.constant dense<0.000000e+00> : vector<64x8xf32>
    %120 = tpu.matmul %119, %110, %cst_62 {dimension_numbers = #tpu.dot_dimension_numbers<[1], [1], [0], [0], [0, 0, 1, 0], [], []>} : vector<64x32xf32>, vector<8x32xf32>, vector<64x8xf32> -> vector<64x8xf32>
    %cst_63 = arith.constant dense<0xFF800000> : vector<64xf32>
    %121 = vector.multi_reduction <maximumf>, %120, %cst_63 [1] : vector<64x8xf32> to vector<64xf32>
    %122 = vector.shape_cast %121 : vector<64xf32> to vector<64x1xf32>
    %123 = vector.broadcast %122 : vector<64x1xf32> to vector<64x8xf32>
    %124 = arith.subf %120, %123 : vector<64x8xf32>
    %125 = math.exp %124 : vector<64x8xf32>
    %cst_64 = arith.constant dense<0.000000e+00> : vector<64xf32>
    %126 = vector.multi_reduction <add>, %125, %cst_64 [1] : vector<64x8xf32> to vector<64xf32>
    %127 = vector.shape_cast %126 : vector<64xf32> to vector<64x1xf32>
    %128 = vector.broadcast %127 : vector<64x1xf32> to vector<64x8xf32>
    %129 = arith.divf %125, %128 : vector<64x8xf32>
    %cst_65 = arith.constant dense<0.000000e+00> : vector<64x32xf32>
    %130 = tpu.matmul %129, %112, %cst_65 {dimension_numbers = #tpu.dot_dimension_numbers<[1], [0], [0], [1], [0, 0, 1, 1], [], []>} : vector<64x8xf32>, vector<8x32xf32>, vector<64x32xf32> -> vector<64x32xf32>
    %131 = vector.shape_cast %130 : vector<64x32xf32> to vector<8x8x32xf32>
    %132 = vector.broadcast %0 : vector<8x1x32xf32> to vector<8x8x32xf32>
    %133 = arith.mulf %131, %132 : vector<8x8x32xf32>
    %cst_66 = arith.constant dense<0.000000e+00> : vector<8x32xf32>
    %134 = vector.multi_reduction <add>, %133, %cst_66 [0] : vector<8x8x32xf32> to vector<8x32xf32>
    %135 = vector.shape_cast %78 : vector<8x32xf32> to vector<1x8x32xf32>
    %136 = vector.shape_cast %106 : vector<8x32xf32> to vector<1x8x32xf32>
    %137 = vector.shape_cast %134 : vector<8x32xf32> to vector<1x8x32xf32>
    %138 = tpu.concatenate %135, %136, %137 in 0 : vector<1x8x32xf32>, vector<1x8x32xf32>, vector<1x8x32xf32> -> vector<3x8x32xf32>
    %c0_67 = arith.constant 0 : index
    %c0_68 = arith.constant 0 : index
    %c0_69 = arith.constant 0 : index
    %c0_70 = arith.constant 0 : index
    %139 = vector.load %arg12[%c0_67, %c0_68, %c0_69, %c0_70] : memref<2x3x32x32xf32, #tpu.memory_space<vmem>>, vector<1x3x32x32xf32>
    %140 = vector.shape_cast %139 : vector<1x3x32x32xf32> to vector<3x32x32xf32>
    "tpu.trace_start"() <{level = 10 : i32, message = "snc,sco->sno"}> : () -> ()
    %cst_71 = arith.constant dense<0.000000e+00> : vector<3x8x32xf32>
    %141 = tpu.matmul %138, %140, %cst_71 {dimension_numbers = #tpu.dot_dimension_numbers<[2], [1], [1], [2], [0, 0, 0, 1, 1, 2], [0], [0]>} : vector<3x8x32xf32>, vector<3x32x32xf32>, vector<3x8x32xf32> -> vector<3x8x32xf32>
    "tpu.trace_stop"() : () -> ()
    %c0_72 = arith.constant 0 : index
    %c0_73 = arith.constant 0 : index
    %c0_74 = arith.constant 0 : index
    %c0_75 = arith.constant 0 : index
    %142 = vector.load %arg13[%c0_72, %c0_73, %c0_74, %c0_75] : memref<2x3x1x32xf32, #tpu.memory_space<vmem>>, vector<1x3x1x32xf32>
    %143 = vector.shape_cast %142 : vector<1x3x1x32xf32> to vector<3x1x32xf32>
    %144 = vector.broadcast %143 : vector<3x1x32xf32> to vector<3x8x32xf32>
    %145 = arith.addf %141, %144 : vector<3x8x32xf32>
    %146 = arith.addf %5, %145 : vector<3x8x32xf32>
    %c0_76 = arith.constant 0 : index
    %c0_77 = arith.constant 0 : index
    %c0_78 = arith.constant 0 : index
    %c0_79 = arith.constant 0 : index
    %147 = vector.load %arg14[%c0_76, %c0_77, %c0_78, %c0_79] : memref<2x3x1x32xf32, #tpu.memory_space<vmem>>, vector<1x3x1x32xf32>
    %148 = vector.shape_cast %147 : vector<1x3x1x32xf32> to vector<3x1x32xf32>
    %c0_80 = arith.constant 0 : index
    %c0_81 = arith.constant 0 : index
    %c0_82 = arith.constant 0 : index
    %c0_83 = arith.constant 0 : index
    %149 = vector.load %arg15[%c0_80, %c0_81, %c0_82, %c0_83] : memref<2x3x1x32xf32, #tpu.memory_space<vmem>>, vector<1x3x1x32xf32>
    %150 = vector.shape_cast %149 : vector<1x3x1x32xf32> to vector<3x1x32xf32>
    %cst_84 = arith.constant dense<0.000000e+00> : vector<3x8xf32>
    %151 = vector.multi_reduction <add>, %146, %cst_84 [2] : vector<3x8x32xf32> to vector<3x8xf32>
    %152 = vector.shape_cast %151 : vector<3x8xf32> to vector<3x8x1xf32>
    %cst_85 = arith.constant dense<0.000000e+00> : vector<8x1xf32>
    %153 = vector.multi_reduction <add>, %152, %cst_85 [0] : vector<3x8x1xf32> to vector<8x1xf32>
    %154 = vector.shape_cast %153 : vector<8x1xf32> to vector<1x8x1xf32>
    %cst_86 = arith.constant 9.600000e+01 : f32
    %155 = vector.broadcast %cst_86 : f32 to vector<1x8x1xf32>
    %156 = arith.divf %154, %155 : vector<1x8x1xf32>
    %157 = vector.broadcast %156 : vector<1x8x1xf32> to vector<3x8x32xf32>
    %158 = arith.subf %146, %157 : vector<3x8x32xf32>
    %159 = arith.mulf %158, %158 : vector<3x8x32xf32>
    %cst_87 = arith.constant dense<0.000000e+00> : vector<3x8xf32>
    %160 = vector.multi_reduction <add>, %159, %cst_87 [2] : vector<3x8x32xf32> to vector<3x8xf32>
    %161 = vector.shape_cast %160 : vector<3x8xf32> to vector<3x8x1xf32>
    %cst_88 = arith.constant dense<0.000000e+00> : vector<8x1xf32>
    %162 = vector.multi_reduction <add>, %161, %cst_88 [0] : vector<3x8x1xf32> to vector<8x1xf32>
    %163 = vector.shape_cast %162 : vector<8x1xf32> to vector<1x8x1xf32>
    %cst_89 = arith.constant 9.600000e+01 : f32
    %164 = vector.broadcast %cst_89 : f32 to vector<1x8x1xf32>
    %165 = arith.divf %163, %164 : vector<1x8x1xf32>
    %cst_90 = arith.constant 9.99999997E-7 : f32
    %166 = vector.broadcast %cst_90 : f32 to vector<1x8x1xf32>
    %167 = arith.addf %165, %166 : vector<1x8x1xf32>
    %168 = math.rsqrt %167 : vector<1x8x1xf32>
    %169 = vector.broadcast %168 : vector<1x8x1xf32> to vector<3x8x32xf32>
    %170 = arith.mulf %158, %169 : vector<3x8x32xf32>
    %171 = vector.broadcast %148 : vector<3x1x32xf32> to vector<3x8x32xf32>
    %172 = arith.mulf %170, %171 : vector<3x8x32xf32>
    %173 = vector.broadcast %150 : vector<3x1x32xf32> to vector<3x8x32xf32>
    %174 = arith.addf %172, %173 : vector<3x8x32xf32>
    %c0_91 = arith.constant 0 : index
    %c0_92 = arith.constant 0 : index
    %c0_93 = arith.constant 0 : index
    %c0_94 = arith.constant 0 : index
    %175 = vector.load %arg16[%c0_91, %c0_92, %c0_93, %c0_94] : memref<2x3x32x64xf32, #tpu.memory_space<vmem>>, vector<1x3x32x64xf32>
    %176 = vector.shape_cast %175 : vector<1x3x32x64xf32> to vector<3x32x64xf32>
    %c0_95 = arith.constant 0 : index
    %c0_96 = arith.constant 0 : index
    %c0_97 = arith.constant 0 : index
    %177 = vector.load %arg17[%c0_95, %c0_96, %c0_97] : memref<2x1x64xf32, #tpu.memory_space<vmem>>, vector<1x1x64xf32>
    %178 = vector.shape_cast %177 : vector<1x1x64xf32> to vector<1x64xf32>
    %c0_98 = arith.constant 0 : index
    %c0_99 = arith.constant 0 : index
    %c0_100 = arith.constant 0 : index
    %c0_101 = arith.constant 0 : index
    %179 = vector.load %arg18[%c0_98, %c0_99, %c0_100, %c0_101] : memref<2x3x64x32xf32, #tpu.memory_space<vmem>>, vector<1x3x64x32xf32>
    %180 = vector.shape_cast %179 : vector<1x3x64x32xf32> to vector<3x64x32xf32>
    %c0_102 = arith.constant 0 : index
    %c0_103 = arith.constant 0 : index
    %c0_104 = arith.constant 0 : index
    %c0_105 = arith.constant 0 : index
    %181 = vector.load %arg19[%c0_102, %c0_103, %c0_104, %c0_105] : memref<2x3x1x32xf32, #tpu.memory_space<vmem>>, vector<1x3x1x32xf32>
    %182 = vector.shape_cast %181 : vector<1x3x1x32xf32> to vector<3x1x32xf32>
    %183 = vector.extract_strided_slice %174 {offsets = [0, 0, 0], sizes = [1, 8, 32], strides = [1, 1, 1]} : vector<3x8x32xf32> to vector<1x8x32xf32>
    %184 = vector.shape_cast %183 : vector<1x8x32xf32> to vector<8x32xf32>
    %185 = vector.extract_strided_slice %176 {offsets = [0, 0, 0], sizes = [1, 32, 64], strides = [1, 1, 1]} : vector<3x32x64xf32> to vector<1x32x64xf32>
    %186 = vector.shape_cast %185 : vector<1x32x64xf32> to vector<32x64xf32>
    %cst_106 = arith.constant dense<0.000000e+00> : vector<8x64xf32>
    %187 = tpu.matmul %184, %186, %cst_106 {dimension_numbers = #tpu.dot_dimension_numbers<[1], [0], [0], [1], [0, 0, 1, 1], [], []>} : vector<8x32xf32>, vector<32x64xf32>, vector<8x64xf32> -> vector<8x64xf32>
    %188 = vector.extract_strided_slice %174 {offsets = [1, 0, 0], sizes = [1, 8, 32], strides = [1, 1, 1]} : vector<3x8x32xf32> to vector<1x8x32xf32>
    %189 = vector.shape_cast %188 : vector<1x8x32xf32> to vector<8x32xf32>
    %190 = vector.extract_strided_slice %176 {offsets = [1, 0, 0], sizes = [1, 32, 64], strides = [1, 1, 1]} : vector<3x32x64xf32> to vector<1x32x64xf32>
    %191 = vector.shape_cast %190 : vector<1x32x64xf32> to vector<32x64xf32>
    %cst_107 = arith.constant dense<0.000000e+00> : vector<8x64xf32>
    %192 = tpu.matmul %189, %191, %cst_107 {dimension_numbers = #tpu.dot_dimension_numbers<[1], [0], [0], [1], [0, 0, 1, 1], [], []>} : vector<8x32xf32>, vector<32x64xf32>, vector<8x64xf32> -> vector<8x64xf32>
    %193 = arith.addf %187, %192 : vector<8x64xf32>
    %194 = vector.extract_strided_slice %174 {offsets = [2, 0, 0], sizes = [1, 8, 32], strides = [1, 1, 1]} : vector<3x8x32xf32> to vector<1x8x32xf32>
    %195 = vector.shape_cast %194 : vector<1x8x32xf32> to vector<8x32xf32>
    %196 = vector.extract_strided_slice %176 {offsets = [2, 0, 0], sizes = [1, 32, 64], strides = [1, 1, 1]} : vector<3x32x64xf32> to vector<1x32x64xf32>
    %197 = vector.shape_cast %196 : vector<1x32x64xf32> to vector<32x64xf32>
    %cst_108 = arith.constant dense<0.000000e+00> : vector<8x64xf32>
    %198 = tpu.matmul %195, %197, %cst_108 {dimension_numbers = #tpu.dot_dimension_numbers<[1], [0], [0], [1], [0, 0, 1, 1], [], []>} : vector<8x32xf32>, vector<32x64xf32>, vector<8x64xf32> -> vector<8x64xf32>
    %199 = arith.addf %193, %198 : vector<8x64xf32>
    %200 = vector.broadcast %178 : vector<1x64xf32> to vector<8x64xf32>
    %201 = arith.addf %199, %200 : vector<8x64xf32>
    %cst_109 = arith.constant 5.000000e-01 : f32
    %202 = vector.broadcast %cst_109 : f32 to vector<8x64xf32>
    %203 = arith.mulf %202, %201 : vector<8x64xf32>
    %cst_110 = arith.constant 0.707106769 : f32
    %204 = vector.broadcast %cst_110 : f32 to vector<8x64xf32>
    %205 = arith.mulf %201, %204 : vector<8x64xf32>
    %206 = math.erf %205 : vector<8x64xf32>
    %cst_111 = arith.constant 1.000000e+00 : f32
    %207 = vector.broadcast %cst_111 : f32 to vector<8x64xf32>
    %208 = arith.addf %207, %206 : vector<8x64xf32>
    %209 = arith.mulf %203, %208 : vector<8x64xf32>
    %210 = vector.extract_strided_slice %180 {offsets = [0, 0, 0], sizes = [1, 64, 32], strides = [1, 1, 1]} : vector<3x64x32xf32> to vector<1x64x32xf32>
    %211 = vector.shape_cast %210 : vector<1x64x32xf32> to vector<64x32xf32>
    %cst_112 = arith.constant dense<0.000000e+00> : vector<8x32xf32>
    %212 = tpu.matmul %209, %211, %cst_112 {dimension_numbers = #tpu.dot_dimension_numbers<[1], [0], [0], [1], [0, 0, 1, 1], [], []>} : vector<8x64xf32>, vector<64x32xf32>, vector<8x32xf32> -> vector<8x32xf32>
    %213 = vector.extract_strided_slice %180 {offsets = [1, 0, 0], sizes = [1, 64, 32], strides = [1, 1, 1]} : vector<3x64x32xf32> to vector<1x64x32xf32>
    %214 = vector.shape_cast %213 : vector<1x64x32xf32> to vector<64x32xf32>
    %cst_113 = arith.constant dense<0.000000e+00> : vector<8x32xf32>
    %215 = tpu.matmul %209, %214, %cst_113 {dimension_numbers = #tpu.dot_dimension_numbers<[1], [0], [0], [1], [0, 0, 1, 1], [], []>} : vector<8x64xf32>, vector<64x32xf32>, vector<8x32xf32> -> vector<8x32xf32>
    %216 = vector.extract_strided_slice %180 {offsets = [2, 0, 0], sizes = [1, 64, 32], strides = [1, 1, 1]} : vector<3x64x32xf32> to vector<1x64x32xf32>
    %217 = vector.shape_cast %216 : vector<1x64x32xf32> to vector<64x32xf32>
    %cst_114 = arith.constant dense<0.000000e+00> : vector<8x32xf32>
    %218 = tpu.matmul %209, %217, %cst_114 {dimension_numbers = #tpu.dot_dimension_numbers<[1], [0], [0], [1], [0, 0, 1, 1], [], []>} : vector<8x64xf32>, vector<64x32xf32>, vector<8x32xf32> -> vector<8x32xf32>
    %219 = vector.shape_cast %212 : vector<8x32xf32> to vector<1x8x32xf32>
    %220 = vector.shape_cast %215 : vector<8x32xf32> to vector<1x8x32xf32>
    %221 = vector.shape_cast %218 : vector<8x32xf32> to vector<1x8x32xf32>
    %222 = tpu.concatenate %219, %220, %221 in 0 : vector<1x8x32xf32>, vector<1x8x32xf32>, vector<1x8x32xf32> -> vector<3x8x32xf32>
    %223 = vector.broadcast %182 : vector<3x1x32xf32> to vector<3x8x32xf32>
    %224 = arith.addf %222, %223 : vector<3x8x32xf32>
    %225 = arith.addf %146, %224 : vector<3x8x32xf32>
    %c1 = arith.constant 1 : index
    %c0_115 = arith.constant 0 : index
    %c0_116 = arith.constant 0 : index
    %c0_117 = arith.constant 0 : index
    %226 = vector.load %arg4[%c1, %c0_115, %c0_116, %c0_117] : memref<2x3x1x32xf32, #tpu.memory_space<vmem>>, vector<1x3x1x32xf32>
    %227 = vector.shape_cast %226 : vector<1x3x1x32xf32> to vector<3x1x32xf32>
    %c1_118 = arith.constant 1 : index
    %c0_119 = arith.constant 0 : index
    %c0_120 = arith.constant 0 : index
    %c0_121 = arith.constant 0 : index
    %228 = vector.load %arg5[%c1_118, %c0_119, %c0_120, %c0_121] : memref<2x3x1x32xf32, #tpu.memory_space<vmem>>, vector<1x3x1x32xf32>
    %229 = vector.shape_cast %228 : vector<1x3x1x32xf32> to vector<3x1x32xf32>
    %cst_122 = arith.constant dense<0.000000e+00> : vector<3x8xf32>
    %230 = vector.multi_reduction <add>, %225, %cst_122 [2] : vector<3x8x32xf32> to vector<3x8xf32>
    %231 = vector.shape_cast %230 : vector<3x8xf32> to vector<3x8x1xf32>
    %cst_123 = arith.constant 3.200000e+01 : f32
    %232 = vector.broadcast %cst_123 : f32 to vector<3x8x1xf32>
    %233 = arith.divf %231, %232 : vector<3x8x1xf32>
    %234 = vector.broadcast %233 : vector<3x8x1xf32> to vector<3x8x32xf32>
    %235 = arith.subf %225, %234 : vector<3x8x32xf32>
    %236 = arith.mulf %235, %235 : vector<3x8x32xf32>
    %cst_124 = arith.constant dense<0.000000e+00> : vector<3x8xf32>
    %237 = vector.multi_reduction <add>, %236, %cst_124 [2] : vector<3x8x32xf32> to vector<3x8xf32>
    %238 = vector.shape_cast %237 : vector<3x8xf32> to vector<3x8x1xf32>
    %cst_125 = arith.constant 3.200000e+01 : f32
    %239 = vector.broadcast %cst_125 : f32 to vector<3x8x1xf32>
    %240 = arith.divf %238, %239 : vector<3x8x1xf32>
    %cst_126 = arith.constant 9.99999997E-7 : f32
    %241 = vector.broadcast %cst_126 : f32 to vector<3x8x1xf32>
    %242 = arith.addf %240, %241 : vector<3x8x1xf32>
    %243 = math.rsqrt %242 : vector<3x8x1xf32>
    %244 = vector.broadcast %243 : vector<3x8x1xf32> to vector<3x8x32xf32>
    %245 = arith.mulf %235, %244 : vector<3x8x32xf32>
    %246 = vector.broadcast %227 : vector<3x1x32xf32> to vector<3x8x32xf32>
    %247 = arith.mulf %245, %246 : vector<3x8x32xf32>
    %248 = vector.broadcast %229 : vector<3x1x32xf32> to vector<3x8x32xf32>
    %249 = arith.addf %247, %248 : vector<3x8x32xf32>
    %c1_127 = arith.constant 1 : index
    %c0_128 = arith.constant 0 : index
    %c0_129 = arith.constant 0 : index
    %c0_130 = arith.constant 0 : index
    %250 = vector.load %arg6[%c1_127, %c0_128, %c0_129, %c0_130] : memref<2x3x32x32xf32, #tpu.memory_space<vmem>>, vector<1x3x32x32xf32>
    %251 = vector.shape_cast %250 : vector<1x3x32x32xf32> to vector<3x32x32xf32>
    "tpu.trace_start"() <{level = 10 : i32, message = "snc,sco->sno"}> : () -> ()
    %cst_131 = arith.constant dense<0.000000e+00> : vector<3x8x32xf32>
    %252 = tpu.matmul %249, %251, %cst_131 {dimension_numbers = #tpu.dot_dimension_numbers<[2], [1], [1], [2], [0, 0, 0, 1, 1, 2], [0], [0]>} : vector<3x8x32xf32>, vector<3x32x32xf32>, vector<3x8x32xf32> -> vector<3x8x32xf32>
    "tpu.trace_stop"() : () -> ()
    %c1_132 = arith.constant 1 : index
    %c0_133 = arith.constant 0 : index
    %c0_134 = arith.constant 0 : index
    %c0_135 = arith.constant 0 : index
    %253 = vector.load %arg7[%c1_132, %c0_133, %c0_134, %c0_135] : memref<2x3x1x32xf32, #tpu.memory_space<vmem>>, vector<1x3x1x32xf32>
    %254 = vector.shape_cast %253 : vector<1x3x1x32xf32> to vector<3x1x32xf32>
    %255 = vector.broadcast %254 : vector<3x1x32xf32> to vector<3x8x32xf32>
    %256 = arith.addf %252, %255 : vector<3x8x32xf32>
    %c1_136 = arith.constant 1 : index
    %c0_137 = arith.constant 0 : index
    %c0_138 = arith.constant 0 : index
    %c0_139 = arith.constant 0 : index
    %257 = vector.load %arg8[%c1_136, %c0_137, %c0_138, %c0_139] : memref<2x3x32x32xf32, #tpu.memory_space<vmem>>, vector<1x3x32x32xf32>
    %258 = vector.shape_cast %257 : vector<1x3x32x32xf32> to vector<3x32x32xf32>
    "tpu.trace_start"() <{level = 10 : i32, message = "snc,sco->sno"}> : () -> ()
    %cst_140 = arith.constant dense<0.000000e+00> : vector<3x8x32xf32>
    %259 = tpu.matmul %249, %258, %cst_140 {dimension_numbers = #tpu.dot_dimension_numbers<[2], [1], [1], [2], [0, 0, 0, 1, 1, 2], [0], [0]>} : vector<3x8x32xf32>, vector<3x32x32xf32>, vector<3x8x32xf32> -> vector<3x8x32xf32>
    "tpu.trace_stop"() : () -> ()
    %c1_141 = arith.constant 1 : index
    %c0_142 = arith.constant 0 : index
    %c0_143 = arith.constant 0 : index
    %c0_144 = arith.constant 0 : index
    %260 = vector.load %arg9[%c1_141, %c0_142, %c0_143, %c0_144] : memref<2x3x1x32xf32, #tpu.memory_space<vmem>>, vector<1x3x1x32xf32>
    %261 = vector.shape_cast %260 : vector<1x3x1x32xf32> to vector<3x1x32xf32>
    %262 = vector.broadcast %261 : vector<3x1x32xf32> to vector<3x8x32xf32>
    %263 = arith.addf %259, %262 : vector<3x8x32xf32>
    %c1_145 = arith.constant 1 : index
    %c0_146 = arith.constant 0 : index
    %c0_147 = arith.constant 0 : index
    %c0_148 = arith.constant 0 : index
    %264 = vector.load %arg10[%c1_145, %c0_146, %c0_147, %c0_148] : memref<2x3x32x32xf32, #tpu.memory_space<vmem>>, vector<1x3x32x32xf32>
    %265 = vector.shape_cast %264 : vector<1x3x32x32xf32> to vector<3x32x32xf32>
    "tpu.trace_start"() <{level = 10 : i32, message = "snc,sco->sno"}> : () -> ()
    %cst_149 = arith.constant dense<0.000000e+00> : vector<3x8x32xf32>
    %266 = tpu.matmul %249, %265, %cst_149 {dimension_numbers = #tpu.dot_dimension_numbers<[2], [1], [1], [2], [0, 0, 0, 1, 1, 2], [0], [0]>} : vector<3x8x32xf32>, vector<3x32x32xf32>, vector<3x8x32xf32> -> vector<3x8x32xf32>
    "tpu.trace_stop"() : () -> ()
    %c1_150 = arith.constant 1 : index
    %c0_151 = arith.constant 0 : index
    %c0_152 = arith.constant 0 : index
    %c0_153 = arith.constant 0 : index
    %267 = vector.load %arg11[%c1_150, %c0_151, %c0_152, %c0_153] : memref<2x3x1x32xf32, #tpu.memory_space<vmem>>, vector<1x3x1x32xf32>
    %268 = vector.shape_cast %267 : vector<1x3x1x32xf32> to vector<3x1x32xf32>
    %269 = vector.broadcast %268 : vector<3x1x32xf32> to vector<3x8x32xf32>
    %270 = arith.addf %266, %269 : vector<3x8x32xf32>
    %271 = vector.extract_strided_slice %256 {offsets = [0, 0, 0], sizes = [1, 8, 32], strides = [1, 1, 1]} : vector<3x8x32xf32> to vector<1x8x32xf32>
    %272 = vector.shape_cast %271 : vector<1x8x32xf32> to vector<8x32xf32>
    %273 = vector.extract_strided_slice %263 {offsets = [0, 0, 0], sizes = [1, 8, 32], strides = [1, 1, 1]} : vector<3x8x32xf32> to vector<1x8x32xf32>
    %274 = vector.shape_cast %273 : vector<1x8x32xf32> to vector<8x32xf32>
    %275 = vector.extract_strided_slice %270 {offsets = [0, 0, 0], sizes = [1, 8, 32], strides = [1, 1, 1]} : vector<3x8x32xf32> to vector<1x8x32xf32>
    %276 = vector.shape_cast %275 : vector<1x8x32xf32> to vector<8x32xf32>
    %cst_154 = arith.constant 5.000000e-01 : f32
    %277 = vector.broadcast %cst_154 : f32 to vector<8x32xf32>
    %278 = arith.mulf %272, %277 : vector<8x32xf32>
    %279 = vector.shape_cast %278 : vector<8x32xf32> to vector<1x8x32xf32>
    %280 = vector.broadcast %279 : vector<1x8x32xf32> to vector<8x8x32xf32>
    %281 = vector.broadcast %0 : vector<8x1x32xf32> to vector<8x8x32xf32>
    %282 = arith.mulf %280, %281 : vector<8x8x32xf32>
    %283 = vector.shape_cast %282 : vector<8x8x32xf32> to vector<64x32xf32>
    %cst_155 = arith.constant dense<0.000000e+00> : vector<64x8xf32>
    %284 = tpu.matmul %283, %274, %cst_155 {dimension_numbers = #tpu.dot_dimension_numbers<[1], [1], [0], [0], [0, 0, 1, 0], [], []>} : vector<64x32xf32>, vector<8x32xf32>, vector<64x8xf32> -> vector<64x8xf32>
    %cst_156 = arith.constant dense<0xFF800000> : vector<64xf32>
    %285 = vector.multi_reduction <maximumf>, %284, %cst_156 [1] : vector<64x8xf32> to vector<64xf32>
    %286 = vector.shape_cast %285 : vector<64xf32> to vector<64x1xf32>
    %287 = vector.broadcast %286 : vector<64x1xf32> to vector<64x8xf32>
    %288 = arith.subf %284, %287 : vector<64x8xf32>
    %289 = math.exp %288 : vector<64x8xf32>
    %cst_157 = arith.constant dense<0.000000e+00> : vector<64xf32>
    %290 = vector.multi_reduction <add>, %289, %cst_157 [1] : vector<64x8xf32> to vector<64xf32>
    %291 = vector.shape_cast %290 : vector<64xf32> to vector<64x1xf32>
    %292 = vector.broadcast %291 : vector<64x1xf32> to vector<64x8xf32>
    %293 = arith.divf %289, %292 : vector<64x8xf32>
    %cst_158 = arith.constant dense<0.000000e+00> : vector<64x32xf32>
    %294 = tpu.matmul %293, %276, %cst_158 {dimension_numbers = #tpu.dot_dimension_numbers<[1], [0], [0], [1], [0, 0, 1, 1], [], []>} : vector<64x8xf32>, vector<8x32xf32>, vector<64x32xf32> -> vector<64x32xf32>
    %295 = vector.shape_cast %294 : vector<64x32xf32> to vector<8x8x32xf32>
    %296 = vector.broadcast %0 : vector<8x1x32xf32> to vector<8x8x32xf32>
    %297 = arith.mulf %295, %296 : vector<8x8x32xf32>
    %cst_159 = arith.constant dense<0.000000e+00> : vector<8x32xf32>
    %298 = vector.multi_reduction <add>, %297, %cst_159 [0] : vector<8x8x32xf32> to vector<8x32xf32>
    %299 = vector.extract_strided_slice %256 {offsets = [1, 0, 0], sizes = [1, 8, 32], strides = [1, 1, 1]} : vector<3x8x32xf32> to vector<1x8x32xf32>
    %300 = vector.shape_cast %299 : vector<1x8x32xf32> to vector<8x32xf32>
    %301 = vector.extract_strided_slice %263 {offsets = [1, 0, 0], sizes = [1, 8, 32], strides = [1, 1, 1]} : vector<3x8x32xf32> to vector<1x8x32xf32>
    %302 = vector.shape_cast %301 : vector<1x8x32xf32> to vector<8x32xf32>
    %303 = vector.extract_strided_slice %270 {offsets = [1, 0, 0], sizes = [1, 8, 32], strides = [1, 1, 1]} : vector<3x8x32xf32> to vector<1x8x32xf32>
    %304 = vector.shape_cast %303 : vector<1x8x32xf32> to vector<8x32xf32>
    %cst_160 = arith.constant 5.000000e-01 : f32
    %305 = vector.broadcast %cst_160 : f32 to vector<8x32xf32>
    %306 = arith.mulf %300, %305 : vector<8x32xf32>
    %307 = vector.shape_cast %306 : vector<8x32xf32> to vector<1x8x32xf32>
    %308 = vector.broadcast %307 : vector<1x8x32xf32> to vector<8x8x32xf32>
    %309 = vector.broadcast %0 : vector<8x1x32xf32> to vector<8x8x32xf32>
    %310 = arith.mulf %308, %309 : vector<8x8x32xf32>
    %311 = vector.shape_cast %310 : vector<8x8x32xf32> to vector<64x32xf32>
    %cst_161 = arith.constant dense<0.000000e+00> : vector<64x8xf32>
    %312 = tpu.matmul %311, %302, %cst_161 {dimension_numbers = #tpu.dot_dimension_numbers<[1], [1], [0], [0], [0, 0, 1, 0], [], []>} : vector<64x32xf32>, vector<8x32xf32>, vector<64x8xf32> -> vector<64x8xf32>
    %cst_162 = arith.constant dense<0xFF800000> : vector<64xf32>
    %313 = vector.multi_reduction <maximumf>, %312, %cst_162 [1] : vector<64x8xf32> to vector<64xf32>
    %314 = vector.shape_cast %313 : vector<64xf32> to vector<64x1xf32>
    %315 = vector.broadcast %314 : vector<64x1xf32> to vector<64x8xf32>
    %316 = arith.subf %312, %315 : vector<64x8xf32>
    %317 = math.exp %316 : vector<64x8xf32>
    %cst_163 = arith.constant dense<0.000000e+00> : vector<64xf32>
    %318 = vector.multi_reduction <add>, %317, %cst_163 [1] : vector<64x8xf32> to vector<64xf32>
    %319 = vector.shape_cast %318 : vector<64xf32> to vector<64x1xf32>
    %320 = vector.broadcast %319 : vector<64x1xf32> to vector<64x8xf32>
    %321 = arith.divf %317, %320 : vector<64x8xf32>
    %cst_164 = arith.constant dense<0.000000e+00> : vector<64x32xf32>
    %322 = tpu.matmul %321, %304, %cst_164 {dimension_numbers = #tpu.dot_dimension_numbers<[1], [0], [0], [1], [0, 0, 1, 1], [], []>} : vector<64x8xf32>, vector<8x32xf32>, vector<64x32xf32> -> vector<64x32xf32>
    %323 = vector.shape_cast %322 : vector<64x32xf32> to vector<8x8x32xf32>
    %324 = vector.broadcast %0 : vector<8x1x32xf32> to vector<8x8x32xf32>
    %325 = arith.mulf %323, %324 : vector<8x8x32xf32>
    %cst_165 = arith.constant dense<0.000000e+00> : vector<8x32xf32>
    %326 = vector.multi_reduction <add>, %325, %cst_165 [0] : vector<8x8x32xf32> to vector<8x32xf32>
    %327 = vector.extract_strided_slice %256 {offsets = [2, 0, 0], sizes = [1, 8, 32], strides = [1, 1, 1]} : vector<3x8x32xf32> to vector<1x8x32xf32>
    %328 = vector.shape_cast %327 : vector<1x8x32xf32> to vector<8x32xf32>
    %329 = vector.extract_strided_slice %263 {offsets = [2, 0, 0], sizes = [1, 8, 32], strides = [1, 1, 1]} : vector<3x8x32xf32> to vector<1x8x32xf32>
    %330 = vector.shape_cast %329 : vector<1x8x32xf32> to vector<8x32xf32>
    %331 = vector.extract_strided_slice %270 {offsets = [2, 0, 0], sizes = [1, 8, 32], strides = [1, 1, 1]} : vector<3x8x32xf32> to vector<1x8x32xf32>
    %332 = vector.shape_cast %331 : vector<1x8x32xf32> to vector<8x32xf32>
    %cst_166 = arith.constant 5.000000e-01 : f32
    %333 = vector.broadcast %cst_166 : f32 to vector<8x32xf32>
    %334 = arith.mulf %328, %333 : vector<8x32xf32>
    %335 = vector.shape_cast %334 : vector<8x32xf32> to vector<1x8x32xf32>
    %336 = vector.broadcast %335 : vector<1x8x32xf32> to vector<8x8x32xf32>
    %337 = vector.broadcast %0 : vector<8x1x32xf32> to vector<8x8x32xf32>
    %338 = arith.mulf %336, %337 : vector<8x8x32xf32>
    %339 = vector.shape_cast %338 : vector<8x8x32xf32> to vector<64x32xf32>
    %cst_167 = arith.constant dense<0.000000e+00> : vector<64x8xf32>
    %340 = tpu.matmul %339, %330, %cst_167 {dimension_numbers = #tpu.dot_dimension_numbers<[1], [1], [0], [0], [0, 0, 1, 0], [], []>} : vector<64x32xf32>, vector<8x32xf32>, vector<64x8xf32> -> vector<64x8xf32>
    %cst_168 = arith.constant dense<0xFF800000> : vector<64xf32>
    %341 = vector.multi_reduction <maximumf>, %340, %cst_168 [1] : vector<64x8xf32> to vector<64xf32>
    %342 = vector.shape_cast %341 : vector<64xf32> to vector<64x1xf32>
    %343 = vector.broadcast %342 : vector<64x1xf32> to vector<64x8xf32>
    %344 = arith.subf %340, %343 : vector<64x8xf32>
    %345 = math.exp %344 : vector<64x8xf32>
    %cst_169 = arith.constant dense<0.000000e+00> : vector<64xf32>
    %346 = vector.multi_reduction <add>, %345, %cst_169 [1] : vector<64x8xf32> to vector<64xf32>
    %347 = vector.shape_cast %346 : vector<64xf32> to vector<64x1xf32>
    %348 = vector.broadcast %347 : vector<64x1xf32> to vector<64x8xf32>
    %349 = arith.divf %345, %348 : vector<64x8xf32>
    %cst_170 = arith.constant dense<0.000000e+00> : vector<64x32xf32>
    %350 = tpu.matmul %349, %332, %cst_170 {dimension_numbers = #tpu.dot_dimension_numbers<[1], [0], [0], [1], [0, 0, 1, 1], [], []>} : vector<64x8xf32>, vector<8x32xf32>, vector<64x32xf32> -> vector<64x32xf32>
    %351 = vector.shape_cast %350 : vector<64x32xf32> to vector<8x8x32xf32>
    %352 = vector.broadcast %0 : vector<8x1x32xf32> to vector<8x8x32xf32>
    %353 = arith.mulf %351, %352 : vector<8x8x32xf32>
    %cst_171 = arith.constant dense<0.000000e+00> : vector<8x32xf32>
    %354 = vector.multi_reduction <add>, %353, %cst_171 [0] : vector<8x8x32xf32> to vector<8x32xf32>
    %355 = vector.shape_cast %298 : vector<8x32xf32> to vector<1x8x32xf32>
    %356 = vector.shape_cast %326 : vector<8x32xf32> to vector<1x8x32xf32>
    %357 = vector.shape_cast %354 : vector<8x32xf32> to vector<1x8x32xf32>
    %358 = tpu.concatenate %355, %356, %357 in 0 : vector<1x8x32xf32>, vector<1x8x32xf32>, vector<1x8x32xf32> -> vector<3x8x32xf32>
    %c1_172 = arith.constant 1 : index
    %c0_173 = arith.constant 0 : index
    %c0_174 = arith.constant 0 : index
    %c0_175 = arith.constant 0 : index
    %359 = vector.load %arg12[%c1_172, %c0_173, %c0_174, %c0_175] : memref<2x3x32x32xf32, #tpu.memory_space<vmem>>, vector<1x3x32x32xf32>
    %360 = vector.shape_cast %359 : vector<1x3x32x32xf32> to vector<3x32x32xf32>
    "tpu.trace_start"() <{level = 10 : i32, message = "snc,sco->sno"}> : () -> ()
    %cst_176 = arith.constant dense<0.000000e+00> : vector<3x8x32xf32>
    %361 = tpu.matmul %358, %360, %cst_176 {dimension_numbers = #tpu.dot_dimension_numbers<[2], [1], [1], [2], [0, 0, 0, 1, 1, 2], [0], [0]>} : vector<3x8x32xf32>, vector<3x32x32xf32>, vector<3x8x32xf32> -> vector<3x8x32xf32>
    "tpu.trace_stop"() : () -> ()
    %c1_177 = arith.constant 1 : index
    %c0_178 = arith.constant 0 : index
    %c0_179 = arith.constant 0 : index
    %c0_180 = arith.constant 0 : index
    %362 = vector.load %arg13[%c1_177, %c0_178, %c0_179, %c0_180] : memref<2x3x1x32xf32, #tpu.memory_space<vmem>>, vector<1x3x1x32xf32>
    %363 = vector.shape_cast %362 : vector<1x3x1x32xf32> to vector<3x1x32xf32>
    %364 = vector.broadcast %363 : vector<3x1x32xf32> to vector<3x8x32xf32>
    %365 = arith.addf %361, %364 : vector<3x8x32xf32>
    %366 = arith.addf %225, %365 : vector<3x8x32xf32>
    %c1_181 = arith.constant 1 : index
    %c0_182 = arith.constant 0 : index
    %c0_183 = arith.constant 0 : index
    %c0_184 = arith.constant 0 : index
    %367 = vector.load %arg14[%c1_181, %c0_182, %c0_183, %c0_184] : memref<2x3x1x32xf32, #tpu.memory_space<vmem>>, vector<1x3x1x32xf32>
    %368 = vector.shape_cast %367 : vector<1x3x1x32xf32> to vector<3x1x32xf32>
    %c1_185 = arith.constant 1 : index
    %c0_186 = arith.constant 0 : index
    %c0_187 = arith.constant 0 : index
    %c0_188 = arith.constant 0 : index
    %369 = vector.load %arg15[%c1_185, %c0_186, %c0_187, %c0_188] : memref<2x3x1x32xf32, #tpu.memory_space<vmem>>, vector<1x3x1x32xf32>
    %370 = vector.shape_cast %369 : vector<1x3x1x32xf32> to vector<3x1x32xf32>
    %cst_189 = arith.constant dense<0.000000e+00> : vector<3x8xf32>
    %371 = vector.multi_reduction <add>, %366, %cst_189 [2] : vector<3x8x32xf32> to vector<3x8xf32>
    %372 = vector.shape_cast %371 : vector<3x8xf32> to vector<3x8x1xf32>
    %cst_190 = arith.constant dense<0.000000e+00> : vector<8x1xf32>
    %373 = vector.multi_reduction <add>, %372, %cst_190 [0] : vector<3x8x1xf32> to vector<8x1xf32>
    %374 = vector.shape_cast %373 : vector<8x1xf32> to vector<1x8x1xf32>
    %cst_191 = arith.constant 9.600000e+01 : f32
    %375 = vector.broadcast %cst_191 : f32 to vector<1x8x1xf32>
    %376 = arith.divf %374, %375 : vector<1x8x1xf32>
    %377 = vector.broadcast %376 : vector<1x8x1xf32> to vector<3x8x32xf32>
    %378 = arith.subf %366, %377 : vector<3x8x32xf32>
    %379 = arith.mulf %378, %378 : vector<3x8x32xf32>
    %cst_192 = arith.constant dense<0.000000e+00> : vector<3x8xf32>
    %380 = vector.multi_reduction <add>, %379, %cst_192 [2] : vector<3x8x32xf32> to vector<3x8xf32>
    %381 = vector.shape_cast %380 : vector<3x8xf32> to vector<3x8x1xf32>
    %cst_193 = arith.constant dense<0.000000e+00> : vector<8x1xf32>
    %382 = vector.multi_reduction <add>, %381, %cst_193 [0] : vector<3x8x1xf32> to vector<8x1xf32>
    %383 = vector.shape_cast %382 : vector<8x1xf32> to vector<1x8x1xf32>
    %cst_194 = arith.constant 9.600000e+01 : f32
    %384 = vector.broadcast %cst_194 : f32 to vector<1x8x1xf32>
    %385 = arith.divf %383, %384 : vector<1x8x1xf32>
    %cst_195 = arith.constant 9.99999997E-7 : f32
    %386 = vector.broadcast %cst_195 : f32 to vector<1x8x1xf32>
    %387 = arith.addf %385, %386 : vector<1x8x1xf32>
    %388 = math.rsqrt %387 : vector<1x8x1xf32>
    %389 = vector.broadcast %388 : vector<1x8x1xf32> to vector<3x8x32xf32>
    %390 = arith.mulf %378, %389 : vector<3x8x32xf32>
    %391 = vector.broadcast %368 : vector<3x1x32xf32> to vector<3x8x32xf32>
    %392 = arith.mulf %390, %391 : vector<3x8x32xf32>
    %393 = vector.broadcast %370 : vector<3x1x32xf32> to vector<3x8x32xf32>
    %394 = arith.addf %392, %393 : vector<3x8x32xf32>
    %c1_196 = arith.constant 1 : index
    %c0_197 = arith.constant 0 : index
    %c0_198 = arith.constant 0 : index
    %c0_199 = arith.constant 0 : index
    %395 = vector.load %arg16[%c1_196, %c0_197, %c0_198, %c0_199] : memref<2x3x32x64xf32, #tpu.memory_space<vmem>>, vector<1x3x32x64xf32>
    %396 = vector.shape_cast %395 : vector<1x3x32x64xf32> to vector<3x32x64xf32>
    %c1_200 = arith.constant 1 : index
    %c0_201 = arith.constant 0 : index
    %c0_202 = arith.constant 0 : index
    %397 = vector.load %arg17[%c1_200, %c0_201, %c0_202] : memref<2x1x64xf32, #tpu.memory_space<vmem>>, vector<1x1x64xf32>
    %398 = vector.shape_cast %397 : vector<1x1x64xf32> to vector<1x64xf32>
    %c1_203 = arith.constant 1 : index
    %c0_204 = arith.constant 0 : index
    %c0_205 = arith.constant 0 : index
    %c0_206 = arith.constant 0 : index
    %399 = vector.load %arg18[%c1_203, %c0_204, %c0_205, %c0_206] : memref<2x3x64x32xf32, #tpu.memory_space<vmem>>, vector<1x3x64x32xf32>
    %400 = vector.shape_cast %399 : vector<1x3x64x32xf32> to vector<3x64x32xf32>
    %c1_207 = arith.constant 1 : index
    %c0_208 = arith.constant 0 : index
    %c0_209 = arith.constant 0 : index
    %c0_210 = arith.constant 0 : index
    %401 = vector.load %arg19[%c1_207, %c0_208, %c0_209, %c0_210] : memref<2x3x1x32xf32, #tpu.memory_space<vmem>>, vector<1x3x1x32xf32>
    %402 = vector.shape_cast %401 : vector<1x3x1x32xf32> to vector<3x1x32xf32>
    %403 = vector.extract_strided_slice %394 {offsets = [0, 0, 0], sizes = [1, 8, 32], strides = [1, 1, 1]} : vector<3x8x32xf32> to vector<1x8x32xf32>
    %404 = vector.shape_cast %403 : vector<1x8x32xf32> to vector<8x32xf32>
    %405 = vector.extract_strided_slice %396 {offsets = [0, 0, 0], sizes = [1, 32, 64], strides = [1, 1, 1]} : vector<3x32x64xf32> to vector<1x32x64xf32>
    %406 = vector.shape_cast %405 : vector<1x32x64xf32> to vector<32x64xf32>
    %cst_211 = arith.constant dense<0.000000e+00> : vector<8x64xf32>
    %407 = tpu.matmul %404, %406, %cst_211 {dimension_numbers = #tpu.dot_dimension_numbers<[1], [0], [0], [1], [0, 0, 1, 1], [], []>} : vector<8x32xf32>, vector<32x64xf32>, vector<8x64xf32> -> vector<8x64xf32>
    %408 = vector.extract_strided_slice %394 {offsets = [1, 0, 0], sizes = [1, 8, 32], strides = [1, 1, 1]} : vector<3x8x32xf32> to vector<1x8x32xf32>
    %409 = vector.shape_cast %408 : vector<1x8x32xf32> to vector<8x32xf32>
    %410 = vector.extract_strided_slice %396 {offsets = [1, 0, 0], sizes = [1, 32, 64], strides = [1, 1, 1]} : vector<3x32x64xf32> to vector<1x32x64xf32>
    %411 = vector.shape_cast %410 : vector<1x32x64xf32> to vector<32x64xf32>
    %cst_212 = arith.constant dense<0.000000e+00> : vector<8x64xf32>
    %412 = tpu.matmul %409, %411, %cst_212 {dimension_numbers = #tpu.dot_dimension_numbers<[1], [0], [0], [1], [0, 0, 1, 1], [], []>} : vector<8x32xf32>, vector<32x64xf32>, vector<8x64xf32> -> vector<8x64xf32>
    %413 = arith.addf %407, %412 : vector<8x64xf32>
    %414 = vector.extract_strided_slice %394 {offsets = [2, 0, 0], sizes = [1, 8, 32], strides = [1, 1, 1]} : vector<3x8x32xf32> to vector<1x8x32xf32>
    %415 = vector.shape_cast %414 : vector<1x8x32xf32> to vector<8x32xf32>
    %416 = vector.extract_strided_slice %396 {offsets = [2, 0, 0], sizes = [1, 32, 64], strides = [1, 1, 1]} : vector<3x32x64xf32> to vector<1x32x64xf32>
    %417 = vector.shape_cast %416 : vector<1x32x64xf32> to vector<32x64xf32>
    %cst_213 = arith.constant dense<0.000000e+00> : vector<8x64xf32>
    %418 = tpu.matmul %415, %417, %cst_213 {dimension_numbers = #tpu.dot_dimension_numbers<[1], [0], [0], [1], [0, 0, 1, 1], [], []>} : vector<8x32xf32>, vector<32x64xf32>, vector<8x64xf32> -> vector<8x64xf32>
    %419 = arith.addf %413, %418 : vector<8x64xf32>
    %420 = vector.broadcast %398 : vector<1x64xf32> to vector<8x64xf32>
    %421 = arith.addf %419, %420 : vector<8x64xf32>
    %cst_214 = arith.constant 5.000000e-01 : f32
    %422 = vector.broadcast %cst_214 : f32 to vector<8x64xf32>
    %423 = arith.mulf %422, %421 : vector<8x64xf32>
    %cst_215 = arith.constant 0.707106769 : f32
    %424 = vector.broadcast %cst_215 : f32 to vector<8x64xf32>
    %425 = arith.mulf %421, %424 : vector<8x64xf32>
    %426 = math.erf %425 : vector<8x64xf32>
    %cst_216 = arith.constant 1.000000e+00 : f32
    %427 = vector.broadcast %cst_216 : f32 to vector<8x64xf32>
    %428 = arith.addf %427, %426 : vector<8x64xf32>
    %429 = arith.mulf %423, %428 : vector<8x64xf32>
    %430 = vector.extract_strided_slice %400 {offsets = [0, 0, 0], sizes = [1, 64, 32], strides = [1, 1, 1]} : vector<3x64x32xf32> to vector<1x64x32xf32>
    %431 = vector.shape_cast %430 : vector<1x64x32xf32> to vector<64x32xf32>
    %cst_217 = arith.constant dense<0.000000e+00> : vector<8x32xf32>
    %432 = tpu.matmul %429, %431, %cst_217 {dimension_numbers = #tpu.dot_dimension_numbers<[1], [0], [0], [1], [0, 0, 1, 1], [], []>} : vector<8x64xf32>, vector<64x32xf32>, vector<8x32xf32> -> vector<8x32xf32>
    %433 = vector.extract_strided_slice %400 {offsets = [1, 0, 0], sizes = [1, 64, 32], strides = [1, 1, 1]} : vector<3x64x32xf32> to vector<1x64x32xf32>
    %434 = vector.shape_cast %433 : vector<1x64x32xf32> to vector<64x32xf32>
    %cst_218 = arith.constant dense<0.000000e+00> : vector<8x32xf32>
    %435 = tpu.matmul %429, %434, %cst_218 {dimension_numbers = #tpu.dot_dimension_numbers<[1], [0], [0], [1], [0, 0, 1, 1], [], []>} : vector<8x64xf32>, vector<64x32xf32>, vector<8x32xf32> -> vector<8x32xf32>
    %436 = vector.extract_strided_slice %400 {offsets = [2, 0, 0], sizes = [1, 64, 32], strides = [1, 1, 1]} : vector<3x64x32xf32> to vector<1x64x32xf32>
    %437 = vector.shape_cast %436 : vector<1x64x32xf32> to vector<64x32xf32>
    %cst_219 = arith.constant dense<0.000000e+00> : vector<8x32xf32>
    %438 = tpu.matmul %429, %437, %cst_219 {dimension_numbers = #tpu.dot_dimension_numbers<[1], [0], [0], [1], [0, 0, 1, 1], [], []>} : vector<8x64xf32>, vector<64x32xf32>, vector<8x32xf32> -> vector<8x32xf32>
    %439 = vector.shape_cast %432 : vector<8x32xf32> to vector<1x8x32xf32>
    %440 = vector.shape_cast %435 : vector<8x32xf32> to vector<1x8x32xf32>
    %441 = vector.shape_cast %438 : vector<8x32xf32> to vector<1x8x32xf32>
    %442 = tpu.concatenate %439, %440, %441 in 0 : vector<1x8x32xf32>, vector<1x8x32xf32>, vector<1x8x32xf32> -> vector<3x8x32xf32>
    %443 = vector.broadcast %402 : vector<3x1x32xf32> to vector<3x8x32xf32>
    %444 = arith.addf %442, %443 : vector<3x8x32xf32>
    %445 = arith.addf %366, %444 : vector<3x8x32xf32>
    %c0_220 = arith.constant 0 : index
    %c0_221 = arith.constant 0 : index
    %c0_222 = arith.constant 0 : index
    %446 = vector.load %arg20[%c0_220, %c0_221, %c0_222] : memref<9x1x32xf32, #tpu.memory_space<vmem>>, vector<9x1x32xf32>
    %c0_223 = arith.constant 0 : index
    %c0_224 = arith.constant 0 : index
    %c0_225 = arith.constant 0 : index
    %447 = vector.load %arg21[%c0_223, %c0_224, %c0_225] : memref<9x1x32xf32, #tpu.memory_space<vmem>>, vector<9x1x32xf32>
    %c0_226 = arith.constant 0 : index
    %c0_227 = arith.constant 0 : index
    %c0_228 = arith.constant 0 : index
    %448 = vector.load %arg22[%c0_226, %c0_227, %c0_228] : memref<3x32x32xf32, #tpu.memory_space<vmem>>, vector<3x32x32xf32>
    %c0_229 = arith.constant 0 : index
    %c0_230 = arith.constant 0 : index
    %c0_231 = arith.constant 0 : index
    %449 = vector.load %arg23[%c0_229, %c0_230, %c0_231] : memref<3x1x32xf32, #tpu.memory_space<vmem>>, vector<3x1x32xf32>
    %c0_232 = arith.constant 0 : index
    %c0_233 = arith.constant 0 : index
    %c0_234 = arith.constant 0 : index
    %450 = vector.load %arg24[%c0_232, %c0_233, %c0_234] : memref<3x32x32xf32, #tpu.memory_space<vmem>>, vector<3x32x32xf32>
    %c0_235 = arith.constant 0 : index
    %c0_236 = arith.constant 0 : index
    %c0_237 = arith.constant 0 : index
    %451 = vector.load %arg25[%c0_235, %c0_236, %c0_237] : memref<3x1x32xf32, #tpu.memory_space<vmem>>, vector<3x1x32xf32>
    %c0_238 = arith.constant 0 : index
    %c0_239 = arith.constant 0 : index
    %c0_240 = arith.constant 0 : index
    %452 = vector.load %arg26[%c0_238, %c0_239, %c0_240] : memref<3x32x32xf32, #tpu.memory_space<vmem>>, vector<3x32x32xf32>
    %c0_241 = arith.constant 0 : index
    %c0_242 = arith.constant 0 : index
    %c0_243 = arith.constant 0 : index
    %453 = vector.load %arg27[%c0_241, %c0_242, %c0_243] : memref<3x1x32xf32, #tpu.memory_space<vmem>>, vector<3x1x32xf32>
    %c0_244 = arith.constant 0 : index
    %c0_245 = arith.constant 0 : index
    %c0_246 = arith.constant 0 : index
    %454 = vector.load %arg28[%c0_244, %c0_245, %c0_246] : memref<3x32x32xf32, #tpu.memory_space<vmem>>, vector<3x32x32xf32>
    %c0_247 = arith.constant 0 : index
    %c0_248 = arith.constant 0 : index
    %c0_249 = arith.constant 0 : index
    %455 = vector.load %arg29[%c0_247, %c0_248, %c0_249] : memref<3x1x32xf32, #tpu.memory_space<vmem>>, vector<3x1x32xf32>
    %456 = vector.extract_strided_slice %445 {offsets = [0, 0, 0], sizes = [1, 8, 32], strides = [1, 1, 1]} : vector<3x8x32xf32> to vector<1x8x32xf32>
    %457 = vector.shape_cast %456 : vector<1x8x32xf32> to vector<8x32xf32>
    %458 = vector.extract_strided_slice %445 {offsets = [1, 0, 0], sizes = [1, 8, 32], strides = [1, 1, 1]} : vector<3x8x32xf32> to vector<1x8x32xf32>
    %459 = vector.shape_cast %458 : vector<1x8x32xf32> to vector<8x32xf32>
    %460 = vector.extract_strided_slice %445 {offsets = [2, 0, 0], sizes = [1, 8, 32], strides = [1, 1, 1]} : vector<3x8x32xf32> to vector<1x8x32xf32>
    %461 = vector.shape_cast %460 : vector<1x8x32xf32> to vector<8x32xf32>
    %462 = vector.extract_strided_slice %446 {offsets = [0, 0, 0], sizes = [1, 1, 32], strides = [1, 1, 1]} : vector<9x1x32xf32> to vector<1x1x32xf32>
    %463 = vector.shape_cast %462 : vector<1x1x32xf32> to vector<1x32xf32>
    %464 = vector.extract_strided_slice %447 {offsets = [0, 0, 0], sizes = [1, 1, 32], strides = [1, 1, 1]} : vector<9x1x32xf32> to vector<1x1x32xf32>
    %465 = vector.shape_cast %464 : vector<1x1x32xf32> to vector<1x32xf32>
    %cst_250 = arith.constant dense<0.000000e+00> : vector<8xf32>
    %466 = vector.multi_reduction <add>, %459, %cst_250 [1] : vector<8x32xf32> to vector<8xf32>
    %467 = vector.shape_cast %466 : vector<8xf32> to vector<8x1xf32>
    %cst_251 = arith.constant 3.200000e+01 : f32
    %468 = vector.broadcast %cst_251 : f32 to vector<8x1xf32>
    %469 = arith.divf %467, %468 : vector<8x1xf32>
    %470 = vector.broadcast %469 : vector<8x1xf32> to vector<8x32xf32>
    %471 = arith.subf %459, %470 : vector<8x32xf32>
    %472 = arith.mulf %471, %471 : vector<8x32xf32>
    %cst_252 = arith.constant dense<0.000000e+00> : vector<8xf32>
    %473 = vector.multi_reduction <add>, %472, %cst_252 [1] : vector<8x32xf32> to vector<8xf32>
    %474 = vector.shape_cast %473 : vector<8xf32> to vector<8x1xf32>
    %cst_253 = arith.constant 3.200000e+01 : f32
    %475 = vector.broadcast %cst_253 : f32 to vector<8x1xf32>
    %476 = arith.divf %474, %475 : vector<8x1xf32>
    %cst_254 = arith.constant 9.99999997E-7 : f32
    %477 = vector.broadcast %cst_254 : f32 to vector<8x1xf32>
    %478 = arith.addf %476, %477 : vector<8x1xf32>
    %479 = math.rsqrt %478 : vector<8x1xf32>
    %480 = vector.broadcast %479 : vector<8x1xf32> to vector<8x32xf32>
    %481 = arith.mulf %471, %480 : vector<8x32xf32>
    %482 = vector.broadcast %463 : vector<1x32xf32> to vector<8x32xf32>
    %483 = arith.mulf %481, %482 : vector<8x32xf32>
    %484 = vector.broadcast %465 : vector<1x32xf32> to vector<8x32xf32>
    %485 = arith.addf %483, %484 : vector<8x32xf32>
    %486 = vector.extract_strided_slice %446 {offsets = [1, 0, 0], sizes = [1, 1, 32], strides = [1, 1, 1]} : vector<9x1x32xf32> to vector<1x1x32xf32>
    %487 = vector.shape_cast %486 : vector<1x1x32xf32> to vector<1x32xf32>
    %488 = vector.extract_strided_slice %447 {offsets = [1, 0, 0], sizes = [1, 1, 32], strides = [1, 1, 1]} : vector<9x1x32xf32> to vector<1x1x32xf32>
    %489 = vector.shape_cast %488 : vector<1x1x32xf32> to vector<1x32xf32>
    %cst_255 = arith.constant dense<0.000000e+00> : vector<8xf32>
    %490 = vector.multi_reduction <add>, %461, %cst_255 [1] : vector<8x32xf32> to vector<8xf32>
    %491 = vector.shape_cast %490 : vector<8xf32> to vector<8x1xf32>
    %cst_256 = arith.constant 3.200000e+01 : f32
    %492 = vector.broadcast %cst_256 : f32 to vector<8x1xf32>
    %493 = arith.divf %491, %492 : vector<8x1xf32>
    %494 = vector.broadcast %493 : vector<8x1xf32> to vector<8x32xf32>
    %495 = arith.subf %461, %494 : vector<8x32xf32>
    %496 = arith.mulf %495, %495 : vector<8x32xf32>
    %cst_257 = arith.constant dense<0.000000e+00> : vector<8xf32>
    %497 = vector.multi_reduction <add>, %496, %cst_257 [1] : vector<8x32xf32> to vector<8xf32>
    %498 = vector.shape_cast %497 : vector<8xf32> to vector<8x1xf32>
    %cst_258 = arith.constant 3.200000e+01 : f32
    %499 = vector.broadcast %cst_258 : f32 to vector<8x1xf32>
    %500 = arith.divf %498, %499 : vector<8x1xf32>
    %cst_259 = arith.constant 9.99999997E-7 : f32
    %501 = vector.broadcast %cst_259 : f32 to vector<8x1xf32>
    %502 = arith.addf %500, %501 : vector<8x1xf32>
    %503 = math.rsqrt %502 : vector<8x1xf32>
    %504 = vector.broadcast %503 : vector<8x1xf32> to vector<8x32xf32>
    %505 = arith.mulf %495, %504 : vector<8x32xf32>
    %506 = vector.broadcast %487 : vector<1x32xf32> to vector<8x32xf32>
    %507 = arith.mulf %505, %506 : vector<8x32xf32>
    %508 = vector.broadcast %489 : vector<1x32xf32> to vector<8x32xf32>
    %509 = arith.addf %507, %508 : vector<8x32xf32>
    %510 = vector.extract_strided_slice %446 {offsets = [2, 0, 0], sizes = [1, 1, 32], strides = [1, 1, 1]} : vector<9x1x32xf32> to vector<1x1x32xf32>
    %511 = vector.shape_cast %510 : vector<1x1x32xf32> to vector<1x32xf32>
    %512 = vector.extract_strided_slice %447 {offsets = [2, 0, 0], sizes = [1, 1, 32], strides = [1, 1, 1]} : vector<9x1x32xf32> to vector<1x1x32xf32>
    %513 = vector.shape_cast %512 : vector<1x1x32xf32> to vector<1x32xf32>
    %cst_260 = arith.constant dense<0.000000e+00> : vector<8xf32>
    %514 = vector.multi_reduction <add>, %457, %cst_260 [1] : vector<8x32xf32> to vector<8xf32>
    %515 = vector.shape_cast %514 : vector<8xf32> to vector<8x1xf32>
    %cst_261 = arith.constant 3.200000e+01 : f32
    %516 = vector.broadcast %cst_261 : f32 to vector<8x1xf32>
    %517 = arith.divf %515, %516 : vector<8x1xf32>
    %518 = vector.broadcast %517 : vector<8x1xf32> to vector<8x32xf32>
    %519 = arith.subf %457, %518 : vector<8x32xf32>
    %520 = arith.mulf %519, %519 : vector<8x32xf32>
    %cst_262 = arith.constant dense<0.000000e+00> : vector<8xf32>
    %521 = vector.multi_reduction <add>, %520, %cst_262 [1] : vector<8x32xf32> to vector<8xf32>
    %522 = vector.shape_cast %521 : vector<8xf32> to vector<8x1xf32>
    %cst_263 = arith.constant 3.200000e+01 : f32
    %523 = vector.broadcast %cst_263 : f32 to vector<8x1xf32>
    %524 = arith.divf %522, %523 : vector<8x1xf32>
    %cst_264 = arith.constant 9.99999997E-7 : f32
    %525 = vector.broadcast %cst_264 : f32 to vector<8x1xf32>
    %526 = arith.addf %524, %525 : vector<8x1xf32>
    %527 = math.rsqrt %526 : vector<8x1xf32>
    %528 = vector.broadcast %527 : vector<8x1xf32> to vector<8x32xf32>
    %529 = arith.mulf %519, %528 : vector<8x32xf32>
    %530 = vector.broadcast %511 : vector<1x32xf32> to vector<8x32xf32>
    %531 = arith.mulf %529, %530 : vector<8x32xf32>
    %532 = vector.broadcast %513 : vector<1x32xf32> to vector<8x32xf32>
    %533 = arith.addf %531, %532 : vector<8x32xf32>
    %534 = vector.extract_strided_slice %448 {offsets = [0, 0, 0], sizes = [1, 32, 32], strides = [1, 1, 1]} : vector<3x32x32xf32> to vector<1x32x32xf32>
    %535 = vector.shape_cast %534 : vector<1x32x32xf32> to vector<32x32xf32>
    %cst_265 = arith.constant dense<0.000000e+00> : vector<8x32xf32>
    %536 = tpu.matmul %485, %535, %cst_265 {dimension_numbers = #tpu.dot_dimension_numbers<[1], [0], [0], [1], [0, 0, 1, 1], [], []>} : vector<8x32xf32>, vector<32x32xf32>, vector<8x32xf32> -> vector<8x32xf32>
    %537 = vector.extract_strided_slice %449 {offsets = [0, 0, 0], sizes = [1, 1, 32], strides = [1, 1, 1]} : vector<3x1x32xf32> to vector<1x1x32xf32>
    %538 = vector.shape_cast %537 : vector<1x1x32xf32> to vector<1x32xf32>
    %539 = vector.broadcast %538 : vector<1x32xf32> to vector<8x32xf32>
    %540 = arith.addf %536, %539 : vector<8x32xf32>
    %541 = vector.extract_strided_slice %450 {offsets = [0, 0, 0], sizes = [1, 32, 32], strides = [1, 1, 1]} : vector<3x32x32xf32> to vector<1x32x32xf32>
    %542 = vector.shape_cast %541 : vector<1x32x32xf32> to vector<32x32xf32>
    %cst_266 = arith.constant dense<0.000000e+00> : vector<8x32xf32>
    %543 = tpu.matmul %509, %542, %cst_266 {dimension_numbers = #tpu.dot_dimension_numbers<[1], [0], [0], [1], [0, 0, 1, 1], [], []>} : vector<8x32xf32>, vector<32x32xf32>, vector<8x32xf32> -> vector<8x32xf32>
    %544 = vector.extract_strided_slice %451 {offsets = [0, 0, 0], sizes = [1, 1, 32], strides = [1, 1, 1]} : vector<3x1x32xf32> to vector<1x1x32xf32>
    %545 = vector.shape_cast %544 : vector<1x1x32xf32> to vector<1x32xf32>
    %546 = vector.broadcast %545 : vector<1x32xf32> to vector<8x32xf32>
    %547 = arith.addf %543, %546 : vector<8x32xf32>
    %548 = vector.extract_strided_slice %452 {offsets = [0, 0, 0], sizes = [1, 32, 32], strides = [1, 1, 1]} : vector<3x32x32xf32> to vector<1x32x32xf32>
    %549 = vector.shape_cast %548 : vector<1x32x32xf32> to vector<32x32xf32>
    %cst_267 = arith.constant dense<0.000000e+00> : vector<8x32xf32>
    %550 = tpu.matmul %533, %549, %cst_267 {dimension_numbers = #tpu.dot_dimension_numbers<[1], [0], [0], [1], [0, 0, 1, 1], [], []>} : vector<8x32xf32>, vector<32x32xf32>, vector<8x32xf32> -> vector<8x32xf32>
    %551 = vector.extract_strided_slice %453 {offsets = [0, 0, 0], sizes = [1, 1, 32], strides = [1, 1, 1]} : vector<3x1x32xf32> to vector<1x1x32xf32>
    %552 = vector.shape_cast %551 : vector<1x1x32xf32> to vector<1x32xf32>
    %553 = vector.broadcast %552 : vector<1x32xf32> to vector<8x32xf32>
    %554 = arith.addf %550, %553 : vector<8x32xf32>
    %cst_268 = arith.constant 5.000000e-01 : f32
    %555 = vector.broadcast %cst_268 : f32 to vector<8x32xf32>
    %556 = arith.mulf %540, %555 : vector<8x32xf32>
    %557 = vector.shape_cast %556 : vector<8x32xf32> to vector<1x8x32xf32>
    %558 = vector.broadcast %557 : vector<1x8x32xf32> to vector<8x8x32xf32>
    %559 = vector.broadcast %0 : vector<8x1x32xf32> to vector<8x8x32xf32>
    %560 = arith.mulf %558, %559 : vector<8x8x32xf32>
    %561 = vector.shape_cast %560 : vector<8x8x32xf32> to vector<64x32xf32>
    %cst_269 = arith.constant dense<0.000000e+00> : vector<64x8xf32>
    %562 = tpu.matmul %561, %547, %cst_269 {dimension_numbers = #tpu.dot_dimension_numbers<[1], [1], [0], [0], [0, 0, 1, 0], [], []>} : vector<64x32xf32>, vector<8x32xf32>, vector<64x8xf32> -> vector<64x8xf32>
    %cst_270 = arith.constant dense<0xFF800000> : vector<64xf32>
    %563 = vector.multi_reduction <maximumf>, %562, %cst_270 [1] : vector<64x8xf32> to vector<64xf32>
    %564 = vector.shape_cast %563 : vector<64xf32> to vector<64x1xf32>
    %565 = vector.broadcast %564 : vector<64x1xf32> to vector<64x8xf32>
    %566 = arith.subf %562, %565 : vector<64x8xf32>
    %567 = math.exp %566 : vector<64x8xf32>
    %cst_271 = arith.constant dense<0.000000e+00> : vector<64xf32>
    %568 = vector.multi_reduction <add>, %567, %cst_271 [1] : vector<64x8xf32> to vector<64xf32>
    %569 = vector.shape_cast %568 : vector<64xf32> to vector<64x1xf32>
    %570 = vector.broadcast %569 : vector<64x1xf32> to vector<64x8xf32>
    %571 = arith.divf %567, %570 : vector<64x8xf32>
    %cst_272 = arith.constant dense<0.000000e+00> : vector<64x32xf32>
    %572 = tpu.matmul %571, %554, %cst_272 {dimension_numbers = #tpu.dot_dimension_numbers<[1], [0], [0], [1], [0, 0, 1, 1], [], []>} : vector<64x8xf32>, vector<8x32xf32>, vector<64x32xf32> -> vector<64x32xf32>
    %573 = vector.shape_cast %572 : vector<64x32xf32> to vector<8x8x32xf32>
    %574 = vector.broadcast %0 : vector<8x1x32xf32> to vector<8x8x32xf32>
    %575 = arith.mulf %573, %574 : vector<8x8x32xf32>
    %cst_273 = arith.constant dense<0.000000e+00> : vector<8x32xf32>
    %576 = vector.multi_reduction <add>, %575, %cst_273 [0] : vector<8x8x32xf32> to vector<8x32xf32>
    %577 = vector.extract_strided_slice %454 {offsets = [0, 0, 0], sizes = [1, 32, 32], strides = [1, 1, 1]} : vector<3x32x32xf32> to vector<1x32x32xf32>
    %578 = vector.shape_cast %577 : vector<1x32x32xf32> to vector<32x32xf32>
    %cst_274 = arith.constant dense<0.000000e+00> : vector<8x32xf32>
    %579 = tpu.matmul %576, %578, %cst_274 {dimension_numbers = #tpu.dot_dimension_numbers<[1], [0], [0], [1], [0, 0, 1, 1], [], []>} : vector<8x32xf32>, vector<32x32xf32>, vector<8x32xf32> -> vector<8x32xf32>
    %580 = vector.extract_strided_slice %455 {offsets = [0, 0, 0], sizes = [1, 1, 32], strides = [1, 1, 1]} : vector<3x1x32xf32> to vector<1x1x32xf32>
    %581 = vector.shape_cast %580 : vector<1x1x32xf32> to vector<1x32xf32>
    %582 = vector.broadcast %581 : vector<1x32xf32> to vector<8x32xf32>
    %583 = arith.addf %579, %582 : vector<8x32xf32>
    %584 = arith.addf %457, %583 : vector<8x32xf32>
    %585 = vector.extract_strided_slice %446 {offsets = [3, 0, 0], sizes = [1, 1, 32], strides = [1, 1, 1]} : vector<9x1x32xf32> to vector<1x1x32xf32>
    %586 = vector.shape_cast %585 : vector<1x1x32xf32> to vector<1x32xf32>
    %587 = vector.extract_strided_slice %447 {offsets = [3, 0, 0], sizes = [1, 1, 32], strides = [1, 1, 1]} : vector<9x1x32xf32> to vector<1x1x32xf32>
    %588 = vector.shape_cast %587 : vector<1x1x32xf32> to vector<1x32xf32>
    %cst_275 = arith.constant dense<0.000000e+00> : vector<8xf32>
    %589 = vector.multi_reduction <add>, %584, %cst_275 [1] : vector<8x32xf32> to vector<8xf32>
    %590 = vector.shape_cast %589 : vector<8xf32> to vector<8x1xf32>
    %cst_276 = arith.constant 3.200000e+01 : f32
    %591 = vector.broadcast %cst_276 : f32 to vector<8x1xf32>
    %592 = arith.divf %590, %591 : vector<8x1xf32>
    %593 = vector.broadcast %592 : vector<8x1xf32> to vector<8x32xf32>
    %594 = arith.subf %584, %593 : vector<8x32xf32>
    %595 = arith.mulf %594, %594 : vector<8x32xf32>
    %cst_277 = arith.constant dense<0.000000e+00> : vector<8xf32>
    %596 = vector.multi_reduction <add>, %595, %cst_277 [1] : vector<8x32xf32> to vector<8xf32>
    %597 = vector.shape_cast %596 : vector<8xf32> to vector<8x1xf32>
    %cst_278 = arith.constant 3.200000e+01 : f32
    %598 = vector.broadcast %cst_278 : f32 to vector<8x1xf32>
    %599 = arith.divf %597, %598 : vector<8x1xf32>
    %cst_279 = arith.constant 9.99999997E-7 : f32
    %600 = vector.broadcast %cst_279 : f32 to vector<8x1xf32>
    %601 = arith.addf %599, %600 : vector<8x1xf32>
    %602 = math.rsqrt %601 : vector<8x1xf32>
    %603 = vector.broadcast %602 : vector<8x1xf32> to vector<8x32xf32>
    %604 = arith.mulf %594, %603 : vector<8x32xf32>
    %605 = vector.broadcast %586 : vector<1x32xf32> to vector<8x32xf32>
    %606 = arith.mulf %604, %605 : vector<8x32xf32>
    %607 = vector.broadcast %588 : vector<1x32xf32> to vector<8x32xf32>
    %608 = arith.addf %606, %607 : vector<8x32xf32>
    %609 = vector.extract_strided_slice %446 {offsets = [4, 0, 0], sizes = [1, 1, 32], strides = [1, 1, 1]} : vector<9x1x32xf32> to vector<1x1x32xf32>
    %610 = vector.shape_cast %609 : vector<1x1x32xf32> to vector<1x32xf32>
    %611 = vector.extract_strided_slice %447 {offsets = [4, 0, 0], sizes = [1, 1, 32], strides = [1, 1, 1]} : vector<9x1x32xf32> to vector<1x1x32xf32>
    %612 = vector.shape_cast %611 : vector<1x1x32xf32> to vector<1x32xf32>
    %cst_280 = arith.constant dense<0.000000e+00> : vector<8xf32>
    %613 = vector.multi_reduction <add>, %461, %cst_280 [1] : vector<8x32xf32> to vector<8xf32>
    %614 = vector.shape_cast %613 : vector<8xf32> to vector<8x1xf32>
    %cst_281 = arith.constant 3.200000e+01 : f32
    %615 = vector.broadcast %cst_281 : f32 to vector<8x1xf32>
    %616 = arith.divf %614, %615 : vector<8x1xf32>
    %617 = vector.broadcast %616 : vector<8x1xf32> to vector<8x32xf32>
    %618 = arith.subf %461, %617 : vector<8x32xf32>
    %619 = arith.mulf %618, %618 : vector<8x32xf32>
    %cst_282 = arith.constant dense<0.000000e+00> : vector<8xf32>
    %620 = vector.multi_reduction <add>, %619, %cst_282 [1] : vector<8x32xf32> to vector<8xf32>
    %621 = vector.shape_cast %620 : vector<8xf32> to vector<8x1xf32>
    %cst_283 = arith.constant 3.200000e+01 : f32
    %622 = vector.broadcast %cst_283 : f32 to vector<8x1xf32>
    %623 = arith.divf %621, %622 : vector<8x1xf32>
    %cst_284 = arith.constant 9.99999997E-7 : f32
    %624 = vector.broadcast %cst_284 : f32 to vector<8x1xf32>
    %625 = arith.addf %623, %624 : vector<8x1xf32>
    %626 = math.rsqrt %625 : vector<8x1xf32>
    %627 = vector.broadcast %626 : vector<8x1xf32> to vector<8x32xf32>
    %628 = arith.mulf %618, %627 : vector<8x32xf32>
    %629 = vector.broadcast %610 : vector<1x32xf32> to vector<8x32xf32>
    %630 = arith.mulf %628, %629 : vector<8x32xf32>
    %631 = vector.broadcast %612 : vector<1x32xf32> to vector<8x32xf32>
    %632 = arith.addf %630, %631 : vector<8x32xf32>
    %633 = vector.extract_strided_slice %446 {offsets = [5, 0, 0], sizes = [1, 1, 32], strides = [1, 1, 1]} : vector<9x1x32xf32> to vector<1x1x32xf32>
    %634 = vector.shape_cast %633 : vector<1x1x32xf32> to vector<1x32xf32>
    %635 = vector.extract_strided_slice %447 {offsets = [5, 0, 0], sizes = [1, 1, 32], strides = [1, 1, 1]} : vector<9x1x32xf32> to vector<1x1x32xf32>
    %636 = vector.shape_cast %635 : vector<1x1x32xf32> to vector<1x32xf32>
    %cst_285 = arith.constant dense<0.000000e+00> : vector<8xf32>
    %637 = vector.multi_reduction <add>, %459, %cst_285 [1] : vector<8x32xf32> to vector<8xf32>
    %638 = vector.shape_cast %637 : vector<8xf32> to vector<8x1xf32>
    %cst_286 = arith.constant 3.200000e+01 : f32
    %639 = vector.broadcast %cst_286 : f32 to vector<8x1xf32>
    %640 = arith.divf %638, %639 : vector<8x1xf32>
    %641 = vector.broadcast %640 : vector<8x1xf32> to vector<8x32xf32>
    %642 = arith.subf %459, %641 : vector<8x32xf32>
    %643 = arith.mulf %642, %642 : vector<8x32xf32>
    %cst_287 = arith.constant dense<0.000000e+00> : vector<8xf32>
    %644 = vector.multi_reduction <add>, %643, %cst_287 [1] : vector<8x32xf32> to vector<8xf32>
    %645 = vector.shape_cast %644 : vector<8xf32> to vector<8x1xf32>
    %cst_288 = arith.constant 3.200000e+01 : f32
    %646 = vector.broadcast %cst_288 : f32 to vector<8x1xf32>
    %647 = arith.divf %645, %646 : vector<8x1xf32>
    %cst_289 = arith.constant 9.99999997E-7 : f32
    %648 = vector.broadcast %cst_289 : f32 to vector<8x1xf32>
    %649 = arith.addf %647, %648 : vector<8x1xf32>
    %650 = math.rsqrt %649 : vector<8x1xf32>
    %651 = vector.broadcast %650 : vector<8x1xf32> to vector<8x32xf32>
    %652 = arith.mulf %642, %651 : vector<8x32xf32>
    %653 = vector.broadcast %634 : vector<1x32xf32> to vector<8x32xf32>
    %654 = arith.mulf %652, %653 : vector<8x32xf32>
    %655 = vector.broadcast %636 : vector<1x32xf32> to vector<8x32xf32>
    %656 = arith.addf %654, %655 : vector<8x32xf32>
    %657 = vector.extract_strided_slice %448 {offsets = [1, 0, 0], sizes = [1, 32, 32], strides = [1, 1, 1]} : vector<3x32x32xf32> to vector<1x32x32xf32>
    %658 = vector.shape_cast %657 : vector<1x32x32xf32> to vector<32x32xf32>
    %cst_290 = arith.constant dense<0.000000e+00> : vector<8x32xf32>
    %659 = tpu.matmul %608, %658, %cst_290 {dimension_numbers = #tpu.dot_dimension_numbers<[1], [0], [0], [1], [0, 0, 1, 1], [], []>} : vector<8x32xf32>, vector<32x32xf32>, vector<8x32xf32> -> vector<8x32xf32>
    %660 = vector.extract_strided_slice %449 {offsets = [1, 0, 0], sizes = [1, 1, 32], strides = [1, 1, 1]} : vector<3x1x32xf32> to vector<1x1x32xf32>
    %661 = vector.shape_cast %660 : vector<1x1x32xf32> to vector<1x32xf32>
    %662 = vector.broadcast %661 : vector<1x32xf32> to vector<8x32xf32>
    %663 = arith.addf %659, %662 : vector<8x32xf32>
    %664 = vector.extract_strided_slice %450 {offsets = [1, 0, 0], sizes = [1, 32, 32], strides = [1, 1, 1]} : vector<3x32x32xf32> to vector<1x32x32xf32>
    %665 = vector.shape_cast %664 : vector<1x32x32xf32> to vector<32x32xf32>
    %cst_291 = arith.constant dense<0.000000e+00> : vector<8x32xf32>
    %666 = tpu.matmul %632, %665, %cst_291 {dimension_numbers = #tpu.dot_dimension_numbers<[1], [0], [0], [1], [0, 0, 1, 1], [], []>} : vector<8x32xf32>, vector<32x32xf32>, vector<8x32xf32> -> vector<8x32xf32>
    %667 = vector.extract_strided_slice %451 {offsets = [1, 0, 0], sizes = [1, 1, 32], strides = [1, 1, 1]} : vector<3x1x32xf32> to vector<1x1x32xf32>
    %668 = vector.shape_cast %667 : vector<1x1x32xf32> to vector<1x32xf32>
    %669 = vector.broadcast %668 : vector<1x32xf32> to vector<8x32xf32>
    %670 = arith.addf %666, %669 : vector<8x32xf32>
    %671 = vector.extract_strided_slice %452 {offsets = [1, 0, 0], sizes = [1, 32, 32], strides = [1, 1, 1]} : vector<3x32x32xf32> to vector<1x32x32xf32>
    %672 = vector.shape_cast %671 : vector<1x32x32xf32> to vector<32x32xf32>
    %cst_292 = arith.constant dense<0.000000e+00> : vector<8x32xf32>
    %673 = tpu.matmul %656, %672, %cst_292 {dimension_numbers = #tpu.dot_dimension_numbers<[1], [0], [0], [1], [0, 0, 1, 1], [], []>} : vector<8x32xf32>, vector<32x32xf32>, vector<8x32xf32> -> vector<8x32xf32>
    %674 = vector.extract_strided_slice %453 {offsets = [1, 0, 0], sizes = [1, 1, 32], strides = [1, 1, 1]} : vector<3x1x32xf32> to vector<1x1x32xf32>
    %675 = vector.shape_cast %674 : vector<1x1x32xf32> to vector<1x32xf32>
    %676 = vector.broadcast %675 : vector<1x32xf32> to vector<8x32xf32>
    %677 = arith.addf %673, %676 : vector<8x32xf32>
    %cst_293 = arith.constant 5.000000e-01 : f32
    %678 = vector.broadcast %cst_293 : f32 to vector<8x32xf32>
    %679 = arith.mulf %663, %678 : vector<8x32xf32>
    %680 = vector.shape_cast %679 : vector<8x32xf32> to vector<1x8x32xf32>
    %681 = vector.broadcast %680 : vector<1x8x32xf32> to vector<8x8x32xf32>
    %682 = vector.broadcast %0 : vector<8x1x32xf32> to vector<8x8x32xf32>
    %683 = arith.mulf %681, %682 : vector<8x8x32xf32>
    %684 = vector.shape_cast %683 : vector<8x8x32xf32> to vector<64x32xf32>
    %cst_294 = arith.constant dense<0.000000e+00> : vector<64x8xf32>
    %685 = tpu.matmul %684, %670, %cst_294 {dimension_numbers = #tpu.dot_dimension_numbers<[1], [1], [0], [0], [0, 0, 1, 0], [], []>} : vector<64x32xf32>, vector<8x32xf32>, vector<64x8xf32> -> vector<64x8xf32>
    %cst_295 = arith.constant dense<0xFF800000> : vector<64xf32>
    %686 = vector.multi_reduction <maximumf>, %685, %cst_295 [1] : vector<64x8xf32> to vector<64xf32>
    %687 = vector.shape_cast %686 : vector<64xf32> to vector<64x1xf32>
    %688 = vector.broadcast %687 : vector<64x1xf32> to vector<64x8xf32>
    %689 = arith.subf %685, %688 : vector<64x8xf32>
    %690 = math.exp %689 : vector<64x8xf32>
    %cst_296 = arith.constant dense<0.000000e+00> : vector<64xf32>
    %691 = vector.multi_reduction <add>, %690, %cst_296 [1] : vector<64x8xf32> to vector<64xf32>
    %692 = vector.shape_cast %691 : vector<64xf32> to vector<64x1xf32>
    %693 = vector.broadcast %692 : vector<64x1xf32> to vector<64x8xf32>
    %694 = arith.divf %690, %693 : vector<64x8xf32>
    %cst_297 = arith.constant dense<0.000000e+00> : vector<64x32xf32>
    %695 = tpu.matmul %694, %677, %cst_297 {dimension_numbers = #tpu.dot_dimension_numbers<[1], [0], [0], [1], [0, 0, 1, 1], [], []>} : vector<64x8xf32>, vector<8x32xf32>, vector<64x32xf32> -> vector<64x32xf32>
    %696 = vector.shape_cast %695 : vector<64x32xf32> to vector<8x8x32xf32>
    %697 = vector.broadcast %0 : vector<8x1x32xf32> to vector<8x8x32xf32>
    %698 = arith.mulf %696, %697 : vector<8x8x32xf32>
    %cst_298 = arith.constant dense<0.000000e+00> : vector<8x32xf32>
    %699 = vector.multi_reduction <add>, %698, %cst_298 [0] : vector<8x8x32xf32> to vector<8x32xf32>
    %700 = vector.extract_strided_slice %454 {offsets = [1, 0, 0], sizes = [1, 32, 32], strides = [1, 1, 1]} : vector<3x32x32xf32> to vector<1x32x32xf32>
    %701 = vector.shape_cast %700 : vector<1x32x32xf32> to vector<32x32xf32>
    %cst_299 = arith.constant dense<0.000000e+00> : vector<8x32xf32>
    %702 = tpu.matmul %699, %701, %cst_299 {dimension_numbers = #tpu.dot_dimension_numbers<[1], [0], [0], [1], [0, 0, 1, 1], [], []>} : vector<8x32xf32>, vector<32x32xf32>, vector<8x32xf32> -> vector<8x32xf32>
    %703 = vector.extract_strided_slice %455 {offsets = [1, 0, 0], sizes = [1, 1, 32], strides = [1, 1, 1]} : vector<3x1x32xf32> to vector<1x1x32xf32>
    %704 = vector.shape_cast %703 : vector<1x1x32xf32> to vector<1x32xf32>
    %705 = vector.broadcast %704 : vector<1x32xf32> to vector<8x32xf32>
    %706 = arith.addf %702, %705 : vector<8x32xf32>
    %707 = arith.addf %459, %706 : vector<8x32xf32>
    %708 = vector.extract_strided_slice %446 {offsets = [6, 0, 0], sizes = [1, 1, 32], strides = [1, 1, 1]} : vector<9x1x32xf32> to vector<1x1x32xf32>
    %709 = vector.shape_cast %708 : vector<1x1x32xf32> to vector<1x32xf32>
    %710 = vector.extract_strided_slice %447 {offsets = [6, 0, 0], sizes = [1, 1, 32], strides = [1, 1, 1]} : vector<9x1x32xf32> to vector<1x1x32xf32>
    %711 = vector.shape_cast %710 : vector<1x1x32xf32> to vector<1x32xf32>
    %cst_300 = arith.constant dense<0.000000e+00> : vector<8xf32>
    %712 = vector.multi_reduction <add>, %584, %cst_300 [1] : vector<8x32xf32> to vector<8xf32>
    %713 = vector.shape_cast %712 : vector<8xf32> to vector<8x1xf32>
    %cst_301 = arith.constant 3.200000e+01 : f32
    %714 = vector.broadcast %cst_301 : f32 to vector<8x1xf32>
    %715 = arith.divf %713, %714 : vector<8x1xf32>
    %716 = vector.broadcast %715 : vector<8x1xf32> to vector<8x32xf32>
    %717 = arith.subf %584, %716 : vector<8x32xf32>
    %718 = arith.mulf %717, %717 : vector<8x32xf32>
    %cst_302 = arith.constant dense<0.000000e+00> : vector<8xf32>
    %719 = vector.multi_reduction <add>, %718, %cst_302 [1] : vector<8x32xf32> to vector<8xf32>
    %720 = vector.shape_cast %719 : vector<8xf32> to vector<8x1xf32>
    %cst_303 = arith.constant 3.200000e+01 : f32
    %721 = vector.broadcast %cst_303 : f32 to vector<8x1xf32>
    %722 = arith.divf %720, %721 : vector<8x1xf32>
    %cst_304 = arith.constant 9.99999997E-7 : f32
    %723 = vector.broadcast %cst_304 : f32 to vector<8x1xf32>
    %724 = arith.addf %722, %723 : vector<8x1xf32>
    %725 = math.rsqrt %724 : vector<8x1xf32>
    %726 = vector.broadcast %725 : vector<8x1xf32> to vector<8x32xf32>
    %727 = arith.mulf %717, %726 : vector<8x32xf32>
    %728 = vector.broadcast %709 : vector<1x32xf32> to vector<8x32xf32>
    %729 = arith.mulf %727, %728 : vector<8x32xf32>
    %730 = vector.broadcast %711 : vector<1x32xf32> to vector<8x32xf32>
    %731 = arith.addf %729, %730 : vector<8x32xf32>
    %732 = vector.extract_strided_slice %446 {offsets = [7, 0, 0], sizes = [1, 1, 32], strides = [1, 1, 1]} : vector<9x1x32xf32> to vector<1x1x32xf32>
    %733 = vector.shape_cast %732 : vector<1x1x32xf32> to vector<1x32xf32>
    %734 = vector.extract_strided_slice %447 {offsets = [7, 0, 0], sizes = [1, 1, 32], strides = [1, 1, 1]} : vector<9x1x32xf32> to vector<1x1x32xf32>
    %735 = vector.shape_cast %734 : vector<1x1x32xf32> to vector<1x32xf32>
    %cst_305 = arith.constant dense<0.000000e+00> : vector<8xf32>
    %736 = vector.multi_reduction <add>, %707, %cst_305 [1] : vector<8x32xf32> to vector<8xf32>
    %737 = vector.shape_cast %736 : vector<8xf32> to vector<8x1xf32>
    %cst_306 = arith.constant 3.200000e+01 : f32
    %738 = vector.broadcast %cst_306 : f32 to vector<8x1xf32>
    %739 = arith.divf %737, %738 : vector<8x1xf32>
    %740 = vector.broadcast %739 : vector<8x1xf32> to vector<8x32xf32>
    %741 = arith.subf %707, %740 : vector<8x32xf32>
    %742 = arith.mulf %741, %741 : vector<8x32xf32>
    %cst_307 = arith.constant dense<0.000000e+00> : vector<8xf32>
    %743 = vector.multi_reduction <add>, %742, %cst_307 [1] : vector<8x32xf32> to vector<8xf32>
    %744 = vector.shape_cast %743 : vector<8xf32> to vector<8x1xf32>
    %cst_308 = arith.constant 3.200000e+01 : f32
    %745 = vector.broadcast %cst_308 : f32 to vector<8x1xf32>
    %746 = arith.divf %744, %745 : vector<8x1xf32>
    %cst_309 = arith.constant 9.99999997E-7 : f32
    %747 = vector.broadcast %cst_309 : f32 to vector<8x1xf32>
    %748 = arith.addf %746, %747 : vector<8x1xf32>
    %749 = math.rsqrt %748 : vector<8x1xf32>
    %750 = vector.broadcast %749 : vector<8x1xf32> to vector<8x32xf32>
    %751 = arith.mulf %741, %750 : vector<8x32xf32>
    %752 = vector.broadcast %733 : vector<1x32xf32> to vector<8x32xf32>
    %753 = arith.mulf %751, %752 : vector<8x32xf32>
    %754 = vector.broadcast %735 : vector<1x32xf32> to vector<8x32xf32>
    %755 = arith.addf %753, %754 : vector<8x32xf32>
    %756 = vector.extract_strided_slice %446 {offsets = [8, 0, 0], sizes = [1, 1, 32], strides = [1, 1, 1]} : vector<9x1x32xf32> to vector<1x1x32xf32>
    %757 = vector.shape_cast %756 : vector<1x1x32xf32> to vector<1x32xf32>
    %758 = vector.extract_strided_slice %447 {offsets = [8, 0, 0], sizes = [1, 1, 32], strides = [1, 1, 1]} : vector<9x1x32xf32> to vector<1x1x32xf32>
    %759 = vector.shape_cast %758 : vector<1x1x32xf32> to vector<1x32xf32>
    %cst_310 = arith.constant dense<0.000000e+00> : vector<8xf32>
    %760 = vector.multi_reduction <add>, %461, %cst_310 [1] : vector<8x32xf32> to vector<8xf32>
    %761 = vector.shape_cast %760 : vector<8xf32> to vector<8x1xf32>
    %cst_311 = arith.constant 3.200000e+01 : f32
    %762 = vector.broadcast %cst_311 : f32 to vector<8x1xf32>
    %763 = arith.divf %761, %762 : vector<8x1xf32>
    %764 = vector.broadcast %763 : vector<8x1xf32> to vector<8x32xf32>
    %765 = arith.subf %461, %764 : vector<8x32xf32>
    %766 = arith.mulf %765, %765 : vector<8x32xf32>
    %cst_312 = arith.constant dense<0.000000e+00> : vector<8xf32>
    %767 = vector.multi_reduction <add>, %766, %cst_312 [1] : vector<8x32xf32> to vector<8xf32>
    %768 = vector.shape_cast %767 : vector<8xf32> to vector<8x1xf32>
    %cst_313 = arith.constant 3.200000e+01 : f32
    %769 = vector.broadcast %cst_313 : f32 to vector<8x1xf32>
    %770 = arith.divf %768, %769 : vector<8x1xf32>
    %cst_314 = arith.constant 9.99999997E-7 : f32
    %771 = vector.broadcast %cst_314 : f32 to vector<8x1xf32>
    %772 = arith.addf %770, %771 : vector<8x1xf32>
    %773 = math.rsqrt %772 : vector<8x1xf32>
    %774 = vector.broadcast %773 : vector<8x1xf32> to vector<8x32xf32>
    %775 = arith.mulf %765, %774 : vector<8x32xf32>
    %776 = vector.broadcast %757 : vector<1x32xf32> to vector<8x32xf32>
    %777 = arith.mulf %775, %776 : vector<8x32xf32>
    %778 = vector.broadcast %759 : vector<1x32xf32> to vector<8x32xf32>
    %779 = arith.addf %777, %778 : vector<8x32xf32>
    %780 = vector.extract_strided_slice %448 {offsets = [2, 0, 0], sizes = [1, 32, 32], strides = [1, 1, 1]} : vector<3x32x32xf32> to vector<1x32x32xf32>
    %781 = vector.shape_cast %780 : vector<1x32x32xf32> to vector<32x32xf32>
    %cst_315 = arith.constant dense<0.000000e+00> : vector<8x32xf32>
    %782 = tpu.matmul %731, %781, %cst_315 {dimension_numbers = #tpu.dot_dimension_numbers<[1], [0], [0], [1], [0, 0, 1, 1], [], []>} : vector<8x32xf32>, vector<32x32xf32>, vector<8x32xf32> -> vector<8x32xf32>
    %783 = vector.extract_strided_slice %449 {offsets = [2, 0, 0], sizes = [1, 1, 32], strides = [1, 1, 1]} : vector<3x1x32xf32> to vector<1x1x32xf32>
    %784 = vector.shape_cast %783 : vector<1x1x32xf32> to vector<1x32xf32>
    %785 = vector.broadcast %784 : vector<1x32xf32> to vector<8x32xf32>
    %786 = arith.addf %782, %785 : vector<8x32xf32>
    %787 = vector.extract_strided_slice %450 {offsets = [2, 0, 0], sizes = [1, 32, 32], strides = [1, 1, 1]} : vector<3x32x32xf32> to vector<1x32x32xf32>
    %788 = vector.shape_cast %787 : vector<1x32x32xf32> to vector<32x32xf32>
    %cst_316 = arith.constant dense<0.000000e+00> : vector<8x32xf32>
    %789 = tpu.matmul %755, %788, %cst_316 {dimension_numbers = #tpu.dot_dimension_numbers<[1], [0], [0], [1], [0, 0, 1, 1], [], []>} : vector<8x32xf32>, vector<32x32xf32>, vector<8x32xf32> -> vector<8x32xf32>
    %790 = vector.extract_strided_slice %451 {offsets = [2, 0, 0], sizes = [1, 1, 32], strides = [1, 1, 1]} : vector<3x1x32xf32> to vector<1x1x32xf32>
    %791 = vector.shape_cast %790 : vector<1x1x32xf32> to vector<1x32xf32>
    %792 = vector.broadcast %791 : vector<1x32xf32> to vector<8x32xf32>
    %793 = arith.addf %789, %792 : vector<8x32xf32>
    %794 = vector.extract_strided_slice %452 {offsets = [2, 0, 0], sizes = [1, 32, 32], strides = [1, 1, 1]} : vector<3x32x32xf32> to vector<1x32x32xf32>
    %795 = vector.shape_cast %794 : vector<1x32x32xf32> to vector<32x32xf32>
    %cst_317 = arith.constant dense<0.000000e+00> : vector<8x32xf32>
    %796 = tpu.matmul %779, %795, %cst_317 {dimension_numbers = #tpu.dot_dimension_numbers<[1], [0], [0], [1], [0, 0, 1, 1], [], []>} : vector<8x32xf32>, vector<32x32xf32>, vector<8x32xf32> -> vector<8x32xf32>
    %797 = vector.extract_strided_slice %453 {offsets = [2, 0, 0], sizes = [1, 1, 32], strides = [1, 1, 1]} : vector<3x1x32xf32> to vector<1x1x32xf32>
    %798 = vector.shape_cast %797 : vector<1x1x32xf32> to vector<1x32xf32>
    %799 = vector.broadcast %798 : vector<1x32xf32> to vector<8x32xf32>
    %800 = arith.addf %796, %799 : vector<8x32xf32>
    %cst_318 = arith.constant 5.000000e-01 : f32
    %801 = vector.broadcast %cst_318 : f32 to vector<8x32xf32>
    %802 = arith.mulf %786, %801 : vector<8x32xf32>
    %803 = vector.shape_cast %802 : vector<8x32xf32> to vector<1x8x32xf32>
    %804 = vector.broadcast %803 : vector<1x8x32xf32> to vector<8x8x32xf32>
    %805 = vector.broadcast %0 : vector<8x1x32xf32> to vector<8x8x32xf32>
    %806 = arith.mulf %804, %805 : vector<8x8x32xf32>
    %807 = vector.shape_cast %806 : vector<8x8x32xf32> to vector<64x32xf32>
    %cst_319 = arith.constant dense<0.000000e+00> : vector<64x8xf32>
    %808 = tpu.matmul %807, %793, %cst_319 {dimension_numbers = #tpu.dot_dimension_numbers<[1], [1], [0], [0], [0, 0, 1, 0], [], []>} : vector<64x32xf32>, vector<8x32xf32>, vector<64x8xf32> -> vector<64x8xf32>
    %cst_320 = arith.constant dense<0xFF800000> : vector<64xf32>
    %809 = vector.multi_reduction <maximumf>, %808, %cst_320 [1] : vector<64x8xf32> to vector<64xf32>
    %810 = vector.shape_cast %809 : vector<64xf32> to vector<64x1xf32>
    %811 = vector.broadcast %810 : vector<64x1xf32> to vector<64x8xf32>
    %812 = arith.subf %808, %811 : vector<64x8xf32>
    %813 = math.exp %812 : vector<64x8xf32>
    %cst_321 = arith.constant dense<0.000000e+00> : vector<64xf32>
    %814 = vector.multi_reduction <add>, %813, %cst_321 [1] : vector<64x8xf32> to vector<64xf32>
    %815 = vector.shape_cast %814 : vector<64xf32> to vector<64x1xf32>
    %816 = vector.broadcast %815 : vector<64x1xf32> to vector<64x8xf32>
    %817 = arith.divf %813, %816 : vector<64x8xf32>
    %cst_322 = arith.constant dense<0.000000e+00> : vector<64x32xf32>
    %818 = tpu.matmul %817, %800, %cst_322 {dimension_numbers = #tpu.dot_dimension_numbers<[1], [0], [0], [1], [0, 0, 1, 1], [], []>} : vector<64x8xf32>, vector<8x32xf32>, vector<64x32xf32> -> vector<64x32xf32>
    %819 = vector.shape_cast %818 : vector<64x32xf32> to vector<8x8x32xf32>
    %820 = vector.broadcast %0 : vector<8x1x32xf32> to vector<8x8x32xf32>
    %821 = arith.mulf %819, %820 : vector<8x8x32xf32>
    %cst_323 = arith.constant dense<0.000000e+00> : vector<8x32xf32>
    %822 = vector.multi_reduction <add>, %821, %cst_323 [0] : vector<8x8x32xf32> to vector<8x32xf32>
    %823 = vector.extract_strided_slice %454 {offsets = [2, 0, 0], sizes = [1, 32, 32], strides = [1, 1, 1]} : vector<3x32x32xf32> to vector<1x32x32xf32>
    %824 = vector.shape_cast %823 : vector<1x32x32xf32> to vector<32x32xf32>
    %cst_324 = arith.constant dense<0.000000e+00> : vector<8x32xf32>
    %825 = tpu.matmul %822, %824, %cst_324 {dimension_numbers = #tpu.dot_dimension_numbers<[1], [0], [0], [1], [0, 0, 1, 1], [], []>} : vector<8x32xf32>, vector<32x32xf32>, vector<8x32xf32> -> vector<8x32xf32>
    %826 = vector.extract_strided_slice %455 {offsets = [2, 0, 0], sizes = [1, 1, 32], strides = [1, 1, 1]} : vector<3x1x32xf32> to vector<1x1x32xf32>
    %827 = vector.shape_cast %826 : vector<1x1x32xf32> to vector<1x32xf32>
    %828 = vector.broadcast %827 : vector<1x32xf32> to vector<8x32xf32>
    %829 = arith.addf %825, %828 : vector<8x32xf32>
    %830 = arith.addf %461, %829 : vector<8x32xf32>
    %831 = vector.shape_cast %584 : vector<8x32xf32> to vector<1x8x32xf32>
    %832 = vector.shape_cast %707 : vector<8x32xf32> to vector<1x8x32xf32>
    %833 = vector.shape_cast %830 : vector<8x32xf32> to vector<1x8x32xf32>
    %834 = tpu.concatenate %831, %832, %833 in 0 : vector<1x8x32xf32>, vector<1x8x32xf32>, vector<1x8x32xf32> -> vector<3x8x32xf32>
    %c0_325 = arith.constant 0 : index
    %c0_326 = arith.constant 0 : index
    %c0_327 = arith.constant 0 : index
    %835 = vector.load %arg30[%c0_325, %c0_326, %c0_327] : memref<3x1x32xf32, #tpu.memory_space<vmem>>, vector<3x1x32xf32>
    %c0_328 = arith.constant 0 : index
    %c0_329 = arith.constant 0 : index
    %c0_330 = arith.constant 0 : index
    %836 = vector.load %arg31[%c0_328, %c0_329, %c0_330] : memref<3x1x32xf32, #tpu.memory_space<vmem>>, vector<3x1x32xf32>
    %cst_331 = arith.constant dense<0.000000e+00> : vector<3x8xf32>
    %837 = vector.multi_reduction <add>, %834, %cst_331 [2] : vector<3x8x32xf32> to vector<3x8xf32>
    %838 = vector.shape_cast %837 : vector<3x8xf32> to vector<3x8x1xf32>
    %cst_332 = arith.constant dense<0.000000e+00> : vector<8x1xf32>
    %839 = vector.multi_reduction <add>, %838, %cst_332 [0] : vector<3x8x1xf32> to vector<8x1xf32>
    %840 = vector.shape_cast %839 : vector<8x1xf32> to vector<1x8x1xf32>
    %cst_333 = arith.constant 9.600000e+01 : f32
    %841 = vector.broadcast %cst_333 : f32 to vector<1x8x1xf32>
    %842 = arith.divf %840, %841 : vector<1x8x1xf32>
    %843 = vector.broadcast %842 : vector<1x8x1xf32> to vector<3x8x32xf32>
    %844 = arith.subf %834, %843 : vector<3x8x32xf32>
    %845 = arith.mulf %844, %844 : vector<3x8x32xf32>
    %cst_334 = arith.constant dense<0.000000e+00> : vector<3x8xf32>
    %846 = vector.multi_reduction <add>, %845, %cst_334 [2] : vector<3x8x32xf32> to vector<3x8xf32>
    %847 = vector.shape_cast %846 : vector<3x8xf32> to vector<3x8x1xf32>
    %cst_335 = arith.constant dense<0.000000e+00> : vector<8x1xf32>
    %848 = vector.multi_reduction <add>, %847, %cst_335 [0] : vector<3x8x1xf32> to vector<8x1xf32>
    %849 = vector.shape_cast %848 : vector<8x1xf32> to vector<1x8x1xf32>
    %cst_336 = arith.constant 9.600000e+01 : f32
    %850 = vector.broadcast %cst_336 : f32 to vector<1x8x1xf32>
    %851 = arith.divf %849, %850 : vector<1x8x1xf32>
    %cst_337 = arith.constant 9.99999997E-7 : f32
    %852 = vector.broadcast %cst_337 : f32 to vector<1x8x1xf32>
    %853 = arith.addf %851, %852 : vector<1x8x1xf32>
    %854 = math.rsqrt %853 : vector<1x8x1xf32>
    %855 = vector.broadcast %854 : vector<1x8x1xf32> to vector<3x8x32xf32>
    %856 = arith.mulf %844, %855 : vector<3x8x32xf32>
    %857 = vector.broadcast %835 : vector<3x1x32xf32> to vector<3x8x32xf32>
    %858 = arith.mulf %856, %857 : vector<3x8x32xf32>
    %859 = vector.broadcast %836 : vector<3x1x32xf32> to vector<3x8x32xf32>
    %860 = arith.addf %858, %859 : vector<3x8x32xf32>
    %c0_338 = arith.constant 0 : index
    %c0_339 = arith.constant 0 : index
    %c0_340 = arith.constant 0 : index
    %861 = vector.load %arg32[%c0_338, %c0_339, %c0_340] : memref<3x32x64xf32, #tpu.memory_space<vmem>>, vector<3x32x64xf32>
    %c0_341 = arith.constant 0 : index
    %c0_342 = arith.constant 0 : index
    %862 = vector.load %arg33[%c0_341, %c0_342] : memref<1x64xf32, #tpu.memory_space<vmem>>, vector<1x64xf32>
    %c0_343 = arith.constant 0 : index
    %c0_344 = arith.constant 0 : index
    %c0_345 = arith.constant 0 : index
    %863 = vector.load %arg34[%c0_343, %c0_344, %c0_345] : memref<3x64x32xf32, #tpu.memory_space<vmem>>, vector<3x64x32xf32>
    %c0_346 = arith.constant 0 : index
    %c0_347 = arith.constant 0 : index
    %c0_348 = arith.constant 0 : index
    %864 = vector.load %arg35[%c0_346, %c0_347, %c0_348] : memref<3x1x32xf32, #tpu.memory_space<vmem>>, vector<3x1x32xf32>
    %865 = vector.extract_strided_slice %860 {offsets = [0, 0, 0], sizes = [1, 8, 32], strides = [1, 1, 1]} : vector<3x8x32xf32> to vector<1x8x32xf32>
    %866 = vector.shape_cast %865 : vector<1x8x32xf32> to vector<8x32xf32>
    %867 = vector.extract_strided_slice %861 {offsets = [0, 0, 0], sizes = [1, 32, 64], strides = [1, 1, 1]} : vector<3x32x64xf32> to vector<1x32x64xf32>
    %868 = vector.shape_cast %867 : vector<1x32x64xf32> to vector<32x64xf32>
    %cst_349 = arith.constant dense<0.000000e+00> : vector<8x64xf32>
    %869 = tpu.matmul %866, %868, %cst_349 {dimension_numbers = #tpu.dot_dimension_numbers<[1], [0], [0], [1], [0, 0, 1, 1], [], []>} : vector<8x32xf32>, vector<32x64xf32>, vector<8x64xf32> -> vector<8x64xf32>
    %870 = vector.extract_strided_slice %860 {offsets = [1, 0, 0], sizes = [1, 8, 32], strides = [1, 1, 1]} : vector<3x8x32xf32> to vector<1x8x32xf32>
    %871 = vector.shape_cast %870 : vector<1x8x32xf32> to vector<8x32xf32>
    %872 = vector.extract_strided_slice %861 {offsets = [1, 0, 0], sizes = [1, 32, 64], strides = [1, 1, 1]} : vector<3x32x64xf32> to vector<1x32x64xf32>
    %873 = vector.shape_cast %872 : vector<1x32x64xf32> to vector<32x64xf32>
    %cst_350 = arith.constant dense<0.000000e+00> : vector<8x64xf32>
    %874 = tpu.matmul %871, %873, %cst_350 {dimension_numbers = #tpu.dot_dimension_numbers<[1], [0], [0], [1], [0, 0, 1, 1], [], []>} : vector<8x32xf32>, vector<32x64xf32>, vector<8x64xf32> -> vector<8x64xf32>
    %875 = arith.addf %869, %874 : vector<8x64xf32>
    %876 = vector.extract_strided_slice %860 {offsets = [2, 0, 0], sizes = [1, 8, 32], strides = [1, 1, 1]} : vector<3x8x32xf32> to vector<1x8x32xf32>
    %877 = vector.shape_cast %876 : vector<1x8x32xf32> to vector<8x32xf32>
    %878 = vector.extract_strided_slice %861 {offsets = [2, 0, 0], sizes = [1, 32, 64], strides = [1, 1, 1]} : vector<3x32x64xf32> to vector<1x32x64xf32>
    %879 = vector.shape_cast %878 : vector<1x32x64xf32> to vector<32x64xf32>
    %cst_351 = arith.constant dense<0.000000e+00> : vector<8x64xf32>
    %880 = tpu.matmul %877, %879, %cst_351 {dimension_numbers = #tpu.dot_dimension_numbers<[1], [0], [0], [1], [0, 0, 1, 1], [], []>} : vector<8x32xf32>, vector<32x64xf32>, vector<8x64xf32> -> vector<8x64xf32>
    %881 = arith.addf %875, %880 : vector<8x64xf32>
    %882 = vector.broadcast %862 : vector<1x64xf32> to vector<8x64xf32>
    %883 = arith.addf %881, %882 : vector<8x64xf32>
    %cst_352 = arith.constant 5.000000e-01 : f32
    %884 = vector.broadcast %cst_352 : f32 to vector<8x64xf32>
    %885 = arith.mulf %884, %883 : vector<8x64xf32>
    %cst_353 = arith.constant 0.707106769 : f32
    %886 = vector.broadcast %cst_353 : f32 to vector<8x64xf32>
    %887 = arith.mulf %883, %886 : vector<8x64xf32>
    %888 = math.erf %887 : vector<8x64xf32>
    %cst_354 = arith.constant 1.000000e+00 : f32
    %889 = vector.broadcast %cst_354 : f32 to vector<8x64xf32>
    %890 = arith.addf %889, %888 : vector<8x64xf32>
    %891 = arith.mulf %885, %890 : vector<8x64xf32>
    %892 = vector.extract_strided_slice %863 {offsets = [0, 0, 0], sizes = [1, 64, 32], strides = [1, 1, 1]} : vector<3x64x32xf32> to vector<1x64x32xf32>
    %893 = vector.shape_cast %892 : vector<1x64x32xf32> to vector<64x32xf32>
    %cst_355 = arith.constant dense<0.000000e+00> : vector<8x32xf32>
    %894 = tpu.matmul %891, %893, %cst_355 {dimension_numbers = #tpu.dot_dimension_numbers<[1], [0], [0], [1], [0, 0, 1, 1], [], []>} : vector<8x64xf32>, vector<64x32xf32>, vector<8x32xf32> -> vector<8x32xf32>
    %895 = vector.extract_strided_slice %863 {offsets = [1, 0, 0], sizes = [1, 64, 32], strides = [1, 1, 1]} : vector<3x64x32xf32> to vector<1x64x32xf32>
    %896 = vector.shape_cast %895 : vector<1x64x32xf32> to vector<64x32xf32>
    %cst_356 = arith.constant dense<0.000000e+00> : vector<8x32xf32>
    %897 = tpu.matmul %891, %896, %cst_356 {dimension_numbers = #tpu.dot_dimension_numbers<[1], [0], [0], [1], [0, 0, 1, 1], [], []>} : vector<8x64xf32>, vector<64x32xf32>, vector<8x32xf32> -> vector<8x32xf32>
    %898 = vector.extract_strided_slice %863 {offsets = [2, 0, 0], sizes = [1, 64, 32], strides = [1, 1, 1]} : vector<3x64x32xf32> to vector<1x64x32xf32>
    %899 = vector.shape_cast %898 : vector<1x64x32xf32> to vector<64x32xf32>
    %cst_357 = arith.constant dense<0.000000e+00> : vector<8x32xf32>
    %900 = tpu.matmul %891, %899, %cst_357 {dimension_numbers = #tpu.dot_dimension_numbers<[1], [0], [0], [1], [0, 0, 1, 1], [], []>} : vector<8x64xf32>, vector<64x32xf32>, vector<8x32xf32> -> vector<8x32xf32>
    %901 = vector.shape_cast %894 : vector<8x32xf32> to vector<1x8x32xf32>
    %902 = vector.shape_cast %897 : vector<8x32xf32> to vector<1x8x32xf32>
    %903 = vector.shape_cast %900 : vector<8x32xf32> to vector<1x8x32xf32>
    %904 = tpu.concatenate %901, %902, %903 in 0 : vector<1x8x32xf32>, vector<1x8x32xf32>, vector<1x8x32xf32> -> vector<3x8x32xf32>
    %905 = vector.broadcast %864 : vector<3x1x32xf32> to vector<3x8x32xf32>
    %906 = arith.addf %904, %905 : vector<3x8x32xf32>
    %907 = arith.addf %834, %906 : vector<3x8x32xf32>
    %c0_358 = arith.constant 0 : index
    %c0_359 = arith.constant 0 : index
    %c0_360 = arith.constant 0 : index
    %c0_361 = arith.constant 0 : index
    %908 = vector.load %arg36[%c0_358, %c0_359, %c0_360, %c0_361] : memref<1x3x8x32xf32, #tpu.memory_space<vmem>>, vector<1x3x8x32xf32>
    %909 = vector.shape_cast %908 : vector<1x3x8x32xf32> to vector<3x8x32xf32>
    %910 = vector.shape_cast %907 : vector<3x8x32xf32> to vector<1x3x8x32xf32>
    tpu.vector_store %arg36[%c0_358, %c0_359, %c0_360, %c0_361], %910 {strides = array<i32>} : memref<1x3x8x32xf32, #tpu.memory_space<vmem>>, vector<1x3x8x32xf32>,
    return
  }
  func.func @transform_0(%arg0: i32) -> (i32, i32, i32, i32) {
    %c0_i32 = arith.constant 0 : i32
    %c0_i32_0 = arith.constant 0 : i32
    %c0_i32_1 = arith.constant 0 : i32
    %c0_i32_2 = arith.constant 0 : i32
    return %arg0, %c0_i32, %c0_i32_0, %c0_i32_1 : i32, i32, i32, i32
  }
  func.func @transform_1(%arg0: i32) -> (i32, i32, i32, i32) {
    %c0_i32 = arith.constant 0 : i32
    %c0_i32_0 = arith.constant 0 : i32
    %c0_i32_1 = arith.constant 0 : i32
    %c0_i32_2 = arith.constant 0 : i32
    %c0_i32_3 = arith.constant 0 : i32
    return %c0_i32, %c0_i32_0, %c0_i32_1, %c0_i32_2 : i32, i32, i32, i32
  }
  func.func @transform_2(%arg0: i32) -> (i32, i32, i32) {
    %c0_i32 = arith.constant 0 : i32
    %c0_i32_0 = arith.constant 0 : i32
    %c0_i32_1 = arith.constant 0 : i32
    %c0_i32_2 = arith.constant 0 : i32
    return %c0_i32, %c0_i32_0, %c0_i32_1 : i32, i32, i32
  }
  func.func @transform_3(%arg0: i32) -> (i32, i32, i32, i32) {
    %c0_i32 = arith.constant 0 : i32
    %c0_i32_0 = arith.constant 0 : i32
    %c0_i32_1 = arith.constant 0 : i32
    %c0_i32_2 = arith.constant 0 : i32
    %c0_i32_3 = arith.constant 0 : i32
    return %c0_i32, %c0_i32_0, %c0_i32_1, %c0_i32_2 : i32, i32, i32, i32
  }
  func.func @transform_4(%arg0: i32) -> (i32, i32, i32, i32) {
    %c0_i32 = arith.constant 0 : i32
    %c0_i32_0 = arith.constant 0 : i32
    %c0_i32_1 = arith.constant 0 : i32
    %c0_i32_2 = arith.constant 0 : i32
    %c0_i32_3 = arith.constant 0 : i32
    return %c0_i32, %c0_i32_0, %c0_i32_1, %c0_i32_2 : i32, i32, i32, i32
  }
  func.func @transform_5(%arg0: i32) -> (i32, i32, i32, i32) {
    %c0_i32 = arith.constant 0 : i32
    %c0_i32_0 = arith.constant 0 : i32
    %c0_i32_1 = arith.constant 0 : i32
    %c0_i32_2 = arith.constant 0 : i32
    %c0_i32_3 = arith.constant 0 : i32
    return %c0_i32, %c0_i32_0, %c0_i32_1, %c0_i32_2 : i32, i32, i32, i32
  }
  func.func @transform_6(%arg0: i32) -> (i32, i32, i32, i32) {
    %c0_i32 = arith.constant 0 : i32
    %c0_i32_0 = arith.constant 0 : i32
    %c0_i32_1 = arith.constant 0 : i32
    %c0_i32_2 = arith.constant 0 : i32
    %c0_i32_3 = arith.constant 0 : i32
    return %c0_i32, %c0_i32_0, %c0_i32_1, %c0_i32_2 : i32, i32, i32, i32
  }
  func.func @transform_7(%arg0: i32) -> (i32, i32, i32, i32) {
    %c0_i32 = arith.constant 0 : i32
    %c0_i32_0 = arith.constant 0 : i32
    %c0_i32_1 = arith.constant 0 : i32
    %c0_i32_2 = arith.constant 0 : i32
    %c0_i32_3 = arith.constant 0 : i32
    return %c0_i32, %c0_i32_0, %c0_i32_1, %c0_i32_2 : i32, i32, i32, i32
  }
  func.func @transform_8(%arg0: i32) -> (i32, i32, i32, i32) {
    %c0_i32 = arith.constant 0 : i32
    %c0_i32_0 = arith.constant 0 : i32
    %c0_i32_1 = arith.constant 0 : i32
    %c0_i32_2 = arith.constant 0 : i32
    %c0_i32_3 = arith.constant 0 : i32
    return %c0_i32, %c0_i32_0, %c0_i32_1, %c0_i32_2 : i32, i32, i32, i32
  }
  func.func @transform_9(%arg0: i32) -> (i32, i32, i32, i32) {
    %c0_i32 = arith.constant 0 : i32
    %c0_i32_0 = arith.constant 0 : i32
    %c0_i32_1 = arith.constant 0 : i32
    %c0_i32_2 = arith.constant 0 : i32
    %c0_i32_3 = arith.constant 0 : i32
    return %c0_i32, %c0_i32_0, %c0_i32_1, %c0_i32_2 : i32, i32, i32, i32
  }
  func.func @transform_10(%arg0: i32) -> (i32, i32, i32, i32) {
    %c0_i32 = arith.constant 0 : i32
    %c0_i32_0 = arith.constant 0 : i32
    %c0_i32_1 = arith.constant 0 : i32
    %c0_i32_2 = arith.constant 0 : i32
    %c0_i32_3 = arith.constant 0 : i32
    return %c0_i32, %c0_i32_0, %c0_i32_1, %c0_i32_2 : i32, i32, i32, i32
  }
  func.func @transform_11(%arg0: i32) -> (i32, i32, i32, i32) {
    %c0_i32 = arith.constant 0 : i32
    %c0_i32_0 = arith.constant 0 : i32
    %c0_i32_1 = arith.constant 0 : i32
    %c0_i32_2 = arith.constant 0 : i32
    %c0_i32_3 = arith.constant 0 : i32
    return %c0_i32, %c0_i32_0, %c0_i32_1, %c0_i32_2 : i32, i32, i32, i32
  }
  func.func @transform_12(%arg0: i32) -> (i32, i32, i32, i32) {
    %c0_i32 = arith.constant 0 : i32
    %c0_i32_0 = arith.constant 0 : i32
    %c0_i32_1 = arith.constant 0 : i32
    %c0_i32_2 = arith.constant 0 : i32
    %c0_i32_3 = arith.constant 0 : i32
    return %c0_i32, %c0_i32_0, %c0_i32_1, %c0_i32_2 : i32, i32, i32, i32
  }
  func.func @transform_13(%arg0: i32) -> (i32, i32, i32, i32) {
    %c0_i32 = arith.constant 0 : i32
    %c0_i32_0 = arith.constant 0 : i32
    %c0_i32_1 = arith.constant 0 : i32
    %c0_i32_2 = arith.constant 0 : i32
    %c0_i32_3 = arith.constant 0 : i32
    return %c0_i32, %c0_i32_0, %c0_i32_1, %c0_i32_2 : i32, i32, i32, i32
  }
  func.func @transform_14(%arg0: i32) -> (i32, i32, i32, i32) {
    %c0_i32 = arith.constant 0 : i32
    %c0_i32_0 = arith.constant 0 : i32
    %c0_i32_1 = arith.constant 0 : i32
    %c0_i32_2 = arith.constant 0 : i32
    %c0_i32_3 = arith.constant 0 : i32
    return %c0_i32, %c0_i32_0, %c0_i32_1, %c0_i32_2 : i32, i32, i32, i32
  }
  func.func @transform_15(%arg0: i32) -> (i32, i32, i32, i32) {
    %c0_i32 = arith.constant 0 : i32
    %c0_i32_0 = arith.constant 0 : i32
    %c0_i32_1 = arith.constant 0 : i32
    %c0_i32_2 = arith.constant 0 : i32
    %c0_i32_3 = arith.constant 0 : i32
    return %c0_i32, %c0_i32_0, %c0_i32_1, %c0_i32_2 : i32, i32, i32, i32
  }
  func.func @transform_16(%arg0: i32) -> (i32, i32, i32) {
    %c0_i32 = arith.constant 0 : i32
    %c0_i32_0 = arith.constant 0 : i32
    %c0_i32_1 = arith.constant 0 : i32
    %c0_i32_2 = arith.constant 0 : i32
    return %c0_i32, %c0_i32_0, %c0_i32_1 : i32, i32, i32
  }
  func.func @transform_17(%arg0: i32) -> (i32, i32, i32, i32) {
    %c0_i32 = arith.constant 0 : i32
    %c0_i32_0 = arith.constant 0 : i32
    %c0_i32_1 = arith.constant 0 : i32
    %c0_i32_2 = arith.constant 0 : i32
    %c0_i32_3 = arith.constant 0 : i32
    return %c0_i32, %c0_i32_0, %c0_i32_1, %c0_i32_2 : i32, i32, i32, i32
  }
  func.func @transform_18(%arg0: i32) -> (i32, i32, i32, i32) {
    %c0_i32 = arith.constant 0 : i32
    %c0_i32_0 = arith.constant 0 : i32
    %c0_i32_1 = arith.constant 0 : i32
    %c0_i32_2 = arith.constant 0 : i32
    %c0_i32_3 = arith.constant 0 : i32
    return %c0_i32, %c0_i32_0, %c0_i32_1, %c0_i32_2 : i32, i32, i32, i32
  }
  func.func @transform_19(%arg0: i32) -> (i32, i32, i32) {
    %c0_i32 = arith.constant 0 : i32
    %c0_i32_0 = arith.constant 0 : i32
    %c0_i32_1 = arith.constant 0 : i32
    %c0_i32_2 = arith.constant 0 : i32
    return %c0_i32, %c0_i32_0, %c0_i32_1 : i32, i32, i32
  }
  func.func @transform_20(%arg0: i32) -> (i32, i32, i32) {
    %c0_i32 = arith.constant 0 : i32
    %c0_i32_0 = arith.constant 0 : i32
    %c0_i32_1 = arith.constant 0 : i32
    %c0_i32_2 = arith.constant 0 : i32
    return %c0_i32, %c0_i32_0, %c0_i32_1 : i32, i32, i32
  }
  func.func @transform_21(%arg0: i32) -> (i32, i32, i32) {
    %c0_i32 = arith.constant 0 : i32
    %c0_i32_0 = arith.constant 0 : i32
    %c0_i32_1 = arith.constant 0 : i32
    %c0_i32_2 = arith.constant 0 : i32
    return %c0_i32, %c0_i32_0, %c0_i32_1 : i32, i32, i32
  }
  func.func @transform_22(%arg0: i32) -> (i32, i32, i32) {
    %c0_i32 = arith.constant 0 : i32
    %c0_i32_0 = arith.constant 0 : i32
    %c0_i32_1 = arith.constant 0 : i32
    %c0_i32_2 = arith.constant 0 : i32
    return %c0_i32, %c0_i32_0, %c0_i32_1 : i32, i32, i32
  }
  func.func @transform_23(%arg0: i32) -> (i32, i32, i32) {
    %c0_i32 = arith.constant 0 : i32
    %c0_i32_0 = arith.constant 0 : i32
    %c0_i32_1 = arith.constant 0 : i32
    %c0_i32_2 = arith.constant 0 : i32
    return %c0_i32, %c0_i32_0, %c0_i32_1 : i32, i32, i32
  }
  func.func @transform_24(%arg0: i32) -> (i32, i32, i32) {
    %c0_i32 = arith.constant 0 : i32
    %c0_i32_0 = arith.constant 0 : i32
    %c0_i32_1 = arith.constant 0 : i32
    %c0_i32_2 = arith.constant 0 : i32
    return %c0_i32, %c0_i32_0, %c0_i32_1 : i32, i32, i32
  }
  func.func @transform_25(%arg0: i32) -> (i32, i32, i32) {
    %c0_i32 = arith.constant 0 : i32
    %c0_i32_0 = arith.constant 0 : i32
    %c0_i32_1 = arith.constant 0 : i32
    %c0_i32_2 = arith.constant 0 : i32
    return %c0_i32, %c0_i32_0, %c0_i32_1 : i32, i32, i32
  }
  func.func @transform_26(%arg0: i32) -> (i32, i32, i32) {
    %c0_i32 = arith.constant 0 : i32
    %c0_i32_0 = arith.constant 0 : i32
    %c0_i32_1 = arith.constant 0 : i32
    %c0_i32_2 = arith.constant 0 : i32
    return %c0_i32, %c0_i32_0, %c0_i32_1 : i32, i32, i32
  }
  func.func @transform_27(%arg0: i32) -> (i32, i32, i32) {
    %c0_i32 = arith.constant 0 : i32
    %c0_i32_0 = arith.constant 0 : i32
    %c0_i32_1 = arith.constant 0 : i32
    %c0_i32_2 = arith.constant 0 : i32
    return %c0_i32, %c0_i32_0, %c0_i32_1 : i32, i32, i32
  }
  func.func @transform_28(%arg0: i32) -> (i32, i32, i32) {
    %c0_i32 = arith.constant 0 : i32
    %c0_i32_0 = arith.constant 0 : i32
    %c0_i32_1 = arith.constant 0 : i32
    %c0_i32_2 = arith.constant 0 : i32
    return %c0_i32, %c0_i32_0, %c0_i32_1 : i32, i32, i32
  }
  func.func @transform_29(%arg0: i32) -> (i32, i32, i32) {
    %c0_i32 = arith.constant 0 : i32
    %c0_i32_0 = arith.constant 0 : i32
    %c0_i32_1 = arith.constant 0 : i32
    %c0_i32_2 = arith.constant 0 : i32
    return %c0_i32, %c0_i32_0, %c0_i32_1 : i32, i32, i32
  }
  func.func @transform_30(%arg0: i32) -> (i32, i32, i32) {
    %c0_i32 = arith.constant 0 : i32
    %c0_i32_0 = arith.constant 0 : i32
    %c0_i32_1 = arith.constant 0 : i32
    %c0_i32_2 = arith.constant 0 : i32
    return %c0_i32, %c0_i32_0, %c0_i32_1 : i32, i32, i32
  }
  func.func @transform_31(%arg0: i32) -> (i32, i32, i32) {
    %c0_i32 = arith.constant 0 : i32
    %c0_i32_0 = arith.constant 0 : i32
    %c0_i32_1 = arith.constant 0 : i32
    %c0_i32_2 = arith.constant 0 : i32
    return %c0_i32, %c0_i32_0, %c0_i32_1 : i32, i32, i32
  }
  func.func @transform_32(%arg0: i32) -> (i32, i32) {
    %c0_i32 = arith.constant 0 : i32
    %c0_i32_0 = arith.constant 0 : i32
    %c0_i32_1 = arith.constant 0 : i32
    return %c0_i32, %c0_i32_0 : i32, i32
  }
  func.func @transform_33(%arg0: i32) -> (i32, i32, i32) {
    %c0_i32 = arith.constant 0 : i32
    %c0_i32_0 = arith.constant 0 : i32
    %c0_i32_1 = arith.constant 0 : i32
    %c0_i32_2 = arith.constant 0 : i32
    return %c0_i32, %c0_i32_0, %c0_i32_1 : i32, i32, i32
  }
  func.func @transform_34(%arg0: i32) -> (i32, i32, i32) {
    %c0_i32 = arith.constant 0 : i32
    %c0_i32_0 = arith.constant 0 : i32
    %c0_i32_1 = arith.constant 0 : i32
    %c0_i32_2 = arith.constant 0 : i32
    return %c0_i32, %c0_i32_0, %c0_i32_1 : i32, i32, i32
  }
  func.func @transform_35(%arg0: i32) -> (i32, i32, i32, i32) {
    %c0_i32 = arith.constant 0 : i32
    %c0_i32_0 = arith.constant 0 : i32
    %c0_i32_1 = arith.constant 0 : i32
    %c0_i32_2 = arith.constant 0 : i32
    return %arg0, %c0_i32, %c0_i32_0, %c0_i32_1 : i32, i32, i32, i32
  }
}

</mosaic_0001>

<bundles_post_ra>
// kernel: transformer_forward.1
= control target key start
LH: loop header
LB: loop body
LE: loop exit
PB: predicated region body
PF: predicated region fallthrough
CT: control target
= control target key end

     0   :  { %s13934_s6 = smov 1   ;;  %s13935_s10 = smov 2   ;;  %s16322_s0 = inlined_call_operand.smem [shape: u32[36], index: -1, kind: input, shape index: {}] }
   0x1   :  { %s14007_s5 = sld [smem:[%s16322_s0]]   ;;  %s13936_s14 = smov 3  }
   0x2   :  { %s14012_s9 = sld [smem:[%s16322_s0 + %s13934_s6]]   ;;  %s13937_s18 = smov 4  }
   0x3   :  { %s14017_s13 = sld [smem:[%s16322_s0 + %s13935_s10]]   ;;  %s13938_s22 = smov 5  }
   0x4   :  { %s14022_s17 = sld [smem:[%s16322_s0 + %s13936_s14]]   ;;  %s13939_s26 = smov 6  }
   0x5   :  { %s14027_s21 = sld [smem:[%s16322_s0 + %s13937_s18]]   ;;  %s13940_s30 = smov 7  }
   0x6   :  { %s14032_s25 = sld [smem:[%s16322_s0 + %s13938_s22]]   ;;  %s13941_s4 = smov 8  }
   0x7   :  { %16356 = sst [smem:[#allocation49_spill]] %s14007_s5  ;;  %s13942_s10 = smov 9  }
   0x8   :  { %16357 = sst [smem:[#allocation50_spill]] %s14012_s9  ;;  %s13943_s15 = smov 10  }
   0x9   :  { %16358 = sst [smem:[#allocation51_spill]] %s14017_s13  ;;  %s13944_s20 = smov 11  }
   0xa   :  { %s14037_s29 = sld [smem:[%s16322_s0 + %s13939_s26]]   ;;  %s13945_s26 = smov 12  }
   0xb   :  { %s14042_s3 = sld [smem:[%s16322_s0 + %s13940_s30]]   ;;  %s13946_s1 = smov 13  }
   0xc   :  { %16359 = sst [smem:[#allocation52_spill]] %s14032_s25  ;;  %s13947_s7 = smov 14  }
   0xd   :  { %s14047_s8 = sld [smem:[%s16322_s0 + %s13941_s4]]   ;;  %s13949_s22 = smov 16  }
   0xe   :  { %s14052_s14 = sld [smem:[%s16322_s0 + %s13942_s10]]   ;;  %s13950_s28 = smov 17  }
   0xf   :  { %s14057_s19 = sld [smem:[%s16322_s0 + %s13943_s15]]   ;;  %s13948_s15 = smov 15  }
  0x10   :  { %s14062_s24 = sld [smem:[%s16322_s0 + %s13944_s20]]  }
  0x11   :  { %16360 = sst [smem:[#allocation53_spill]] %s14042_s3 }
  0x12   :  { %s14067_s30 = sld [smem:[%s16322_s0 + %s13945_s26]]  }
  0x13   :  { %16361 = sst [smem:[#allocation54_spill]] %s14047_s8 }
  0x14   :  { %16362 = sst [smem:[#allocation55_spill]] %s14052_s14 }
  0x15   :  { %s14072_s6 = sld [smem:[%s16322_s0 + %s13946_s1]]  }
  0x16   :  { %16363 = sst [smem:[#allocation56_spill]] %s14062_s24 }
  0x17   :  { %s14077_s12 = sld [smem:[%s16322_s0 + %s13947_s7]]   ;;  %s13951_s7 = smov 18  }
  0x18   :  { %s14082_s20 = sld [smem:[%s16322_s0 + %s13948_s15]]   ;;  %s13952_s15 = smov 19  }
  0x19   :  { %s14087_s27 = sld [smem:[%s16322_s0 + %s13949_s22]]   ;;  %s13953_s22 = smov 20  }
  0x1a   :  { %s14092_s4 = sld [smem:[%s16322_s0 + %s13950_s28]]   ;;  %s13954_s28 = smov 21  }
  0x1b   :  { %16364 = sst [smem:[#allocation57_spill]] %s14072_s6 }
  0x1c   :  { %s14097_s24 = sld [smem:[%s16322_s0 + %s13951_s7]]   ;;  %s13955_s7 = smov 22  }
  0x1d   :  { %16365 = sst [smem:[#allocation58_spill]] %s14077_s12 }
  0x1e   :  { %16366 = sst [smem:[#allocation59_spill]] %s14082_s20 }
  0x1f   :  { %16367 = sst [smem:[#allocation60_spill]] %s14087_s27 }
  0x20   :  { %16368 = sst [smem:[#allocation61_spill]] %s14092_s4 }
  0x21   :  { %s14102_s20 = sld [smem:[%s16322_s0 + %s13952_s15]]   ;;  %s13956_s15 = smov 23  }
  0x22   :  { %s14107_s13 = sld [smem:[%s16322_s0 + %s13953_s22]]   ;;  %s13957_s22 = smov 24  }
  0x23   :  { %s14112_s4 = sld [smem:[%s16322_s0 + %s13954_s28]]   ;;  %s13958_s28 = smov 25  }
  0x24   :  { %s14117_s14 = sld [smem:[%s16322_s0 + %s13955_s7]]   ;;  %s13959_s7 = smov 26  }
  0x25   :  { %s14122_s3 = sld [smem:[%s16322_s0 + %s13956_s15]]   ;;  %s13960_s15 = smov 27  }
  0x26   :  { %s14127_s25 = sld [smem:[%s16322_s0 + %s13957_s22]]   ;;  %s13961_s22 = smov 28  }
  0x27   :  { %16369 = sst [smem:[#allocation62_spill]] %s14102_s20 }
  0x28   :  { %s14137_s9 = sld [smem:[%s16322_s0 + %s13959_s7]]   ;;  %s13963_s7 = smov 30  }
  0x29   :  { %16370 = sst [smem:[#allocation63_spill]] %s14112_s4 }
  0x2a   :  { %16371 = sst [smem:[#allocation64_spill]] %s14117_s14 }
  0x2b   :  { %16372 = sst [smem:[#allocation65_spill]] %s14122_s3 }
  0x2c   :  { %s14132_s4 = sld [smem:[%s16322_s0 + %s13958_s28]]   ;;  %s13962_s28 = smov 29  }
  0x2d   :  { %s14142_s3 = sld [smem:[%s16322_s0 + %s13960_s15]]   ;;  %s13964_s15 = smov 31  }
  0x2e   :  { %16374 = sst [smem:[#allocation67_spill]] %s14137_s9 }
  0x2f   :  { %s14147_s5 = sld [smem:[%s16322_s0 + %s13961_s22]]   ;;  %s13965_s22 = smov 32  }
  0x30   :  { %s14157_s14 = sld [smem:[%s16322_s0 + %s13963_s7]]   ;;  %s13967_s7 = smov 34  }
  0x31   :  { %s14167_s20 = sld [smem:[%s16322_s0 + %s13965_s22]]  }
  0x32   :  { %16373 = sst [smem:[#allocation66_spill]] %s14132_s4 }
  0x33   :  { %16375 = sst [smem:[#allocation68_spill]] %s14142_s3 }
  0x34   :  { %s14152_s4 = sld [smem:[%s16322_s0 + %s13962_s28]]   ;;  %s13966_s28 = smov 33  }
  0x35   :  { %16376 = sst [smem:[#allocation69_spill]] %s14147_s5 }
  0x36   :  { %s14162_s3 = sld [smem:[%s16322_s0 + %s13964_s15]]   ;;  %s13968_s15 = smov 35  }
  0x37   :  { %s14177_s27 = sld [smem:[%s16322_s0 + %s13967_s7]]  }
  0x3a   :  { %16377 = sst [smem:[#allocation70_spill]] %s14152_s4 }
  0x3b   :  { %s14172_s4 = sld [smem:[%s16322_s0 + %s13966_s28]]  }
  0x3c   :  { %16378 = sst [smem:[#allocation71_spill]] %s14162_s3 }
  0x3d   :  { %s14182_s3 = sld [smem:[%s16322_s0 + %s13968_s15]]  }
  0x3e   :  { %76 = vsyncpa [#allocation3], 0 }
  0x3f   :  { %77 = vsyncpa [#allocation5], 0 }
  0x40   :  { %78 = vsyncpa [#allocation8], 0 }
  0x41   :  { %79 = vsyncpa [#allocation11], 0 }
  0x42   :  { %80 = vsyncpa [#allocation14], 0 }
  0x43   :  { %81 = vsyncpa [#allocation17], 0 }
  0x44   :  { %82 = vsyncpa [#allocation20], 0 }
  0x45   :  { %83 = vsyncpa [#allocation23], 0 }
  0x46   :  { %84 = vsyncpa [#allocation26], 0 }
  0x47   :  { %85 = vsyncpa [#allocation29], 0 }
  0x48   :  { %86 = vsyncpa [#allocation32], 0 }
  0x49   :  { %87 = vsyncpa [#allocation35], 0  ;;  %s14184_s22 = smov 0  }
  0x4a LB: > { %s16379_s12 = sld [smem:[#allocation58_spill]]  ;;  %s16380_s9 = sld [smem:[#allocation67_spill]]  ;;  %s13932_s22 = sphi %s14184_s22, %s93_s22  }
  0x4b   : > { %s16381_s6 = sld [smem:[#allocation57_spill]]  ;;  %s16382_s5 = sld [smem:[#allocation69_spill]] }
  0x4c   : > { %s16383_s8 = sld [smem:[#allocation54_spill]]  ;;  %s14190_s0 = sadd.s32 4294967295, %s13932_s22  }
  0x4d   : > { %p10384_p0 = scmp.ge.s32.totalorder %s13932_s22, 1  ;;  %p864_p1 = scmp.lt.s32.totalorder %s13932_s22, 3 }
  0x4e   : > { %p16340_p2 = scmp.eq.s32.totalorder %s14190_s0, 0  ;;  %s13969_s26 = smov [#allocation4]  }
  0x4f   : > { %p14195_p3 = pnand %p10384_p0, %p864_p1  ;;  %s895_s28 = sshll.u32 %s13969_s26, 4  ;;  %s14199_s28 = int_to_ptr.vmem [resolvable:$true] %s895_s28 }
  0x50   : > { %s13970_s1 = smov [#allocation7]   ;;  %s13971_s10 = smov [#allocation10]  }
  0x51   : > { %s16384_s23 = scalar_select %p14195_p3, 1, 0 }
  0x52   : > { %p12691_p4 = pneg %p14195_p3  ;;  %s927_s2 = sshll.u32 %s13970_s1, 4  ;;  %s14203_s2 = int_to_ptr.vmem [resolvable:$true] %s927_s2 }
  0x53   : > { %s959_s11 = sshll.u32 %s13971_s10, 4  ;;  %s13972_s15 = smov [#allocation13]   ;;  %s14211_s11 = int_to_ptr.vmem [resolvable:$true] %s959_s11 }
  0x54   : > { %p14207_p5 = pnand %p16340_p2, %p12691_p4  ;;  %s14213_s16 = sshll.u32 %s13972_s15, 4  ;;  %s986_s16 = int_to_ptr.vmem [resolvable:$true] %s14213_s16 }
  0x55   : > { %s13234_s18 = scalar_lea.hbm %s14027_s21, 96 }
  0x56   : > { %p13235_p6 = scmp.ne.s32.totalorder %s14027_s21, %s13234_s18  ;;  %p14219_p7 = pneg %p14207_p5 }
  0x57   : > { %p13241_p10 = scmp.lt.u32.totalorder %s13234_s18, %s14027_s21 }
  0x58   : > { %p13237_p8 = pnand %p14219_p7, %p13235_p6 }
  0x5a   : > { %p13238_p9 = pneg %p13237_p8 }
  0x5c   : > { %p13243_p11 = pnand %p13241_p10, %p13238_p9 }
  0x5e   : > { %13246 = shalt.err (!%p13243_p11)
}
  0x5f   : > { %s13247_s1 = scalar_lea.vmem %s14199_s28, 96  ;;  %p13255_p1 = scmp.lt.s32.totalorder %s14199_s28, %s14199_s28 }
  0x60   : > { %p13248_p12 = scmp.ne.s32.totalorder %s14199_s28, %s13247_s1  ;;  %p13256_p4 = scmp.lt.s32.totalorder %s13247_s1, %s13247_s1 }
  0x62   : > { %p13250_p13 = pnand %p13248_p12, %p14219_p7  ;;  %p13257_p2 = por %p13256_p4, %p13255_p1 }
  0x64   : > { %p13251_p0 = pneg %p13250_p13 }
  0x66   : > { %p13258_p3 = pnand %p13257_p2, %p13251_p0 }
  0x68   : > { %13261 = shalt.err (!%p13258_p3)
}
  0x69   : > { %s16346_s10 = smov 16   ;;  %s16348_s15 = smov 1  }
  0x6a   : > { %12697 = dma.hbm_to_vmem [thread:$0]  (!%p14207_p5), %s14027_s21, 96, %s14199_s28, [#allocation5], %s16346_s10, %s16346_s10, %s16348_s15  }
  0x6b   : > { %s13262_s18 = scalar_lea.hbm %s16383_s8, 96 }
  0x6c   : > { %p13263_p6 = scmp.ne.s32.totalorder %s16383_s8, %s13262_s18  ;;  %p13269_p3 = scmp.lt.u32.totalorder %s13262_s18, %s16383_s8 }
  0x6e   : > { %p13265_p8 = pnand %p13263_p6, %p14219_p7 }
  0x70   : > { %p13266_p2 = pneg %p13265_p8 }
  0x72   : > { %p13271_p9 = pnand %p13269_p3, %p13266_p2 }
  0x74   : > { %13274 = shalt.err (!%p13271_p9)
}
  0x75   : > { %s13275_s1 = scalar_lea.vmem %s14203_s2, 96  ;;  %p13283_p13 = scmp.lt.s32.totalorder %s14203_s2, %s14203_s2 }
  0x76   : > { %p13276_p10 = scmp.ne.s32.totalorder %s14203_s2, %s13275_s1  ;;  %p13284_p0 = scmp.lt.s32.totalorder %s13275_s1, %s13275_s1 }
  0x78   : > { %p13278_p11 = pnand %p13276_p10, %p14219_p7  ;;  %p13285_p1 = por %p13284_p0, %p13283_p13 }
  0x7a   : > { %p13279_p12 = pneg %p13278_p11 }
  0x7c   : > { %p13286_p4 = pnand %p13285_p1, %p13279_p12 }
  0x7e   : > { %13289 = shalt.err (!%p13286_p4)
}
  0x7f   : > { %12703 = dma.hbm_to_vmem [thread:$0]  (!%p14207_p5), %s16383_s8, 96, %s14203_s2, [#allocation8], %s16346_s10, %s16346_s10, %s16348_s15  }
  0x80   : > { %s13290_s28 = scalar_lea.hbm %s14067_s30, 96 }
  0x81   : > { %p13291_p6 = scmp.ne.s32.totalorder %s14067_s30, %s13290_s28  ;;  %p13297_p3 = scmp.lt.u32.totalorder %s13290_s28, %s14067_s30 }
  0x83   : > { %p13293_p8 = pnand %p13291_p6, %p14219_p7 }
  0x85   : > { %p13294_p2 = pneg %p13293_p8 }
  0x87   : > { %p13299_p9 = pnand %p13297_p3, %p13294_p2 }
  0x89   : > { %13302 = shalt.err (!%p13299_p9)
}
  0x8a   : > { %s13303_s18 = scalar_lea.vmem %s14211_s11, 96  ;;  %p13311_p13 = scmp.lt.s32.totalorder %s14211_s11, %s14211_s11 }
  0x8b   : > { %p13304_p10 = scmp.ne.s32.totalorder %s14211_s11, %s13303_s18  ;;  %p13312_p0 = scmp.lt.s32.totalorder %s13303_s18, %s13303_s18 }
  0x8d   : > { %p13306_p11 = pnand %p13304_p10, %p14219_p7  ;;  %p13313_p1 = por %p13312_p0, %p13311_p13 }
  0x8f   : > { %p13307_p12 = pneg %p13306_p11 }
  0x91   : > { %p13314_p4 = pnand %p13313_p1, %p13307_p12 }
  0x93   : > { %13317 = shalt.err (!%p13314_p4)
}
  0x94   : > { %12709 = dma.hbm_to_vmem [thread:$0]  (!%p14207_p5), %s14067_s30, 96, %s14211_s11, [#allocation11], %s16346_s10, %s16346_s10, %s16348_s15  }
  0x95   : > { %s13318_s2 = scalar_lea.hbm %s16379_s12, 96 }
  0x96   : > { %p13319_p6 = scmp.ne.s32.totalorder %s16379_s12, %s13318_s2  ;;  %p13325_p3 = scmp.lt.u32.totalorder %s13318_s2, %s16379_s12 }
  0x98   : > { %p13321_p8 = pnand %p13319_p6, %p14219_p7 }
  0x9a   : > { %p13322_p2 = pneg %p13321_p8 }
  0x9c   : > { %p13327_p9 = pnand %p13325_p3, %p13322_p2 }
  0x9e   : > { %13330 = shalt.err (!%p13327_p9)
}
  0x9f   : > { %s13331_s1 = scalar_lea.vmem %s986_s16, 96  ;;  %p13339_p13 = scmp.lt.s32.totalorder %s986_s16, %s986_s16 }
  0xa0   : > { %p13332_p10 = scmp.ne.s32.totalorder %s986_s16, %s13331_s1  ;;  %p13340_p0 = scmp.lt.s32.totalorder %s13331_s1, %s13331_s1 }
  0xa2   : > { %p13334_p11 = pnand %p13332_p10, %p14219_p7  ;;  %p13341_p1 = por %p13340_p0, %p13339_p13 }
  0xa4   : > { %p13335_p12 = pneg %p13334_p11 }
  0xa6   : > { %p13342_p4 = pnand %p13341_p1, %p13335_p12 }
  0xa8   : > { %13345 = shalt.err (!%p13342_p4)
}
  0xa9   : > { %12715 = dma.hbm_to_vmem [thread:$0]  (!%p14207_p5), %s16379_s12, 96, %s986_s16, [#allocation14], %s16346_s10, %s16346_s10, %s16348_s15  }
  0xaa   : > { %s13975_s11 = smov [#allocation16]   ;;  %s13976_s18 = smov [#allocation19]  }
  0xab   : > { %s1017_s28 = sshll.u32 %s13975_s11, 4  ;;  %s1043_s2 = sshll.u32 %s13976_s18, 4  ;;  %s1018_s28 = int_to_ptr.vmem [resolvable:$true] %s1017_s28  ;;  %s1044_s2 = int_to_ptr.vmem [resolvable:$true] %s1043_s2 }
  0xac   : > { %s13346_s1 = scalar_lea.hbm %s14097_s24, 96 }
  0xad   : > { %p13347_p6 = scmp.ne.s32.totalorder %s14097_s24, %s13346_s1  ;;  %p13353_p3 = scmp.lt.u32.totalorder %s13346_s1, %s14097_s24 }
  0xaf   : > { %p13349_p8 = pnand %p13347_p6, %p14219_p7 }
  0xb1   : > { %p13350_p2 = pneg %p13349_p8 }
  0xb3   : > { %p13355_p9 = pnand %p13353_p3, %p13350_p2 }
  0xb5   : > { %13358 = shalt.err (!%p13355_p9)
}
  0xb6   : > { %s13359_s8 = scalar_lea.vmem %s1018_s28, 96  ;;  %p13367_p13 = scmp.lt.s32.totalorder %s1018_s28, %s1018_s28 }
  0xb7   : > { %p13360_p10 = scmp.ne.s32.totalorder %s1018_s28, %s13359_s8  ;;  %p13368_p0 = scmp.lt.s32.totalorder %s13359_s8, %s13359_s8 }
  0xb9   : > { %p13362_p11 = pnand %p13360_p10, %p14219_p7  ;;  %p13369_p1 = por %p13368_p0, %p13367_p13 }
  0xbb   : > { %p13363_p12 = pneg %p13362_p11 }
  0xbd   : > { %p13370_p4 = pnand %p13369_p1, %p13363_p12 }
  0xbf   : > { %13373 = shalt.err (!%p13370_p4)
}
  0xc0   : > { %12721 = dma.hbm_to_vmem [thread:$0]  (!%p14207_p5), %s14097_s24, 96, %s1018_s28, [#allocation17], %s16346_s10, %s16346_s10, %s16348_s15  }
  0xc1   : > { %s13374_s16 = scalar_lea.hbm %s14107_s13, 144 }
  0xc2   : > { %p13375_p6 = scmp.ne.s32.totalorder %s14107_s13, %s13374_s16  ;;  %p13381_p3 = scmp.lt.u32.totalorder %s13374_s16, %s14107_s13 }
  0xc4   : > { %p13377_p8 = pnand %p13375_p6, %p14219_p7 }
  0xc6   : > { %p13378_p2 = pneg %p13377_p8 }
  0xc8   : > { %p13383_p9 = pnand %p13381_p3, %p13378_p2 }
  0xca   : > { %13386 = shalt.err (!%p13383_p9)
}
  0xcb   : > { %s13387_s8 = scalar_lea.vmem %s1044_s2, 144  ;;  %s13394_s11 = scalar_lea.vmem %s1044_s2, 160 }
  0xcc   : > { %p13388_p10 = scmp.ne.s32.totalorder %s1044_s2, %s13387_s8  ;;  %p13395_p13 = scmp.lt.s32.totalorder %s1044_s2, %s1044_s2 }
  0xcd   : > { %p13396_p0 = scmp.lt.s32.totalorder %s13394_s11, %s13387_s8 }
  0xce   : > { %p13390_p11 = pnand %p13388_p10, %p14219_p7 }
  0xcf   : > { %p13397_p1 = por %p13396_p0, %p13395_p13 }
  0xd0   : > { %p13391_p12 = pneg %p13390_p11 }
  0xd2   : > { %p13398_p4 = pnand %p13397_p1, %p13391_p12 }
  0xd4   : > { %13401 = shalt.err (!%p13398_p4)
}
  0xd5   : > { %12727 = dma.hbm_to_vmem [thread:$0]  (!%p14207_p5), %s14107_s13, 144, %s1044_s2, [#allocation20], %s16346_s10, %s16346_s10, %s16348_s15  }
  0xd6   : > { %s13977_s28 = smov [#allocation22]   ;;  %s13978_s1 = smov [#allocation25]  }
  0xd7   : > { %s1075_s18 = sshll.u32 %s13977_s28, 4  ;;  %s1101_s16 = sshll.u32 %s13978_s1, 4  ;;  %s1076_s18 = int_to_ptr.vmem [resolvable:$true] %s1075_s18  ;;  %s1102_s16 = int_to_ptr.vmem [resolvable:$true] %s1101_s16 }
  0xd8   : > { %s13402_s8 = scalar_lea.hbm %s14127_s25, 48 }
  0xd9   : > { %p13403_p6 = scmp.ne.s32.totalorder %s14127_s25, %s13402_s8  ;;  %p13409_p3 = scmp.lt.u32.totalorder %s13402_s8, %s14127_s25 }
  0xdb   : > { %p13405_p8 = pnand %p13403_p6, %p14219_p7 }
  0xdd   : > { %p13406_p2 = pneg %p13405_p8 }
  0xdf   : > { %p13411_p9 = pnand %p13409_p3, %p13406_p2 }
  0xe1   : > { %13414 = shalt.err (!%p13411_p9)
}
  0xe2   : > { %s13415_s11 = scalar_lea.vmem %s1076_s18, 48  ;;  %s13422_s2 = scalar_lea.vmem %s1076_s18, 64 }
  0xe3   : > { %p13416_p10 = scmp.ne.s32.totalorder %s1076_s18, %s13415_s11  ;;  %p13423_p13 = scmp.lt.s32.totalorder %s1076_s18, %s1076_s18 }
  0xe4   : > { %p13424_p0 = scmp.lt.s32.totalorder %s13422_s2, %s13415_s11 }
  0xe5   : > { %p13418_p11 = pnand %p13416_p10, %p14219_p7 }
  0xe6   : > { %p13425_p1 = por %p13424_p0, %p13423_p13 }
  0xe7   : > { %p13419_p12 = pneg %p13418_p11 }
  0xe9   : > { %p13426_p4 = pnand %p13425_p1, %p13419_p12 }
  0xeb   : > { %13429 = shalt.err (!%p13426_p4)
}
  0xec   : > { %12733 = dma.hbm_to_vmem [thread:$0]  (!%p14207_p5), %s14127_s25, 48, %s1076_s18, [#allocation23], %s16346_s10, %s16346_s10, %s16348_s15  }
  0xed   : > { %s13430_s28 = scalar_lea.hbm %s16380_s9, 48 }
  0xee   : > { %p13431_p6 = scmp.ne.s32.totalorder %s16380_s9, %s13430_s28  ;;  %p13437_p3 = scmp.lt.u32.totalorder %s13430_s28, %s16380_s9 }
  0xf0   : > { %p13433_p8 = pnand %p13431_p6, %p14219_p7 }
  0xf2   : > { %p13434_p2 = pneg %p13433_p8 }
  0xf4   : > { %p13439_p9 = pnand %p13437_p3, %p13434_p2 }
  0xf6   : > { %13442 = shalt.err (!%p13439_p9)
}
  0xf7   : > { %s13443_s1 = scalar_lea.vmem %s1102_s16, 48  ;;  %s13450_s8 = scalar_lea.vmem %s1102_s16, 64 }
  0xf8   : > { %p13444_p10 = scmp.ne.s32.totalorder %s1102_s16, %s13443_s1  ;;  %p13451_p13 = scmp.lt.s32.totalorder %s1102_s16, %s1102_s16 }
  0xf9   : > { %p13452_p0 = scmp.lt.s32.totalorder %s13450_s8, %s13443_s1 }
  0xfa   : > { %p13446_p11 = pnand %p13444_p10, %p14219_p7 }
  0xfb   : > { %p13453_p1 = por %p13452_p0, %p13451_p13 }
  0xfc   : > { %p13447_p12 = pneg %p13446_p11 }
  0xfe   : > { %p13454_p4 = pnand %p13453_p1, %p13447_p12 }
 0x100   : > { %13457 = shalt.err (!%p13454_p4)
}
 0x101   : > { %12739 = dma.hbm_to_vmem [thread:$0]  (!%p14207_p5), %s16380_s9, 48, %s1102_s16, [#allocation26], %s16346_s10, %s16346_s10, %s16348_s15  }
 0x102   : > { %s13979_s18 = smov [#allocation28]   ;;  %s13980_s2 = smov [#allocation31]  }
 0x103   : > { %s1127_s11 = sshll.u32 %s13979_s18, 4  ;;  %s1153_s28 = sshll.u32 %s13980_s2, 4  ;;  %s1128_s11 = int_to_ptr.vmem [resolvable:$true] %s1127_s11  ;;  %s1154_s28 = int_to_ptr.vmem [resolvable:$true] %s1153_s28 }
 0x104   : > { %s13458_s1 = scalar_lea.hbm %s16382_s5, 48 }
 0x105   : > { %p13459_p6 = scmp.ne.s32.totalorder %s16382_s5, %s13458_s1  ;;  %p13465_p3 = scmp.lt.u32.totalorder %s13458_s1, %s16382_s5 }
 0x107   : > { %p13461_p8 = pnand %p13459_p6, %p14219_p7 }
 0x109   : > { %p13462_p2 = pneg %p13461_p8 }
 0x10b   : > { %p13467_p9 = pnand %p13465_p3, %p13462_p2 }
 0x10d   : > { %13470 = shalt.err (!%p13467_p9)
}
 0x10e   : > { %s13471_s8 = scalar_lea.vmem %s1128_s11, 48  ;;  %s13478_s16 = scalar_lea.vmem %s1128_s11, 64 }
 0x10f   : > { %p13472_p10 = scmp.ne.s32.totalorder %s1128_s11, %s13471_s8  ;;  %p13479_p13 = scmp.lt.s32.totalorder %s1128_s11, %s1128_s11 }
 0x110   : > { %p13480_p0 = scmp.lt.s32.totalorder %s13478_s16, %s13471_s8 }
 0x111   : > { %p13474_p11 = pnand %p13472_p10, %p14219_p7 }
 0x112   : > { %p13481_p1 = por %p13480_p0, %p13479_p13 }
 0x113   : > { %p13475_p12 = pneg %p13474_p11 }
 0x115   : > { %p13482_p4 = pnand %p13481_p1, %p13475_p12 }
 0x117   : > { %13485 = shalt.err (!%p13482_p4)
}
 0x118   : > { %12745 = dma.hbm_to_vmem [thread:$0]  (!%p14207_p5), %s16382_s5, 48, %s1128_s11, [#allocation29], %s16346_s10, %s16346_s10, %s16348_s15  }
 0x119   : > { %s13486_s18 = scalar_lea.hbm %s14157_s14, 48 }
 0x11a   : > { %p13487_p6 = scmp.ne.s32.totalorder %s14157_s14, %s13486_s18  ;;  %p13493_p3 = scmp.lt.u32.totalorder %s13486_s18, %s14157_s14 }
 0x11c   : > { %p13489_p8 = pnand %p13487_p6, %p14219_p7 }
 0x11e   : > { %p13490_p2 = pneg %p13489_p8 }
 0x120   : > { %p13495_p9 = pnand %p13493_p3, %p13490_p2 }
 0x122   : > { %13498 = shalt.err (!%p13495_p9)
}
 0x123   : > { %s13499_s2 = scalar_lea.vmem %s1154_s28, 48  ;;  %s13506_s1 = scalar_lea.vmem %s1154_s28, 64 }
 0x124   : > { %p13500_p10 = scmp.ne.s32.totalorder %s1154_s28, %s13499_s2  ;;  %p13507_p13 = scmp.lt.s32.totalorder %s1154_s28, %s1154_s28 }
 0x125   : > { %p13508_p0 = scmp.lt.s32.totalorder %s13506_s1, %s13499_s2 }
 0x126   : > { %p13502_p11 = pnand %p13500_p10, %p14219_p7 }
 0x127   : > { %p13509_p1 = por %p13508_p0, %p13507_p13 }
 0x128   : > { %p13503_p12 = pneg %p13502_p11 }
 0x12a   : > { %p13510_p4 = pnand %p13509_p1, %p13503_p12 }
 0x12c   : > { %13513 = shalt.err (!%p13510_p4)
}
 0x12d   : > { %12751 = dma.hbm_to_vmem [thread:$0]  (!%p14207_p5), %s14157_s14, 48, %s1154_s28, [#allocation32], %s16346_s10, %s16346_s10, %s16348_s15  }
 0x12e   : > { %s13981_s11 = smov [#allocation34]   ;;  %s13982_s16 = smov [#allocation2]  }
 0x12f   : > { %s1180_s8 = sshll.u32 %s13981_s11, 4  ;;  %s882_s18 = sshll.u32 %s13982_s16, 4  ;;  %s1181_s8 = int_to_ptr.vmem [resolvable:$true] %s1180_s8  ;;  %s883_s18 = int_to_ptr.vmem [resolvable:$true] %s882_s18 }
 0x130   : > { %s13514_s2 = scalar_lea.hbm %s14167_s20, 16 }
 0x131   : > { %p13515_p6 = scmp.ne.s32.totalorder %s14167_s20, %s13514_s2  ;;  %p13521_p3 = scmp.lt.u32.totalorder %s13514_s2, %s14167_s20 }
 0x133   : > { %p13517_p8 = pnand %p13515_p6, %p14219_p7 }
 0x135   : > { %p13518_p2 = pneg %p13517_p8 }
 0x137   : > { %p13523_p9 = pnand %p13521_p3, %p13518_p2 }
 0x139   : > { %13526 = shalt.err (!%p13523_p9)
}
 0x13a   : > { %s13527_s1 = scalar_lea.vmem %s1181_s8, 16  ;;  %s13534_s28 = scalar_lea.vmem %s1181_s8, 32 }
 0x13b   : > { %p13528_p10 = scmp.ne.s32.totalorder %s1181_s8, %s13527_s1  ;;  %p13535_p13 = scmp.lt.s32.totalorder %s1181_s8, %s1181_s8 }
 0x13c   : > { %p13536_p0 = scmp.lt.s32.totalorder %s13534_s28, %s13527_s1 }
 0x13d   : > { %p13530_p11 = pnand %p13528_p10, %p14219_p7 }
 0x13e   : > { %p13537_p1 = por %p13536_p0, %p13535_p13 }
 0x13f   : > { %p13531_p12 = pneg %p13530_p11 }
 0x141   : > { %p13538_p4 = pnand %p13537_p1, %p13531_p12 }
 0x143   : > { %13541 = shalt.err (!%p13538_p4)
}
 0x144   : > { %12757 = dma.hbm_to_vmem [thread:$0]  (!%p14207_p5), %s14167_s20, 16, %s1181_s8, [#allocation35]  }
 0x145   : > { %s13542_s11 = scalar_lea.hbm %s14022_s17, 96 }
 0x146   : > { %p13543_p6 = scmp.ne.s32.totalorder %s14022_s17, %s13542_s11  ;;  %p13549_p3 = scmp.lt.u32.totalorder %s13542_s11, %s14022_s17 }
 0x148   : > { %p13545_p8 = pnand %p13543_p6, %p14219_p7 }
 0x14a   : > { %p13546_p2 = pneg %p13545_p8 }
 0x14c   : > { %p13551_p9 = pnand %p13549_p3, %p13546_p2 }
 0x14e   : > { %13554 = shalt.err (!%p13551_p9)
}
 0x14f   : > { %s13555_s16 = scalar_lea.vmem %s883_s18, 96  ;;  %p13563_p13 = scmp.lt.s32.totalorder %s883_s18, %s883_s18 }
 0x150   : > { %p13556_p10 = scmp.ne.s32.totalorder %s883_s18, %s13555_s16  ;;  %p13564_p0 = scmp.lt.s32.totalorder %s13555_s16, %s13555_s16 }
 0x152   : > { %p13558_p11 = pnand %p13556_p10, %p14219_p7  ;;  %p13565_p1 = por %p13564_p0, %p13563_p13 }
 0x154   : > { %p13559_p12 = pneg %p13558_p11 }
 0x156   : > { %p13566_p4 = pnand %p13565_p1, %p13559_p12 }
 0x158   : > { %13569 = shalt.err (!%p13566_p4)
}
 0x159   : > { %12694 = dma.hbm_to_vmem [thread:$0]  (!%p14207_p5), %s14022_s17, 96, %s883_s18, [#allocation3], %s16346_s10, %s16346_s10, %s16348_s15  }
 0x15a   : > { %s13983_s8 = smov [#allocation6]   ;;  %s13984_s1 = smov [#allocation9]  }
 0x15b   : > { %s911_s2 = sshll.u32 %s13983_s8, 4  ;;  %s943_s28 = sshll.u32 %s13984_s1, 4  ;;  %s912_s2 = int_to_ptr.vmem [resolvable:$true] %s911_s2  ;;  %s944_s28 = int_to_ptr.vmem [resolvable:$true] %s943_s28 }
 0x15c   : > { %s13570_s11 = scalar_lea.hbm %s14037_s29, 96 }
 0x15d   : > { %p13571_p6 = scmp.ne.s32.totalorder %s14037_s29, %s13570_s11  ;;  %p13577_p3 = scmp.lt.u32.totalorder %s13570_s11, %s14037_s29 }
 0x15f   : > { %p13573_p8 = pnand %p13571_p6, %p14219_p7 }
 0x161   : > { %p13574_p2 = pneg %p13573_p8 }
 0x163   : > { %p13579_p9 = pnand %p13577_p3, %p13574_p2 }
 0x165   : > { %13582 = shalt.err (!%p13579_p9)
}
 0x166   : > { %s13583_s16 = scalar_lea.vmem %s912_s2, 96  ;;  %p13591_p13 = scmp.lt.s32.totalorder %s912_s2, %s912_s2 }
 0x167   : > { %p13584_p10 = scmp.ne.s32.totalorder %s912_s2, %s13583_s16  ;;  %p13592_p0 = scmp.lt.s32.totalorder %s13583_s16, %s13583_s16 }
 0x169   : > { %p13586_p11 = pnand %p13584_p10, %p14219_p7  ;;  %p13593_p1 = por %p13592_p0, %p13591_p13 }
 0x16b   : > { %p13587_p12 = pneg %p13586_p11 }
 0x16d   : > { %p13594_p4 = pnand %p13593_p1, %p13587_p12 }
 0x16f   : > { %13597 = shalt.err (!%p13594_p4)
}
 0x170   : > { %12700 = dma.hbm_to_vmem [thread:$0]  (!%p14207_p5), %s14037_s29, 96, %s912_s2, [#allocation5], %s16346_s10, %s16346_s10, %s16348_s15  }
 0x171   : > { %s13598_s18 = scalar_lea.hbm %s14057_s19, 96 }
 0x172   : > { %p13599_p6 = scmp.ne.s32.totalorder %s14057_s19, %s13598_s18  ;;  %p13605_p3 = scmp.lt.u32.totalorder %s13598_s18, %s14057_s19 }
 0x174   : > { %p13601_p8 = pnand %p13599_p6, %p14219_p7 }
 0x176   : > { %p13602_p2 = pneg %p13601_p8 }
 0x178   : > { %p13607_p9 = pnand %p13605_p3, %p13602_p2 }
 0x17a   : > { %13610 = shalt.err (!%p13607_p9)
}
 0x17b   : > { %s13611_s8 = scalar_lea.vmem %s944_s28, 96  ;;  %p13619_p13 = scmp.lt.s32.totalorder %s944_s28, %s944_s28 }
 0x17c   : > { %p13612_p10 = scmp.ne.s32.totalorder %s944_s28, %s13611_s8  ;;  %p13620_p0 = scmp.lt.s32.totalorder %s13611_s8, %s13611_s8 }
 0x17e   : > { %p13614_p11 = pnand %p13612_p10, %p14219_p7  ;;  %p13621_p1 = por %p13620_p0, %p13619_p13 }
 0x180   : > { %p13615_p12 = pneg %p13614_p11 }
 0x182   : > { %p13622_p4 = pnand %p13621_p1, %p13615_p12 }
 0x184   : > { %13625 = shalt.err (!%p13622_p4)
}
 0x185   : > { %12706 = dma.hbm_to_vmem [thread:$0]  (!%p14207_p5), %s14057_s19, 96, %s944_s28, [#allocation8], %s16346_s10, %s16346_s10, %s16348_s15  }
 0x186   : > { %s13985_s2 = smov [#allocation12]   ;;  %s13986_s11 = smov [#allocation15]  }
 0x187   : > { %s972_s1 = sshll.u32 %s13985_s2, 4  ;;  %s1001_s16 = sshll.u32 %s13986_s11, 4  ;;  %s973_s1 = int_to_ptr.vmem [resolvable:$true] %s972_s1  ;;  %s1002_s16 = int_to_ptr.vmem [resolvable:$true] %s1001_s16 }
 0x188   : > { %s13626_s18 = scalar_lea.hbm %s16381_s6, 96 }
 0x189   : > { %p13627_p6 = scmp.ne.s32.totalorder %s16381_s6, %s13626_s18  ;;  %p13633_p3 = scmp.lt.u32.totalorder %s13626_s18, %s16381_s6 }
 0x18b   : > { %p13629_p8 = pnand %p13627_p6, %p14219_p7 }
 0x18d   : > { %p13630_p2 = pneg %p13629_p8 }
 0x18f   : > { %p13635_p9 = pnand %p13633_p3, %p13630_p2 }
 0x191   : > { %13638 = shalt.err (!%p13635_p9)
}
 0x192   : > { %s13639_s8 = scalar_lea.vmem %s973_s1, 96  ;;  %p13647_p13 = scmp.lt.s32.totalorder %s973_s1, %s973_s1 }
 0x193   : > { %p13640_p10 = scmp.ne.s32.totalorder %s973_s1, %s13639_s8  ;;  %p13648_p0 = scmp.lt.s32.totalorder %s13639_s8, %s13639_s8 }
 0x195   : > { %p13642_p11 = pnand %p13640_p10, %p14219_p7  ;;  %p13649_p1 = por %p13648_p0, %p13647_p13 }
 0x197   : > { %p13643_p12 = pneg %p13642_p11 }
 0x199   : > { %p13650_p4 = pnand %p13649_p1, %p13643_p12 }
 0x19b   : > { %13653 = shalt.err (!%p13650_p4)
}
 0x19c   : > { %s16387_s28 = sld [smem:[#allocation60_spill]] }
 0x19d   : > { %12712 = dma.hbm_to_vmem [thread:$0]  (!%p14207_p5), %s16381_s6, 96, %s973_s1, [#allocation11], %s16346_s10, %s16346_s10, %s16348_s15  }
 0x1a2   : > { %s13654_s2 = scalar_lea.hbm %s16387_s28, 32 }
 0x1a3   : > { %p13655_p6 = scmp.ne.s32.totalorder %s16387_s28, %s13654_s2  ;;  %p13661_p3 = scmp.lt.u32.totalorder %s13654_s2, %s16387_s28 }
 0x1a5   : > { %p13657_p8 = pnand %p13655_p6, %p14219_p7 }
 0x1a7   : > { %p13658_p2 = pneg %p13657_p8 }
 0x1a9   : > { %p13663_p9 = pnand %p13661_p3, %p13658_p2 }
 0x1ab   : > { %13666 = shalt.err (!%p13663_p9)
}
 0x1ac   : > { %s13667_s11 = scalar_lea.vmem %s1002_s16, 32  ;;  %p13675_p13 = scmp.lt.s32.totalorder %s1002_s16, %s1002_s16 }
 0x1ad   : > { %p13668_p10 = scmp.ne.s32.totalorder %s1002_s16, %s13667_s11  ;;  %p13676_p0 = scmp.lt.s32.totalorder %s13667_s11, %s13667_s11 }
 0x1af   : > { %p13670_p11 = pnand %p13668_p10, %p14219_p7  ;;  %p13677_p1 = por %p13676_p0, %p13675_p13 }
 0x1b1   : > { %p13671_p12 = pneg %p13670_p11 }
 0x1b3   : > { %p13678_p4 = pnand %p13677_p1, %p13671_p12 }
 0x1b5   : > { %13681 = shalt.err (!%p13678_p4)
}
 0x1b6   : > { %s16388_s1 = sld [smem:[#allocation62_spill]]  ;;  %s13987_s18 = smov [#allocation18]  }
 0x1b7   : > { %12718 = dma.hbm_to_vmem [thread:$0]  (!%p14207_p5), %s16387_s28, 32, %s1002_s16, [#allocation14], %s16346_s10, %s16346_s10, %s16348_s15  }
 0x1b8   : > { %s1030_s8 = sshll.u32 %s13987_s18, 4  ;;  %s13988_s2 = smov [#allocation21]   ;;  %s1031_s8 = int_to_ptr.vmem [resolvable:$true] %s1030_s8 }
 0x1b9   : > { %s1059_s5 = sshll.u32 %s13988_s2, 4  ;;  %s1060_s5 = int_to_ptr.vmem [resolvable:$true] %s1059_s5 }
 0x1bc   : > { %s13682_s11 = scalar_lea.hbm %s16388_s1, 144 }
 0x1bd   : > { %p13683_p6 = scmp.ne.s32.totalorder %s16388_s1, %s13682_s11  ;;  %p13689_p3 = scmp.lt.u32.totalorder %s13682_s11, %s16388_s1 }
 0x1bf   : > { %p13685_p8 = pnand %p13683_p6, %p14219_p7 }
 0x1c1   : > { %p13686_p2 = pneg %p13685_p8 }
 0x1c3   : > { %p13691_p9 = pnand %p13689_p3, %p13686_p2 }
 0x1c5   : > { %13694 = shalt.err (!%p13691_p9)
}
 0x1c6   : > { %s13695_s6 = scalar_lea.vmem %s1031_s8, 144  ;;  %s13702_s16 = scalar_lea.vmem %s1031_s8, 160 }
 0x1c7   : > { %p13696_p10 = scmp.ne.s32.totalorder %s1031_s8, %s13695_s6  ;;  %p13703_p13 = scmp.lt.s32.totalorder %s1031_s8, %s1031_s8 }
 0x1c8   : > { %p13704_p0 = scmp.lt.s32.totalorder %s13702_s16, %s13695_s6 }
 0x1c9   : > { %p13698_p11 = pnand %p13696_p10, %p14219_p7 }
 0x1ca   : > { %p13705_p1 = por %p13704_p0, %p13703_p13 }
 0x1cb   : > { %p13699_p12 = pneg %p13698_p11 }
 0x1cd   : > { %p13706_p4 = pnand %p13705_p1, %p13699_p12 }
 0x1cf   : > { %13709 = shalt.err (!%p13706_p4)
}
 0x1d0   : > { %s16389_s18 = sld [smem:[#allocation64_spill]] }
 0x1d1   : > { %12724 = dma.hbm_to_vmem [thread:$0]  (!%p14207_p5), %s16388_s1, 144, %s1031_s8, [#allocation17], %s16346_s10, %s16346_s10, %s16348_s15  }
 0x1d6   : > { %s13710_s2 = scalar_lea.hbm %s16389_s18, 48 }
 0x1d7   : > { %p13711_p6 = scmp.ne.s32.totalorder %s16389_s18, %s13710_s2  ;;  %p13717_p3 = scmp.lt.u32.totalorder %s13710_s2, %s16389_s18 }
 0x1d9   : > { %p13713_p8 = pnand %p13711_p6, %p14219_p7 }
 0x1db   : > { %p13714_p2 = pneg %p13713_p8 }
 0x1dd   : > { %p13719_p9 = pnand %p13717_p3, %p13714_p2 }
 0x1df   : > { %13722 = shalt.err (!%p13719_p9)
}
 0x1e0   : > { %s13723_s6 = scalar_lea.vmem %s1060_s5, 48  ;;  %s13730_s11 = scalar_lea.vmem %s1060_s5, 64 }
 0x1e1   : > { %p13724_p10 = scmp.ne.s32.totalorder %s1060_s5, %s13723_s6  ;;  %p13731_p13 = scmp.lt.s32.totalorder %s1060_s5, %s1060_s5 }
 0x1e2   : > { %p13732_p0 = scmp.lt.s32.totalorder %s13730_s11, %s13723_s6 }
 0x1e3   : > { %p13726_p11 = pnand %p13724_p10, %p14219_p7 }
 0x1e4   : > { %p13733_p1 = por %p13732_p0, %p13731_p13 }
 0x1e5   : > { %p13727_p12 = pneg %p13726_p11 }
 0x1e7   : > { %p13734_p4 = pnand %p13733_p1, %p13727_p12 }
 0x1e9   : > { %13737 = shalt.err (!%p13734_p4)
}
 0x1ea   : > { %s16390_s8 = sld [smem:[#allocation66_spill]]  ;;  %s13989_s16 = smov [#allocation24]  }
 0x1eb   : > { %12730 = dma.hbm_to_vmem [thread:$0]  (!%p14207_p5), %s16389_s18, 48, %s1060_s5, [#allocation20], %s16346_s10, %s16346_s10, %s16348_s15  }
 0x1ec   : > { %s1088_s2 = sshll.u32 %s13989_s16, 4  ;;  %s1089_s2 = int_to_ptr.vmem [resolvable:$true] %s1088_s2 }
 0x1f0   : > { %s13738_s1 = scalar_lea.hbm %s16390_s8, 1536 }
 0x1f1   : > { %p13739_p6 = scmp.ne.s32.totalorder %s16390_s8, %s13738_s1  ;;  %p13745_p3 = scmp.lt.u32.totalorder %s13738_s1, %s16390_s8 }
 0x1f3   : > { %p13741_p8 = pnand %p13739_p6, %p14219_p7 }
 0x1f5   : > { %p13742_p2 = pneg %p13741_p8 }
 0x1f7   : > { %p13747_p9 = pnand %p13745_p3, %p13742_p2 }
 0x1f9   : > { %13750 = shalt.err (!%p13747_p9)
}
 0x1fa   : > { %s13751_s6 = scalar_lea.vmem %s1089_s2, 1536  ;;  %p13759_p13 = scmp.lt.s32.totalorder %s1089_s2, %s1089_s2 }
 0x1fb   : > { %p13752_p10 = scmp.ne.s32.totalorder %s1089_s2, %s13751_s6  ;;  %p13760_p0 = scmp.lt.s32.totalorder %s13751_s6, %s13751_s6 }
 0x1fd   : > { %p13754_p11 = pnand %p13752_p10, %p14219_p7  ;;  %p13761_p1 = por %p13760_p0, %p13759_p13 }
 0x1ff   : > { %p13755_p12 = pneg %p13754_p11 }
 0x201   : > { %p13762_p4 = pnand %p13761_p1, %p13755_p12 }
 0x203   : > { %13765 = shalt.err (!%p13762_p4)
}
 0x204   : > { %s16352_s5 = smov 128   ;;  %s16391_s11 = sld [smem:[#allocation68_spill]] }
 0x205   : > { %s16353_s1 = smov 8   ;;  %s13992_s16 = smov [#allocation27]  }
 0x206   : > { %12736 = dma.hbm_to_vmem [thread:$0]  (!%p14207_p5), %s16390_s8, 1536, %s1089_s2, [#allocation23], %s16352_s5, %s16352_s5, %s16353_s1  }
 0x207   : > { %s1114_s10 = sshll.u32 %s13992_s16, 4  ;;  %s13993_s15 = smov [#allocation30]   ;;  %s1115_s10 = int_to_ptr.vmem [resolvable:$true] %s1114_s10 }
 0x208   : > { %s1140_s6 = sshll.u32 %s13993_s15, 4  ;;  %s14481_s6 = int_to_ptr.vmem [resolvable:$true] %s1140_s6 }
 0x20a   : > { %s13766_s9 = scalar_lea.hbm %s16391_s11, 1536 }
 0x20b   : > { %p13767_p6 = scmp.ne.s32.totalorder %s16391_s11, %s13766_s9  ;;  %p13773_p3 = scmp.lt.u32.totalorder %s13766_s9, %s16391_s11 }
 0x20d   : > { %p13769_p8 = pnand %p13767_p6, %p14219_p7 }
 0x20f   : > { %p13770_p2 = pneg %p13769_p8 }
 0x211   : > { %p13775_p9 = pnand %p13773_p3, %p13770_p2 }
 0x213   : > { %13778 = shalt.err (!%p13775_p9)
}
 0x214   : > { %s13779_s12 = scalar_lea.vmem %s1115_s10, 1536  ;;  %p13787_p13 = scmp.lt.s32.totalorder %s1115_s10, %s1115_s10 }
 0x215   : > { %p13780_p10 = scmp.ne.s32.totalorder %s1115_s10, %s13779_s12  ;;  %p13788_p0 = scmp.lt.s32.totalorder %s13779_s12, %s13779_s12 }
 0x217   : > { %p13782_p11 = pnand %p13780_p10, %p14219_p7  ;;  %p13789_p1 = por %p13788_p0, %p13787_p13 }
 0x219   : > { %p13783_p12 = pneg %p13782_p11 }
 0x21b   : > { %p13790_p4 = pnand %p13789_p1, %p13783_p12 }
 0x21d   : > { %13793 = shalt.err (!%p13790_p4)
}
 0x21e   : > { %s16392_s9 = sld [smem:[#allocation70_spill]] }
 0x21f   : > { %12742 = dma.hbm_to_vmem [thread:$0]  (!%p14207_p5), %s16391_s11, 1536, %s1115_s10, [#allocation26], %s16352_s5, %s16352_s5, %s16353_s1  }
 0x224   : > { %s13794_s15 = scalar_lea.hbm %s16392_s9, 48 }
 0x225   : > { %p13795_p6 = scmp.ne.s32.totalorder %s16392_s9, %s13794_s15  ;;  %p13801_p3 = scmp.lt.u32.totalorder %s13794_s15, %s16392_s9 }
 0x227   : > { %p13797_p8 = pnand %p13795_p6, %p14219_p7 }
 0x229   : > { %p13798_p2 = pneg %p13797_p8 }
 0x22b   : > { %p13803_p9 = pnand %p13801_p3, %p13798_p2 }
 0x22d   : > { %13806 = shalt.err (!%p13803_p9)
}
 0x22e   : > { %s13807_s12 = scalar_lea.vmem %s14481_s6, 48  ;;  %s13814_s2 = scalar_lea.vmem %s14481_s6, 64 }
 0x22f   : > { %p13808_p10 = scmp.ne.s32.totalorder %s14481_s6, %s13807_s12  ;;  %p13815_p13 = scmp.lt.s32.totalorder %s14481_s6, %s14481_s6 }
 0x230   : > { %p13816_p0 = scmp.lt.s32.totalorder %s13814_s2, %s13807_s12 }
 0x231   : > { %p13810_p11 = pnand %p13808_p10, %p14219_p7 }
 0x232   : > { %p13817_p1 = por %p13816_p0, %p13815_p13 }
 0x233   : > { %p13811_p12 = pneg %p13810_p11 }
 0x235   : > { %p13818_p4 = pnand %p13817_p1, %p13811_p12 }
 0x237   : > { %13821 = shalt.err (!%p13818_p4)
}
 0x238   : > { %s16393_s10 = smov 1   ;;  %s16394_s16 = smov 16  }
 0x239   : > { %s16395_s15 = sld [smem:[#allocation71_spill]]  ;;  %s13994_s5 = smov [#allocation33]  }
 0x23a   : > { %12748 = dma.hbm_to_vmem [thread:$0]  (!%p14207_p5), %s16392_s9, 48, %s14481_s6, [#allocation29], %s16394_s16, %s16394_s16, %s16393_s10  }
 0x23b   : > { %s1166_s1 = sshll.u32 %s13994_s5, 4  ;;  %s13995_s8 = smov [#allocation36]   ;;  %s1167_s1 = int_to_ptr.vmem [resolvable:$true] %s1166_s1 }
 0x23c   : > { %s1193_s11 = sshll.u32 %s13995_s8, 4  ;;  %s14515_s11 = int_to_ptr.vmem [resolvable:$true] %s1193_s11 }
 0x23f   : > { %s13822_s12 = scalar_lea.hbm %s16395_s15, 1536 }
 0x240   : > { %p13823_p6 = scmp.ne.s32.totalorder %s16395_s15, %s13822_s12  ;;  %p13829_p3 = scmp.lt.u32.totalorder %s13822_s12, %s16395_s15 }
 0x242   : > { %p13825_p8 = pnand %p13823_p6, %p14219_p7 }
 0x244   : > { %p13826_p2 = pneg %p13825_p8 }
 0x246   : > { %p13831_p9 = pnand %p13829_p3, %p13826_p2 }
 0x248   : > { %13834 = shalt.err (!%p13831_p9)
}
 0x249   : > { %s13835_s2 = scalar_lea.vmem %s1167_s1, 1536  ;;  %p13843_p13 = scmp.lt.s32.totalorder %s1167_s1, %s1167_s1 }
 0x24a   : > { %p13836_p10 = scmp.ne.s32.totalorder %s1167_s1, %s13835_s2  ;;  %p13844_p0 = scmp.lt.s32.totalorder %s13835_s2, %s13835_s2 }
 0x24c   : > { %p13838_p11 = pnand %p13836_p10, %p14219_p7  ;;  %p13845_p1 = por %p13844_p0, %p13843_p13 }
 0x24e   : > { %p13839_p12 = pneg %p13838_p11 }
 0x250   : > { %p13846_p4 = pnand %p13845_p1, %p13839_p12 }
 0x252   : > { %13849 = shalt.err (!%p13846_p4)
}
 0x253   : > { %s16396_s8 = smov 8   ;;  %s16397_s5 = smov 128  }
 0x254   : > { %12754 = dma.hbm_to_vmem [thread:$0]  (!%p14207_p5), %s16395_s15, 1536, %s1167_s1, [#allocation32], %s16397_s5, %s16397_s5, %s16396_s8  }
 0x255   : > { %s13850_s6 = scalar_lea.hbm %s14177_s27, 48 }
 0x256   : > { %p13851_p6 = scmp.ne.s32.totalorder %s14177_s27, %s13850_s6  ;;  %p13857_p3 = scmp.lt.u32.totalorder %s13850_s6, %s14177_s27 }
 0x258   : > { %p13853_p8 = pnand %p13851_p6, %p14219_p7 }
 0x25a   : > { %p13854_p2 = pneg %p13853_p8 }
 0x25c   : > { %p13859_p9 = pnand %p13857_p3, %p13854_p2 }
 0x25e   : > { %13862 = shalt.err (!%p13859_p9)
}
 0x25f   : > { %s13863_s12 = scalar_lea.vmem %s14515_s11, 48  ;;  %s13870_s2 = scalar_lea.vmem %s14515_s11, 64 }
 0x260   : > { %p13864_p10 = scmp.ne.s32.totalorder %s14515_s11, %s13863_s12  ;;  %p13871_p13 = scmp.lt.s32.totalorder %s14515_s11, %s14515_s11 }
 0x261   : > { %p13872_p0 = scmp.lt.s32.totalorder %s13870_s2, %s13863_s12 }
 0x262   : > { %p13866_p11 = pnand %p13864_p10, %p14219_p7 }
 0x263   : > { %p13873_p1 = por %p13872_p0, %p13871_p13 }
 0x264   : > { %p13867_p12 = pneg %p13866_p11 }
 0x266   : > { %p13874_p4 = pnand %p13873_p1, %p13867_p12 }
 0x268   : > { %13877 = shalt.err (!%p13874_p4)
}
 0x269   : > { %12760 = dma.hbm_to_vmem [thread:$0]  (!%p14207_p5), %s14177_s27, 48, %s14515_s11, [#allocation35], %s16394_s16, %s16394_s16, %s16393_s10  }
 0x26a   : > { %p16398_p6 = scmp.ne.s32.totalorder %s16384_s23, 0 }
 0x26b   : > { %p16399_p7 = scmp.eq.s32.totalorder (!%p16398_p6), %s14190_s0, 0 }
 0x26c   : > { %1217 = sbr.rel (%p16398_p6) target bundleno = 10662 (0x29a6), region = 160 }
 0x273   : > { %13883 = dma.done.wait (%p16399_p7), [#allocation3], 96   ;;  %p16400_p8 = pmov %p16399_p7 }
 0x274   : > { %p16401_p2 = pmov %p16399_p7 }
 0x275   : > { %13885 = vsyncadd (%p16400_p8), [#allocation3], 4294967200 }
 0x276   : > { %13887 = dma.done.wait (%p16401_p2), [#allocation5], 192   ;;  %p16402_p3 = pmov %p16401_p2 }
 0x277   : > { %p16403_p9 = pmov %p16401_p2 }
 0x278   : > { %13889 = vsyncadd (%p16402_p3), [#allocation5], 4294967104 }
 0x279   : > { %13891 = dma.done.wait (%p16403_p9), [#allocation8], 192   ;;  %p16404_p5 = pmov %p16401_p2 }
 0x27a   : > { %p16405_p10 = pmov %p16401_p2 }
 0x27b   : > { %13893 = vsyncadd (%p16404_p5), [#allocation8], 4294967104 }
 0x27c   : > { %13895 = dma.done.wait (%p16405_p10), [#allocation11], 192   ;;  %p16406_p11 = pmov %p16401_p2 }
 0x27d   : > { %p16407_p12 = pmov %p16401_p2 }
 0x27e   : > { %13897 = vsyncadd (%p16406_p11), [#allocation11], 4294967104 }
 0x27f   : > { %13899 = dma.done.wait (%p16407_p12), [#allocation14], 128   ;;  %p16408_p13 = pmov %p16401_p2 }
 0x280   : > { %p16409_p0 = pmov %p16401_p2 }
 0x281   : > { %13901 = vsyncadd (%p16408_p13), [#allocation14], 4294967168 }
 0x282   : > { %13903 = dma.done.wait (%p16409_p0), [#allocation17], 240   ;;  %p16410_p1 = pmov %p16409_p0 }
 0x283   : > { %p16411_p4 = pmov %p16409_p0 }
 0x284   : > { %13905 = vsyncadd (%p16410_p1), [#allocation17], 4294967056 }
 0x285   : > { %13907 = dma.done.wait (%p16411_p4), [#allocation20], 192   ;;  %p16412_p6 = pmov %p16409_p0 }
 0x286   : > { %p16413_p7 = pmov %p16409_p0 }
 0x287   : > { %13909 = vsyncadd (%p16412_p6), [#allocation20], 4294967104 }
 0x288   : > { %13911 = dma.done.wait (%p16413_p7), [#allocation23], 1584   ;;  %p16414_p8 = pmov %p16409_p0 }
 0x289   : > { %p16415_p2 = pmov %p16409_p0 }
 0x28a   : > { %13913 = vsyncadd (%p16414_p8), [#allocation23], 4294965712 }
 0x28b   : > { %13915 = dma.done.wait (%p16415_p2), [#allocation26], 1584   ;;  %p16416_p3 = pmov %p16409_p0 }
 0x28c   : > { %p16417_p9 = pmov %p16409_p0 }
 0x28d   : > { %13917 = vsyncadd (%p16416_p3), [#allocation26], 4294965712 }
 0x28e   : > { %13919 = dma.done.wait (%p16417_p9), [#allocation29], 96   ;;  %p16418_p5 = pmov %p16409_p0 }
 0x28f   : > { %p16419_p10 = pmov %p16409_p0 }
 0x290   : > { %13921 = vsyncadd (%p16418_p5), [#allocation29], 4294967200 }
 0x291   : > { %13923 = dma.done.wait (%p16419_p10), [#allocation32], 1584   ;;  %p16420_p11 = pmov %p16409_p0 }
 0x292   : > { %p16421_p12 = pmov %p16409_p0 }
 0x293   : > { %13925 = vsyncadd (%p16420_p11), [#allocation32], 4294965712 }
 0x294   : > { %13927 = dma.done.wait (%p16421_p12), [#allocation35], 64   ;;  %p16422_p13 = pmov %p16409_p0 }
 0x295   : > { %s16423_s23 = sld [smem:[#allocation49_spill]]  ;;  %s16424_s7 = sld [smem:[#allocation50_spill]]  ;;  %vm1426_vm0 = vcmask 261120   ;;  %v13996_v30 = vmov 0.0|0.0   ;;  %vm13997_vm1 = vmmov 0   ;;  %v13998_v39 = vmov 0.0  }
 0x296   : > { %13929 = vsyncadd (%p16422_p13), [#allocation35], 4294967232  ;;  %p1393_p0 = scmp.lt.s32.totalorder %s14190_s0, 1  ;;  %s16425_s1 = sld [smem:[#allocation52_spill]]  ;;  %12224 = vmatprep.subr.bf16.mxu1 %v13996_v30  ;;  %12218 = vmatprep.subr.bf16.mxu0 %v13996_v30  ;;  %v10436_v51 = vld [vmem:[#allocation2 + $0x1] ss:$0 sm:$0xff] }
 0x297   : > { %11319 = vmatprep.mubr.msk.f32.mxu1 %vm13997_vm1, %v13998_v39  ;;  %11308 = vmatprep.mubr.msk.f32.mxu0 %vm13997_vm1, %v13998_v39  ;;  %s16426_s10 = sld [smem:[#allocation53_spill]]  ;;  %v10439_v55 = vld [vmem:[#allocation4 + $0x1] ss:$0 sm:$0xff]  ;;  %v10435_v60 = vld [vmem:[#allocation2] ss:$0 sm:$0xff]  ;;  %s16427_s16 = sld [smem:[#allocation55_spill]] }
 0x298   : > { %s16435_s0 = smov (!%p1393_p0, %s14190_s0), 1  ;;  %s16428_s8 = sld [smem:[#allocation51_spill]]  ;;  %vm2436_vm2 = vcmask 64512   ;;  %vm4050_vm3 = vcmask 523264  }
 0x299   : > { %s12598_s26 = smul.u32 24, %s16435_s0  ;;  %s16429_s5 = sld [smem:[#allocation56_spill]] }
 0x29a   : > { %s16430_s6 = sld [smem:[#allocation59_spill]]  ;;  %s16431_s12 = sld [smem:[#allocation61_spill]] }
 0x29b   : > { %s1397_s11 = scalar_lea.vmem %s16423_s23, %s12598_s26  ;;  %v1415_v1 = vld [vmem:[%s16424_s7 + $0x8] sm:$0xff]  ;;  %v1416_v4 = vld [vmem:[%s16424_s7 + $0x10] sm:$0xff]  ;;  %v1414_v6 = vld [vmem:[%s16424_s7] sm:$0xff]  ;;  %s16432_s2 = sld [smem:[#allocation63_spill]] }
 0x29c   : > { %v1412_v0 = vld [vmem:[%s1397_s11 + $0x8] sm:$0xff]  ;;  %v1413_v2 = vld [vmem:[%s1397_s11 + $0x10] sm:$0xff]  ;;  %v1411_v5 = vld [vmem:[%s1397_s11] sm:$0xff]  ;;  %s16433_s23 = sld [smem:[#allocation65_spill]]  ;;  %s1402_s11 = scalar_lea.vmem %s14182_s3, %s12598_s26 }
 0x29d   : > { %v14608_v3 = vadd.f32 %v1415_v1, %v1412_v0  ;;  %v14612_v7 = vadd.f32 %v1416_v4, %v1413_v2  ;;  %v14614_v8 = vadd.f32 %v1414_v6, %v1411_v5  ;;  %v1513_v27 = vld [vmem:[%s16425_s1 + $0x20] sm:$0xff]  ;;  %v1514_v28 = vld [vmem:[%s16425_s1 + $0x28] sm:$0xff]  ;;  %v1515_v33 = vld [vmem:[%s16425_s1 + $0x30] sm:$0xff] }
 0x29e   : > { %v12225_v29 = vpack.c.bf16 %v1514_v28, %v1513_v27  ;;  %v1509_v31 = vld [vmem:[%s16425_s1] sm:$0xff]  ;;  %v1510_v32 = vld [vmem:[%s16425_s1 + $0x8] sm:$0xff]  ;;  %v1516_v35 = vld [vmem:[%s16425_s1 + $0x38] sm:$0xff] }
 0x29f   : > { %v1430_v9 = vsel %vm1426_vm0, %v14608_v3, 0.0  ;;  %v1433_v10 = vsel %vm1426_vm0, %v14612_v7, 0.0  ;;  %v1427_v11 = vsel %vm1426_vm0, %v14614_v8, 0.0  ;;  %v12219_v34 = vpack.c.bf16 %v1510_v32, %v1509_v31  ;;  %v1511_v37 = vld [vmem:[%s16425_s1 + $0x10] sm:$0xff]  ;;  %v1512_v38 = vld [vmem:[%s16425_s1 + $0x18] sm:$0xff]  ;;  %v1761_v53 = vld [vmem:[%s16426_s10] sm:$0xff] }
 0x2a0   : > { %1431 = vadd.xlane.f32.xlu0 %v1430_v9  ;;  %1434 = vadd.xlane.f32.xlu1 %v1433_v10  ;;  %v12228_v36 = vpack.c.bf16 %v1516_v35, %v1515_v33  ;;  %v12222_v40 = vpack.c.bf16 %v1512_v38, %v1511_v37  ;;  %v1762_v54 = vld [vmem:[%s16426_s10 + $0x8] sm:$0xff]  ;;  %v1763_v61 = vld [vmem:[%s16426_s10 + $0x10] sm:$0xff]  ;;  %v1764_v62 = vld [vmem:[%s16426_s10 + $0x18] sm:$0xff] }
 0x2a1   : > { %12226 = vmatpush3.bf16.msra.mxu1 %v12225_v29  ;;  %12220 = vmatpush3.bf16.msra.mxu0 %v12219_v34  ;;  %v12237_v57 = vpack.c.bf16 %v1762_v54, %v1761_v53  ;;  %v1517_v0 = vld [vmem:[%s16425_s1 + $0x40] sm:$0xff]  ;;  %v1518_v1 = vld [vmem:[%s16425_s1 + $0x48] sm:$0xff]  ;;  %v12240_v6 = vpack.c.bf16 %v1764_v62, %v1763_v61  ;;  %v1767_v31 = vld [vmem:[%s16426_s10 + $0x30] sm:$0xff] }
 0x2a2   : > { %12227 = vmatprep.subr.bf16.mxu1 %v13996_v30  ;;  %12221 = vmatprep.subr.bf16.mxu0 %v13996_v30  ;;  %v10438_v4 = vld [vmem:[#allocation4] ss:$0 sm:$0xff]  ;;  %v12231_v9 = vpack.c.bf16 %v1518_v1, %v1517_v0  ;;  %v2009_v28 = vld [vmem:[%s16427_s16 + $0x28] sm:$0xff]  ;;  %v1768_v32 = vld [vmem:[%s16426_s10 + $0x38] sm:$0xff] }
 0x2a3   : > { %v1769_v10 = vld [vmem:[%s16426_s10 + $0x40] sm:$0xff]  ;;  %v12246_v34 = vpack.c.bf16 %v1768_v32, %v1767_v31  ;;  %v2010_v35 = vld [vmem:[%s16427_s16 + $0x30] sm:$0xff]  ;;  %v2005_v38 = vld [vmem:[%s16427_s16 + $0x8] sm:$0xff] }
 0x2a4   : > { %1428 = vadd.xlane.f32.xlu0 %v1427_v11  ;;  %v1770_v11 = vld [vmem:[%s16426_s10 + $0x48] sm:$0xff]  ;;  %v2008_v27 = vld [vmem:[%s16427_s16 + $0x20] sm:$0xff] }
 0x2a5   : > { %12229 = vmatpush3.bf16.msra.mxu1 %v12228_v36  ;;  %12223 = vmatpush3.bf16.msra.mxu0 %v12222_v40  ;;  %v12261_v33 = vpack.c.bf16 %v2009_v28, %v2008_v27  ;;  %v2011_v36 = vld [vmem:[%s16427_s16 + $0x38] sm:$0xff]  ;;  %v2004_v37 = vld [vmem:[%s16427_s16] sm:$0xff]  ;;  %v10441_v53 = vld [vmem:[#allocation6] ss:$0 sm:$0xff] }
 0x2a6   : > { %12236 = vmatprep.subr.bf16.mxu1 %v13996_v30  ;;  %12230 = vmatprep.subr.bf16.mxu0 %v13996_v30  ;;  %v12264_v40 = vpack.c.bf16 %v2011_v36, %v2010_v35  ;;  %v14725_v62 = vld [vmem:[%s16428_s8] ss:$0 sm:$0xff]  ;;  %v10453_v35 = vld [vmem:[#allocation9] ss:$0 sm:$0xff] }
 0x32d   : > { %v1432_v12 = vpop.xlane.xlu0 %1431  ;;  %v1435_v14 = vpop.xlane.xlu1 %1434 }
 0x32e   : > { %v1438_v13 = vmul.f32 0.03125, %v1432_v12  ;;  %v1439_v15 = vmul.f32 0.03125, %v1435_v14  ;;  %v1519_v14 = vld [vmem:[%s16425_s1 + $0x50] sm:$0xff] }
 0x330   : > { %v1441_v16 = vsub.f32 %v14608_v3, %v1438_v13  ;;  %v14624_v17 = vsub.f32 %v14612_v7, %v1439_v15  ;;  %v1520_v15 = vld [vmem:[%s16425_s1 + $0x58] sm:$0xff] }
 0x331   : > { %v1429_v18 = vpop.xlane.xlu0 %1428 }
 0x332   : > { %v1437_v19 = vmul.f32 0.03125, %v1429_v18  ;;  %v1444_v20 = vmul.f32 %v1441_v16, %v1441_v16  ;;  %v1445_v21 = vmul.f32 %v14624_v17, %v14624_v17  ;;  %v12249_v18 = vpack.c.bf16 %v1770_v11, %v1769_v10  ;;  %v14747_v11 = vld [vmem:[%s16428_s8 + $0x4] ss:$0 sm:$0xff] }
 0x334   : > { %v1440_v22 = vsub.f32 %v14614_v8, %v1437_v19  ;;  %v1449_v23 = vsel %vm1426_vm0, %v1444_v20, 0.0  ;;  %v1452_v24 = vsel %vm1426_vm0, %v1445_v21, 0.0  ;;  %v12234_v19 = vpack.c.bf16 %v1520_v15, %v1519_v14  ;;  %v1771_v20 = vld [vmem:[%s16426_s10 + $0x50] sm:$0xff] }
 0x335   : > { %1450 = vadd.xlane.f32.xlu1 %v1449_v23  ;;  %v1766_v23 = vld [vmem:[%s16426_s10 + $0x28] sm:$0xff] }
 0x336   : > { %v1443_v25 = vmul.f32 %v1440_v22, %v1440_v22 }
 0x338   : > { %v1446_v26 = vsel %vm1426_vm0, %v1443_v25, 0.0 }
 0x339   : > { %1453 = vadd.xlane.f32.xlu1 %v1452_v24  ;;  %1447 = vadd.xlane.f32.xlu0 %v1446_v26  ;;  %v10440_v24 = vld [vmem:[#allocation4 + $0x2] ss:$0 sm:$0xff] }
 0x3c2   : > { %v1451_v41 = vpop.xlane.xlu1 %1450 }
 0x3c3   : > { %v1456_v42 = vmul.f32 0.03125, %v1451_v41  ;;  %v12255_v41 = vpack.c.bf16 %v2005_v38, %v2004_v37  ;;  %v10443_v37 = vld [vmem:[#allocation6 + $0x2] ss:$0 sm:$0xff]  ;;  %v10454_v38 = vld [vmem:[#allocation9 + $0x1] ss:$0 sm:$0xff] }
 0x3c5   : > { %v1459_v43 = vadd.f32 1e-06, %v1456_v42  ;;  %v2006_v42 = vld [vmem:[%s16427_s16 + $0x10] sm:$0xff] }
 0x3c6   : > { %v1454_v44 = vpop.xlane.xlu1 %1453  ;;  %v1448_v45 = vpop.xlane.xlu0 %1447 }
 0x3c7   : > { %12880 = vrsqrt.f32 %v1459_v43  ;;  %v1457_v46 = vmul.f32 0.03125, %v1454_v44  ;;  %v1455_v47 = vmul.f32 0.03125, %v1448_v45  ;;  %v2007_v43 = vld [vmem:[%s16427_s16 + $0x18] sm:$0xff]  ;;  %v2012_v45 = vld [vmem:[%s16427_s16 + $0x40] sm:$0xff] }
 0x3c8   : > { %v12258_v44 = vpack.c.bf16 %v2007_v43, %v2006_v42 }
 0x3c9   : > { %v1458_v48 = vadd.f32 1e-06, %v1455_v47  ;;  %v1460_v49 = vadd.f32 1e-06, %v1457_v46  ;;  %v2013_v46 = vld [vmem:[%s16427_s16 + $0x48] sm:$0xff] }
 0x3ca   : > { %v12267_v47 = vpack.c.bf16 %v2013_v46, %v2012_v45 }
 0x3cb   : > { %12882 = vrsqrt.f32 %v1458_v48  ;;  %v2014_v48 = vld [vmem:[%s16427_s16 + $0x50] sm:$0xff] }
 0x3cc   : > { %12884 = vrsqrt.f32 %v1460_v49  ;;  %v2015_v49 = vld [vmem:[%s16427_s16 + $0x58] sm:$0xff] }
 0x3d1   : > { %v12881_v50 = vpop.eup %12880 }
 0x3d2   : > { %v1465_v52 = vmul.f32 %v12881_v50, %v1441_v16  ;;  %v10437_v16 = vld [vmem:[#allocation2 + $0x2] ss:$0 sm:$0xff]  ;;  %v12270_v50 = vpack.c.bf16 %v2015_v49, %v2014_v48 }
 0x3d4   : > { %v1486_v56 = vmul.f32 %v10436_v51, %v1465_v52 }
 0x3d5   : > { %v12883_v58 = vpop.eup %12882 }
 0x3d6   : > { %v14652_v59 = vadd.f32 %v10439_v55, %v1486_v56  ;;  %v1464_v63 = vmul.f32 %v12883_v58, %v1440_v22  ;;  %v12885_v2 = vpop.eup %12884  ;;  %v1765_v22 = vld [vmem:[%s16426_s10 + $0x20] sm:$0xff] }
 0x3d7   : > { %v1466_v12 = vmul.f32 %v12885_v2, %v14624_v17  ;;  %v1772_v17 = vld [vmem:[%s16426_s10 + $0x58] sm:$0xff]  ;;  %v12243_v26 = vpack.c.bf16 %v1766_v23, %v1765_v22  ;;  %v10442_v2 = vld [vmem:[#allocation6 + $0x1] ss:$0 sm:$0xff]  ;;  %v10448_v22 = vld [vmem:[#allocation7 + $0x1] ss:$0 sm:$0xff] }
 0x3d8   : > { %11320 = vmatmul.mubr.msk.f32.vlgmr.msra.gmra.mrb[0].mxu1 %vm1426_vm0, %v14652_v59  ;;  %v1485_v5 = vmul.f32 %v10435_v60, %v1464_v63  ;;  %v12252_v25 = vpack.c.bf16 %v1772_v17, %v1771_v20  ;;  %v14728_v63 = vld [vmem:[%s16428_s8 + $0x2] ss:$0 sm:$0xff]  ;;  %v14758_v20 = vld [vmem:[%s16428_s8 + $0x6] ss:$0 sm:$0xff]  ;;  %v14764_v23 = vld [vmem:[%s16428_s8 + $0x7] ss:$0 sm:$0xff] }
 0x3d9   : > { %12238 = vmatpush3.bf16.msra.mxu1 %v12237_v57  ;;  %11341 = vmatprep.mubr.msk.f32.mxu1 %vm13997_vm1, %v13998_v39  ;;  %v1487_v21 = vmul.f32 %v10437_v16, %v1466_v12  ;;  %v10447_v57 = vld [vmem:[#allocation7] ss:$0 sm:$0xff]  ;;  %v14754_v16 = vld [vmem:[%s16428_s8 + $0x5] ss:$0 sm:$0xff] }
 0x3da   : > { %12239 = vmatprep.subr.bf16.mxu1 %v13996_v30  ;;  %v14666_v13 = vadd.f32 %v10438_v4, %v1485_v5  ;;  %v14737_v4 = vld [vmem:[%s16428_s8 + $0x1] ss:$0 sm:$0xff]  ;;  %v14740_v5 = vld [vmem:[%s16428_s8 + $0x3] ss:$0 sm:$0xff] }
 0x3db   : > { %v1508_v29 = vadd.f32 %v10440_v24, %v1487_v21  ;;  %v10449_v24 = vld [vmem:[#allocation7 + $0x2] ss:$0 sm:$0xff] }
 0x3dc   : > { %11309 = vmatmul.mubr.msk.f32.vlgmr.msra.gmra.mrb[0].mxu0 %vm1426_vm0, %v14666_v13 }
 0x3dd   : > { %12241 = vmatpush3.bf16.msra.mxu1 %v12240_v6  ;;  %12232 = vmatpush3.bf16.msra.mxu0 %v12231_v9 }
 0x3de   : > { %12248 = vmatprep.subr.bf16.mxu1 %v13996_v30  ;;  %12233 = vmatprep.subr.bf16.mxu0 %v13996_v30 }
 0x3df   : > { %11330 = vmatprep.mubr.msk.f32.mxu0 %vm13997_vm1, %v13998_v39 }
 0x3e0   : > { %11342 = vmatmul.mubr.msk.f32.vlgmr.msra.gmra.mrb[2].mxu1 %vm1426_vm0, %v14666_v13 }
 0x3e1   : > { %12250 = vmatpush3.bf16.msra.mxu1 %v12249_v18  ;;  %11363 = vmatprep.mubr.msk.f32.mxu1 %vm13997_vm1, %v13998_v39 }
 0x3e2   : > { %12235 = vmatpush3.bf16.msra.mxu0 %v12234_v19  ;;  %12251 = vmatprep.subr.bf16.mxu1 %v13996_v30 }
 0x3e3   : > { %12242 = vmatprep.subr.bf16.mxu0 %v13996_v30 }
 0x3e5   : > { %11331 = vmatmul.mubr.msk.f32.vlgmr.msra.gmra.mrb[2].mxu0 %vm1426_vm0, %v1508_v29  ;;  %12253 = vmatpush3.bf16.msra.mxu1 %v12252_v25 }
 0x3e6   : > { %12244 = vmatpush3.bf16.msra.mxu0 %v12243_v26  ;;  %12260 = vmatprep.subr.bf16.mxu1 %v13996_v30 }
 0x3e7   : > { %12245 = vmatprep.subr.bf16.mxu0 %v13996_v30  ;;  %11352 = vmatprep.mubr.msk.f32.mxu0 %vm13997_vm1, %v13998_v39 }
 0x3e8   : > { %11364 = vmatmul.mubr.msk.f32.vlgmr.msra.gmra.mrb[4].mxu1 %vm1426_vm0, %v1508_v29 }
 0x3e9   : > { %12262 = vmatpush3.bf16.msra.mxu1 %v12261_v33  ;;  %11385 = vmatprep.mubr.msk.f32.mxu1 %vm13997_vm1, %v13998_v39 }
 0x3ea   : > { %12247 = vmatpush3.bf16.msra.mxu0 %v12246_v34  ;;  %12263 = vmatprep.subr.bf16.mxu1 %v13996_v30 }
 0x3eb   : > { %12254 = vmatprep.subr.bf16.mxu0 %v13996_v30 }
 0x3ed   : > { %11353 = vmatmul.mubr.msk.f32.vlgmr.msra.gmra.mrb[4].mxu0 %vm1426_vm0, %v14652_v59  ;;  %12265 = vmatpush3.bf16.msra.mxu1 %v12264_v40 }
 0x3ee   : > { %12256 = vmatpush3.bf16.msra.mxu0 %v12255_v41  ;;  %11374 = vmatprep.mubr.msk.f32.mxu0 %vm13997_vm1, %v13998_v39 }
 0x3ef   : > { %12257 = vmatprep.subr.bf16.mxu0 %v13996_v30 }
 0x3f0   : > { %11386 = vmatmul.mubr.msk.f32.vlgmr.msra.gmra.mrb[6].mxu1 %vm1426_vm0, %v14652_v59 }
 0x3f2   : > { %12259 = vmatpush3.bf16.msra.mxu0 %v12258_v44 }
 0x3f3   : > { %12266 = vmatprep.subr.bf16.mxu0 %v13996_v30 }
 0x3f5   : > { %11375 = vmatmul.mubr.msk.f32.vlgmr.msra.gmra.mrb[6].mxu0 %vm1426_vm0, %v14666_v13 }
 0x3f6   : > { %12268 = vmatpush3.bf16.msra.mxu0 %v12267_v47  ;;  %11396 = vmatprep.mubr.msk.f32.mxu0 %vm13997_vm1, %v13998_v39 }
 0x3f7   : > { %12269 = vmatprep.subr.bf16.mxu0 %v13996_v30 }
 0x3fa   : > { %12271 = vmatpush3.bf16.msra.mxu0 %v12270_v50 }
 0x3fd   : > { %11397 = vmatmul.mubr.msk.f32.vlgmr.msra.gmra.mrb[8].mxu0 %vm1426_vm0, %v1508_v29 }
 0x4ab   : > { %v1684_v51 = vpop.f32.mrb[0].mxu1 }
 0x4ac   : > { %v11321_v52 = vpop.f32.mrb[1].mxu1  ;;  %v1685_v12 = vadd.f32 %v10442_v2, %v1684_v51 }
 0x4ae   : > { %v2677_v17 = vmul.f32 0.5, %v1685_v12 }
 0x4af   : > { %v1611_v54 = vpop.f32.mrb[0].mxu0 }
 0x4b0   : > { %v1612_v55 = vadd.f32 %v10441_v53, %v1611_v54  ;;  %v11310_v56 = vpop.f32.mrb[1].mxu0  ;;  %v2678_v29 = vmul.f32 %v14725_v62, %v2677_v17  ;;  %v2679_v34 = vmul.f32 %v14737_v4, %v2677_v17  ;;  %v2680_v36 = vmul.f32 %v14728_v63, %v2677_v17 }
 0x4b1   : > { %v2681_v43 = vmul.f32 %v14740_v5, %v2677_v17  ;;  %v2682_v45 = vmul.f32 %v14747_v11, %v2677_v17  ;;  %v2683_v47 = vmul.f32 %v14754_v16, %v2677_v17  ;;  %v2684_v49 = vmul.f32 %v14758_v20, %v2677_v17 }
 0x4b2   : > { %v2247_v58 = vmul.f32 0.5, %v1612_v55  ;;  %v2685_v52 = vmul.f32 %v14764_v23, %v2677_v17 }
 0x4b3   : > { %v1860_v59 = vpop.f32.mrb[2].mxu1 }
 0x4b4   : > { %v1861_v60 = vadd.f32 %v10447_v57, %v1860_v59  ;;  %v11343_v61 = vpop.f32.mrb[3].mxu1  ;;  %v2296_v0 = vmul.f32 %v14725_v62, %v2247_v58  ;;  %v2298_v1 = vmul.f32 %v14728_v63, %v2247_v58  ;;  %v2297_v9 = vmul.f32 %v14737_v4, %v2247_v58 }
 0x4b5   : > { %v2299_v10 = vmul.f32 %v14740_v5, %v2247_v58  ;;  %v2300_v14 = vmul.f32 %v14747_v11, %v2247_v58  ;;  %v2301_v19 = vmul.f32 %v14754_v16, %v2247_v58  ;;  %v2302_v21 = vmul.f32 %v14758_v20, %v2247_v58 }
 0x4b6   : > { %11399 = vmatprep.subr.msk.mxu0 %vm1426_vm0, %v1861_v60  ;;  %12596 = vmatprep.subr.msk.mxu1 %vm1426_vm0, %v1861_v60  ;;  %v2303_v26 = vmul.f32 %v14764_v23, %v2247_v58 }
 0x4b7   : > { %11400 = vmatpush3.xpose.msk.msra.mxu0 %vm1426_vm0, %v1861_v60  ;;  %12597 = vmatpush3.xpose.msk.msra.mxu1 %vm1426_vm0, %v1861_v60 }
 0x4b8   : > { %v1757_v6 = vpop.f32.mrb[2].mxu0  ;;  %11401 = vmatprep.mubr.msk.f32.mxu0 %vm1426_vm0, %v2296_v0  ;;  %11404 = vmatprep.mubr.msk.f32.mxu1 %vm1426_vm0, %v2298_v1 }
 0x4b9   : > { %v11332_v13 = vpop.f32.mrb[3].mxu0  ;;  %v1758_v44 = vadd.f32 %v10443_v37, %v1757_v6 }
 0x4ba   : > { %11402 = vmatmul.mubr.msk.f32.vlgmr.msra.gmra.mrb[10].mxu0 %vm1426_vm0, %v2297_v9  ;;  %11405 = vmatmul.mubr.msk.f32.vlgmr.msra.gmra.mrb[8].mxu1 %vm1426_vm0, %v2299_v10 }
 0x4bb   : > { %v2000_v15 = vpop.f32.mrb[4].mxu1  ;;  %11407 = vmatprep.mubr.msk.f32.mxu1 %vm1426_vm0, %v2300_v14  ;;  %v3058_v48 = vmul.f32 0.5, %v1758_v44 }
 0x4bc   : > { %v11365_v18 = vpop.f32.mrb[5].mxu1  ;;  %v2001_v31 = vadd.f32 %v10449_v24, %v2000_v15 }
 0x4bd   : > { %v3059_v53 = vmul.f32 %v14725_v62, %v3058_v48  ;;  %v3060_v54 = vmul.f32 %v14737_v4, %v3058_v48  ;;  %v3061_v55 = vmul.f32 %v14728_v63, %v3058_v48  ;;  %v3062_v56 = vmul.f32 %v14740_v5, %v3058_v48 }
 0x4be   : > { %11408 = vmatmul.mubr.msk.f32.gmra.mrb[10].mxu1 %vm1426_vm0, %v2301_v19  ;;  %v3063_v57 = vmul.f32 %v14747_v11, %v3058_v48  ;;  %v3064_v58 = vmul.f32 %v14754_v16, %v3058_v48  ;;  %v3065_v59 = vmul.f32 %v14758_v20, %v3058_v48  ;;  %v3066_v60 = vmul.f32 %v14764_v23, %v3058_v48 }
 0x4bf   : > { %11410 = vmatprep.mubr.msk.f32.mxu1 %vm1426_vm0, %v2302_v21 }
 0x4c0   : > { %v1930_v25 = vpop.f32.mrb[4].mxu0 }
 0x4c1   : > { %v1931_v27 = vadd.f32 %v10448_v22, %v1930_v25  ;;  %v11354_v28 = vpop.f32.mrb[5].mxu0 }
 0x4c2   : > { %11411 = vmatmul.mubr.msk.f32.gmra.mrb[12].mxu1 %vm1426_vm0, %v2303_v26 }
 0x4c3   : > { %11427 = vmatprep.subr.msk.mxu1 %vm1426_vm0, %v1931_v27  ;;  %v2173_v32 = vpop.f32.mrb[6].mxu1  ;;  %11429 = vmatprep.mubr.msk.f32.mxu1 %vm1426_vm0, %v2678_v29 }
 0x4c4   : > { %11428 = vmatpush3.xpose.msk.msra.mxu1 %vm1426_vm0, %v1931_v27  ;;  %v11387_v33 = vpop.f32.mrb[7].mxu1  ;;  %v14781_v46 = vadd.f32 %v10454_v38, %v2173_v32 }
 0x4c5   : > { %11455 = vmatprep.subr.msk.mxu1 %vm1426_vm0, %v2001_v31 }
 0x4c7   : > { %11430 = vmatmul.mubr.msk.f32.vlgmr.msra.gmra.mrb[14].mxu1 %vm1426_vm0, %v2679_v34 }
 0x4c8   : > { %v2103_v40 = vpop.f32.mrb[6].mxu0  ;;  %11432 = vmatprep.mubr.msk.f32.mxu1 %vm1426_vm0, %v2680_v36  ;;  %11456 = vmatpush3.xpose.msk.msra.mxu1 %vm1426_vm0, %v2001_v31 }
 0x4c9   : > { %v2104_v41 = vadd.f32 %v10453_v35, %v2103_v40  ;;  %v11376_v42 = vpop.f32.mrb[7].mxu0  ;;  %12272 = vmatprep.subr.bf16.mxu1 %v13996_v30 }
 0x4cb   : > { %11413 = vmatprep.subr.mxu0 %v2104_v41  ;;  %11433 = vmatmul.mubr.msk.f32.gmra.mrb[16].mxu1 %vm1426_vm0, %v2681_v43 }
 0x4cc   : > { %11414 = vmatpush3.msra.mxu0 %v2104_v41  ;;  %11435 = vmatprep.mubr.msk.f32.mxu1 %vm1426_vm0, %v2682_v45 }
 0x4cd   : > { %11441 = vmatprep.subr.mxu0 %v14781_v46 }
 0x4cf   : > { %11436 = vmatmul.mubr.msk.f32.gmra.mrb[18].mxu1 %vm1426_vm0, %v2683_v47 }
 0x4d0   : > { %v14789_v50 = vpop.f32.mrb[8].mxu0  ;;  %11438 = vmatprep.mubr.msk.f32.mxu1 %vm1426_vm0, %v2684_v49 }
 0x4d1   : > { %v11398_v51 = vpop.f32.mrb[9].mxu0 }
 0x4d3   : > { %11439 = vmatmul.mubr.msk.f32.gmra.mrb[20].mxu1 %vm1426_vm0, %v2685_v52 }
 0x4d4   : > { %11457 = vmatprep.mubr.msk.f32.mxu1 %vm1426_vm0, %v3059_v53 }
 0x4d7   : > { %11458 = vmatmul.mubr.msk.f32.vlgmr.msra.gmra.mrb[22].mxu1 %vm1426_vm0, %v3060_v54 }
 0x4d8   : > { %11460 = vmatprep.mubr.msk.f32.mxu1 %vm1426_vm0, %v3061_v55 }
 0x4db   : > { %11461 = vmatmul.mubr.msk.f32.gmra.mrb[24].mxu1 %vm1426_vm0, %v3062_v56 }
 0x4dc   : > { %11463 = vmatprep.mubr.msk.f32.mxu1 %vm1426_vm0, %v3063_v57 }
 0x4df   : > { %11464 = vmatmul.mubr.msk.f32.gmra.mrb[26].mxu1 %vm1426_vm0, %v3064_v58 }
 0x4e0   : > { %11466 = vmatprep.mubr.msk.f32.mxu1 %vm1426_vm0, %v3065_v59 }
 0x4e3   : > { %11467 = vmatmul.mubr.msk.f32.gmra.mrb[28].mxu1 %vm1426_vm0, %v3066_v60 }
 0x4e4   : > { %11491 = vmatprep.mubr.msk.f32.mxu1 %vm13997_vm1, %v13998_v39 }
 0x58d   : > { %v14812_v61 = vpop.f32.mrb[10].mxu0  ;;  %v14814_v0 = vpop.f32.mrb[8].mxu1 }
 0x58e   : > { %v14816_v1 = vpop.f32.mrb[11].mxu0  ;;  %v14818_v2 = vpop.f32.mrb[9].mxu1  ;;  %v2440_v6 = vsel %vm2436_vm2, %v14812_v61, -inf  ;;  %v2446_v13 = vsel %vm2436_vm2, %v14814_v0, -inf }
 0x58f   : > { %2441 = vmax.xlane.f32.xlu1 %v2440_v6  ;;  %v2437_v9 = vsel %vm2436_vm2, %v14816_v1, -inf  ;;  %v2443_v14 = vsel %vm2436_vm2, %v14818_v2, -inf }
 0x590   : > { %2438 = vmax.xlane.f32.xlu0 %v2437_v9 }
 0x591   : > { %v14824_v10 = vpop.f32.mrb[10].mxu1 }
 0x592   : > { %v14826_v12 = vpop.f32.mrb[11].mxu1  ;;  %v2452_v19 = vsel %vm2436_vm2, %v14824_v10, -inf }
 0x593   : > { %2447 = vmax.xlane.f32.xlu1 %v2446_v13  ;;  %v2449_v17 = vsel %vm2436_vm2, %v14826_v12, -inf }
 0x594   : > { %2444 = vmax.xlane.f32.xlu0 %v2443_v14 }
 0x595   : > { %v14832_v15 = vpop.f32.mrb[12].mxu1 }
 0x596   : > { %v14834_v18 = vpop.f32.mrb[13].mxu1  ;;  %v2458_v22 = vsel %vm2436_vm2, %v14832_v15, -inf }
 0x597   : > { %2453 = vmax.xlane.f32.xlu1 %v2452_v19  ;;  %v2455_v25 = vsel %vm2436_vm2, %v14834_v18, -inf }
 0x598   : > { %2450 = vmax.xlane.f32.xlu0 %v2449_v17 }
 0x59a   : > { %v14840_v21 = vpop.f32.mrb[14].mxu1 }
 0x59b   : > { %v14844_v24 = vpop.f32.mrb[15].mxu1  ;;  %2459 = vmax.xlane.f32.xlu1 %v2458_v22  ;;  %v2821_v27 = vsel %vm2436_vm2, %v14840_v21, -inf }
 0x59c   : > { %2456 = vmax.xlane.f32.xlu0 %v2455_v25  ;;  %v2818_v29 = vsel %vm2436_vm2, %v14844_v24, -inf }
 0x59e   : > { %v14848_v26 = vpop.f32.mrb[16].mxu1 }
 0x59f   : > { %v14852_v28 = vpop.f32.mrb[17].mxu1  ;;  %2822 = vmax.xlane.f32.xlu1 %v2821_v27  ;;  %v2827_v32 = vsel %vm2436_vm2, %v14848_v26, -inf }
 0x5a0   : > { %2819 = vmax.xlane.f32.xlu0 %v2818_v29  ;;  %v2824_v34 = vsel %vm2436_vm2, %v14852_v28, -inf }
 0x5a2   : > { %v14856_v31 = vpop.f32.mrb[18].mxu1 }
 0x5a3   : > { %v14860_v33 = vpop.f32.mrb[19].mxu1  ;;  %2828 = vmax.xlane.f32.xlu1 %v2827_v32  ;;  %v2833_v36 = vsel %vm2436_vm2, %v14856_v31, -inf }
 0x5a4   : > { %2825 = vmax.xlane.f32.xlu0 %v2824_v34  ;;  %v2830_v38 = vsel %vm2436_vm2, %v14860_v33, -inf }
 0x5a6   : > { %v14864_v35 = vpop.f32.mrb[20].mxu1 }
 0x5a7   : > { %v14868_v37 = vpop.f32.mrb[21].mxu1  ;;  %2834 = vmax.xlane.f32.xlu1 %v2833_v36  ;;  %v2839_v41 = vsel %vm2436_vm2, %v14864_v35, -inf }
 0x5a8   : > { %2831 = vmax.xlane.f32.xlu0 %v2830_v38  ;;  %v2836_v43 = vsel %vm2436_vm2, %v14868_v37, -inf }
 0x5aa   : > { %v14872_v40 = vpop.f32.mrb[22].mxu1 }
 0x5ab   : > { %v14876_v42 = vpop.f32.mrb[23].mxu1  ;;  %2840 = vmax.xlane.f32.xlu1 %v2839_v41  ;;  %v3202_v45 = vsel %vm2436_vm2, %v14872_v40, -inf }
 0x5ac   : > { %2837 = vmax.xlane.f32.xlu0 %v2836_v43  ;;  %v3199_v48 = vsel %vm2436_vm2, %v14876_v42, -inf }
 0x5ae   : > { %v14880_v44 = vpop.f32.mrb[24].mxu1 }
 0x5af   : > { %v14884_v47 = vpop.f32.mrb[25].mxu1  ;;  %3203 = vmax.xlane.f32.xlu1 %v3202_v45  ;;  %v3208_v51 = vsel %vm2436_vm2, %v14880_v44, -inf }
 0x5b0   : > { %3200 = vmax.xlane.f32.xlu0 %v3199_v48  ;;  %v3205_v53 = vsel %vm2436_vm2, %v14884_v47, -inf }
 0x5b2   : > { %v14888_v49 = vpop.f32.mrb[26].mxu1 }
 0x5b3   : > { %v14892_v52 = vpop.f32.mrb[27].mxu1  ;;  %3209 = vmax.xlane.f32.xlu1 %v3208_v51  ;;  %v3214_v55 = vsel %vm2436_vm2, %v14888_v49, -inf }
 0x5b4   : > { %3206 = vmax.xlane.f32.xlu0 %v3205_v53  ;;  %v3211_v57 = vsel %vm2436_vm2, %v14892_v52, -inf }
 0x5b6   : > { %v14896_v54 = vpop.f32.mrb[28].mxu1 }
 0x5b7   : > { %v14900_v56 = vpop.f32.mrb[29].mxu1  ;;  %3215 = vmax.xlane.f32.xlu1 %v3214_v55  ;;  %v3220_v58 = vsel %vm2436_vm2, %v14896_v54, -inf }
 0x5b8   : > { %3212 = vmax.xlane.f32.xlu0 %v3211_v57  ;;  %v3217_v59 = vsel %vm2436_vm2, %v14900_v56, -inf }
 0x5bb   : > { %3221 = vmax.xlane.f32.xlu1 %v3220_v58 }
 0x5bc   : > { %3218 = vmax.xlane.f32.xlu0 %v3217_v59 }
 0x61c   : > { %v2442_v60 = vpop.xlane.xlu1 %2441 }
 0x61d   : > { %v2462_v6 = vsub.f32 %v14812_v61, %v2442_v60  ;;  %v2439_v9 = vpop.xlane.xlu0 %2438 }
 0x61e   : > { %v2461_v13 = vsub.f32 %v14816_v1, %v2439_v9 }
 0x61f   : > { %v2471_v14 = vmul.f32 1.442695, %v2462_v6 }
 0x620   : > { %v2469_v19 = vmul.f32 1.442695, %v2461_v13  ;;  %v2448_v17 = vpop.xlane.xlu1 %2447 }
 0x621   : > { %12886 = vpow2.f32 %v2471_v14  ;;  %v2464_v22 = vsub.f32 %v14814_v0, %v2448_v17  ;;  %v2445_v25 = vpop.xlane.xlu0 %2444 }
 0x622   : > { %12888 = vpow2.f32 %v2469_v19  ;;  %v2463_v27 = vsub.f32 %v14818_v2, %v2445_v25 }
 0x623   : > { %v2475_v29 = vmul.f32 1.442695, %v2464_v22 }
 0x624   : > { %v2473_v32 = vmul.f32 1.442695, %v2463_v27  ;;  %v2454_v34 = vpop.xlane.xlu1 %2453 }
 0x625   : > { %12890 = vpow2.f32 %v2475_v29  ;;  %v2466_v36 = vsub.f32 %v14824_v10, %v2454_v34  ;;  %v2451_v61 = vpop.xlane.xlu0 %2450 }
 0x626   : > { %12892 = vpow2.f32 %v2473_v32  ;;  %v2465_v1 = vsub.f32 %v14826_v12, %v2451_v61 }
 0x627   : > { %v2479_v38 = vmul.f32 1.442695, %v2466_v36 }
 0x628   : > { %v2477_v41 = vmul.f32 1.442695, %v2465_v1  ;;  %v2460_v43 = vpop.xlane.xlu1 %2459 }
 0x629   : > { %12894 = vpow2.f32 %v2479_v38  ;;  %v2468_v0 = vsub.f32 %v14832_v15, %v2460_v43  ;;  %v2457_v45 = vpop.xlane.xlu0 %2456 }
 0x62a   : > { %12896 = vpow2.f32 %v2477_v41  ;;  %v2467_v2 = vsub.f32 %v14834_v18, %v2457_v45 }
 0x62b   : > { %v14916_v48 = vpop.eup %12886  ;;  %v2483_v51 = vmul.f32 1.442695, %v2468_v0 }
 0x62c   : > { %v14918_v53 = vpop.eup %12888  ;;  %v2481_v10 = vmul.f32 1.442695, %v2467_v2  ;;  %v2823_v55 = vpop.xlane.xlu1 %2822  ;;  %v2488_v12 = vsel %vm2436_vm2, %v14916_v48, 0.0 }
 0x62d   : > { %12898 = vpow2.f32 %v2483_v51  ;;  %v2843_v57 = vsub.f32 %v14840_v21, %v2823_v55  ;;  %2489 = vadd.xlane.f32.xlu1 %v2488_v12  ;;  %v2820_v58 = vpop.xlane.xlu0 %2819  ;;  %v2485_v15 = vsel %vm2436_vm2, %v14918_v53, 0.0 }
 0x62e   : > { %12900 = vpow2.f32 %v2481_v10  ;;  %v2842_v18 = vsub.f32 %v14844_v24, %v2820_v58  ;;  %2486 = vadd.xlane.f32.xlu0 %v2485_v15 }
 0x62f   : > { %v14926_v59 = vpop.eup %12890  ;;  %v2852_v60 = vmul.f32 1.442695, %v2843_v57 }
 0x630   : > { %v14928_v6 = vpop.eup %12892  ;;  %v2850_v9 = vmul.f32 1.442695, %v2842_v18  ;;  %v2829_v13 = vpop.xlane.xlu1 %2828  ;;  %v2494_v14 = vsel %vm2436_vm2, %v14926_v59, 0.0 }
 0x631   : > { %12902 = vpow2.f32 %v2852_v60  ;;  %v2845_v21 = vsub.f32 %v14848_v26, %v2829_v13  ;;  %2495 = vadd.xlane.f32.xlu1 %v2494_v14  ;;  %v2826_v19 = vpop.xlane.xlu0 %2825  ;;  %v2491_v17 = vsel %vm2436_vm2, %v14928_v6, 0.0 }
 0x632   : > { %12904 = vpow2.f32 %v2850_v9  ;;  %v2844_v24 = vsub.f32 %v14852_v28, %v2826_v19  ;;  %2492 = vadd.xlane.f32.xlu0 %v2491_v17 }
 0x633   : > { %v14936_v22 = vpop.eup %12894  ;;  %v2856_v25 = vmul.f32 1.442695, %v2845_v21 }
 0x634   : > { %v14938_v27 = vpop.eup %12896  ;;  %v2854_v29 = vmul.f32 1.442695, %v2844_v24  ;;  %v2835_v32 = vpop.xlane.xlu1 %2834  ;;  %v2500_v34 = vsel %vm2436_vm2, %v14936_v22, 0.0 }
 0x635   : > { %12906 = vpow2.f32 %v2856_v25  ;;  %v2847_v26 = vsub.f32 %v14856_v31, %v2835_v32  ;;  %2501 = vadd.xlane.f32.xlu1 %v2500_v34  ;;  %v2832_v36 = vpop.xlane.xlu0 %2831  ;;  %v2497_v61 = vsel %vm2436_vm2, %v14938_v27, 0.0 }
 0x636   : > { %12908 = vpow2.f32 %v2854_v29  ;;  %v2846_v28 = vsub.f32 %v14860_v33, %v2832_v36  ;;  %2498 = vadd.xlane.f32.xlu0 %v2497_v61 }
 0x637   : > { %v14946_v1 = vpop.eup %12898  ;;  %v2860_v38 = vmul.f32 1.442695, %v2847_v26 }
 0x638   : > { %v14948_v41 = vpop.eup %12900  ;;  %v2858_v43 = vmul.f32 1.442695, %v2846_v28  ;;  %v2841_v0 = vpop.xlane.xlu1 %2840  ;;  %v2506_v45 = vsel %vm2436_vm2, %v14946_v1, 0.0 }
 0x639   : > { %12910 = vpow2.f32 %v2860_v38  ;;  %v2849_v31 = vsub.f32 %v14864_v35, %v2841_v0  ;;  %2507 = vadd.xlane.f32.xlu1 %v2506_v45  ;;  %v2838_v2 = vpop.xlane.xlu0 %2837  ;;  %v2503_v51 = vsel %vm2436_vm2, %v14948_v41, 0.0 }
 0x63a   : > { %12912 = vpow2.f32 %v2858_v43  ;;  %v2848_v33 = vsub.f32 %v14868_v37, %v2838_v2  ;;  %2504 = vadd.xlane.f32.xlu0 %v2503_v51 }
 0x63b   : > { %v14956_v10 = vpop.eup %12902  ;;  %v2864_v55 = vmul.f32 1.442695, %v2849_v31 }
 0x63c   : > { %v14958_v12 = vpop.eup %12904  ;;  %v2862_v57 = vmul.f32 1.442695, %v2848_v33  ;;  %v3204_v58 = vpop.xlane.xlu1 %3203  ;;  %v2869_v15 = vsel %vm2436_vm2, %v14956_v10, 0.0 }
 0x63d   : > { %12914 = vpow2.f32 %v2864_v55  ;;  %v3224_v35 = vsub.f32 %v14872_v40, %v3204_v58  ;;  %2870 = vadd.xlane.f32.xlu1 %v2869_v15  ;;  %v3201_v18 = vpop.xlane.xlu0 %3200  ;;  %v2866_v60 = vsel %vm2436_vm2, %v14958_v12, 0.0 }
 0x63e   : > { %12916 = vpow2.f32 %v2862_v57  ;;  %v3223_v37 = vsub.f32 %v14876_v42, %v3201_v18  ;;  %2867 = vadd.xlane.f32.xlu0 %v2866_v60 }
 0x63f   : > { %v14966_v9 = vpop.eup %12906  ;;  %v3233_v13 = vmul.f32 1.442695, %v3224_v35 }
 0x640   : > { %v14968_v14 = vpop.eup %12908  ;;  %v3231_v21 = vmul.f32 1.442695, %v3223_v37  ;;  %v3210_v19 = vpop.xlane.xlu1 %3209  ;;  %v2875_v17 = vsel %vm2436_vm2, %v14966_v9, 0.0 }
 0x641   : > { %12918 = vpow2.f32 %v3233_v13  ;;  %v3226_v40 = vsub.f32 %v14880_v44, %v3210_v19  ;;  %2876 = vadd.xlane.f32.xlu1 %v2875_v17  ;;  %v3207_v24 = vpop.xlane.xlu0 %3206  ;;  %v2872_v25 = vsel %vm2436_vm2, %v14968_v14, 0.0 }
 0x642   : > { %12920 = vpow2.f32 %v3231_v21  ;;  %v3225_v42 = vsub.f32 %v14884_v47, %v3207_v24  ;;  %2873 = vadd.xlane.f32.xlu0 %v2872_v25 }
 0x643   : > { %v14976_v29 = vpop.eup %12910  ;;  %v3237_v32 = vmul.f32 1.442695, %v3226_v40 }
 0x644   : > { %v14978_v34 = vpop.eup %12912  ;;  %v3235_v26 = vmul.f32 1.442695, %v3225_v42  ;;  %v3216_v36 = vpop.xlane.xlu1 %3215  ;;  %v2881_v61 = vsel %vm2436_vm2, %v14976_v29, 0.0 }
 0x645   : > { %12922 = vpow2.f32 %v3237_v32  ;;  %v3228_v44 = vsub.f32 %v14888_v49, %v3216_v36  ;;  %2882 = vadd.xlane.f32.xlu1 %v2881_v61  ;;  %v3213_v28 = vpop.xlane.xlu0 %3212  ;;  %v2878_v38 = vsel %vm2436_vm2, %v14978_v34, 0.0 }
 0x646   : > { %12924 = vpow2.f32 %v3235_v26  ;;  %v3227_v47 = vsub.f32 %v14892_v52, %v3213_v28  ;;  %2879 = vadd.xlane.f32.xlu0 %v2878_v38 }
 0x647   : > { %v14986_v43 = vpop.eup %12914  ;;  %v3241_v0 = vmul.f32 1.442695, %v3228_v44 }
 0x648   : > { %v14988_v45 = vpop.eup %12916  ;;  %v3239_v31 = vmul.f32 1.442695, %v3227_v47  ;;  %v3222_v2 = vpop.xlane.xlu1 %3221  ;;  %v2887_v51 = vsel %vm2436_vm2, %v14986_v43, 0.0 }
 0x649   : > { %12926 = vpow2.f32 %v3241_v0  ;;  %v3230_v49 = vsub.f32 %v14896_v54, %v3222_v2  ;;  %2888 = vadd.xlane.f32.xlu1 %v2887_v51  ;;  %v3219_v33 = vpop.xlane.xlu0 %3218  ;;  %v2884_v55 = vsel %vm2436_vm2, %v14988_v45, 0.0  ;;  %v10455_v2 = vld [vmem:[#allocation9 + $0x2] ss:$0 sm:$0xff] }
 0x64a   : > { %12928 = vpow2.f32 %v3239_v31  ;;  %v3229_v52 = vsub.f32 %v14900_v56, %v3219_v33  ;;  %2885 = vadd.xlane.f32.xlu0 %v2884_v55 }
 0x64b   : > { %v14996_v57 = vpop.eup %12918  ;;  %v3245_v58 = vmul.f32 1.442695, %v3230_v49 }
 0x64c   : > { %v14998_v15 = vpop.eup %12920  ;;  %v3243_v35 = vmul.f32 1.442695, %v3229_v52  ;;  %v3250_v18 = vsel %vm2436_vm2, %v14996_v57, 0.0 }
 0x64d   : > { %12930 = vpow2.f32 %v3245_v58  ;;  %3251 = vadd.xlane.f32.xlu1 %v3250_v18  ;;  %v3247_v54 = vsel %vm2436_vm2, %v14998_v15, 0.0  ;;  %v2244_v58 = vadd.f32 %v10455_v2, %v14789_v50 }
 0x64e   : > { %12932 = vpow2.f32 %v3243_v35  ;;  %3248 = vadd.xlane.f32.xlu0 %v3247_v54 }
 0x64f   : > { %v15004_v60 = vpop.eup %12922 }
 0x650   : > { %v15006_v56 = vpop.eup %12924  ;;  %v3256_v37 = vsel %vm2436_vm2, %v15004_v60, 0.0 }
 0x651   : > { %3257 = vadd.xlane.f32.xlu1 %v3256_v37  ;;  %v3253_v13 = vsel %vm2436_vm2, %v15006_v56, 0.0 }
 0x652   : > { %3254 = vadd.xlane.f32.xlu0 %v3253_v13 }
 0x653   : > { %v15012_v21 = vpop.eup %12926 }
 0x654   : > { %v15014_v19 = vpop.eup %12928  ;;  %v3262_v17 = vsel %vm2436_vm2, %v15012_v21, 0.0 }
 0x655   : > { %3263 = vadd.xlane.f32.xlu1 %v3262_v17  ;;  %v3259_v40 = vsel %vm2436_vm2, %v15014_v19, 0.0 }
 0x656   : > { %3260 = vadd.xlane.f32.xlu0 %v3259_v40 }
 0x657   : > { %v15020_v24 = vpop.eup %12930 }
 0x658   : > { %v15022_v25 = vpop.eup %12932  ;;  %v3268_v42 = vsel %vm2436_vm2, %v15020_v24, 0.0 }
 0x659   : > { %3269 = vadd.xlane.f32.xlu1 %v3268_v42  ;;  %v3265_v32 = vsel %vm2436_vm2, %v15022_v25, 0.0 }
 0x65a   : > { %3266 = vadd.xlane.f32.xlu0 %v3265_v32 }
 0x6ba   : > { %v2490_v26 = vpop.xlane.xlu1 %2489 }
 0x6bb   : > { %12934 = vrcp.f32 %v2490_v26  ;;  %v2487_v36 = vpop.xlane.xlu0 %2486 }
 0x6bc   : > { %12936 = vrcp.f32 %v2487_v36 }
 0x6be   : > { %v2496_v61 = vpop.xlane.xlu1 %2495 }
 0x6bf   : > { %12938 = vrcp.f32 %v2496_v61  ;;  %v2493_v44 = vpop.xlane.xlu0 %2492 }
 0x6c0   : > { %12940 = vrcp.f32 %v2493_v44 }
 0x6c2   : > { %v2502_v28 = vpop.xlane.xlu1 %2501 }
 0x6c3   : > { %12942 = vrcp.f32 %v2502_v28  ;;  %v2499_v38 = vpop.xlane.xlu0 %2498 }
 0x6c4   : > { %12944 = vrcp.f32 %v2499_v38 }
 0x6c5   : > { %v12935_v47 = vpop.eup %12934 }
 0x6c6   : > { %v12937_v0 = vpop.eup %12936  ;;  %v2508_v31 = vpop.xlane.xlu1 %2507  ;;  %v2512_v33 = vmul.f32 %v12935_v47, %v14916_v48 }
 0x6c7   : > { %12946 = vrcp.f32 %v2508_v31  ;;  %v2505_v51 = vpop.xlane.xlu0 %2504  ;;  %v2510_v49 = vmul.f32 %v12937_v0, %v14918_v53 }
 0x6c8   : > { %12948 = vrcp.f32 %v2505_v51 }
 0x6c9   : > { %v12939_v55 = vpop.eup %12938  ;;  %11415 = vmatprep.mubr.msk.f32.mxu0 %vm2436_vm2, %v2510_v49 }
 0x6ca   : > { %v12941_v52 = vpop.eup %12940  ;;  %v2871_v35 = vpop.xlane.xlu1 %2870  ;;  %11416 = vmatmul.mubr.msk.f32.vlgmr.msra.gmra.mrb[12].mxu0 %vm2436_vm2, %v2512_v33  ;;  %v2516_v53 = vmul.f32 %v12939_v55, %v14926_v59 }
 0x6cb   : > { %12950 = vrcp.f32 %v2871_v35  ;;  %11442 = vmatpush3.msra.mxu0 %v14781_v46  ;;  %v2868_v18 = vpop.xlane.xlu0 %2867  ;;  %v2514_v54 = vmul.f32 %v12941_v52, %v14928_v6 }
 0x6cc   : > { %11469 = vmatprep.subr.mxu0 %v2244_v58  ;;  %12952 = vrcp.f32 %v2868_v18 }
 0x6cd   : > { %v12943_v48 = vpop.eup %12942  ;;  %11418 = vmatprep.mubr.msk.f32.mxu0 %vm2436_vm2, %v2514_v54 }
 0x6ce   : > { %v12945_v37 = vpop.eup %12944  ;;  %v2877_v13 = vpop.xlane.xlu1 %2876  ;;  %11419 = vmatmul.mubr.msk.f32.gmra.mrb[14].mxu0 %vm2436_vm2, %v2516_v53  ;;  %v2520_v46 = vmul.f32 %v12943_v48, %v14936_v22 }
 0x6cf   : > { %12954 = vrcp.f32 %v2877_v13  ;;  %v2874_v50 = vpop.xlane.xlu0 %2873  ;;  %v2518_v17 = vmul.f32 %v12945_v37, %v14938_v27 }
 0x6d0   : > { %12956 = vrcp.f32 %v2874_v50 }
 0x6d1   : > { %v12947_v40 = vpop.eup %12946  ;;  %11421 = vmatprep.mubr.msk.f32.mxu0 %vm2436_vm2, %v2518_v17 }
 0x6d2   : > { %v12949_v6 = vpop.eup %12948  ;;  %v2883_v42 = vpop.xlane.xlu1 %2882  ;;  %11422 = vmatmul.mubr.msk.f32.gmra.mrb[16].mxu0 %vm2436_vm2, %v2520_v46  ;;  %v2524_v26 = vmul.f32 %v12947_v40, %v14946_v1 }
 0x6d3   : > { %12958 = vrcp.f32 %v2883_v42  ;;  %v2880_v59 = vpop.xlane.xlu0 %2879  ;;  %v2522_v32 = vmul.f32 %v12949_v6, %v14948_v41  ;;  %v3441_v42 = vld [vmem:[%s16429_s5 + $0x10] sm:$0xff] }
 0x6d4   : > { %12960 = vrcp.f32 %v2880_v59 }
 0x6d5   : > { %v12951_v36 = vpop.eup %12950  ;;  %11424 = vmatprep.mubr.msk.f32.mxu0 %vm2436_vm2, %v2522_v32  ;;  %v3444_v32 = vld [vmem:[%s16429_s5 + $0x28] sm:$0xff] }
 0x6d6   : > { %v12953_v27 = vpop.eup %12952  ;;  %v2889_v61 = vpop.xlane.xlu1 %2888  ;;  %11425 = vmatmul.mubr.msk.f32.gmra.mrb[18].mxu0 %vm2436_vm2, %v2524_v26  ;;  %v2893_v28 = vmul.f32 %v12951_v36, %v14956_v10  ;;  %v3445_v36 = vld [vmem:[%s16429_s5 + $0x30] sm:$0xff] }
 0x6d7   : > { %12962 = vrcp.f32 %v2889_v61  ;;  %v2886_v22 = vpop.xlane.xlu0 %2885  ;;  %v2891_v44 = vmul.f32 %v12953_v27, %v14958_v12  ;;  %v3446_v27 = vld [vmem:[%s16429_s5 + $0x38] sm:$0xff] }
 0x6d8   : > { %12964 = vrcp.f32 %v2886_v22  ;;  %v12282_v61 = vpack.c.bf16 %v3446_v27, %v3445_v36  ;;  %v15135_v36 = vld [vmem:[%s16428_s8 + $0x5] ss:$0 sm:$0xff] }
 0x6d9   : > { %v12955_v38 = vpop.eup %12954  ;;  %11443 = vmatprep.mubr.msk.f32.mxu0 %vm2436_vm2, %v2891_v44 }
 0x6da   : > { %v12957_v41 = vpop.eup %12956  ;;  %v3252_v47 = vpop.xlane.xlu1 %3251  ;;  %11444 = vmatmul.mubr.msk.f32.vlgmr.msra.gmra.mrb[20].mxu0 %vm2436_vm2, %v2893_v28  ;;  %v2897_v31 = vmul.f32 %v12955_v38, %v14966_v9 }
 0x6db   : > { %12966 = vrcp.f32 %v3252_v47  ;;  %11470 = vmatpush3.msra.mxu0 %v2244_v58  ;;  %v3249_v1 = vpop.xlane.xlu0 %3248  ;;  %v2895_v0 = vmul.f32 %v12957_v41, %v14968_v14 }
 0x6dc   : > { %12968 = vrcp.f32 %v3249_v1  ;;  %12278 = vmatprep.subr.bf16.mxu0 %v13996_v30 }
 0x6dd   : > { %v12959_v12 = vpop.eup %12958  ;;  %11446 = vmatprep.mubr.msk.f32.mxu0 %vm2436_vm2, %v2895_v0 }
 0x6de   : > { %v12961_v10 = vpop.eup %12960  ;;  %v3258_v2 = vpop.xlane.xlu1 %3257  ;;  %11447 = vmatmul.mubr.msk.f32.gmra.mrb[22].mxu0 %vm2436_vm2, %v2897_v31  ;;  %v2901_v33 = vmul.f32 %v12959_v12, %v14976_v29 }
 0x6df   : > { %12970 = vrcp.f32 %v3258_v2  ;;  %v3255_v51 = vpop.xlane.xlu0 %3254  ;;  %v2899_v49 = vmul.f32 %v12961_v10, %v14978_v34 }
 0x6e0   : > { %12972 = vrcp.f32 %v3255_v51 }
 0x6e1   : > { %v12963_v14 = vpop.eup %12962  ;;  %11449 = vmatprep.mubr.msk.f32.mxu0 %vm2436_vm2, %v2899_v49 }
 0x6e2   : > { %v12965_v9 = vpop.eup %12964  ;;  %v3264_v55 = vpop.xlane.xlu1 %3263  ;;  %11450 = vmatmul.mubr.msk.f32.gmra.mrb[24].mxu0 %vm2436_vm2, %v2901_v33  ;;  %v2905_v35 = vmul.f32 %v12963_v14, %v14986_v43 }
 0x6e3   : > { %12974 = vrcp.f32 %v3264_v55  ;;  %v3261_v52 = vpop.xlane.xlu0 %3260  ;;  %v2903_v58 = vmul.f32 %v12965_v9, %v14988_v45 }
 0x6e4   : > { %12976 = vrcp.f32 %v3261_v52 }
 0x6e5   : > { %v12967_v18 = vpop.eup %12966  ;;  %11452 = vmatprep.mubr.msk.f32.mxu0 %vm2436_vm2, %v2903_v58 }
 0x6e6   : > { %v12969_v34 = vpop.eup %12968  ;;  %v3270_v54 = vpop.xlane.xlu1 %3269  ;;  %11453 = vmatmul.mubr.msk.f32.gmra.mrb[26].mxu0 %vm2436_vm2, %v2905_v35  ;;  %v3274_v48 = vmul.f32 %v12967_v18, %v14996_v57 }
 0x6e7   : > { %12978 = vrcp.f32 %v3270_v54  ;;  %v3267_v29 = vpop.xlane.xlu0 %3266  ;;  %v3272_v53 = vmul.f32 %v12969_v34, %v14998_v15 }
 0x6e8   : > { %12980 = vrcp.f32 %v3267_v29  ;;  %v3447_v29 = vld [vmem:[%s16429_s5 + $0x40] sm:$0xff] }
 0x6e9   : > { %v12971_v37 = vpop.eup %12970  ;;  %11471 = vmatprep.mubr.msk.f32.mxu0 %vm2436_vm2, %v3272_v53 }
 0x6ea   : > { %v12973_v45 = vpop.eup %12972  ;;  %11472 = vmatmul.mubr.msk.f32.vlgmr.msra.gmra.mrb[28].mxu0 %vm2436_vm2, %v3274_v48  ;;  %v3278_v13 = vmul.f32 %v12971_v37, %v15004_v60 }
 0x6eb   : > { %v3276_v43 = vmul.f32 %v12973_v45, %v15006_v56 }
 0x6ed   : > { %v12975_v50 = vpop.eup %12974  ;;  %11474 = vmatprep.mubr.msk.f32.mxu0 %vm2436_vm2, %v3276_v43 }
 0x6ee   : > { %v12977_v17 = vpop.eup %12976  ;;  %11475 = vmatmul.mubr.msk.f32.gmra.mrb[30].mxu0 %vm2436_vm2, %v3278_v13  ;;  %v3282_v15 = vmul.f32 %v12975_v50, %v15012_v21  ;;  %v3439_v21 = vld [vmem:[%s16429_s5] sm:$0xff] }
 0x6ef   : > { %v3280_v57 = vmul.f32 %v12977_v17, %v15014_v19  ;;  %v3440_v19 = vld [vmem:[%s16429_s5 + $0x8] sm:$0xff]  ;;  %v15113_v13 = vld [vmem:[%s16428_s8] ss:$0 sm:$0xff] }
 0x6f0   : > { %v12273_v6 = vpack.c.bf16 %v3440_v19, %v3439_v21  ;;  %v15126_v19 = vld [vmem:[%s16428_s8 + $0x2] ss:$0 sm:$0xff] }
 0x6f1   : > { %v12979_v46 = vpop.eup %12978  ;;  %11477 = vmatprep.mubr.msk.f32.mxu0 %vm2436_vm2, %v3280_v57  ;;  %v3449_v57 = vld [vmem:[%s16429_s5 + $0x50] sm:$0xff] }
 0x6f2   : > { %v12981_v56 = vpop.eup %12980  ;;  %11478 = vmatmul.mubr.msk.f32.gmra.mrb[32].mxu0 %vm2436_vm2, %v3282_v15  ;;  %v3286_v40 = vmul.f32 %v12979_v46, %v15020_v24  ;;  %12274 = vmatpush3.bf16.msra.mxu1 %v12273_v6  ;;  %v3443_v24 = vld [vmem:[%s16429_s5 + $0x20] sm:$0xff]  ;;  %v3450_v15 = vld [vmem:[%s16429_s5 + $0x58] sm:$0xff] }
 0x6f3   : > { %v3284_v60 = vmul.f32 %v12981_v56, %v15022_v25  ;;  %12275 = vmatprep.subr.bf16.mxu1 %v13996_v30  ;;  %v3442_v25 = vld [vmem:[%s16429_s5 + $0x18] sm:$0xff]  ;;  %v12279_v26 = vpack.c.bf16 %v3444_v32, %v3443_v24 }
 0x6f4   : > { %v12276_v59 = vpack.c.bf16 %v3442_v25, %v3441_v42  ;;  %v12288_v42 = vpack.c.bf16 %v3450_v15, %v3449_v57 }
 0x6f5   : > { %11480 = vmatprep.mubr.msk.f32.mxu0 %vm2436_vm2, %v3284_v60  ;;  %12280 = vmatpush3.bf16.msra.mxu0 %v12279_v26 }
 0x6f6   : > { %11481 = vmatmul.mubr.msk.f32.gmra.mrb[34].mxu0 %vm2436_vm2, %v3286_v40  ;;  %12277 = vmatpush3.bf16.msra.mxu1 %v12276_v59  ;;  %v15122_v40 = vld [vmem:[%s16428_s8 + $0x3] ss:$0 sm:$0xff] }
 0x6f7   : > { %11502 = vmatprep.mubr.msk.f32.mxu0 %vm13997_vm1, %v13998_v39  ;;  %12284 = vmatprep.subr.bf16.mxu1 %v13996_v30 }
 0x6f8   : > { %12281 = vmatprep.subr.bf16.mxu0 %v13996_v30 }
 0x6f9   : > { %12283 = vmatpush3.bf16.msra.mxu0 %v12282_v61  ;;  %v15139_v61 = vld [vmem:[%s16428_s8 + $0x4] ss:$0 sm:$0xff] }
 0x6fa   : > { %12290 = vmatprep.subr.bf16.mxu0 %v13996_v30 }
 0x79d   : > { %v11417_v22 = vpop.f32.mrb[12].mxu0 }
 0x79e   : > { %v2655_v44 = vmul.f32 %v11417_v22, %v14737_v4  ;;  %v2615_v28 = vpop.f32.mrb[13].mxu0 }
 0x79f   : > { %v2654_v38 = vmul.f32 %v14725_v62, %v2615_v28 }
 0x7a0   : > { %v2663_v41 = vsel %vm1426_vm0, %v2655_v44, 0.0 }
 0x7a1   : > { %v2662_v47 = vsel %vm1426_vm0, %v2654_v38, 0.0  ;;  %v11420_v1 = vpop.f32.mrb[14].mxu0 }
 0x7a2   : > { %v2664_v0 = vadd.f32 %v2663_v41, %v2662_v47  ;;  %v2625_v31 = vpop.f32.mrb[15].mxu0  ;;  %v2657_v12 = vmul.f32 %v11420_v1, %v14740_v5 }
 0x7a3   : > { %v2656_v10 = vmul.f32 %v14728_v63, %v2625_v31 }
 0x7a4   : > { %v2667_v62 = vsel %vm1426_vm0, %v2657_v12, 0.0  ;;  %v15150_v12 = vld [vmem:[%s16428_s8 + $0x6] ss:$0 sm:$0xff] }
 0x7a5   : > { %v2665_v2 = vsel %vm1426_vm0, %v2656_v10, 0.0  ;;  %v11423_v51 = vpop.f32.mrb[16].mxu0 }
 0x7a6   : > { %v2666_v49 = vadd.f32 %v2665_v2, %v2664_v0  ;;  %v2635_v33 = vpop.f32.mrb[17].mxu0  ;;  %v2659_v14 = vmul.f32 %v11423_v51, %v14754_v16  ;;  %v3448_v16 = vld [vmem:[%s16429_s5 + $0x48] sm:$0xff]  ;;  %v15146_v0 = vld [vmem:[%s16428_s8 + $0x7] ss:$0 sm:$0xff] }
 0x7a7   : > { %v2658_v9 = vmul.f32 %v14747_v11, %v2635_v33 }
 0x7a8   : > { %v2668_v55 = vadd.f32 %v2667_v62, %v2666_v49  ;;  %v2671_v35 = vsel %vm1426_vm0, %v2659_v14, 0.0  ;;  %v15155_v62 = vld [vmem:[%s16428_s8 + $0x1] ss:$0 sm:$0xff] }
 0x7a9   : > { %v2669_v52 = vsel %vm1426_vm0, %v2658_v9, 0.0  ;;  %v11426_v5 = vpop.f32.mrb[18].mxu0 }
 0x7aa   : > { %v2670_v58 = vadd.f32 %v2669_v52, %v2668_v55  ;;  %v2645_v63 = vpop.f32.mrb[19].mxu0  ;;  %v2661_v18 = vmul.f32 %v11426_v5, %v14764_v23 }
 0x7ab   : > { %v2660_v34 = vmul.f32 %v14758_v20, %v2645_v63  ;;  %v12285_v20 = vpack.c.bf16 %v3448_v16, %v3447_v29 }
 0x7ac   : > { %v2672_v54 = vadd.f32 %v2671_v35, %v2670_v58  ;;  %v2675_v43 = vsel %vm1426_vm0, %v2661_v18, 0.0 }
 0x7ad   : > { %v2673_v11 = vsel %vm1426_vm0, %v2660_v34, 0.0  ;;  %v11445_v53 = vpop.f32.mrb[20].mxu0 }
 0x7ae   : > { %v2674_v48 = vadd.f32 %v2673_v11, %v2672_v54  ;;  %v3036_v37 = vmul.f32 %v11445_v53, %v14737_v4  ;;  %v2996_v45 = vpop.f32.mrb[21].mxu0 }
 0x7af   : > { %v3035_v23 = vmul.f32 %v15113_v13, %v2996_v45 }
 0x7b0   : > { %v2676_v50 = vadd.f32 %v2675_v43, %v2674_v48  ;;  %v3044_v17 = vsel %vm1426_vm0, %v3036_v37, 0.0 }
 0x7b1   : > { %v3043_v46 = vsel %vm1426_vm0, %v3035_v23, 0.0  ;;  %v11448_v56 = vpop.f32.mrb[22].mxu0 }
 0x7b2   : > { %v3045_v60 = vadd.f32 %v3044_v17, %v3043_v46  ;;  %v3006_v4 = vpop.f32.mrb[23].mxu0  ;;  %11492 = vmatmul.mubr.msk.f32.vlgmr.msra.gmra.mrb[30].mxu1 %vm1426_vm0, %v2676_v50  ;;  %v3038_v21 = vmul.f32 %v15122_v40, %v11448_v56 }
 0x7b3   : > { %v3037_v6 = vmul.f32 %v15126_v19, %v3006_v4  ;;  %12286 = vmatpush3.bf16.msra.mxu1 %v12285_v20  ;;  %11513 = vmatprep.mubr.msk.f32.mxu1 %vm13997_vm1, %v13998_v39 }
 0x7b4   : > { %12287 = vmatprep.subr.bf16.mxu1 %v13996_v30  ;;  %v3048_v26 = vsel %vm1426_vm0, %v3038_v21, 0.0 }
 0x7b5   : > { %v3046_v25 = vsel %vm1426_vm0, %v3037_v6, 0.0  ;;  %v11451_v59 = vpop.f32.mrb[24].mxu0 }
 0x7b6   : > { %v3047_v24 = vadd.f32 %v3046_v25, %v3045_v60  ;;  %v3016_v32 = vpop.f32.mrb[25].mxu0  ;;  %v3040_v27 = vmul.f32 %v15135_v36, %v11451_v59  ;;  %v10518_v25 = vld [vmem:[#allocation10] ss:$0 sm:$0xff] }
 0x7b7   : > { %v3039_v22 = vmul.f32 %v15139_v61, %v3016_v32  ;;  %12289 = vmatpush3.bf16.msra.mxu1 %v12288_v42 }
 0x7b8   : > { %v3049_v44 = vadd.f32 %v3048_v26, %v3047_v24  ;;  %12296 = vmatprep.subr.bf16.mxu1 %v13996_v30  ;;  %v3052_v1 = vsel %vm1426_vm0, %v3040_v27, 0.0 }
 0x7b9   : > { %v3050_v28 = vsel %vm1426_vm0, %v3039_v22, 0.0  ;;  %v11454_v38 = vpop.f32.mrb[26].mxu0  ;;  %v10519_v22 = vld [vmem:[#allocation10 + $0x1] ss:$0 sm:$0xff] }
 0x7ba   : > { %v3051_v41 = vadd.f32 %v3050_v28, %v3049_v44  ;;  %v3026_v47 = vpop.f32.mrb[27].mxu0  ;;  %v3042_v31 = vmul.f32 %v15146_v0, %v11454_v38 }
 0x7bb   : > { %v3041_v10 = vmul.f32 %v15150_v12, %v3026_v47 }
 0x7bc   : > { %v3053_v2 = vadd.f32 %v3052_v1, %v3051_v41  ;;  %v3056_v55 = vsel %vm1426_vm0, %v3042_v31, 0.0  ;;  %v10520_v1 = vld [vmem:[#allocation10 + $0x2] ss:$0 sm:$0xff] }
 0x7bd   : > { %v3054_v51 = vsel %vm1426_vm0, %v3041_v10, 0.0  ;;  %v11473_v49 = vpop.f32.mrb[28].mxu0 }
 0x7be   : > { %v3055_v33 = vadd.f32 %v3054_v51, %v3053_v2  ;;  %v3417_v14 = vmul.f32 %v15155_v62, %v11473_v49  ;;  %v3377_v9 = vpop.f32.mrb[29].mxu0 }
 0x7bf   : > { %v3416_v52 = vmul.f32 %v15113_v13, %v3377_v9 }
 0x7c0   : > { %v3057_v5 = vadd.f32 %v3056_v55, %v3055_v33  ;;  %v3425_v58 = vsel %vm1426_vm0, %v3417_v14, 0.0 }
 0x7c1   : > { %v3424_v63 = vsel %vm1426_vm0, %v3416_v52, 0.0  ;;  %v11476_v35 = vpop.f32.mrb[30].mxu0 }
 0x7c2   : > { %v3426_v18 = vadd.f32 %v3425_v58, %v3424_v63  ;;  %v3387_v34 = vpop.f32.mrb[31].mxu0  ;;  %11503 = vmatmul.mubr.msk.f32.vlgmr.msra.gmra.mrb[36].mxu0 %vm1426_vm0, %v3057_v5  ;;  %v3419_v54 = vmul.f32 %v15122_v40, %v11476_v35 }
 0x7c3   : > { %v3418_v29 = vmul.f32 %v15126_v19, %v3387_v34  ;;  %11524 = vmatprep.mubr.msk.f32.mxu0 %vm13997_vm1, %v13998_v39 }
 0x7c4   : > { %v3429_v37 = vsel %vm1426_vm0, %v3419_v54, 0.0 }
 0x7c5   : > { %v3427_v16 = vsel %vm1426_vm0, %v3418_v29, 0.0  ;;  %v11479_v11 = vpop.f32.mrb[32].mxu0  ;;  %v3782_v29 = vld [vmem:[%s16430_s6 + $0x20] sm:$0xff] }
 0x7c6   : > { %v3428_v53 = vadd.f32 %v3427_v16, %v3426_v18  ;;  %v3397_v48 = vpop.f32.mrb[33].mxu0  ;;  %v3421_v45 = vmul.f32 %v15135_v36, %v11479_v11  ;;  %v3783_v16 = vld [vmem:[%s16430_s6 + $0x28] sm:$0xff]  ;;  %v3778_v11 = vld [vmem:[%s16430_s6] sm:$0xff] }
 0x7c7   : > { %v3420_v43 = vmul.f32 %v15139_v61, %v3397_v48  ;;  %v3779_v48 = vld [vmem:[%s16430_s6 + $0x8] sm:$0xff] }
 0x7c8   : > { %v3430_v23 = vadd.f32 %v3429_v37, %v3428_v53  ;;  %v3433_v15 = vsel %vm1426_vm0, %v3421_v45, 0.0  ;;  %v12291_v53 = vpack.c.bf16 %v3783_v16, %v3782_v29  ;;  %v3784_v37 = vld [vmem:[%s16430_s6 + $0x30] sm:$0xff]  ;;  %v3785_v45 = vld [vmem:[%s16430_s6 + $0x38] sm:$0xff] }
 0x7c9   : > { %v3431_v20 = vsel %vm1426_vm0, %v3420_v43, 0.0  ;;  %v11482_v50 = vpop.f32.mrb[34].mxu0  ;;  %v12297_v43 = vpack.c.bf16 %v3779_v48, %v3778_v11  ;;  %v3802_v29 = vld [vmem:[%s16431_s12 + $0x58] sm:$0xff]  ;;  %v3795_v11 = vld [vmem:[%s16431_s12 + $0x20] sm:$0xff] }
 0x7ca   : > { %v3432_v17 = vadd.f32 %v3431_v20, %v3430_v23  ;;  %v3407_v57 = vpop.f32.mrb[35].mxu0  ;;  %v3423_v46 = vmul.f32 %v15146_v0, %v11482_v50  ;;  %v3780_v23 = vld [vmem:[%s16430_s6 + $0x10] sm:$0xff]  ;;  %v3781_v20 = vld [vmem:[%s16430_s6 + $0x18] sm:$0xff]  ;;  %12292 = vmatpush3.bf16.msra.mxu0 %v12291_v53  ;;  %v12294_v50 = vpack.c.bf16 %v3785_v45, %v3784_v37  ;;  %v3796_v53 = vld [vmem:[%s16431_s12 + $0x28] sm:$0xff] }
 0x7cb   : > { %v3422_v56 = vmul.f32 %v15150_v12, %v3407_v57  ;;  %12293 = vmatprep.subr.bf16.mxu0 %v13996_v30  ;;  %v12315_v48 = vpack.c.bf16 %v3796_v53, %v3795_v11  ;;  %v3803_v37 = vld [vmem:[%s16431_s12 + $0x60] sm:$0xff]  ;;  %v3804_v45 = vld [vmem:[%s16431_s12 + $0x68] sm:$0xff]  ;;  %v10539_v11 = vld [vmem:[#allocation16 + $0x2] ss:$0 sm:$0xff] }
 0x7cc   : > { %v3434_v60 = vadd.f32 %v3433_v15, %v3432_v17  ;;  %v3437_v6 = vsel %vm1426_vm0, %v3423_v46, 0.0  ;;  %v12300_v17 = vpack.c.bf16 %v3781_v20, %v3780_v23  ;;  %v3797_v23 = vld [vmem:[%s16431_s12 + $0x30] sm:$0xff]  ;;  %v3798_v20 = vld [vmem:[%s16431_s12 + $0x38] sm:$0xff] }
 0x7cd   : > { %v3435_v4 = vsel %vm1426_vm0, %v3422_v56, 0.0 }
 0x7ce   : > { %v3436_v21 = vadd.f32 %v3435_v4, %v3434_v60  ;;  %12295 = vmatpush3.bf16.msra.mxu0 %v12294_v50  ;;  %v12318_v50 = vpack.c.bf16 %v3798_v20, %v3797_v23 }
 0x7cf   : > { %12302 = vmatprep.subr.bf16.mxu0 %v13996_v30 }
 0x7d0   : > { %v3438_v42 = vadd.f32 %v3437_v6, %v3436_v21 }
 0x7d2   : > { %11514 = vmatmul.mubr.msk.f32.vlgmr.msra.gmra.mrb[32].mxu1 %vm1426_vm0, %v3438_v42  ;;  %v10525_v42 = vld [vmem:[#allocation12 + $0x1] ss:$0 sm:$0xff] }
 0x7d3   : > { %11535 = vmatprep.mubr.msk.f32.mxu1 %vm13997_vm1, %v13998_v39  ;;  %12298 = vmatpush3.bf16.msra.mxu1 %v12297_v43  ;;  %v12327_v43 = vpack.c.bf16 %v3804_v45, %v3803_v37 }
 0x7d4   : > { %12299 = vmatprep.subr.bf16.mxu1 %v13996_v30 }
 0x7d7   : > { %12301 = vmatpush3.bf16.msra.mxu1 %v12300_v17  ;;  %v3805_v17 = vld [vmem:[%s16431_s12 + $0x70] sm:$0xff] }
 0x7d8   : > { %12308 = vmatprep.subr.bf16.mxu1 %v13996_v30 }
 0x885   : > { %v3541_v59 = vpop.f32.mrb[30].mxu1 }
 0x886   : > { %v3542_v24 = vadd.f32 %v10518_v25, %v3541_v59  ;;  %v11493_v32 = vpop.f32.mrb[31].mxu1  ;;  %v10524_v25 = vld [vmem:[#allocation12] ss:$0 sm:$0xff] }
 0x887   : > { %v3786_v32 = vld [vmem:[%s16430_s6 + $0x40] sm:$0xff] }
 0x888   : > { %v15181_v26 = vadd.f32 %v3542_v24, %v14614_v8 }
 0x88a   : > { %v3700_v27 = vsel %vm1426_vm0, %v15181_v26, 0.0 }
 0x88b   : > { %3701 = vadd.xlane.f32.xlu0 %v3700_v27  ;;  %v3787_v27 = vld [vmem:[%s16430_s6 + $0x48] sm:$0xff] }
 0x895   : > { %v3614_v44 = vpop.f32.mrb[36].mxu0 }
 0x896   : > { %v3615_v28 = vadd.f32 %v10519_v22, %v3614_v44  ;;  %v11504_v38 = vpop.f32.mrb[37].mxu0  ;;  %v10528_v22 = vld [vmem:[#allocation13 + $0x1] ss:$0 sm:$0xff]  ;;  %v10527_v44 = vld [vmem:[#allocation13] ss:$0 sm:$0xff] }
 0x898   : > { %v15186_v41 = vadd.f32 %v3615_v28, %v14608_v3 }
 0x89a   : > { %v3703_v47 = vsel %vm1426_vm0, %v15186_v41, 0.0 }
 0x89b   : > { %3704 = vadd.xlane.f32.xlu1 %v3703_v47  ;;  %v12303_v47 = vpack.c.bf16 %v3787_v27, %v3786_v32  ;;  %v3807_v27 = vld [vmem:[%s16431_s12 + $0x80] sm:$0xff] }
 0x8a5   : > { %v3687_v31 = vpop.f32.mrb[32].mxu1 }
 0x8a6   : > { %v3688_v10 = vadd.f32 %v10520_v1, %v3687_v31  ;;  %v11515_v8 = vpop.f32.mrb[33].mxu1 }
 0x8a7   : > { %v3789_v8 = vld [vmem:[%s16430_s6 + $0x58] sm:$0xff] }
 0x8a8   : > { %v15191_v2 = vadd.f32 %v3688_v10, %v14612_v7  ;;  %v3788_v10 = vld [vmem:[%s16430_s6 + $0x50] sm:$0xff] }
 0x8aa   : > { %v3706_v51 = vsel %vm1426_vm0, %v15191_v2, 0.0 }
 0x8ab   : > { %3707 = vadd.xlane.f32.xlu0 %v3706_v51 }
 0x918   : > { %v3702_v49 = vpop.xlane.xlu0 %3701 }
 0x928   : > { %v3705_v33 = vpop.xlane.xlu1 %3704 }
 0x929   : > { %v3709_v14 = vadd.f32 %v3705_v33, %v3702_v49  ;;  %v10526_v49 = vld [vmem:[#allocation12 + $0x2] ss:$0 sm:$0xff]  ;;  %v12306_v33 = vpack.c.bf16 %v3789_v8, %v3788_v10  ;;  %v3810_v10 = vld [vmem:[%s16431_s12 + $0x98] sm:$0xff] }
 0x938   : > { %v3708_v3 = vpop.xlane.xlu0 %3707 }
 0x939   : > { %v3710_v9 = vadd.f32 %v3709_v14, %v3708_v3  ;;  %v10529_v3 = vld [vmem:[#allocation13 + $0x2] ss:$0 sm:$0xff] }
 0x93b   : > { %v3712_v55 = vmul.f32 0.010416667, %v3710_v9 }
 0x93d   : > { %v3714_v52 = vsub.f32 %v15186_v41, %v3712_v55  ;;  %v3713_v5 = vsub.f32 %v15181_v26, %v3712_v55  ;;  %v3715_v7 = vsub.f32 %v15191_v2, %v3712_v55  ;;  %v3791_v55 = vld [vmem:[%s16431_s12] sm:$0xff] }
 0x93f   : > { %v3717_v58 = vmul.f32 %v3714_v52, %v3714_v52  ;;  %v3716_v63 = vmul.f32 %v3713_v5, %v3713_v5  ;;  %v3718_v34 = vmul.f32 %v3715_v7, %v3715_v7 }
 0x941   : > { %v3722_v35 = vsel %vm1426_vm0, %v3717_v58, 0.0  ;;  %v3719_v18 = vsel %vm1426_vm0, %v3716_v63, 0.0  ;;  %v3725_v54 = vsel %vm1426_vm0, %v3718_v34, 0.0  ;;  %v3800_v58 = vld [vmem:[%s16431_s12 + $0x48] sm:$0xff] }
 0x942   : > { %3723 = vadd.xlane.f32.xlu0 %v3722_v35  ;;  %3720 = vadd.xlane.f32.xlu1 %v3719_v18  ;;  %v3793_v35 = vld [vmem:[%s16431_s12 + $0x10] sm:$0xff]  ;;  %v3794_v18 = vld [vmem:[%s16431_s12 + $0x18] sm:$0xff] }
 0x943   : > { %v12312_v34 = vpack.c.bf16 %v3794_v18, %v3793_v35 }
 0x946   : > { %3726 = vadd.xlane.f32.xlu1 %v3725_v54  ;;  %v3801_v54 = vld [vmem:[%s16431_s12 + $0x50] sm:$0xff] }
 0x947   : > { %v12324_v16 = vpack.c.bf16 %v3802_v29, %v3801_v54 }
 0x9cf   : > { %v3724_v57 = vpop.xlane.xlu0 %3723  ;;  %v3721_v15 = vpop.xlane.xlu1 %3720 }
 0x9d0   : > { %v3728_v46 = vadd.f32 %v3724_v57, %v3721_v15  ;;  %v3806_v57 = vld [vmem:[%s16431_s12 + $0x78] sm:$0xff] }
 0x9d1   : > { %v12330_v15 = vpack.c.bf16 %v3806_v57, %v3805_v17 }
 0x9d3   : > { %v3727_v56 = vpop.xlane.xlu1 %3726 }
 0x9d4   : > { %v3729_v60 = vadd.f32 %v3728_v46, %v3727_v56 }
 0x9d6   : > { %v3730_v4 = vmul.f32 0.010416667, %v3729_v60 }
 0x9d8   : > { %v3731_v21 = vadd.f32 1e-06, %v3730_v4 }
 0x9da   : > { %12982 = vrsqrt.f32 %v3731_v21 }
 0x9e4   : > { %v12983_v6 = vpop.eup %12982 }
 0x9e5   : > { %v3734_v59 = vmul.f32 %v12983_v6, %v3714_v52  ;;  %v3733_v24 = vmul.f32 %v12983_v6, %v3713_v5  ;;  %v3735_v51 = vmul.f32 %v12983_v6, %v3715_v7  ;;  %v3792_v52 = vld [vmem:[%s16431_s12 + $0x8] sm:$0xff]  ;;  %v3799_v7 = vld [vmem:[%s16431_s12 + $0x40] sm:$0xff]  ;;  %v10533_v6 = vld [vmem:[#allocation15] ss:$0 sm:$0xff] }
 0x9e6   : > { %v12309_v5 = vpack.c.bf16 %v3792_v52, %v3791_v55  ;;  %v12321_v63 = vpack.c.bf16 %v3800_v58, %v3799_v7  ;;  %v10537_v55 = vld [vmem:[#allocation16] ss:$0 sm:$0xff]  ;;  %v10538_v52 = vld [vmem:[#allocation16 + $0x1] ss:$0 sm:$0xff] }
 0x9e7   : > { %v3755_v28 = vmul.f32 %v10525_v42, %v3734_v59  ;;  %v3754_v38 = vmul.f32 %v10524_v25, %v3733_v24  ;;  %v3756_v14 = vmul.f32 %v10526_v49, %v3735_v51  ;;  %v3811_v51 = vld [vmem:[%s16431_s12 + $0xa0] sm:$0xff]  ;;  %v3812_v49 = vld [vmem:[%s16431_s12 + $0xa8] sm:$0xff] }
 0x9e9   : > { %v3776_v1 = vadd.f32 %v10528_v22, %v3755_v28  ;;  %v3775_v31 = vadd.f32 %v10527_v44, %v3754_v38  ;;  %v3777_v9 = vadd.f32 %v10529_v3, %v3756_v14  ;;  %v3808_v22 = vld [vmem:[%s16431_s12 + $0x88] sm:$0xff]  ;;  %v3813_v14 = vld [vmem:[%s16431_s12 + $0xb0] sm:$0xff]  ;;  %v3814_v3 = vld [vmem:[%s16431_s12 + $0xb8] sm:$0xff] }
 0x9eb   : > { %11525 = vmatmul.mubr.msk.f32.vlgmr.msra.gmra.mrb[38].mxu0 %vm1426_vm0, %v3776_v1  ;;  %11536 = vmatmul.mubr.msk.f32.vlgmr.msra.gmra.mrb[34].mxu1 %vm1426_vm0, %v3775_v31  ;;  %v3809_v31 = vld [vmem:[%s16431_s12 + $0x90] sm:$0xff] }
 0x9ec   : > { %12304 = vmatpush3.bf16.msra.mxu0 %v12303_v47  ;;  %11546 = vmatprep.mubr.msk.f32.mxu0 %vm13997_vm1, %v13998_v39  ;;  %v12333_v47 = vpack.c.bf16 %v3808_v22, %v3807_v27  ;;  %v12336_v8 = vpack.c.bf16 %v3810_v10, %v3809_v31  ;;  %v10554_v22 = vld [vmem:[%s16425_s1 + $0xa0] sm:$0xff] }
 0x9ed   : > { %12305 = vmatprep.subr.bf16.mxu0 %v13996_v30  ;;  %11565 = vmatprep.mubr.msk.f32.mxu1 %vm13997_vm1, %v13998_v39 }
 0x9ee   : > { %12310 = vmatpush3.bf16.msra.mxu1 %v12309_v5 }
 0x9ef   : > { %12311 = vmatprep.subr.bf16.mxu1 %v13996_v30 }
 0x9f0   : > { %12307 = vmatpush3.bf16.msra.mxu0 %v12306_v33  ;;  %v12339_v33 = vpack.c.bf16 %v3812_v49, %v3811_v51 }
 0x9f1   : > { %12320 = vmatprep.subr.bf16.mxu0 %v13996_v30 }
 0x9f2   : > { %12313 = vmatpush3.bf16.msra.mxu1 %v12312_v34 }
 0x9f3   : > { %11547 = vmatmul.mubr.msk.f32.vlgmr.msra.gmra.mrb[40].mxu0 %vm1426_vm0, %v3777_v9  ;;  %12314 = vmatprep.subr.bf16.mxu1 %v13996_v30  ;;  %v12342_v9 = vpack.c.bf16 %v3814_v3, %v3813_v14  ;;  %v10540_v3 = vld [vmem:[#allocation2 + $0x3] ss:$0 sm:$0xff] }
 0x9f4   : > { %11584 = vmatprep.mubr.msk.f32.mxu0 %vm13997_vm1, %v13998_v39  ;;  %12322 = vmatpush3.bf16.msra.mxu0 %v12321_v63 }
 0x9f5   : > { %12323 = vmatprep.subr.bf16.mxu0 %v13996_v30 }
 0x9f6   : > { %12316 = vmatpush3.bf16.msra.mxu1 %v12315_v48 }
 0x9f7   : > { %12317 = vmatprep.subr.bf16.mxu1 %v13996_v30 }
 0x9f8   : > { %12325 = vmatpush3.bf16.msra.mxu0 %v12324_v16 }
 0x9f9   : > { %12326 = vmatprep.subr.bf16.mxu0 %v13996_v30 }
 0x9fa   : > { %12319 = vmatpush3.bf16.msra.mxu1 %v12318_v50 }
 0x9fb   : > { %12332 = vmatprep.subr.bf16.mxu1 %v13996_v30 }
 0x9fc   : > { %12328 = vmatpush3.bf16.msra.mxu0 %v12327_v43 }
 0x9fd   : > { %12329 = vmatprep.subr.bf16.mxu0 %v13996_v30 }
 0xa00   : > { %12331 = vmatpush3.bf16.msra.mxu0 %v12330_v15 }
 0xa01   : > { %12344 = vmatprep.subr.bf16.mxu0 %v13996_v30 }
 0xabe   : > { %v3887_v46 = vpop.f32.mrb[38].mxu0  ;;  %v3960_v56 = vpop.f32.mrb[34].mxu1 }
 0xabf   : > { %v3961_v60 = vadd.f32 %v3960_v56, %v3887_v46  ;;  %v11526_v4 = vpop.f32.mrb[39].mxu0  ;;  %v11537_v21 = vpop.f32.mrb[35].mxu1 }
 0xac6   : > { %v4033_v42 = vpop.f32.mrb[40].mxu0 }
 0xac7   : > { %v4037_v25 = vadd.f32 %v4033_v42, %v3961_v60  ;;  %v11548_v59 = vpop.f32.mrb[41].mxu0  ;;  %v10546_v42 = vld [vmem:[%s16425_s1 + $0x60] sm:$0xff] }
 0xac9   : > { %v4044_v24 = vadd.f32 %v10533_v6, %v4037_v25  ;;  %v10547_v25 = vld [vmem:[%s16425_s1 + $0x68] sm:$0xff] }
 0xaca   : > { %v12345_v59 = vpack.c.bf16 %v10547_v25, %v10546_v42  ;;  %v10572_v42 = vld [vmem:[%s16426_s10 + $0xa0] sm:$0xff]  ;;  %v10573_v25 = vld [vmem:[%s16426_s10 + $0xa8] sm:$0xff] }
 0xacb   : > { %v4046_v32 = vmul.f32 0.70710677, %v4044_v24  ;;  %v4045_v28 = vmul.f32 0.5, %v4044_v24  ;;  %v10548_v24 = vld [vmem:[%s16425_s1 + $0x70] sm:$0xff] }
 0xacd   : > { %12984 = verf.f32 %v4046_v32  ;;  %v10549_v32 = vld [vmem:[%s16425_s1 + $0x78] sm:$0xff] }
 0xace   : > { %v12348_v27 = vpack.c.bf16 %v10549_v32, %v10548_v24 }
 0xad7   : > { %v12985_v44 = vpop.eup %12984 }
 0xad8   : > { %v4048_v38 = vadd.f32 1.0, %v12985_v44  ;;  %v10555_v44 = vld [vmem:[%s16425_s1 + $0xa8] sm:$0xff] }
 0xada   : > { %v4049_v1 = vmul.f32 %v4048_v38, %v4045_v28  ;;  %v12357_v28 = vpack.c.bf16 %v10555_v44, %v10554_v22  ;;  %v10556_v38 = vld [vmem:[%s16425_s1 + $0xb0] sm:$0xff] }
 0xadb   : > { %v10570_v22 = vld [vmem:[%s16426_s10 + $0x90] sm:$0xff] }
 0xadc   : > { %11566 = vmatmul.mubr.msk.f32.vlgmr.msra.gmra.mrb[36].mxu1 %vm4050_vm3, %v4049_v1  ;;  %11585 = vmatmul.mubr.msk.f32.vlgmr.msra.gmra.mrb[42].mxu0 %vm4050_vm3, %v4049_v1 }
 0xadd   : > { %12334 = vmatpush3.bf16.msra.mxu1 %v12333_v47  ;;  %11603 = vmatprep.mubr.msk.f32.mxu1 %vm13997_vm1, %v13998_v39  ;;  %v10557_v47 = vld [vmem:[%s16425_s1 + $0xb8] sm:$0xff] }
 0xade   : > { %12335 = vmatprep.subr.bf16.mxu1 %v13996_v30  ;;  %11614 = vmatprep.mubr.msk.f32.mxu0 %vm13997_vm1, %v13998_v39 }
 0xadf   : > { %12346 = vmatpush3.bf16.msra.mxu0 %v12345_v59  ;;  %v10545_v59 = vld [vmem:[#allocation4 + $0x5] ss:$0 sm:$0xff] }
 0xae0   : > { %12347 = vmatprep.subr.bf16.mxu0 %v13996_v30 }
 0xae1   : > { %12337 = vmatpush3.bf16.msra.mxu1 %v12336_v8 }
 0xae2   : > { %12338 = vmatprep.subr.bf16.mxu1 %v13996_v30 }
 0xae3   : > { %12349 = vmatpush3.bf16.msra.mxu0 %v12348_v27  ;;  %v12375_v27 = vpack.c.bf16 %v10573_v25, %v10572_v42 }
 0xae4   : > { %12350 = vmatprep.subr.bf16.mxu0 %v13996_v30 }
 0xae5   : > { %12340 = vmatpush3.bf16.msra.mxu1 %v12339_v33 }
 0xae6   : > { %12341 = vmatprep.subr.bf16.mxu1 %v13996_v30 }
 0xae9   : > { %12343 = vmatpush3.bf16.msra.mxu1 %v12342_v9 }
 0xaea   : > { %12356 = vmatprep.subr.bf16.mxu1 %v13996_v30 }
 0xaec   : > { %11604 = vmatmul.mubr.msk.f32.vlgmr.msra.gmra.mrb[38].mxu1 %vm4050_vm3, %v4049_v1  ;;  %v12360_v1 = vpack.c.bf16 %v10557_v47, %v10556_v38  ;;  %v10575_v38 = vld [vmem:[%s16426_s10 + $0xb8] sm:$0xff] }
 0xaed   : > { %11636 = vmatprep.mubr.msk.f32.mxu1 %vm13997_vm1, %v13998_v39  ;;  %12358 = vmatpush3.bf16.msra.mxu1 %v12357_v28  ;;  %v10571_v28 = vld [vmem:[%s16426_s10 + $0x98] sm:$0xff] }
 0xaee   : > { %12359 = vmatprep.subr.bf16.mxu1 %v13996_v30  ;;  %v12372_v47 = vpack.c.bf16 %v10571_v28, %v10570_v22 }
 0xaf1   : > { %12361 = vmatpush3.bf16.msra.mxu1 %v12360_v1 }
 0xaf2   : > { %12368 = vmatprep.subr.bf16.mxu1 %v13996_v30 }
 0xbaf   : > { %v4120_v5 = vpop.f32.mrb[36].mxu1  ;;  %v4190_v7 = vpop.f32.mrb[42].mxu0 }
 0xbb0   : > { %v4282_v58 = vadd.f32 %v10537_v55, %v4120_v5  ;;  %v4283_v63 = vadd.f32 %v10538_v52, %v4190_v7  ;;  %v11567_v35 = vpop.f32.mrb[37].mxu1  ;;  %v11586_v18 = vpop.f32.mrb[43].mxu0  ;;  %v10550_v52 = vld [vmem:[%s16425_s1 + $0x80] sm:$0xff]  ;;  %v10551_v5 = vld [vmem:[%s16425_s1 + $0x88] sm:$0xff] }
 0xbb2   : > { %v15274_v34 = vadd.f32 %v4282_v58, %v15181_v26  ;;  %v15277_v54 = vadd.f32 %v4283_v63, %v15186_v41  ;;  %v10543_v63 = vld [vmem:[#allocation4 + $0x3] ss:$0 sm:$0xff] }
 0xbb4   : > { %v4299_v29 = vsel %vm1426_vm0, %v15277_v54, 0.0  ;;  %v4296_v16 = vsel %vm1426_vm0, %v15274_v34, 0.0 }
 0xbb5   : > { %4300 = vadd.xlane.f32.xlu1 %v4299_v29  ;;  %4297 = vadd.xlane.f32.xlu0 %v4296_v16  ;;  %v12351_v29 = vpack.c.bf16 %v10551_v5, %v10550_v52 }
 0xbbf   : > { %v4260_v53 = vpop.f32.mrb[38].mxu1 }
 0xbc0   : > { %v4284_v48 = vadd.f32 %v10539_v11, %v4260_v53  ;;  %v11605_v37 = vpop.f32.mrb[39].mxu1  ;;  %v10552_v53 = vld [vmem:[%s16425_s1 + $0x90] sm:$0xff] }
 0xbc1   : > { %v10541_v37 = vld [vmem:[#allocation2 + $0x4] ss:$0 sm:$0xff] }
 0xbc2   : > { %v15284_v45 = vadd.f32 %v4284_v48, %v15191_v2  ;;  %v10553_v48 = vld [vmem:[%s16425_s1 + $0x98] sm:$0xff] }
 0xbc4   : > { %v4302_v26 = vsel %vm1426_vm0, %v15284_v45, 0.0 }
 0xbc5   : > { %4303 = vadd.xlane.f32.xlu0 %v4302_v26  ;;  %v12354_v26 = vpack.c.bf16 %v10553_v48, %v10552_v53 }
 0xc42   : > { %v4301_v41 = vpop.xlane.xlu1 %4300  ;;  %v4298_v43 = vpop.xlane.xlu0 %4297 }
 0xc43   : > { %v4306_v23 = vmul.f32 0.03125, %v4301_v41  ;;  %v4305_v20 = vmul.f32 0.03125, %v4298_v43  ;;  %v10564_v43 = vld [vmem:[%s16426_s10 + $0x60] sm:$0xff] }
 0xc45   : > { %v4309_v50 = vsub.f32 %v15277_v54, %v4306_v23  ;;  %v4308_v17 = vsub.f32 %v15274_v34, %v4305_v20  ;;  %v10565_v23 = vld [vmem:[%s16426_s10 + $0x68] sm:$0xff] }
 0xc46   : > { %v10544_v20 = vld [vmem:[#allocation4 + $0x4] ss:$0 sm:$0xff] }
 0xc47   : > { %v4311_v57 = vmul.f32 %v4308_v17, %v4308_v17  ;;  %v4312_v15 = vmul.f32 %v4309_v50, %v4309_v50 }
 0xc49   : > { %v4314_v2 = vsel %vm1426_vm0, %v4311_v57, 0.0  ;;  %v4317_v46 = vsel %vm1426_vm0, %v4312_v15, 0.0  ;;  %v10566_v57 = vld [vmem:[%s16426_s10 + $0x70] sm:$0xff]  ;;  %v10567_v15 = vld [vmem:[%s16426_s10 + $0x78] sm:$0xff] }
 0xc4a   : > { %4315 = vadd.xlane.f32.xlu1 %v4314_v2  ;;  %4318 = vadd.xlane.f32.xlu0 %v4317_v46  ;;  %v12366_v46 = vpack.c.bf16 %v10567_v15, %v10566_v57 }
 0xc52   : > { %v4304_v56 = vpop.xlane.xlu0 %4303 }
 0xc53   : > { %v4307_v60 = vmul.f32 0.03125, %v4304_v56  ;;  %v10542_v56 = vld [vmem:[#allocation2 + $0x5] ss:$0 sm:$0xff] }
 0xc55   : > { %v15293_v4 = vsub.f32 %v15284_v45, %v4307_v60  ;;  %v10568_v60 = vld [vmem:[%s16426_s10 + $0x80] sm:$0xff] }
 0xc57   : > { %v4313_v21 = vmul.f32 %v15293_v4, %v15293_v4 }
 0xc59   : > { %v4320_v6 = vsel %vm1426_vm0, %v4313_v21, 0.0 }
 0xc5a   : > { %4321 = vadd.xlane.f32.xlu1 %v4320_v6  ;;  %v10569_v6 = vld [vmem:[%s16426_s10 + $0x88] sm:$0xff] }
 0xc5b   : > { %v12369_v32 = vpack.c.bf16 %v10569_v6, %v10568_v60 }
 0xcd7   : > { %v4316_v31 = vpop.xlane.xlu1 %4315  ;;  %v4319_v10 = vpop.xlane.xlu0 %4318 }
 0xcd8   : > { %v4323_v8 = vmul.f32 0.03125, %v4316_v31  ;;  %v4324_v51 = vmul.f32 0.03125, %v4319_v10  ;;  %v10582_v31 = vld [vmem:[%s16427_s16 + $0x60] sm:$0xff]  ;;  %v10583_v10 = vld [vmem:[%s16427_s16 + $0x68] sm:$0xff] }
 0xcda   : > { %v4326_v49 = vadd.f32 1e-06, %v4323_v8  ;;  %v4327_v33 = vadd.f32 1e-06, %v4324_v51  ;;  %v10586_v8 = vld [vmem:[%s16427_s16 + $0x80] sm:$0xff]  ;;  %v10587_v51 = vld [vmem:[%s16427_s16 + $0x88] sm:$0xff] }
 0xcdc   : > { %12986 = vrsqrt.f32 %v4326_v49  ;;  %v12381_v49 = vpack.c.bf16 %v10583_v10, %v10582_v31 }
 0xcdd   : > { %12988 = vrsqrt.f32 %v4327_v33  ;;  %v12387_v33 = vpack.c.bf16 %v10587_v51, %v10586_v8 }
 0xce6   : > { %v12987_v14 = vpop.eup %12986 }
 0xce7   : > { %v4332_v9 = vmul.f32 %v12987_v14, %v4308_v17  ;;  %v4322_v55 = vpop.xlane.xlu1 %4321  ;;  %v12989_v7 = vpop.eup %12988  ;;  %v10584_v14 = vld [vmem:[%s16427_s16 + $0x70] sm:$0xff] }
 0xce8   : > { %v4325_v58 = vmul.f32 0.03125, %v4322_v55  ;;  %v4333_v16 = vmul.f32 %v12989_v7, %v4309_v50  ;;  %v12363_v50 = vpack.c.bf16 %v10565_v23, %v10564_v43  ;;  %v10589_v55 = vld [vmem:[%s16427_s16 + $0x98] sm:$0xff]  ;;  %v10590_v7 = vld [vmem:[%s16427_s16 + $0xa0] sm:$0xff]  ;;  %v10576_v23 = vld [vmem:[#allocation7 + $0x3] ss:$0 sm:$0xff] }
 0xce9   : > { %v4353_v35 = vmul.f32 %v10540_v3, %v4332_v9  ;;  %v10585_v3 = vld [vmem:[%s16427_s16 + $0x78] sm:$0xff]  ;;  %v10588_v9 = vld [vmem:[%s16427_s16 + $0x90] sm:$0xff] }
 0xcea   : > { %v4328_v18 = vadd.f32 1e-06, %v4325_v58  ;;  %v4354_v41 = vmul.f32 %v10541_v37, %v4333_v16  ;;  %v12384_v52 = vpack.c.bf16 %v10585_v3, %v10584_v14  ;;  %v12390_v5 = vpack.c.bf16 %v10589_v55, %v10588_v9  ;;  %v10591_v58 = vld [vmem:[%s16427_s16 + $0xa8] sm:$0xff] }
 0xceb   : > { %v15312_v11 = vadd.f32 %v10543_v63, %v4353_v35  ;;  %v12393_v63 = vpack.c.bf16 %v10591_v58, %v10590_v7  ;;  %v10592_v35 = vld [vmem:[%s16427_s16 + $0xb0] sm:$0xff]  ;;  %v10558_v16 = vld [vmem:[#allocation6 + $0x3] ss:$0 sm:$0xff] }
 0xcec   : > { %12990 = vrsqrt.f32 %v4328_v18  ;;  %v15323_v17 = vadd.f32 %v10544_v20, %v4354_v41  ;;  %v10593_v18 = vld [vmem:[%s16427_s16 + $0xb8] sm:$0xff] }
 0xced   : > { %11615 = vmatmul.mubr.msk.f32.vlgmr.msra.gmra.mrb[44].mxu0 %vm1426_vm0, %v15312_v11 }
 0xcee   : > { %12352 = vmatpush3.bf16.msra.mxu0 %v12351_v29  ;;  %11625 = vmatprep.mubr.msk.f32.mxu0 %vm13997_vm1, %v13998_v39  ;;  %v12396_v29 = vpack.c.bf16 %v10593_v18, %v10592_v35 }
 0xcef   : > { %12353 = vmatprep.subr.bf16.mxu0 %v13996_v30 }
 0xcf2   : > { %12355 = vmatpush3.bf16.msra.mxu0 %v12354_v26 }
 0xcf3   : > { %12362 = vmatprep.subr.bf16.mxu0 %v13996_v30 }
 0xcf5   : > { %11626 = vmatmul.mubr.msk.f32.vlgmr.msra.gmra.mrb[46].mxu0 %vm1426_vm0, %v15323_v17 }
 0xcf6   : > { %v12991_v2 = vpop.eup %12990  ;;  %12364 = vmatpush3.bf16.msra.mxu0 %v12363_v50  ;;  %11647 = vmatprep.mubr.msk.f32.mxu0 %vm13997_vm1, %v13998_v39 }
 0xcf7   : > { %v4334_v21 = vmul.f32 %v12991_v2, %v15293_v4  ;;  %12365 = vmatprep.subr.bf16.mxu0 %v13996_v30  ;;  %v10574_v4 = vld [vmem:[%s16426_s10 + $0xb0] sm:$0xff] }
 0xcf8   : > { %v12378_v1 = vpack.c.bf16 %v10575_v38, %v10574_v4  ;;  %v10594_v38 = vld [vmem:[#allocation9 + $0x3] ss:$0 sm:$0xff] }
 0xcf9   : > { %v4355_v24 = vmul.f32 %v10542_v56, %v4334_v21  ;;  %v10578_v56 = vld [vmem:[#allocation7 + $0x5] ss:$0 sm:$0xff]  ;;  %v10559_v21 = vld [vmem:[#allocation6 + $0x4] ss:$0 sm:$0xff] }
 0xcfa   : > { %12367 = vmatpush3.bf16.msra.mxu0 %v12366_v46  ;;  %v10577_v46 = vld [vmem:[#allocation7 + $0x4] ss:$0 sm:$0xff] }
 0xcfb   : > { %v4376_v44 = vadd.f32 %v10545_v59, %v4355_v24  ;;  %12374 = vmatprep.subr.bf16.mxu0 %v13996_v30 }
 0xcfd   : > { %11637 = vmatmul.mubr.msk.f32.vlgmr.msra.gmra.mrb[40].mxu1 %vm1426_vm0, %v4376_v44  ;;  %11648 = vmatmul.mubr.msk.f32.vlgmr.msra.gmra.mrb[48].mxu0 %vm1426_vm0, %v15312_v11 }
 0xcfe   : > { %12370 = vmatpush3.bf16.msra.mxu1 %v12369_v32  ;;  %12376 = vmatpush3.bf16.msra.mxu0 %v12375_v27 }
 0xcff   : > { %12371 = vmatprep.subr.bf16.mxu1 %v13996_v30  ;;  %12377 = vmatprep.subr.bf16.mxu0 %v13996_v30 }
 0xd00   : > { %11658 = vmatprep.mubr.msk.f32.mxu1 %vm13997_vm1, %v13998_v39  ;;  %11669 = vmatprep.mubr.msk.f32.mxu0 %vm13997_vm1, %v13998_v39 }
 0xd02   : > { %12373 = vmatpush3.bf16.msra.mxu1 %v12372_v47  ;;  %12379 = vmatpush3.bf16.msra.mxu0 %v12378_v1  ;;  %v10595_v47 = vld [vmem:[#allocation9 + $0x4] ss:$0 sm:$0xff] }
 0xd03   : > { %12380 = vmatprep.subr.bf16.mxu1 %v13996_v30  ;;  %12386 = vmatprep.subr.bf16.mxu0 %v13996_v30 }
 0xd05   : > { %11659 = vmatmul.mubr.msk.f32.vlgmr.msra.gmra.mrb[42].mxu1 %vm1426_vm0, %v15323_v17  ;;  %11670 = vmatmul.mubr.msk.f32.vlgmr.msra.gmra.mrb[50].mxu0 %vm1426_vm0, %v4376_v44 }
 0xd06   : > { %12382 = vmatpush3.bf16.msra.mxu1 %v12381_v49  ;;  %12388 = vmatpush3.bf16.msra.mxu0 %v12387_v33 }
 0xd07   : > { %12383 = vmatprep.subr.bf16.mxu1 %v13996_v30  ;;  %12389 = vmatprep.subr.bf16.mxu0 %v13996_v30 }
 0xd08   : > { %11680 = vmatprep.mubr.msk.f32.mxu1 %vm13997_vm1, %v13998_v39  ;;  %11691 = vmatprep.mubr.msk.f32.mxu0 %vm13997_vm1, %v13998_v39 }
 0xd0a   : > { %12385 = vmatpush3.bf16.msra.mxu1 %v12384_v52  ;;  %12391 = vmatpush3.bf16.msra.mxu0 %v12390_v5  ;;  %v10560_v52 = vld [vmem:[#allocation6 + $0x5] ss:$0 sm:$0xff] }
 0xd0b   : > { %12392 = vmatprep.subr.bf16.mxu1 %v13996_v30 }
 0xd0d   : > { %11681 = vmatmul.mubr.msk.f32.vlgmr.msra.gmra.mrb[44].mxu1 %vm1426_vm0, %v15312_v11  ;;  %11692 = vmatmul.mubr.msk.f32.vlgmr.msra.gmra.mrb[52].mxu0 %vm1426_vm0, %v15323_v17 }
 0xd0e   : > { %12394 = vmatpush3.bf16.msra.mxu1 %v12393_v63  ;;  %11702 = vmatprep.mubr.msk.f32.mxu1 %vm13997_vm1, %v13998_v39 }
 0xd0f   : > { %12395 = vmatprep.subr.bf16.mxu1 %v13996_v30 }
 0xd12   : > { %12397 = vmatpush3.bf16.msra.mxu1 %v12396_v29 }
 0xd15   : > { %11703 = vmatmul.mubr.msk.f32.vlgmr.msra.gmra.mrb[46].mxu1 %vm1426_vm0, %v4376_v44 }
 0xdc0   : > { %v4481_v53 = vpop.f32.mrb[44].mxu0 }
 0xdc1   : > { %v4482_v48 = vadd.f32 %v10558_v16, %v4481_v53  ;;  %v11616_v37 = vpop.f32.mrb[45].mxu0 }
 0xdc3   : > { %v5121_v26 = vmul.f32 0.5, %v4482_v48 }
 0xdc5   : > { %v5122_v11 = vmul.f32 %v15113_v13, %v5121_v26  ;;  %v5123_v2 = vmul.f32 %v15155_v62, %v5121_v26  ;;  %v5124_v60 = vmul.f32 %v15126_v19, %v5121_v26  ;;  %v5125_v27 = vmul.f32 %v15122_v40, %v5121_v26 }
 0xdc6   : > { %v5126_v44 = vmul.f32 %v15139_v61, %v5121_v26  ;;  %v5127_v28 = vmul.f32 %v15135_v36, %v5121_v26  ;;  %v5128_v1 = vmul.f32 %v15150_v12, %v5121_v26  ;;  %v5129_v14 = vmul.f32 %v15146_v0, %v5121_v26 }
 0xdc7   : > { %11707 = vmatprep.mubr.msk.f32.mxu0 %vm1426_vm0, %v5122_v11 }
 0xdc8   : > { %v4554_v41 = vpop.f32.mrb[46].mxu0 }
 0xdc9   : > { %v11627_v43 = vpop.f32.mrb[47].mxu0  ;;  %v4555_v22 = vadd.f32 %v10559_v21, %v4554_v41 }
 0xdcb   : > { %v5502_v4 = vmul.f32 0.5, %v4555_v22 }
 0xdcd   : > { %v5503_v3 = vmul.f32 %v15113_v13, %v5502_v4  ;;  %v5504_v9 = vmul.f32 %v15155_v62, %v5502_v4  ;;  %v5505_v55 = vmul.f32 %v15126_v19, %v5502_v4  ;;  %v5506_v58 = vmul.f32 %v15122_v40, %v5502_v4 }
 0xdce   : > { %v5507_v35 = vmul.f32 %v15139_v61, %v5502_v4  ;;  %v5508_v18 = vmul.f32 %v15135_v36, %v5502_v4  ;;  %v5509_v16 = vmul.f32 %v15150_v12, %v5502_v4  ;;  %v5510_v53 = vmul.f32 %v15146_v0, %v5502_v4 }
 0xdd0   : > { %v4627_v20 = vpop.f32.mrb[40].mxu1  ;;  %v4732_v50 = vpop.f32.mrb[48].mxu0 }
 0xdd1   : > { %v4733_v17 = vadd.f32 %v10576_v23, %v4732_v50  ;;  %v11638_v57 = vpop.f32.mrb[41].mxu1  ;;  %v11649_v15 = vpop.f32.mrb[49].mxu0  ;;  %v4628_v63 = vadd.f32 %v10560_v52, %v4627_v20 }
 0xdd3   : > { %11705 = vmatprep.subr.msk.mxu0 %vm1426_vm0, %v4733_v17  ;;  %v5883_v29 = vmul.f32 0.5, %v4628_v63 }
 0xdd4   : > { %11706 = vmatpush3.xpose.msk.msra.mxu0 %vm1426_vm0, %v4733_v17 }
 0xdd5   : > { %v5884_v48 = vmul.f32 %v15113_v13, %v5883_v29  ;;  %v5885_v37 = vmul.f32 %v15155_v62, %v5883_v29  ;;  %v5886_v26 = vmul.f32 %v15126_v19, %v5883_v29  ;;  %v5887_v11 = vmul.f32 %v15122_v40, %v5883_v29 }
 0xdd6   : > { %v5888_v41 = vmul.f32 %v15139_v61, %v5883_v29  ;;  %v5889_v13 = vmul.f32 %v15135_v36, %v5883_v29  ;;  %v5890_v43 = vmul.f32 %v15150_v12, %v5883_v29  ;;  %v5891_v19 = vmul.f32 %v15146_v0, %v5883_v29 }
 0xdd7   : > { %11708 = vmatmul.mubr.msk.f32.vlgmr.msra.gmra.mrb[54].mxu0 %vm1426_vm0, %v5123_v2 }
 0xdd8   : > { %v4802_v6 = vpop.f32.mrb[42].mxu1  ;;  %v4872_v42 = vpop.f32.mrb[50].mxu0  ;;  %11710 = vmatprep.mubr.msk.f32.mxu0 %vm1426_vm0, %v5124_v60 }
 0xdd9   : > { %v4803_v25 = vadd.f32 %v10577_v46, %v4802_v6  ;;  %v11660_v59 = vpop.f32.mrb[43].mxu1  ;;  %v4873_v24 = vadd.f32 %v10578_v56, %v4872_v42  ;;  %v11671_v32 = vpop.f32.mrb[51].mxu0 }
 0xddb   : > { %11733 = vmatprep.subr.msk.mxu0 %vm1426_vm0, %v4803_v25  ;;  %11711 = vmatmul.mubr.msk.f32.gmra.mrb[56].mxu0 %vm1426_vm0, %v5125_v27 }
 0xddc   : > { %11734 = vmatpush3.xpose.msk.msra.mxu0 %vm1426_vm0, %v4803_v25  ;;  %11713 = vmatprep.mubr.msk.f32.mxu0 %vm1426_vm0, %v5126_v44 }
 0xddd   : > { %11761 = vmatprep.subr.msk.mxu0 %vm1426_vm0, %v4873_v24 }
 0xddf   : > { %11714 = vmatmul.mubr.msk.f32.gmra.mrb[58].mxu0 %vm1426_vm0, %v5127_v28 }
 0xde0   : > { %v4977_v31 = vpop.f32.mrb[44].mxu1  ;;  %v5047_v10 = vpop.f32.mrb[52].mxu0  ;;  %11716 = vmatprep.mubr.msk.f32.mxu0 %vm1426_vm0, %v5128_v1 }
 0xde1   : > { %v4978_v8 = vadd.f32 %v10594_v38, %v4977_v31  ;;  %v11682_v51 = vpop.f32.mrb[45].mxu1  ;;  %v15403_v49 = vadd.f32 %v10595_v47, %v5047_v10  ;;  %v11693_v33 = vpop.f32.mrb[53].mxu0 }
 0xde3   : > { %11719 = vmatprep.subr.mxu1 %v4978_v8  ;;  %11717 = vmatmul.mubr.msk.f32.gmra.mrb[60].mxu0 %vm1426_vm0, %v5129_v14 }
 0xde4   : > { %11720 = vmatpush3.msra.mxu1 %v4978_v8  ;;  %11735 = vmatprep.mubr.msk.f32.mxu0 %vm1426_vm0, %v5503_v3 }
 0xde5   : > { %11747 = vmatprep.subr.mxu1 %v15403_v49 }
 0xde7   : > { %11736 = vmatmul.mubr.msk.f32.vlgmr.msra.gmra.mrb[62].mxu0 %vm1426_vm0, %v5504_v9 }
 0xde8   : > { %v15413_v5 = vpop.f32.mrb[46].mxu1  ;;  %11762 = vmatpush3.xpose.msk.msra.mxu0 %vm1426_vm0, %v4873_v24  ;;  %11738 = vmatprep.mubr.msk.f32.mxu0 %vm1426_vm0, %v5505_v55 }
 0xde9   : > { %v11704_v7 = vpop.f32.mrb[47].mxu1  ;;  %12398 = vmatprep.subr.bf16.mxu0 %v13996_v30 }
 0xdeb   : > { %11739 = vmatmul.mubr.msk.f32.gmra.mrb[64].mxu0 %vm1426_vm0, %v5506_v58 }
 0xdec   : > { %11741 = vmatprep.mubr.msk.f32.mxu0 %vm1426_vm0, %v5507_v35 }
 0xdef   : > { %11742 = vmatmul.mubr.msk.f32.gmra.mrb[66].mxu0 %vm1426_vm0, %v5508_v18 }
 0xdf0   : > { %11744 = vmatprep.mubr.msk.f32.mxu0 %vm1426_vm0, %v5509_v16 }
 0xdf3   : > { %11745 = vmatmul.mubr.msk.f32.gmra.mrb[68].mxu0 %vm1426_vm0, %v5510_v53 }
 0xdf4   : > { %11763 = vmatprep.mubr.msk.f32.mxu0 %vm1426_vm0, %v5884_v48 }
 0xdf7   : > { %11764 = vmatmul.mubr.msk.f32.vlgmr.msra.gmra.mrb[70].mxu0 %vm1426_vm0, %v5885_v37 }
 0xdf8   : > { %11766 = vmatprep.mubr.msk.f32.mxu0 %vm1426_vm0, %v5886_v26 }
 0xdfb   : > { %11767 = vmatmul.mubr.msk.f32.gmra.mrb[72].mxu0 %vm1426_vm0, %v5887_v11 }
 0xdfc   : > { %11769 = vmatprep.mubr.msk.f32.mxu0 %vm1426_vm0, %v5888_v41 }
 0xdff   : > { %11770 = vmatmul.mubr.msk.f32.gmra.mrb[74].mxu0 %vm1426_vm0, %v5889_v13 }
 0xe00   : > { %11772 = vmatprep.mubr.msk.f32.mxu0 %vm1426_vm0, %v5890_v43 }
 0xe03   : > { %11773 = vmatmul.mubr.msk.f32.gmra.mrb[76].mxu0 %vm1426_vm0, %v5891_v19 }
 0xe04   : > { %11797 = vmatprep.mubr.msk.f32.mxu0 %vm13997_vm1, %v13998_v39 }
 0xeaa   : > { %v15446_v40 = vpop.f32.mrb[54].mxu0 }
 0xeab   : > { %v15448_v61 = vpop.f32.mrb[55].mxu0  ;;  %v5265_v36 = vsel %vm2436_vm2, %v15446_v40, -inf }
 0xeac   : > { %5266 = vmax.xlane.f32.xlu1 %v5265_v36  ;;  %v5262_v12 = vsel %vm2436_vm2, %v15448_v61, -inf }
 0xead   : > { %5263 = vmax.xlane.f32.xlu0 %v5262_v12 }
 0xeae   : > { %v15454_v62 = vpop.f32.mrb[56].mxu0 }
 0xeaf   : > { %v15456_v0 = vpop.f32.mrb[57].mxu0  ;;  %v5271_v23 = vsel %vm2436_vm2, %v15454_v62, -inf }
 0xeb0   : > { %5272 = vmax.xlane.f32.xlu1 %v5271_v23  ;;  %v5268_v20 = vsel %vm2436_vm2, %v15456_v0, -inf }
 0xeb1   : > { %5269 = vmax.xlane.f32.xlu0 %v5268_v20 }
 0xeb2   : > { %v15462_v50 = vpop.f32.mrb[58].mxu0 }
 0xeb3   : > { %v15464_v17 = vpop.f32.mrb[59].mxu0  ;;  %v5277_v57 = vsel %vm2436_vm2, %v15462_v50, -inf }
 0xeb4   : > { %5278 = vmax.xlane.f32.xlu1 %v5277_v57  ;;  %v5274_v15 = vsel %vm2436_vm2, %v15464_v17, -inf }
 0xeb5   : > { %5275 = vmax.xlane.f32.xlu0 %v5274_v15 }
 0xeb6   : > { %v15470_v2 = vpop.f32.mrb[60].mxu0 }
 0xeb7   : > { %v15472_v46 = vpop.f32.mrb[61].mxu0  ;;  %v5283_v56 = vsel %vm2436_vm2, %v15470_v2, -inf }
 0xeb8   : > { %5284 = vmax.xlane.f32.xlu1 %v5283_v56  ;;  %v5280_v60 = vsel %vm2436_vm2, %v15472_v46, -inf }
 0xeb9   : > { %5281 = vmax.xlane.f32.xlu0 %v5280_v60 }
 0xeba   : > { %v15478_v21 = vpop.f32.mrb[62].mxu0 }
 0xebb   : > { %v15480_v6 = vpop.f32.mrb[63].mxu0  ;;  %v5646_v42 = vsel %vm2436_vm2, %v15478_v21, -inf }
 0xebc   : > { %5647 = vmax.xlane.f32.xlu1 %v5646_v42  ;;  %v5643_v25 = vsel %vm2436_vm2, %v15480_v6, -inf }
 0xebd   : > { %5644 = vmax.xlane.f32.xlu0 %v5643_v25 }
 0xebe   : > { %v15486_v59 = vpop.f32.mrb[64].mxu0 }
 0xebf   : > { %v15488_v24 = vpop.f32.mrb[65].mxu0  ;;  %v5652_v32 = vsel %vm2436_vm2, %v15486_v59, -inf }
 0xec0   : > { %5653 = vmax.xlane.f32.xlu1 %v5652_v32  ;;  %v5649_v27 = vsel %vm2436_vm2, %v15488_v24, -inf }
 0xec1   : > { %5650 = vmax.xlane.f32.xlu0 %v5649_v27 }
 0xec2   : > { %v15494_v22 = vpop.f32.mrb[66].mxu0 }
 0xec3   : > { %v15496_v44 = vpop.f32.mrb[67].mxu0  ;;  %v5658_v28 = vsel %vm2436_vm2, %v15494_v22, -inf }
 0xec4   : > { %5659 = vmax.xlane.f32.xlu1 %v5658_v28  ;;  %v5655_v4 = vsel %vm2436_vm2, %v15496_v44, -inf }
 0xec5   : > { %5656 = vmax.xlane.f32.xlu0 %v5655_v4 }
 0xec6   : > { %v15502_v38 = vpop.f32.mrb[68].mxu0 }
 0xec7   : > { %v15504_v47 = vpop.f32.mrb[69].mxu0  ;;  %v5664_v1 = vsel %vm2436_vm2, %v15502_v38, -inf }
 0xec8   : > { %5665 = vmax.xlane.f32.xlu1 %v5664_v1  ;;  %v5661_v31 = vsel %vm2436_vm2, %v15504_v47, -inf }
 0xec9   : > { %5662 = vmax.xlane.f32.xlu0 %v5661_v31 }
 0xeca   : > { %v15510_v10 = vpop.f32.mrb[70].mxu0 }
 0xecb   : > { %v15512_v8 = vpop.f32.mrb[71].mxu0  ;;  %v6027_v51 = vsel %vm2436_vm2, %v15510_v10, -inf }
 0xecc   : > { %6028 = vmax.xlane.f32.xlu1 %v6027_v51  ;;  %v6024_v33 = vsel %vm2436_vm2, %v15512_v8, -inf }
 0xecd   : > { %6025 = vmax.xlane.f32.xlu0 %v6024_v33 }
 0xece   : > { %v15518_v14 = vpop.f32.mrb[72].mxu0 }
 0xecf   : > { %v15520_v3 = vpop.f32.mrb[73].mxu0  ;;  %v6033_v9 = vsel %vm2436_vm2, %v15518_v14, -inf }
 0xed0   : > { %6034 = vmax.xlane.f32.xlu1 %v6033_v9  ;;  %v6030_v55 = vsel %vm2436_vm2, %v15520_v3, -inf }
 0xed1   : > { %6031 = vmax.xlane.f32.xlu0 %v6030_v55 }
 0xed2   : > { %v15526_v52 = vpop.f32.mrb[74].mxu0 }
 0xed3   : > { %v15528_v7 = vpop.f32.mrb[75].mxu0  ;;  %v6039_v58 = vsel %vm2436_vm2, %v15526_v52, -inf }
 0xed4   : > { %6040 = vmax.xlane.f32.xlu1 %v6039_v58  ;;  %v6036_v63 = vsel %vm2436_vm2, %v15528_v7, -inf }
 0xed5   : > { %6037 = vmax.xlane.f32.xlu0 %v6036_v63 }
 0xed6   : > { %v15534_v35 = vpop.f32.mrb[76].mxu0 }
 0xed7   : > { %v15536_v18 = vpop.f32.mrb[77].mxu0  ;;  %v6045_v29 = vsel %vm2436_vm2, %v15534_v35, -inf }
 0xed8   : > { %6046 = vmax.xlane.f32.xlu1 %v6045_v29  ;;  %v6042_v16 = vsel %vm2436_vm2, %v15536_v18, -inf }
 0xed9   : > { %6043 = vmax.xlane.f32.xlu0 %v6042_v16 }
 0xf39   : > { %v5267_v53 = vpop.xlane.xlu1 %5266 }
 0xf3a   : > { %v5287_v48 = vsub.f32 %v15446_v40, %v5267_v53  ;;  %v5264_v37 = vpop.xlane.xlu0 %5263 }
 0xf3b   : > { %v5286_v26 = vsub.f32 %v15448_v61, %v5264_v37 }
 0xf3c   : > { %v5296_v11 = vmul.f32 1.442695, %v5287_v48 }
 0xf3d   : > { %v5294_v41 = vmul.f32 1.442695, %v5286_v26  ;;  %v5273_v13 = vpop.xlane.xlu1 %5272 }
 0xf3e   : > { %12992 = vpow2.f32 %v5296_v11  ;;  %v5289_v43 = vsub.f32 %v15454_v62, %v5273_v13  ;;  %v5270_v19 = vpop.xlane.xlu0 %5269 }
 0xf3f   : > { %12994 = vpow2.f32 %v5294_v41  ;;  %v5288_v36 = vsub.f32 %v15456_v0, %v5270_v19 }
 0xf40   : > { %v5300_v12 = vmul.f32 1.442695, %v5289_v43 }
 0xf41   : > { %v5298_v23 = vmul.f32 1.442695, %v5288_v36  ;;  %v5279_v20 = vpop.xlane.xlu1 %5278 }
 0xf42   : > { %12996 = vpow2.f32 %v5300_v12  ;;  %v5291_v57 = vsub.f32 %v15462_v50, %v5279_v20  ;;  %v5276_v40 = vpop.xlane.xlu0 %5275 }
 0xf43   : > { %12998 = vpow2.f32 %v5298_v23  ;;  %v5290_v61 = vsub.f32 %v15464_v17, %v5276_v40 }
 0xf44   : > { %v5304_v15 = vmul.f32 1.442695, %v5291_v57 }
 0xf45   : > { %v5302_v56 = vmul.f32 1.442695, %v5290_v61  ;;  %v5285_v60 = vpop.xlane.xlu1 %5284 }
 0xf46   : > { %13000 = vpow2.f32 %v5304_v15  ;;  %v5293_v62 = vsub.f32 %v15470_v2, %v5285_v60  ;;  %v5282_v42 = vpop.xlane.xlu0 %5281 }
 0xf47   : > { %13002 = vpow2.f32 %v5302_v56  ;;  %v5292_v0 = vsub.f32 %v15472_v46, %v5282_v42 }
 0xf48   : > { %v15550_v25 = vpop.eup %12992  ;;  %v5308_v32 = vmul.f32 1.442695, %v5293_v62 }
 0xf49   : > { %v15552_v27 = vpop.eup %12994  ;;  %v5306_v50 = vmul.f32 1.442695, %v5292_v0  ;;  %v5648_v28 = vpop.xlane.xlu1 %5647  ;;  %v5313_v17 = vsel %vm2436_vm2, %v15550_v25, 0.0 }
 0xf4a   : > { %13004 = vpow2.f32 %v5308_v32  ;;  %v5668_v4 = vsub.f32 %v15478_v21, %v5648_v28  ;;  %v5645_v1 = vpop.xlane.xlu0 %5644  ;;  %5314 = vadd.xlane.f32.xlu1 %v5313_v17  ;;  %v5310_v2 = vsel %vm2436_vm2, %v15552_v27, 0.0 }
 0xf4b   : > { %13006 = vpow2.f32 %v5306_v50  ;;  %v5667_v46 = vsub.f32 %v15480_v6, %v5645_v1  ;;  %5311 = vadd.xlane.f32.xlu0 %v5310_v2 }
 0xf4c   : > { %v15560_v31 = vpop.eup %12996  ;;  %v5677_v51 = vmul.f32 1.442695, %v5668_v4 }
 0xf4d   : > { %v15562_v33 = vpop.eup %12998  ;;  %v5675_v9 = vmul.f32 1.442695, %v5667_v46  ;;  %v5654_v55 = vpop.xlane.xlu1 %5653  ;;  %v5319_v58 = vsel %vm2436_vm2, %v15560_v31, 0.0 }
 0xf4e   : > { %13008 = vpow2.f32 %v5677_v51  ;;  %v5670_v21 = vsub.f32 %v15486_v59, %v5654_v55  ;;  %v5651_v63 = vpop.xlane.xlu0 %5650  ;;  %5320 = vadd.xlane.f32.xlu1 %v5319_v58  ;;  %v5316_v29 = vsel %vm2436_vm2, %v15562_v33, 0.0 }
 0xf4f   : > { %13010 = vpow2.f32 %v5675_v9  ;;  %v5669_v6 = vsub.f32 %v15488_v24, %v5651_v63  ;;  %5317 = vadd.xlane.f32.xlu0 %v5316_v29 }
 0xf50   : > { %v15570_v16 = vpop.eup %13000  ;;  %v5681_v53 = vmul.f32 1.442695, %v5670_v21 }
 0xf51   : > { %v15572_v48 = vpop.eup %13002  ;;  %v5679_v37 = vmul.f32 1.442695, %v5669_v6  ;;  %v5660_v26 = vpop.xlane.xlu1 %5659  ;;  %v5325_v11 = vsel %vm2436_vm2, %v15570_v16, 0.0 }
 0xf52   : > { %13012 = vpow2.f32 %v5681_v53  ;;  %v5672_v59 = vsub.f32 %v15494_v22, %v5660_v26  ;;  %v5657_v41 = vpop.xlane.xlu0 %5656  ;;  %5326 = vadd.xlane.f32.xlu1 %v5325_v11  ;;  %v5322_v13 = vsel %vm2436_vm2, %v15572_v48, 0.0 }
 0xf53   : > { %13014 = vpow2.f32 %v5679_v37  ;;  %v5671_v24 = vsub.f32 %v15496_v44, %v5657_v41  ;;  %5323 = vadd.xlane.f32.xlu0 %v5322_v13 }
 0xf54   : > { %v15580_v43 = vpop.eup %13004  ;;  %v5685_v19 = vmul.f32 1.442695, %v5672_v59 }
 0xf55   : > { %v15582_v36 = vpop.eup %13006  ;;  %v5683_v12 = vmul.f32 1.442695, %v5671_v24  ;;  %v5666_v23 = vpop.xlane.xlu1 %5665  ;;  %v5331_v20 = vsel %vm2436_vm2, %v15580_v43, 0.0 }
 0xf56   : > { %13016 = vpow2.f32 %v5685_v19  ;;  %v5674_v22 = vsub.f32 %v15502_v38, %v5666_v23  ;;  %5332 = vadd.xlane.f32.xlu1 %v5331_v20  ;;  %v5663_v57 = vpop.xlane.xlu0 %5662  ;;  %v5328_v40 = vsel %vm2436_vm2, %v15582_v36, 0.0 }
 0xf57   : > { %13018 = vpow2.f32 %v5683_v12  ;;  %v5673_v44 = vsub.f32 %v15504_v47, %v5663_v57  ;;  %5329 = vadd.xlane.f32.xlu0 %v5328_v40 }
 0xf58   : > { %v15590_v61 = vpop.eup %13008  ;;  %v5689_v15 = vmul.f32 1.442695, %v5674_v22 }
 0xf59   : > { %v15592_v56 = vpop.eup %13010  ;;  %v5687_v60 = vmul.f32 1.442695, %v5673_v44  ;;  %v6029_v62 = vpop.xlane.xlu1 %6028  ;;  %v5694_v42 = vsel %vm2436_vm2, %v15590_v61, 0.0 }
 0xf5a   : > { %13020 = vpow2.f32 %v5689_v15  ;;  %v6049_v38 = vsub.f32 %v15510_v10, %v6029_v62  ;;  %5695 = vadd.xlane.f32.xlu1 %v5694_v42  ;;  %v6026_v0 = vpop.xlane.xlu0 %6025  ;;  %v5691_v32 = vsel %vm2436_vm2, %v15592_v56, 0.0 }
 0xf5b   : > { %13022 = vpow2.f32 %v5687_v60  ;;  %v6048_v47 = vsub.f32 %v15512_v8, %v6026_v0  ;;  %5692 = vadd.xlane.f32.xlu0 %v5691_v32 }
 0xf5c   : > { %v15600_v50 = vpop.eup %13012  ;;  %v6058_v28 = vmul.f32 1.442695, %v6049_v38 }
 0xf5d   : > { %v15602_v17 = vpop.eup %13014  ;;  %v6056_v4 = vmul.f32 1.442695, %v6048_v47  ;;  %v6035_v1 = vpop.xlane.xlu1 %6034  ;;  %v5700_v2 = vsel %vm2436_vm2, %v15600_v50, 0.0 }
 0xf5e   : > { %13024 = vpow2.f32 %v6058_v28  ;;  %v6051_v10 = vsub.f32 %v15518_v14, %v6035_v1  ;;  %5701 = vadd.xlane.f32.xlu1 %v5700_v2  ;;  %v6032_v46 = vpop.xlane.xlu0 %6031  ;;  %v5697_v51 = vsel %vm2436_vm2, %v15602_v17, 0.0 }
 0xf5f   : > { %13026 = vpow2.f32 %v6056_v4  ;;  %v6050_v8 = vsub.f32 %v15520_v3, %v6032_v46  ;;  %5698 = vadd.xlane.f32.xlu0 %v5697_v51 }
 0xf60   : > { %v15610_v9 = vpop.eup %13016  ;;  %v6062_v55 = vmul.f32 1.442695, %v6051_v10 }
 0xf61   : > { %v15612_v58 = vpop.eup %13018  ;;  %v6060_v21 = vmul.f32 1.442695, %v6050_v8  ;;  %v6041_v63 = vpop.xlane.xlu1 %6040  ;;  %v5706_v29 = vsel %vm2436_vm2, %v15610_v9, 0.0 }
 0xf62   : > { %13028 = vpow2.f32 %v6062_v55  ;;  %v6053_v14 = vsub.f32 %v15526_v52, %v6041_v63  ;;  %5707 = vadd.xlane.f32.xlu1 %v5706_v29  ;;  %v6038_v6 = vpop.xlane.xlu0 %6037  ;;  %v5703_v53 = vsel %vm2436_vm2, %v15612_v58, 0.0  ;;  %v10596_v63 = vld [vmem:[#allocation9 + $0x5] ss:$0 sm:$0xff] }
 0xf63   : > { %13030 = vpow2.f32 %v6060_v21  ;;  %v6052_v3 = vsub.f32 %v15528_v7, %v6038_v6  ;;  %5704 = vadd.xlane.f32.xlu0 %v5703_v53 }
 0xf64   : > { %v15620_v37 = vpop.eup %13020  ;;  %v6066_v26 = vmul.f32 1.442695, %v6053_v14 }
 0xf65   : > { %v15622_v11 = vpop.eup %13022  ;;  %v6064_v59 = vmul.f32 1.442695, %v6052_v3  ;;  %v6047_v41 = vpop.xlane.xlu1 %6046  ;;  %v5712_v13 = vsel %vm2436_vm2, %v15620_v37, 0.0 }
 0xf66   : > { %13032 = vpow2.f32 %v6066_v26  ;;  %v6055_v52 = vsub.f32 %v15534_v35, %v6047_v41  ;;  %5713 = vadd.xlane.f32.xlu1 %v5712_v13  ;;  %v6044_v24 = vpop.xlane.xlu0 %6043  ;;  %v5709_v19 = vsel %vm2436_vm2, %v15622_v11, 0.0  ;;  %v5118_v26 = vadd.f32 %v10596_v63, %v15413_v5 }
 0xf67   : > { %13034 = vpow2.f32 %v6064_v59  ;;  %v6054_v7 = vsub.f32 %v15536_v18, %v6044_v24  ;;  %5710 = vadd.xlane.f32.xlu0 %v5709_v19 }
 0xf68   : > { %v15630_v12 = vpop.eup %13024  ;;  %v6070_v23 = vmul.f32 1.442695, %v6055_v52 }
 0xf69   : > { %v15632_v20 = vpop.eup %13026  ;;  %v6068_v22 = vmul.f32 1.442695, %v6054_v7  ;;  %v6075_v57 = vsel %vm2436_vm2, %v15630_v12, 0.0 }
 0xf6a   : > { %13036 = vpow2.f32 %v6070_v23  ;;  %6076 = vadd.xlane.f32.xlu1 %v6075_v57  ;;  %v6072_v35 = vsel %vm2436_vm2, %v15632_v20, 0.0 }
 0xf6b   : > { %13038 = vpow2.f32 %v6068_v22  ;;  %6073 = vadd.xlane.f32.xlu0 %v6072_v35 }
 0xf6c   : > { %v15638_v40 = vpop.eup %13028 }
 0xf6d   : > { %v15640_v18 = vpop.eup %13030  ;;  %v6081_v44 = vsel %vm2436_vm2, %v15638_v40, 0.0 }
 0xf6e   : > { %6082 = vadd.xlane.f32.xlu1 %v6081_v44  ;;  %v6078_v15 = vsel %vm2436_vm2, %v15640_v18, 0.0 }
 0xf6f   : > { %6079 = vadd.xlane.f32.xlu0 %v6078_v15 }
 0xf70   : > { %v15646_v60 = vpop.eup %13032 }
 0xf71   : > { %v15648_v62 = vpop.eup %13034  ;;  %v6087_v42 = vsel %vm2436_vm2, %v15646_v60, 0.0 }
 0xf72   : > { %6088 = vadd.xlane.f32.xlu1 %v6087_v42  ;;  %v6084_v38 = vsel %vm2436_vm2, %v15648_v62, 0.0 }
 0xf73   : > { %6085 = vadd.xlane.f32.xlu0 %v6084_v38 }
 0xf74   : > { %v15654_v0 = vpop.eup %13036 }
 0xf75   : > { %v15656_v32 = vpop.eup %13038  ;;  %v6093_v47 = vsel %vm2436_vm2, %v15654_v0, 0.0 }
 0xf76   : > { %6094 = vadd.xlane.f32.xlu1 %v6093_v47  ;;  %v6090_v28 = vsel %vm2436_vm2, %v15656_v32, 0.0 }
 0xf77   : > { %6091 = vadd.xlane.f32.xlu0 %v6090_v28 }
 0xfd7   : > { %v5315_v4 = vpop.xlane.xlu1 %5314 }
 0xfd8   : > { %13040 = vrcp.f32 %v5315_v4  ;;  %v5312_v1 = vpop.xlane.xlu0 %5311 }
 0xfd9   : > { %13042 = vrcp.f32 %v5312_v1 }
 0xfdb   : > { %v5321_v2 = vpop.xlane.xlu1 %5320 }
 0xfdc   : > { %13044 = vrcp.f32 %v5321_v2  ;;  %v5318_v10 = vpop.xlane.xlu0 %5317 }
 0xfdd   : > { %13046 = vrcp.f32 %v5318_v10 }
 0xfdf   : > { %v5327_v46 = vpop.xlane.xlu1 %5326 }
 0xfe0   : > { %13048 = vrcp.f32 %v5327_v46  ;;  %v5324_v51 = vpop.xlane.xlu0 %5323 }
 0xfe1   : > { %13050 = vrcp.f32 %v5324_v51 }
 0xfe2   : > { %v13041_v8 = vpop.eup %13040 }
 0xfe3   : > { %v13043_v55 = vpop.eup %13042  ;;  %v5333_v21 = vpop.xlane.xlu1 %5332  ;;  %v5337_v6 = vmul.f32 %v13041_v8, %v15550_v25 }
 0xfe4   : > { %13052 = vrcp.f32 %v5333_v21  ;;  %v5330_v29 = vpop.xlane.xlu0 %5329  ;;  %v5335_v14 = vmul.f32 %v13043_v55, %v15552_v27 }
 0xfe5   : > { %13054 = vrcp.f32 %v5330_v29 }
 0xfe6   : > { %v13045_v53 = vpop.eup %13044  ;;  %11721 = vmatprep.mubr.msk.f32.mxu1 %vm2436_vm2, %v5335_v14 }
 0xfe7   : > { %v13047_v3 = vpop.eup %13046  ;;  %v5696_v59 = vpop.xlane.xlu1 %5695  ;;  %11722 = vmatmul.mubr.msk.f32.vlgmr.msra.gmra.mrb[48].mxu1 %vm2436_vm2, %v5337_v6  ;;  %v5341_v25 = vmul.f32 %v13045_v53, %v15560_v31 }
 0xfe8   : > { %13056 = vrcp.f32 %v5696_v59  ;;  %11748 = vmatpush3.msra.mxu1 %v15403_v49  ;;  %v5693_v41 = vpop.xlane.xlu0 %5692  ;;  %v5339_v13 = vmul.f32 %v13047_v3, %v15562_v33 }
 0xfe9   : > { %13058 = vrcp.f32 %v5693_v41  ;;  %11775 = vmatprep.subr.mxu1 %v5118_v26 }
 0xfea   : > { %v13049_v27 = vpop.eup %13048  ;;  %11724 = vmatprep.mubr.msk.f32.mxu1 %vm2436_vm2, %v5339_v13 }
 0xfeb   : > { %v13051_v52 = vpop.eup %13050  ;;  %v5702_v24 = vpop.xlane.xlu1 %5701  ;;  %11725 = vmatmul.mubr.msk.f32.gmra.mrb[50].mxu1 %vm2436_vm2, %v5341_v25  ;;  %v5345_v49 = vmul.f32 %v13049_v27, %v15570_v16  ;;  %v10653_v27 = vld [vmem:[%s16429_s5 + $0x70] sm:$0xff] }
 0xfec   : > { %13060 = vrcp.f32 %v5702_v24  ;;  %v5699_v5 = vpop.xlane.xlu0 %5698  ;;  %v5343_v19 = vmul.f32 %v13051_v52, %v15572_v48  ;;  %v10656_v24 = vld [vmem:[%s16429_s5 + $0x88] sm:$0xff] }
 0xfed   : > { %13062 = vrcp.f32 %v5699_v5 }
 0xfee   : > { %v13053_v7 = vpop.eup %13052  ;;  %11727 = vmatprep.mubr.msk.f32.mxu1 %vm2436_vm2, %v5343_v19  ;;  %v10657_v19 = vld [vmem:[%s16429_s5 + $0x90] sm:$0xff] }
 0xfef   : > { %v13055_v33 = vpop.eup %13054  ;;  %v5708_v23 = vpop.xlane.xlu1 %5707  ;;  %11728 = vmatmul.mubr.msk.f32.gmra.mrb[52].mxu1 %vm2436_vm2, %v5345_v49  ;;  %v5349_v57 = vmul.f32 %v13053_v7, %v15580_v43  ;;  %v10658_v49 = vld [vmem:[%s16429_s5 + $0x98] sm:$0xff] }
 0xff0   : > { %13064 = vrcp.f32 %v5708_v23  ;;  %v5705_v31 = vpop.xlane.xlu0 %5704  ;;  %v5347_v22 = vmul.f32 %v13055_v33, %v15582_v36  ;;  %v12408_v7 = vpack.c.bf16 %v10658_v49, %v10657_v19  ;;  %v15728_v23 = vld [vmem:[%s16428_s8 + $0x1] ss:$0 sm:$0xff] }
 0xff1   : > { %13066 = vrcp.f32 %v5705_v31 }
 0xff2   : > { %v13057_v35 = vpop.eup %13056  ;;  %11730 = vmatprep.mubr.msk.f32.mxu1 %vm2436_vm2, %v5347_v22 }
 0xff3   : > { %v13059_v48 = vpop.eup %13058  ;;  %v5714_v44 = vpop.xlane.xlu1 %5713  ;;  %11731 = vmatmul.mubr.msk.f32.gmra.mrb[54].mxu1 %vm2436_vm2, %v5349_v57  ;;  %v5718_v42 = vmul.f32 %v13057_v35, %v15590_v61  ;;  %v15732_v57 = vld [vmem:[%s16428_s8] ss:$0 sm:$0xff] }
 0xff4   : > { %13068 = vrcp.f32 %v5714_v44  ;;  %v5711_v16 = vpop.xlane.xlu0 %5710  ;;  %v5716_v15 = vmul.f32 %v13059_v48, %v15592_v56 }
 0xff5   : > { %13070 = vrcp.f32 %v5711_v16 }
 0xff6   : > { %v13061_v38 = vpop.eup %13060  ;;  %11749 = vmatprep.mubr.msk.f32.mxu1 %vm2436_vm2, %v5716_v15 }
 0xff7   : > { %v13063_v36 = vpop.eup %13062  ;;  %v6077_v47 = vpop.xlane.xlu1 %6076  ;;  %11750 = vmatmul.mubr.msk.f32.vlgmr.msra.gmra.mrb[56].mxu1 %vm2436_vm2, %v5718_v42  ;;  %v5722_v4 = vmul.f32 %v13061_v38, %v15600_v50  ;;  %v15738_v38 = vld [vmem:[%s16428_s8 + $0x3] ss:$0 sm:$0xff] }
 0xff8   : > { %13072 = vrcp.f32 %v6077_v47  ;;  %11776 = vmatpush3.msra.mxu1 %v5118_v26  ;;  %v6074_v43 = vpop.xlane.xlu0 %6073  ;;  %v5720_v28 = vmul.f32 %v13063_v36, %v15602_v17  ;;  %v15742_v47 = vld [vmem:[%s16428_s8 + $0x2] ss:$0 sm:$0xff] }
 0xff9   : > { %13074 = vrcp.f32 %v6074_v43  ;;  %12404 = vmatprep.subr.bf16.mxu1 %v13996_v30 }
 0xffa   : > { %v13065_v56 = vpop.eup %13064  ;;  %11752 = vmatprep.mubr.msk.f32.mxu1 %vm2436_vm2, %v5720_v28 }
 0xffb   : > { %v13067_v61 = vpop.eup %13066  ;;  %v6083_v1 = vpop.xlane.xlu1 %6082  ;;  %11753 = vmatmul.mubr.msk.f32.gmra.mrb[58].mxu1 %vm2436_vm2, %v5722_v4  ;;  %v5726_v46 = vmul.f32 %v13065_v56, %v15610_v9 }
 0xffc   : > { %13076 = vrcp.f32 %v6083_v1  ;;  %v6080_v2 = vpop.xlane.xlu0 %6079  ;;  %v5724_v10 = vmul.f32 %v13067_v61, %v15612_v58 }
 0xffd   : > { %13078 = vrcp.f32 %v6080_v2  ;;  %v15748_v2 = vld [vmem:[%s16428_s8 + $0x5] ss:$0 sm:$0xff] }
 0xffe   : > { %v13069_v17 = vpop.eup %13068  ;;  %11755 = vmatprep.mubr.msk.f32.mxu1 %vm2436_vm2, %v5724_v10 }
 0xfff   : > { %v13071_v50 = vpop.eup %13070  ;;  %v6089_v51 = vpop.xlane.xlu1 %6088  ;;  %11756 = vmatmul.mubr.msk.f32.gmra.mrb[60].mxu1 %vm2436_vm2, %v5726_v46  ;;  %v5730_v21 = vmul.f32 %v13069_v17, %v15620_v37  ;;  %v15752_v46 = vld [vmem:[%s16428_s8 + $0x4] ss:$0 sm:$0xff] }
0x1000   : > { %13080 = vrcp.f32 %v6089_v51  ;;  %v6086_v8 = vpop.xlane.xlu0 %6085  ;;  %v5728_v55 = vmul.f32 %v13071_v50, %v15622_v11 }
0x1001   : > { %13082 = vrcp.f32 %v6086_v8 }
0x1002   : > { %v13073_v63 = vpop.eup %13072  ;;  %11758 = vmatprep.mubr.msk.f32.mxu1 %vm2436_vm2, %v5728_v55 }
0x1003   : > { %v13075_v58 = vpop.eup %13074  ;;  %v6095_v29 = vpop.xlane.xlu1 %6094  ;;  %11759 = vmatmul.mubr.msk.f32.gmra.mrb[62].mxu1 %vm2436_vm2, %v5730_v21  ;;  %v6099_v6 = vmul.f32 %v13073_v63, %v15630_v12 }
0x1004   : > { %13084 = vrcp.f32 %v6095_v29  ;;  %v6092_v9 = vpop.xlane.xlu0 %6091  ;;  %v6097_v14 = vmul.f32 %v13075_v58, %v15632_v20  ;;  %v15758_v58 = vld [vmem:[%s16428_s8 + $0x7] ss:$0 sm:$0xff] }
0x1005   : > { %13086 = vrcp.f32 %v6092_v9  ;;  %v15762_v9 = vld [vmem:[%s16428_s8 + $0x6] ss:$0 sm:$0xff] }
0x1006   : > { %v13077_v53 = vpop.eup %13076  ;;  %11777 = vmatprep.mubr.msk.f32.mxu1 %vm2436_vm2, %v6097_v14 }
0x1007   : > { %v13079_v11 = vpop.eup %13078  ;;  %11778 = vmatmul.mubr.msk.f32.vlgmr.msra.gmra.mrb[64].mxu1 %vm2436_vm2, %v6099_v6  ;;  %v6103_v3 = vmul.f32 %v13077_v53, %v15638_v40  ;;  %v10659_v53 = vld [vmem:[%s16429_s5 + $0xa0] sm:$0xff] }
0x1008   : > { %v6101_v37 = vmul.f32 %v13079_v11, %v15640_v18  ;;  %v10660_v11 = vld [vmem:[%s16429_s5 + $0xa8] sm:$0xff] }
0x100a   : > { %v13081_v26 = vpop.eup %13080  ;;  %11780 = vmatprep.mubr.msk.f32.mxu1 %vm2436_vm2, %v6101_v37 }
0x100b   : > { %v13083_v59 = vpop.eup %13082  ;;  %11781 = vmatmul.mubr.msk.f32.gmra.mrb[66].mxu1 %vm2436_vm2, %v6103_v3  ;;  %v6107_v20 = vmul.f32 %v13081_v26, %v15646_v60  ;;  %v10651_v60 = vld [vmem:[%s16429_s5 + $0x60] sm:$0xff] }
0x100c   : > { %v6105_v12 = vmul.f32 %v13083_v59, %v15648_v62  ;;  %v10652_v62 = vld [vmem:[%s16429_s5 + $0x68] sm:$0xff] }
0x100d   : > { %v12399_v25 = vpack.c.bf16 %v10652_v62, %v10651_v60  ;;  %v10661_v60 = vld [vmem:[%s16429_s5 + $0xb0] sm:$0xff]  ;;  %v10662_v62 = vld [vmem:[%s16429_s5 + $0xb8] sm:$0xff] }
0x100e   : > { %v13085_v41 = vpop.eup %13084  ;;  %11783 = vmatprep.mubr.msk.f32.mxu1 %vm2436_vm2, %v6105_v12 }
0x100f   : > { %v13087_v18 = vpop.eup %13086  ;;  %11784 = vmatmul.mubr.msk.f32.gmra.mrb[68].mxu1 %vm2436_vm2, %v6107_v20  ;;  %v6111_v13 = vmul.f32 %v13085_v41, %v15654_v0  ;;  %12400 = vmatpush3.bf16.msra.mxu0 %v12399_v25  ;;  %v10655_v0 = vld [vmem:[%s16429_s5 + $0x80] sm:$0xff] }
0x1010   : > { %v6109_v40 = vmul.f32 %v13087_v18, %v15656_v32  ;;  %12401 = vmatprep.subr.bf16.mxu0 %v13996_v30  ;;  %v10654_v32 = vld [vmem:[%s16429_s5 + $0x78] sm:$0xff]  ;;  %v12405_v5 = vpack.c.bf16 %v10656_v24, %v10655_v0  ;;  %v12411_v18 = vpack.c.bf16 %v10660_v11, %v10659_v53 }
0x1011   : > { %v12402_v52 = vpack.c.bf16 %v10654_v32, %v10653_v27 }
0x1012   : > { %11786 = vmatprep.mubr.msk.f32.mxu1 %vm2436_vm2, %v6109_v40  ;;  %12406 = vmatpush3.bf16.msra.mxu1 %v12405_v5  ;;  %v12414_v5 = vpack.c.bf16 %v10662_v62, %v10661_v60 }
0x1013   : > { %11787 = vmatmul.mubr.msk.f32.gmra.mrb[70].mxu1 %vm2436_vm2, %v6111_v13  ;;  %12403 = vmatpush3.bf16.msra.mxu0 %v12402_v52 }
0x1014   : > { %11808 = vmatprep.mubr.msk.f32.mxu1 %vm13997_vm1, %v13998_v39  ;;  %12410 = vmatprep.subr.bf16.mxu0 %v13996_v30 }
0x1015   : > { %12407 = vmatprep.subr.bf16.mxu1 %v13996_v30 }
0x1016   : > { %12409 = vmatpush3.bf16.msra.mxu1 %v12408_v7 }
0x1017   : > { %12416 = vmatprep.subr.bf16.mxu1 %v13996_v30 }
0x10ba   : > { %v11723_v33 = vpop.f32.mrb[48].mxu1 }
0x10bb   : > { %v5480_v31 = vmul.f32 %v15728_v23, %v11723_v33  ;;  %v5440_v22 = vpop.f32.mrb[49].mxu1 }
0x10bc   : > { %v5479_v35 = vmul.f32 %v15732_v57, %v5440_v22 }
0x10bd   : > { %v5488_v48 = vsel %vm1426_vm0, %v5480_v31, 0.0 }
0x10be   : > { %v5487_v44 = vsel %vm1426_vm0, %v5479_v35, 0.0  ;;  %v11726_v16 = vpop.f32.mrb[50].mxu1 }
0x10bf   : > { %v5489_v15 = vadd.f32 %v5488_v48, %v5487_v44  ;;  %v5450_v42 = vpop.f32.mrb[51].mxu1  ;;  %v5482_v36 = vmul.f32 %v15738_v38, %v11726_v16 }
0x10c0   : > { %v5481_v43 = vmul.f32 %v15742_v47, %v5450_v42 }
0x10c1   : > { %v5492_v1 = vsel %vm1426_vm0, %v5482_v36, 0.0 }
0x10c2   : > { %v5490_v28 = vsel %vm1426_vm0, %v5481_v43, 0.0  ;;  %v11729_v4 = vpop.f32.mrb[52].mxu1 }
0x10c3   : > { %v5491_v56 = vadd.f32 %v5490_v28, %v5489_v15  ;;  %v5460_v61 = vpop.f32.mrb[53].mxu1  ;;  %v5484_v10 = vmul.f32 %v15748_v2, %v11729_v4 }
0x10c4   : > { %v5483_v17 = vmul.f32 %v15752_v46, %v5460_v61 }
0x10c5   : > { %v5493_v50 = vadd.f32 %v5492_v1, %v5491_v56  ;;  %v5496_v63 = vsel %vm1426_vm0, %v5484_v10, 0.0 }
0x10c6   : > { %v5494_v51 = vsel %vm1426_vm0, %v5483_v17, 0.0  ;;  %v11732_v8 = vpop.f32.mrb[54].mxu1 }
0x10c7   : > { %v5495_v55 = vadd.f32 %v5494_v51, %v5493_v50  ;;  %v5470_v21 = vpop.f32.mrb[55].mxu1  ;;  %v5486_v29 = vmul.f32 %v15758_v58, %v11732_v8 }
0x10c8   : > { %v5485_v14 = vmul.f32 %v15762_v9, %v5470_v21 }
0x10c9   : > { %v5497_v6 = vadd.f32 %v5496_v63, %v5495_v55  ;;  %v5500_v20 = vsel %vm1426_vm0, %v5486_v29, 0.0 }
0x10ca   : > { %v5498_v37 = vsel %vm1426_vm0, %v5485_v14, 0.0  ;;  %v11751_v3 = vpop.f32.mrb[56].mxu1 }
0x10cb   : > { %v5499_v26 = vadd.f32 %v5498_v37, %v5497_v6  ;;  %v5861_v59 = vmul.f32 %v15728_v23, %v11751_v3  ;;  %v5821_v12 = vpop.f32.mrb[57].mxu1 }
0x10cc   : > { %v5860_v41 = vmul.f32 %v15732_v57, %v5821_v12 }
0x10cd   : > { %v5501_v40 = vadd.f32 %v5500_v20, %v5499_v26  ;;  %v5869_v13 = vsel %vm1426_vm0, %v5861_v59, 0.0 }
0x10ce   : > { %v5868_v25 = vsel %vm1426_vm0, %v5860_v41, 0.0  ;;  %v11754_v27 = vpop.f32.mrb[58].mxu1 }
0x10cf   : > { %v5870_v32 = vadd.f32 %v5869_v13, %v5868_v25  ;;  %v5831_v52 = vpop.f32.mrb[59].mxu1  ;;  %11798 = vmatmul.mubr.msk.f32.vlgmr.msra.gmra.mrb[78].mxu0 %vm1426_vm0, %v5501_v40  ;;  %v5863_v0 = vmul.f32 %v15738_v38, %v11754_v27 }
0x10d0   : > { %v5862_v24 = vmul.f32 %v15742_v47, %v5831_v52  ;;  %12412 = vmatpush3.bf16.msra.mxu0 %v12411_v18  ;;  %11819 = vmatprep.mubr.msk.f32.mxu0 %vm13997_vm1, %v13998_v39 }
0x10d1   : > { %12413 = vmatprep.subr.bf16.mxu0 %v13996_v30  ;;  %v5873_v31 = vsel %vm1426_vm0, %v5863_v0, 0.0 }
0x10d2   : > { %v5871_v19 = vsel %vm1426_vm0, %v5862_v24, 0.0  ;;  %v11757_v49 = vpop.f32.mrb[60].mxu1 }
0x10d3   : > { %v5872_v7 = vadd.f32 %v5871_v19, %v5870_v32  ;;  %v5841_v33 = vpop.f32.mrb[61].mxu1  ;;  %v5865_v22 = vmul.f32 %v15748_v2, %v11757_v49  ;;  %v10663_v19 = vld [vmem:[#allocation10 + $0x3] ss:$0 sm:$0xff] }
0x10d4   : > { %v5864_v35 = vmul.f32 %v15752_v46, %v5841_v33  ;;  %12415 = vmatpush3.bf16.msra.mxu0 %v12414_v5 }
0x10d5   : > { %v5874_v48 = vadd.f32 %v5873_v31, %v5872_v7  ;;  %12422 = vmatprep.subr.bf16.mxu0 %v13996_v30  ;;  %v5877_v36 = vsel %vm1426_vm0, %v5865_v22, 0.0 }
0x10d6   : > { %v5875_v44 = vsel %vm1426_vm0, %v5864_v35, 0.0  ;;  %v11760_v16 = vpop.f32.mrb[62].mxu1  ;;  %v10664_v35 = vld [vmem:[#allocation10 + $0x4] ss:$0 sm:$0xff] }
0x10d7   : > { %v5876_v15 = vadd.f32 %v5875_v44, %v5874_v48  ;;  %v5851_v42 = vpop.f32.mrb[63].mxu1  ;;  %v5867_v43 = vmul.f32 %v15758_v58, %v11760_v16 }
0x10d8   : > { %v5866_v28 = vmul.f32 %v15762_v9, %v5851_v42 }
0x10d9   : > { %v5878_v4 = vadd.f32 %v5877_v36, %v5876_v15  ;;  %v5881_v50 = vsel %vm1426_vm0, %v5867_v43, 0.0  ;;  %v10665_v36 = vld [vmem:[#allocation10 + $0x5] ss:$0 sm:$0xff] }
0x10da   : > { %v5879_v56 = vsel %vm1426_vm0, %v5866_v28, 0.0  ;;  %v11779_v61 = vpop.f32.mrb[64].mxu1 }
0x10db   : > { %v5880_v1 = vadd.f32 %v5879_v56, %v5878_v4  ;;  %v6242_v10 = vmul.f32 %v15728_v23, %v11779_v61  ;;  %v6202_v17 = vpop.f32.mrb[65].mxu1 }
0x10dc   : > { %v6241_v51 = vmul.f32 %v15732_v57, %v6202_v17 }
0x10dd   : > { %v5882_v8 = vadd.f32 %v5881_v50, %v5880_v1  ;;  %v6250_v55 = vsel %vm1426_vm0, %v6242_v10, 0.0 }
0x10de   : > { %v6249_v21 = vsel %vm1426_vm0, %v6241_v51, 0.0  ;;  %v11782_v63 = vpop.f32.mrb[66].mxu1 }
0x10df   : > { %v6251_v29 = vadd.f32 %v6250_v55, %v6249_v21  ;;  %v6212_v14 = vpop.f32.mrb[67].mxu1  ;;  %11809 = vmatmul.mubr.msk.f32.vlgmr.msra.gmra.mrb[72].mxu1 %vm1426_vm0, %v5882_v8  ;;  %v6244_v6 = vmul.f32 %v15738_v38, %v11782_v63 }
0x10e0   : > { %v6243_v53 = vmul.f32 %v15742_v47, %v6212_v14  ;;  %11830 = vmatprep.mubr.msk.f32.mxu1 %vm13997_vm1, %v13998_v39 }
0x10e1   : > { %v6254_v59 = vsel %vm1426_vm0, %v6244_v6, 0.0 }
0x10e2   : > { %v6252_v11 = vsel %vm1426_vm0, %v6243_v53, 0.0  ;;  %v11785_v37 = vpop.f32.mrb[68].mxu1  ;;  %v10679_v53 = vld [vmem:[%s16430_s6 + $0x80] sm:$0xff] }
0x10e3   : > { %v6253_v3 = vadd.f32 %v6252_v11, %v6251_v29  ;;  %v6222_v26 = vpop.f32.mrb[69].mxu1  ;;  %v6246_v12 = vmul.f32 %v15748_v2, %v11785_v37  ;;  %v10680_v11 = vld [vmem:[%s16430_s6 + $0x88] sm:$0xff]  ;;  %v10675_v37 = vld [vmem:[%s16430_s6 + $0x60] sm:$0xff] }
0x10e4   : > { %v6245_v20 = vmul.f32 %v15752_v46, %v6222_v26  ;;  %v10676_v26 = vld [vmem:[%s16430_s6 + $0x68] sm:$0xff] }
0x10e5   : > { %v6255_v41 = vadd.f32 %v6254_v59, %v6253_v3  ;;  %v6258_v62 = vsel %vm1426_vm0, %v6246_v12, 0.0  ;;  %v12417_v3 = vpack.c.bf16 %v10680_v11, %v10679_v53  ;;  %v10681_v59 = vld [vmem:[%s16430_s6 + $0x90] sm:$0xff]  ;;  %v10682_v12 = vld [vmem:[%s16430_s6 + $0x98] sm:$0xff] }
0x10e6   : > { %v6256_v18 = vsel %vm1426_vm0, %v6245_v20, 0.0  ;;  %v11788_v40 = vpop.f32.mrb[70].mxu1  ;;  %v12423_v20 = vpack.c.bf16 %v10676_v26, %v10675_v37  ;;  %v10698_v53 = vld [vmem:[%s16431_s12 + $0x118] sm:$0xff]  ;;  %v10691_v37 = vld [vmem:[%s16431_s12 + $0xe0] sm:$0xff] }
0x10e7   : > { %v6257_v13 = vadd.f32 %v6256_v18, %v6255_v41  ;;  %v6232_v60 = vpop.f32.mrb[71].mxu1  ;;  %v6248_v25 = vmul.f32 %v15758_v58, %v11788_v40  ;;  %v10677_v41 = vld [vmem:[%s16430_s6 + $0x70] sm:$0xff]  ;;  %v10678_v18 = vld [vmem:[%s16430_s6 + $0x78] sm:$0xff]  ;;  %12418 = vmatpush3.bf16.msra.mxu1 %v12417_v3  ;;  %v12420_v40 = vpack.c.bf16 %v10682_v12, %v10681_v59  ;;  %v10692_v3 = vld [vmem:[%s16431_s12 + $0xe8] sm:$0xff] }
0x10e8   : > { %v6247_v27 = vmul.f32 %v15762_v9, %v6232_v60  ;;  %12419 = vmatprep.subr.bf16.mxu1 %v13996_v30  ;;  %v12441_v26 = vpack.c.bf16 %v10692_v3, %v10691_v37  ;;  %v10699_v59 = vld [vmem:[%s16431_s12 + $0x120] sm:$0xff]  ;;  %v10700_v12 = vld [vmem:[%s16431_s12 + $0x128] sm:$0xff] }
0x10e9   : > { %v6259_v32 = vadd.f32 %v6258_v62, %v6257_v13  ;;  %v6262_v24 = vsel %vm1426_vm0, %v6248_v25, 0.0  ;;  %v12426_v13 = vpack.c.bf16 %v10678_v18, %v10677_v41  ;;  %v10693_v41 = vld [vmem:[%s16431_s12 + $0xf0] sm:$0xff]  ;;  %v10694_v18 = vld [vmem:[%s16431_s12 + $0xf8] sm:$0xff] }
0x10ea   : > { %v6260_v52 = vsel %vm1426_vm0, %v6247_v27, 0.0 }
0x10eb   : > { %v6261_v0 = vadd.f32 %v6260_v52, %v6259_v32  ;;  %12421 = vmatpush3.bf16.msra.mxu1 %v12420_v40  ;;  %v12444_v40 = vpack.c.bf16 %v10694_v18, %v10693_v41 }
0x10ec   : > { %12428 = vmatprep.subr.bf16.mxu1 %v13996_v30 }
0x10ed   : > { %v6263_v5 = vadd.f32 %v6262_v24, %v6261_v0 }
0x10ef   : > { %11820 = vmatmul.mubr.msk.f32.vlgmr.msra.gmra.mrb[80].mxu0 %vm1426_vm0, %v6263_v5  ;;  %v10670_v5 = vld [vmem:[#allocation12 + $0x4] ss:$0 sm:$0xff] }
0x10f0   : > { %11841 = vmatprep.mubr.msk.f32.mxu0 %vm13997_vm1, %v13998_v39  ;;  %12424 = vmatpush3.bf16.msra.mxu0 %v12423_v20  ;;  %v12453_v20 = vpack.c.bf16 %v10700_v12, %v10699_v59 }
0x10f1   : > { %12425 = vmatprep.subr.bf16.mxu0 %v13996_v30 }
0x10f4   : > { %12427 = vmatpush3.bf16.msra.mxu0 %v12426_v13  ;;  %v10701_v13 = vld [vmem:[%s16431_s12 + $0x130] sm:$0xff] }
0x10f5   : > { %12434 = vmatprep.subr.bf16.mxu0 %v13996_v30 }
0x11a2   : > { %v6368_v49 = vpop.f32.mrb[78].mxu0 }
0x11a3   : > { %v6369_v7 = vadd.f32 %v10663_v19, %v6368_v49  ;;  %v11799_v33 = vpop.f32.mrb[79].mxu0  ;;  %v10669_v19 = vld [vmem:[#allocation12 + $0x3] ss:$0 sm:$0xff] }
0x11a4   : > { %v10683_v33 = vld [vmem:[%s16430_s6 + $0xa0] sm:$0xff] }
0x11a5   : > { %v15815_v31 = vadd.f32 %v6369_v7, %v15274_v34 }
0x11a7   : > { %v6529_v22 = vsel %vm1426_vm0, %v15815_v31, 0.0 }
0x11a8   : > { %6530 = vadd.xlane.f32.xlu0 %v6529_v22  ;;  %v10684_v22 = vld [vmem:[%s16430_s6 + $0xa8] sm:$0xff] }
0x11b2   : > { %v6441_v48 = vpop.f32.mrb[72].mxu1 }
0x11b3   : > { %v6442_v44 = vadd.f32 %v10664_v35, %v6441_v48  ;;  %v11810_v16 = vpop.f32.mrb[73].mxu1  ;;  %v10673_v35 = vld [vmem:[#allocation13 + $0x4] ss:$0 sm:$0xff]  ;;  %v10672_v48 = vld [vmem:[#allocation13 + $0x3] ss:$0 sm:$0xff] }
0x11b5   : > { %v15820_v15 = vadd.f32 %v6442_v44, %v15277_v54 }
0x11b7   : > { %v6532_v42 = vsel %vm1426_vm0, %v15820_v15, 0.0 }
0x11b8   : > { %6533 = vadd.xlane.f32.xlu1 %v6532_v42  ;;  %v12429_v42 = vpack.c.bf16 %v10684_v22, %v10683_v33  ;;  %v10703_v22 = vld [vmem:[%s16431_s12 + $0x140] sm:$0xff] }
0x11c2   : > { %v6514_v43 = vpop.f32.mrb[80].mxu0 }
0x11c3   : > { %v6515_v28 = vadd.f32 %v10665_v36, %v6514_v43  ;;  %v11821_v34 = vpop.f32.mrb[81].mxu0 }
0x11c4   : > { %v10686_v34 = vld [vmem:[%s16430_s6 + $0xb8] sm:$0xff] }
0x11c5   : > { %v15825_v4 = vadd.f32 %v6515_v28, %v15284_v45  ;;  %v10685_v28 = vld [vmem:[%s16430_s6 + $0xb0] sm:$0xff] }
0x11c7   : > { %v6535_v56 = vsel %vm1426_vm0, %v15825_v4, 0.0 }
0x11c8   : > { %6536 = vadd.xlane.f32.xlu0 %v6535_v56 }
0x1235   : > { %v6531_v61 = vpop.xlane.xlu0 %6530 }
0x1245   : > { %v6534_v1 = vpop.xlane.xlu1 %6533 }
0x1246   : > { %v6538_v10 = vadd.f32 %v6534_v1, %v6531_v61  ;;  %v10671_v61 = vld [vmem:[#allocation12 + $0x5] ss:$0 sm:$0xff]  ;;  %v12432_v1 = vpack.c.bf16 %v10686_v34, %v10685_v28  ;;  %v10706_v28 = vld [vmem:[%s16431_s12 + $0x158] sm:$0xff] }
0x1255   : > { %v6537_v54 = vpop.xlane.xlu0 %6536 }
0x1256   : > { %v6539_v17 = vadd.f32 %v6538_v10, %v6537_v54  ;;  %v10674_v54 = vld [vmem:[#allocation13 + $0x5] ss:$0 sm:$0xff] }
0x1258   : > { %v6540_v50 = vmul.f32 0.010416667, %v6539_v17 }
0x125a   : > { %v6541_v51 = vsub.f32 %v15815_v31, %v6540_v50  ;;  %v6542_v8 = vsub.f32 %v15820_v15, %v6540_v50  ;;  %v6543_v45 = vsub.f32 %v15825_v4, %v6540_v50  ;;  %v10687_v50 = vld [vmem:[%s16431_s12 + $0xc0] sm:$0xff] }
0x125c   : > { %v6545_v55 = vmul.f32 %v6542_v8, %v6542_v8  ;;  %v6544_v21 = vmul.f32 %v6541_v51, %v6541_v51  ;;  %v6546_v14 = vmul.f32 %v6543_v45, %v6543_v45 }
0x125e   : > { %v6550_v63 = vsel %vm1426_vm0, %v6545_v55, 0.0  ;;  %v6547_v29 = vsel %vm1426_vm0, %v6544_v21, 0.0  ;;  %v6553_v6 = vsel %vm1426_vm0, %v6546_v14, 0.0  ;;  %v10696_v55 = vld [vmem:[%s16431_s12 + $0x108] sm:$0xff] }
0x125f   : > { %6551 = vadd.xlane.f32.xlu0 %v6550_v63  ;;  %6548 = vadd.xlane.f32.xlu1 %v6547_v29  ;;  %v10689_v63 = vld [vmem:[%s16431_s12 + $0xd0] sm:$0xff]  ;;  %v10690_v29 = vld [vmem:[%s16431_s12 + $0xd8] sm:$0xff] }
0x1260   : > { %v12438_v14 = vpack.c.bf16 %v10690_v29, %v10689_v63 }
0x1263   : > { %6554 = vadd.xlane.f32.xlu1 %v6553_v6  ;;  %v10697_v6 = vld [vmem:[%s16431_s12 + $0x110] sm:$0xff] }
0x1264   : > { %v12450_v11 = vpack.c.bf16 %v10698_v53, %v10697_v6 }
0x12ec   : > { %v6552_v60 = vpop.xlane.xlu0 %6551  ;;  %v6549_v62 = vpop.xlane.xlu1 %6548 }
0x12ed   : > { %v6556_v25 = vadd.f32 %v6552_v60, %v6549_v62  ;;  %v10702_v60 = vld [vmem:[%s16431_s12 + $0x138] sm:$0xff] }
0x12ee   : > { %v12456_v62 = vpack.c.bf16 %v10702_v60, %v10701_v13 }
0x12f0   : > { %v6555_v27 = vpop.xlane.xlu1 %6554 }
0x12f1   : > { %v6557_v32 = vadd.f32 %v6556_v25, %v6555_v27 }
0x12f3   : > { %v6558_v52 = vmul.f32 0.010416667, %v6557_v32 }
0x12f5   : > { %v6559_v0 = vadd.f32 1e-06, %v6558_v52 }
0x12f7   : > { %13088 = vrsqrt.f32 %v6559_v0 }
0x1301   : > { %v13089_v24 = vpop.eup %13088 }
0x1302   : > { %v6562_v49 = vmul.f32 %v13089_v24, %v6542_v8  ;;  %v6561_v7 = vmul.f32 %v13089_v24, %v6541_v51  ;;  %v6563_v56 = vmul.f32 %v13089_v24, %v6543_v45  ;;  %v10688_v51 = vld [vmem:[%s16431_s12 + $0xc8] sm:$0xff]  ;;  %v10695_v45 = vld [vmem:[%s16431_s12 + $0x100] sm:$0xff]  ;;  %v10714_v24 = vld [vmem:[#allocation15 + $0x1] ss:$0 sm:$0xff] }
0x1303   : > { %v12435_v8 = vpack.c.bf16 %v10688_v51, %v10687_v50  ;;  %v12447_v21 = vpack.c.bf16 %v10696_v55, %v10695_v45  ;;  %v10719_v50 = vld [vmem:[#allocation16 + $0x4] ss:$0 sm:$0xff] }
0x1304   : > { %v6583_v44 = vmul.f32 %v10670_v5, %v6562_v49  ;;  %v6582_v16 = vmul.f32 %v10669_v19, %v6561_v7  ;;  %v6584_v10 = vmul.f32 %v10671_v61, %v6563_v56  ;;  %v10707_v56 = vld [vmem:[%s16431_s12 + $0x160] sm:$0xff]  ;;  %v10708_v61 = vld [vmem:[%s16431_s12 + $0x168] sm:$0xff] }
0x1306   : > { %v6604_v36 = vadd.f32 %v10673_v35, %v6583_v44  ;;  %v6603_v43 = vadd.f32 %v10672_v48, %v6582_v16  ;;  %v6605_v17 = vadd.f32 %v10674_v54, %v6584_v10  ;;  %v10704_v35 = vld [vmem:[%s16431_s12 + $0x148] sm:$0xff]  ;;  %v10709_v10 = vld [vmem:[%s16431_s12 + $0x170] sm:$0xff]  ;;  %v10710_v54 = vld [vmem:[%s16431_s12 + $0x178] sm:$0xff] }
0x1308   : > { %11831 = vmatmul.mubr.msk.f32.vlgmr.msra.gmra.mrb[74].mxu1 %vm1426_vm0, %v6604_v36  ;;  %11842 = vmatmul.mubr.msk.f32.vlgmr.msra.gmra.mrb[82].mxu0 %vm1426_vm0, %v6603_v43  ;;  %v10705_v43 = vld [vmem:[%s16431_s12 + $0x150] sm:$0xff] }
0x1309   : > { %12430 = vmatpush3.bf16.msra.mxu1 %v12429_v42  ;;  %11852 = vmatprep.mubr.msk.f32.mxu1 %vm13997_vm1, %v13998_v39  ;;  %v12459_v42 = vpack.c.bf16 %v10704_v35, %v10703_v22  ;;  %v12462_v34 = vpack.c.bf16 %v10706_v28, %v10705_v43  ;;  %v7152_v28 = vld [vmem:[%s16433_s23] sm:$0xff] }
0x130a   : > { %12431 = vmatprep.subr.bf16.mxu1 %v13996_v30  ;;  %11871 = vmatprep.mubr.msk.f32.mxu0 %vm13997_vm1, %v13998_v39 }
0x130b   : > { %12436 = vmatpush3.bf16.msra.mxu0 %v12435_v8 }
0x130c   : > { %12437 = vmatprep.subr.bf16.mxu0 %v13996_v30 }
0x130d   : > { %12433 = vmatpush3.bf16.msra.mxu1 %v12432_v1  ;;  %v12465_v1 = vpack.c.bf16 %v10708_v61, %v10707_v56  ;;  %v10722_v61 = vld [vmem:[#allocation19] ss:$0 sm:$0xff] }
0x130e   : > { %12446 = vmatprep.subr.bf16.mxu1 %v13996_v30 }
0x130f   : > { %12439 = vmatpush3.bf16.msra.mxu0 %v12438_v14  ;;  %v10720_v14 = vld [vmem:[#allocation16 + $0x5] ss:$0 sm:$0xff] }
0x1310   : > { %11853 = vmatmul.mubr.msk.f32.vlgmr.msra.gmra.mrb[76].mxu1 %vm1426_vm0, %v6605_v17  ;;  %12440 = vmatprep.subr.bf16.mxu0 %v13996_v30  ;;  %v12468_v17 = vpack.c.bf16 %v10710_v54, %v10709_v10 }
0x1311   : > { %11890 = vmatprep.mubr.msk.f32.mxu1 %vm13997_vm1, %v13998_v39  ;;  %12448 = vmatpush3.bf16.msra.mxu1 %v12447_v21 }
0x1312   : > { %12449 = vmatprep.subr.bf16.mxu1 %v13996_v30 }
0x1313   : > { %12442 = vmatpush3.bf16.msra.mxu0 %v12441_v26  ;;  %v10718_v26 = vld [vmem:[#allocation16 + $0x3] ss:$0 sm:$0xff] }
0x1314   : > { %12443 = vmatprep.subr.bf16.mxu0 %v13996_v30 }
0x1315   : > { %12451 = vmatpush3.bf16.msra.mxu1 %v12450_v11 }
0x1316   : > { %12452 = vmatprep.subr.bf16.mxu1 %v13996_v30 }
0x1317   : > { %12445 = vmatpush3.bf16.msra.mxu0 %v12444_v40 }
0x1318   : > { %12458 = vmatprep.subr.bf16.mxu0 %v13996_v30 }
0x1319   : > { %12454 = vmatpush3.bf16.msra.mxu1 %v12453_v20 }
0x131a   : > { %12455 = vmatprep.subr.bf16.mxu1 %v13996_v30 }
0x131d   : > { %12457 = vmatpush3.bf16.msra.mxu1 %v12456_v62 }
0x131e   : > { %12470 = vmatprep.subr.bf16.mxu1 %v13996_v30 }
0x13db   : > { %v6719_v25 = vpop.f32.mrb[74].mxu1  ;;  %v6792_v27 = vpop.f32.mrb[82].mxu0 }
0x13dc   : > { %v6793_v32 = vadd.f32 %v6792_v27, %v6719_v25  ;;  %v11832_v52 = vpop.f32.mrb[75].mxu1  ;;  %v11843_v0 = vpop.f32.mrb[83].mxu0 }
0x13dd   : > { %v7139_v0 = vld [vmem:[%s16432_s2 + $0x10] sm:$0xff] }
0x13e3   : > { %v6865_v5 = vpop.f32.mrb[76].mxu1 }
0x13e4   : > { %v6869_v19 = vadd.f32 %v6865_v5, %v6793_v32  ;;  %v11854_v49 = vpop.f32.mrb[77].mxu1  ;;  %v7137_v32 = vld [vmem:[%s16432_s2] sm:$0xff] }
0x13e6   : > { %v6876_v7 = vadd.f32 %v10714_v24, %v6869_v19  ;;  %v7140_v24 = vld [vmem:[%s16432_s2 + $0x18] sm:$0xff] }
0x13e7   : > { %v12474_v5 = vpack.c.bf16 %v7140_v24, %v7139_v0 }
0x13e8   : > { %v6878_v33 = vmul.f32 0.70710677, %v6876_v7  ;;  %v6877_v44 = vmul.f32 0.5, %v6876_v7 }
0x13ea   : > { %13090 = verf.f32 %v6878_v33 }
0x13f4   : > { %v13091_v48 = vpop.eup %13090 }
0x13f5   : > { %v6880_v16 = vadd.f32 1.0, %v13091_v48 }
0x13f7   : > { %v6881_v36 = vmul.f32 %v6880_v16, %v6877_v44 }
0x13f9   : > { %11872 = vmatmul.mubr.msk.f32.vlgmr.msra.gmra.mrb[84].mxu0 %vm4050_vm3, %v6881_v36  ;;  %11891 = vmatmul.mubr.msk.f32.vlgmr.msra.gmra.mrb[78].mxu1 %vm4050_vm3, %v6881_v36 }
0x13fa   : > { %12460 = vmatpush3.bf16.msra.mxu0 %v12459_v42  ;;  %11909 = vmatprep.mubr.msk.f32.mxu0 %vm13997_vm1, %v13998_v39  ;;  %v10721_v42 = vld [vmem:[#allocation18] ss:$0 sm:$0xff] }
0x13fb   : > { %12461 = vmatprep.subr.bf16.mxu0 %v13996_v30  ;;  %11920 = vmatprep.mubr.msk.f32.mxu1 %vm13997_vm1, %v13998_v39 }
0x13fe   : > { %12463 = vmatpush3.bf16.msra.mxu0 %v12462_v34  ;;  %v7153_v34 = vld [vmem:[%s16433_s23 + $0x8] sm:$0xff] }
0x13ff   : > { %12464 = vmatprep.subr.bf16.mxu0 %v13996_v30  ;;  %v12477_v54 = vpack.c.bf16 %v7153_v34, %v7152_v28 }
0x1402   : > { %12466 = vmatpush3.bf16.msra.mxu0 %v12465_v1 }
0x1403   : > { %12467 = vmatprep.subr.bf16.mxu0 %v13996_v30 }
0x1406   : > { %12469 = vmatpush3.bf16.msra.mxu0 %v12468_v17 }
0x1407   : > { %12482 = vmatprep.subr.bf16.mxu0 %v13996_v30 }
0x1409   : > { %11910 = vmatmul.mubr.msk.f32.vlgmr.msra.gmra.mrb[86].mxu0 %vm4050_vm3, %v6881_v36 }
0x140a   : > { %11942 = vmatprep.mubr.msk.f32.mxu0 %vm13997_vm1, %v13998_v39 }
0x14cc   : > { %v6951_v51 = vpop.f32.mrb[84].mxu0  ;;  %v7021_v8 = vpop.f32.mrb[78].mxu1 }
0x14cd   : > { %v7114_v45 = vadd.f32 %v10719_v50, %v7021_v8  ;;  %v11873_v55 = vpop.f32.mrb[85].mxu0  ;;  %v11892_v21 = vpop.f32.mrb[79].mxu1  ;;  %v7113_v12 = vadd.f32 %v10718_v26, %v6951_v51  ;;  %v7154_v50 = vld [vmem:[%s16433_s23 + $0x10] sm:$0xff]  ;;  %v7155_v51 = vld [vmem:[%s16433_s23 + $0x18] sm:$0xff]  ;;  %v7169_v26 = vld [vmem:[#allocation24 + $0x10] sm:$0xff] }
0x14ce   : > { %v12480_v8 = vpack.c.bf16 %v7155_v51, %v7154_v50  ;;  %v10723_v55 = vld [vmem:[#allocation18 + $0x1] ss:$0 sm:$0xff] }
0x14cf   : > { %v15908_v63 = vadd.f32 %v7114_v45, %v15820_v15  ;;  %v15919_v18 = vadd.f32 %v7113_v12, %v15815_v31  ;;  %v7138_v31 = vld [vmem:[%s16432_s2 + $0x8] sm:$0xff] }
0x14d0   : > { %v12471_v52 = vpack.c.bf16 %v7138_v31, %v7137_v32 }
0x14d1   : > { %v7197_v29 = vsel %vm1426_vm0, %v15908_v63, 0.0  ;;  %v7251_v40 = vsel %vm1426_vm0, %v15919_v18, 0.0 }
0x14d2   : > { %7198 = vadd.xlane.f32.xlu0 %v7197_v29  ;;  %12472 = vmatpush3.bf16.msra.mxu1 %v12471_v52  ;;  %v10724_v29 = vld [vmem:[#allocation19 + $0x1] ss:$0 sm:$0xff] }
0x14d3   : > { %12473 = vmatprep.subr.bf16.mxu1 %v13996_v30 }
0x14d6   : > { %12475 = vmatpush3.bf16.msra.mxu1 %v12474_v5  ;;  %v10729_v5 = vld [vmem:[#allocation22] ss:$0 sm:$0xff] }
0x14d7   : > { %12476 = vmatprep.subr.bf16.mxu1 %v13996_v30 }
0x14dc   : > { %v7091_v6 = vpop.f32.mrb[86].mxu0 }
0x14dd   : > { %v7115_v53 = vadd.f32 %v10720_v14, %v7091_v6  ;;  %v11911_v11 = vpop.f32.mrb[87].mxu0 }
0x14de   : > { %v7168_v11 = vld [vmem:[#allocation24 + $0x8] sm:$0xff] }
0x14df   : > { %v15913_v37 = vadd.f32 %v7115_v53, %v15825_v4  ;;  %v7167_v53 = vld [vmem:[#allocation24] sm:$0xff] }
0x14e1   : > { %v7224_v3 = vsel %vm1426_vm0, %v15913_v37, 0.0 }
0x14e2   : > { %7225 = vadd.xlane.f32.xlu1 %v7224_v3  ;;  %v12483_v3 = vpack.c.bf16 %v7168_v11, %v7167_v53 }
0x14e4   : > { %12484 = vmatpush3.bf16.msra.mxu0 %v12483_v3 }
0x14e5   : > { %12485 = vmatprep.subr.bf16.mxu0 %v13996_v30 }
0x155f   : > { %v7199_v59 = vpop.xlane.xlu0 %7198 }
0x1560   : > { %v7200_v15 = vmul.f32 0.03125, %v7199_v59  ;;  %v7170_v59 = vld [vmem:[#allocation24 + $0x18] sm:$0xff] }
0x1562   : > { %v7201_v20 = vsub.f32 %v15908_v63, %v7200_v15  ;;  %v12486_v15 = vpack.c.bf16 %v7170_v59, %v7169_v26 }
0x1564   : > { %v7202_v41 = vmul.f32 %v7201_v20, %v7201_v20  ;;  %12487 = vmatpush3.bf16.msra.mxu0 %v12486_v15 }
0x1566   : > { %v7203_v4 = vsel %vm1426_vm0, %v7202_v41, 0.0 }
0x1567   : > { %7204 = vadd.xlane.f32.xlu0 %v7203_v4 }
0x156b   : > { %7252 = vadd.xlane.f32.xlu0 %v7251_v40  ;;  %v10725_v40 = vld [vmem:[#allocation18 + $0x2] ss:$0 sm:$0xff] }
0x156f   : > { %v7226_v13 = vpop.xlane.xlu1 %7225 }
0x1570   : > { %v7227_v60 = vmul.f32 0.03125, %v7226_v13 }
0x1572   : > { %v7228_v62 = vsub.f32 %v15913_v37, %v7227_v60  ;;  %v10726_v60 = vld [vmem:[#allocation19 + $0x2] ss:$0 sm:$0xff] }
0x1574   : > { %v7229_v25 = vmul.f32 %v7228_v62, %v7228_v62 }
0x1576   : > { %v7230_v27 = vsel %vm1426_vm0, %v7229_v25, 0.0 }
0x1577   : > { %7231 = vadd.xlane.f32.xlu1 %v7230_v27  ;;  %v10727_v27 = vld [vmem:[#allocation21] ss:$0 sm:$0xff] }
0x15f4   : > { %v7205_v19 = vpop.xlane.xlu0 %7204 }
0x15f5   : > { %v7206_v49 = vmul.f32 0.03125, %v7205_v19 }
0x15f7   : > { %v7207_v7 = vadd.f32 1e-06, %v7206_v49 }
0x15f8   : > { %v7253_v33 = vpop.xlane.xlu0 %7252 }
0x15f9   : > { %13092 = vrsqrt.f32 %v7207_v7  ;;  %v7254_v22 = vmul.f32 0.03125, %v7253_v33 }
0x15fb   : > { %v7255_v35 = vsub.f32 %v15919_v18, %v7254_v22 }
0x15fd   : > { %v7256_v48 = vmul.f32 %v7255_v35, %v7255_v35 }
0x15ff   : > { %v7257_v44 = vsel %vm1426_vm0, %v7256_v48, 0.0 }
0x1600   : > { %7258 = vadd.xlane.f32.xlu1 %v7257_v44 }
0x1603   : > { %v13093_v16 = vpop.eup %13092 }
0x1604   : > { %v15934_v36 = vmul.f32 %v13093_v16, %v7201_v20  ;;  %v7232_v43 = vpop.xlane.xlu1 %7231 }
0x1605   : > { %v7233_v56 = vmul.f32 0.03125, %v7232_v43 }
0x1606   : > { %v7216_v1 = vmul.f32 %v10721_v42, %v15934_v36 }
0x1607   : > { %v7234_v10 = vadd.f32 1e-06, %v7233_v56 }
0x1608   : > { %v7223_v17 = vadd.f32 %v10722_v61, %v7216_v1 }
0x1609   : > { %13094 = vrsqrt.f32 %v7234_v10 }
0x160a   : > { %11921 = vmatmul.mubr.msk.f32.vlgmr.msra.gmra.mrb[80].mxu1 %vm1426_vm0, %v7223_v17 }
0x160b   : > { %12478 = vmatpush3.bf16.msra.mxu1 %v12477_v54  ;;  %11931 = vmatprep.mubr.msk.f32.mxu1 %vm13997_vm1, %v13998_v39 }
0x160c   : > { %12479 = vmatprep.subr.bf16.mxu1 %v13996_v30 }
0x160f   : > { %12481 = vmatpush3.bf16.msra.mxu1 %v12480_v8 }
0x1613   : > { %v13095_v45 = vpop.eup %13094 }
0x1614   : > { %v15945_v21 = vmul.f32 %v13095_v45, %v7228_v62 }
0x1616   : > { %v7243_v14 = vmul.f32 %v10723_v55, %v15945_v21 }
0x1618   : > { %v7250_v6 = vadd.f32 %v10724_v29, %v7243_v14 }
0x161a   : > { %11932 = vmatmul.mubr.msk.f32.vlgmr.msra.gmra.mrb[82].mxu1 %vm1426_vm0, %v7250_v6 }
0x168d   : > { %v7259_v12 = vpop.xlane.xlu1 %7258 }
0x168e   : > { %v7260_v20 = vmul.f32 0.03125, %v7259_v12 }
0x1690   : > { %v7261_v41 = vadd.f32 1e-06, %v7260_v20 }
0x1692   : > { %13096 = vrsqrt.f32 %v7261_v41 }
0x169c   : > { %v13097_v4 = vpop.eup %13096 }
0x169d   : > { %v7263_v13 = vmul.f32 %v13097_v4, %v7255_v35 }
0x169f   : > { %v7270_v62 = vmul.f32 %v10725_v40, %v7263_v13 }
0x16a1   : > { %v7277_v25 = vadd.f32 %v10726_v60, %v7270_v62 }
0x16a3   : > { %11943 = vmatmul.mubr.msk.f32.vlgmr.msra.gmra.mrb[88].mxu0 %vm1426_vm0, %v7277_v25 }
0x16dd   : > { %v7353_v32 = vpop.f32.mrb[80].mxu1 }
0x16de   : > { %v7354_v31 = vadd.f32 %v10727_v27, %v7353_v32  ;;  %v11922_v52 = vpop.f32.mrb[81].mxu1 }
0x16e0   : > { %v7515_v0 = vmul.f32 0.5, %v7354_v31 }
0x16e2   : > { %v7516_v24 = vmul.f32 %v15732_v57, %v7515_v0  ;;  %v7517_v33 = vmul.f32 %v15728_v23, %v7515_v0  ;;  %v7518_v22 = vmul.f32 %v15742_v47, %v7515_v0  ;;  %v7519_v57 = vmul.f32 %v15738_v38, %v7515_v0  ;;  %v10731_v38 = vld [vmem:[#allocation25] ss:$0 sm:$0xff] }
0x16e3   : > { %v7520_v35 = vmul.f32 %v15752_v46, %v7515_v0  ;;  %v7521_v48 = vmul.f32 %v15748_v2, %v7515_v0  ;;  %v7522_v23 = vmul.f32 %v15762_v9, %v7515_v0  ;;  %v7523_v47 = vmul.f32 %v15758_v58, %v7515_v0 }
0x16e4   : > { %11947 = vmatprep.mubr.msk.f32.mxu1 %vm1426_vm0, %v7516_v24 }
0x16ed   : > { %v7432_v19 = vpop.f32.mrb[82].mxu1 }
0x16ee   : > { %v7433_v49 = vadd.f32 %v10729_v5, %v7432_v19  ;;  %v11933_v7 = vpop.f32.mrb[83].mxu1 }
0x16f0   : > { %11945 = vmatprep.subr.msk.mxu1 %vm1426_vm0, %v7433_v49 }
0x16f1   : > { %11946 = vmatpush3.xpose.msk.msra.mxu1 %vm1426_vm0, %v7433_v49 }
0x16f2   : > { %12488 = vmatprep.subr.bf16.mxu1 %v13996_v30 }
0x16f4   : > { %11948 = vmatmul.mubr.msk.f32.vlgmr.msra.gmra.mrb[84].mxu1 %vm1426_vm0, %v7517_v33 }
0x16f5   : > { %11950 = vmatprep.mubr.msk.f32.mxu1 %vm1426_vm0, %v7518_v22 }
0x16f8   : > { %11951 = vmatmul.mubr.msk.f32.gmra.mrb[86].mxu1 %vm1426_vm0, %v7519_v57 }
0x16f9   : > { %11953 = vmatprep.mubr.msk.f32.mxu1 %vm1426_vm0, %v7520_v35 }
0x16fc   : > { %11954 = vmatmul.mubr.msk.f32.gmra.mrb[88].mxu1 %vm1426_vm0, %v7521_v48 }
0x16fd   : > { %11956 = vmatprep.mubr.msk.f32.mxu1 %vm1426_vm0, %v7522_v23 }
0x1700   : > { %11957 = vmatmul.mubr.msk.f32.gmra.mrb[90].mxu1 %vm1426_vm0, %v7523_v47 }
0x1701   : > { %11981 = vmatprep.mubr.msk.f32.mxu1 %vm13997_vm1, %v13998_v39 }
0x1776   : > { %v7511_v46 = vpop.f32.mrb[88].mxu0 }
0x1777   : > { %v7512_v44 = vadd.f32 %v10731_v38, %v7511_v46  ;;  %v11944_v16 = vpop.f32.mrb[89].mxu0 }
0x1779   : > { %11959 = vmatprep.subr.mxu0 %v7512_v44 }
0x177a   : > { %11960 = vmatpush3.msra.mxu0 %v7512_v44 }
0x177b   : > { %12494 = vmatprep.subr.bf16.mxu0 %v13996_v30 }
0x17c7   : > { %v11949_v2 = vpop.f32.mrb[84].mxu1 }
0x17c8   : > { %v7617_v9 = vpop.f32.mrb[85].mxu1  ;;  %v7659_v42 = vsel %vm2436_vm2, %v11949_v2, -inf }
0x17c9   : > { %7660 = vmax.xlane.f32.xlu1 %v7659_v42  ;;  %v7656_v58 = vsel %vm2436_vm2, %v7617_v9, -inf }
0x17ca   : > { %7657 = vmax.xlane.f32.xlu0 %v7656_v58 }
0x17cb   : > { %v11952_v43 = vpop.f32.mrb[86].mxu1 }
0x17cc   : > { %v7627_v28 = vpop.f32.mrb[87].mxu1  ;;  %v7665_v34 = vsel %vm2436_vm2, %v11952_v43, -inf }
0x17cd   : > { %7666 = vmax.xlane.f32.xlu1 %v7665_v34  ;;  %v7662_v56 = vsel %vm2436_vm2, %v7627_v28, -inf }
0x17ce   : > { %7663 = vmax.xlane.f32.xlu0 %v7662_v56 }
0x17cf   : > { %v11955_v61 = vpop.f32.mrb[88].mxu1 }
0x17d0   : > { %v7637_v1 = vpop.f32.mrb[89].mxu1  ;;  %v7671_v10 = vsel %vm2436_vm2, %v11955_v61, -inf }
0x17d1   : > { %7672 = vmax.xlane.f32.xlu1 %v7671_v10  ;;  %v7668_v54 = vsel %vm2436_vm2, %v7637_v1, -inf }
0x17d2   : > { %7669 = vmax.xlane.f32.xlu0 %v7668_v54 }
0x17d3   : > { %v11958_v17 = vpop.f32.mrb[90].mxu1 }
0x17d4   : > { %v7647_v50 = vpop.f32.mrb[91].mxu1  ;;  %v7677_v51 = vsel %vm2436_vm2, %v11958_v17, -inf }
0x17d5   : > { %7678 = vmax.xlane.f32.xlu1 %v7677_v51  ;;  %v7674_v8 = vsel %vm2436_vm2, %v7647_v50, -inf }
0x17d6   : > { %7675 = vmax.xlane.f32.xlu0 %v7674_v8 }
0x1856   : > { %v7661_v45 = vpop.xlane.xlu1 %7660 }
0x1857   : > { %v7681_v55 = vsub.f32 %v11949_v2, %v7661_v45  ;;  %v7658_v29 = vpop.xlane.xlu0 %7657 }
0x1858   : > { %v7680_v14 = vsub.f32 %v7617_v9, %v7658_v29 }
0x1859   : > { %v7690_v6 = vmul.f32 1.442695, %v7681_v55 }
0x185a   : > { %v7688_v53 = vmul.f32 1.442695, %v7680_v14  ;;  %v7667_v11 = vpop.xlane.xlu1 %7666 }
0x185b   : > { %13098 = vpow2.f32 %v7690_v6  ;;  %v7683_v3 = vsub.f32 %v11952_v43, %v7667_v11  ;;  %v7664_v26 = vpop.xlane.xlu0 %7663 }
0x185c   : > { %13100 = vpow2.f32 %v7688_v53  ;;  %v7682_v59 = vsub.f32 %v7627_v28, %v7664_v26  ;;  %v7183_v26 = vld [vmem:[#allocation27 + $0x8] sm:$0xff] }
0x185d   : > { %v7694_v15 = vmul.f32 1.442695, %v7683_v3  ;;  %v7182_v3 = vld [vmem:[#allocation27] sm:$0xff] }
0x185e   : > { %v7692_v12 = vmul.f32 1.442695, %v7682_v59  ;;  %v7673_v20 = vpop.xlane.xlu1 %7672  ;;  %v12489_v59 = vpack.c.bf16 %v7183_v26, %v7182_v3 }
0x185f   : > { %13102 = vpow2.f32 %v7694_v15  ;;  %v7685_v41 = vsub.f32 %v11955_v61, %v7673_v20  ;;  %v7670_v4 = vpop.xlane.xlu0 %7669  ;;  %v7184_v15 = vld [vmem:[#allocation27 + $0x10] sm:$0xff] }
0x1860   : > { %13104 = vpow2.f32 %v7692_v12  ;;  %v7684_v40 = vsub.f32 %v7637_v1, %v7670_v4  ;;  %12490 = vmatpush3.bf16.msra.mxu1 %v12489_v59  ;;  %v7185_v12 = vld [vmem:[#allocation27 + $0x18] sm:$0xff]  ;;  %v16002_v4 = vld [vmem:[%s16428_s8 + $0x1] ss:$0 sm:$0xff] }
0x1861   : > { %v7698_v13 = vmul.f32 1.442695, %v7685_v41  ;;  %12491 = vmatprep.subr.bf16.mxu1 %v13996_v30  ;;  %v12492_v20 = vpack.c.bf16 %v7185_v12, %v7184_v15  ;;  %v10760_v12 = vld [vmem:[#allocation22 + $0x1] ss:$0 sm:$0xff] }
0x1862   : > { %v7696_v60 = vmul.f32 1.442695, %v7684_v40  ;;  %v7679_v62 = vpop.xlane.xlu1 %7678 }
0x1863   : > { %13106 = vpow2.f32 %v7698_v13  ;;  %v7687_v25 = vsub.f32 %v11958_v17, %v7679_v62  ;;  %v7676_v27 = vpop.xlane.xlu0 %7675 }
0x1864   : > { %13108 = vpow2.f32 %v7696_v60  ;;  %v7686_v32 = vsub.f32 %v7647_v50, %v7676_v27  ;;  %12493 = vmatpush3.bf16.msra.mxu1 %v12492_v20  ;;  %v16006_v60 = vld [vmem:[%s16428_s8] ss:$0 sm:$0xff] }
0x1865   : > { %v13099_v31 = vpop.eup %13098  ;;  %v7702_v52 = vmul.f32 1.442695, %v7687_v25  ;;  %12500 = vmatprep.subr.bf16.mxu1 %v13996_v30 }
0x1866   : > { %v13101_v0 = vpop.eup %13100  ;;  %v7700_v24 = vmul.f32 1.442695, %v7686_v32  ;;  %v7707_v5 = vsel %vm2436_vm2, %v13099_v31, 0.0 }
0x1867   : > { %13110 = vpow2.f32 %v7702_v52  ;;  %7708 = vadd.xlane.f32.xlu1 %v7707_v5  ;;  %v7704_v19 = vsel %vm2436_vm2, %v13101_v0, 0.0  ;;  %v16016_v5 = vld [vmem:[%s16428_s8 + $0x2] ss:$0 sm:$0xff] }
0x1868   : > { %13112 = vpow2.f32 %v7700_v24  ;;  %7705 = vadd.xlane.f32.xlu0 %v7704_v19 }
0x1869   : > { %v13103_v49 = vpop.eup %13102 }
0x186a   : > { %v13105_v7 = vpop.eup %13104  ;;  %v7713_v33 = vsel %vm2436_vm2, %v13103_v49, 0.0 }
0x186b   : > { %7714 = vadd.xlane.f32.xlu1 %v7713_v33  ;;  %v7710_v22 = vsel %vm2436_vm2, %v13105_v7, 0.0 }
0x186c   : > { %7711 = vadd.xlane.f32.xlu0 %v7710_v22 }
0x186d   : > { %v13107_v57 = vpop.eup %13106 }
0x186e   : > { %v13109_v35 = vpop.eup %13108  ;;  %v7719_v48 = vsel %vm2436_vm2, %v13107_v57, 0.0 }
0x186f   : > { %7720 = vadd.xlane.f32.xlu1 %v7719_v48  ;;  %v7716_v23 = vsel %vm2436_vm2, %v13109_v35, 0.0 }
0x1870   : > { %7717 = vadd.xlane.f32.xlu0 %v7716_v23  ;;  %v16026_v23 = vld [vmem:[%s16428_s8 + $0x4] ss:$0 sm:$0xff] }
0x1871   : > { %v13111_v47 = vpop.eup %13110 }
0x1872   : > { %v13113_v38 = vpop.eup %13112  ;;  %v7725_v46 = vsel %vm2436_vm2, %v13111_v47, 0.0 }
0x1873   : > { %7726 = vadd.xlane.f32.xlu1 %v7725_v46  ;;  %v7722_v44 = vsel %vm2436_vm2, %v13113_v38, 0.0 }
0x1874   : > { %7723 = vadd.xlane.f32.xlu0 %v7722_v44 }
0x18f4   : > { %v7709_v16 = vpop.xlane.xlu1 %7708 }
0x18f5   : > { %13114 = vrcp.f32 %v7709_v16  ;;  %v7706_v2 = vpop.xlane.xlu0 %7705 }
0x18f6   : > { %13116 = vrcp.f32 %v7706_v2 }
0x18f8   : > { %v7715_v9 = vpop.xlane.xlu1 %7714 }
0x18f9   : > { %13118 = vrcp.f32 %v7715_v9  ;;  %v7712_v42 = vpop.xlane.xlu0 %7711 }
0x18fa   : > { %13120 = vrcp.f32 %v7712_v42  ;;  %v16032_v42 = vld [vmem:[%s16428_s8 + $0x7] ss:$0 sm:$0xff] }
0x18fc   : > { %v7721_v58 = vpop.xlane.xlu1 %7720 }
0x18fd   : > { %13122 = vrcp.f32 %v7721_v58  ;;  %v7718_v43 = vpop.xlane.xlu0 %7717 }
0x18fe   : > { %13124 = vrcp.f32 %v7718_v43  ;;  %v16036_v43 = vld [vmem:[%s16428_s8 + $0x6] ss:$0 sm:$0xff] }
0x18ff   : > { %v13115_v28 = vpop.eup %13114 }
0x1900   : > { %v13117_v34 = vpop.eup %13116  ;;  %v7727_v56 = vpop.xlane.xlu1 %7726  ;;  %v7731_v10 = vmul.f32 %v13115_v28, %v13099_v31 }
0x1901   : > { %13126 = vrcp.f32 %v7727_v56  ;;  %v7724_v61 = vpop.xlane.xlu0 %7723  ;;  %v7729_v1 = vmul.f32 %v13117_v34, %v13101_v0  ;;  %v16012_v0 = vld [vmem:[%s16428_s8 + $0x3] ss:$0 sm:$0xff] }
0x1902   : > { %13128 = vrcp.f32 %v7724_v61  ;;  %v7156_v56 = vld [vmem:[%s16433_s23 + $0x20] sm:$0xff]  ;;  %v7157_v61 = vld [vmem:[%s16433_s23 + $0x28] sm:$0xff] }
0x1903   : > { %v13119_v54 = vpop.eup %13118  ;;  %11961 = vmatprep.mubr.msk.f32.mxu0 %vm2436_vm2, %v7729_v1 }
0x1904   : > { %v13121_v17 = vpop.eup %13120  ;;  %11962 = vmatmul.mubr.msk.f32.vlgmr.msra.gmra.mrb[90].mxu0 %vm2436_vm2, %v7731_v10  ;;  %v7735_v51 = vmul.f32 %v13119_v54, %v13103_v49 }
0x1905   : > { %v7733_v50 = vmul.f32 %v13121_v17, %v13105_v7  ;;  %v12501_v17 = vpack.c.bf16 %v7157_v61, %v7156_v56 }
0x1907   : > { %v13123_v8 = vpop.eup %13122  ;;  %11964 = vmatprep.mubr.msk.f32.mxu0 %vm2436_vm2, %v7733_v50 }
0x1908   : > { %v13125_v45 = vpop.eup %13124  ;;  %11965 = vmatmul.mubr.msk.f32.gmra.mrb[92].mxu0 %vm2436_vm2, %v7735_v51  ;;  %v7739_v29 = vmul.f32 %v13123_v8, %v13107_v57  ;;  %v7158_v51 = vld [vmem:[%s16433_s23 + $0x30] sm:$0xff]  ;;  %v7159_v8 = vld [vmem:[%s16433_s23 + $0x38] sm:$0xff] }
0x1909   : > { %v7737_v55 = vmul.f32 %v13125_v45, %v13109_v35  ;;  %v16022_v35 = vld [vmem:[%s16428_s8 + $0x5] ss:$0 sm:$0xff]  ;;  %v10754_v45 = vld [vmem:[#allocation18 + $0x4] ss:$0 sm:$0xff] }
0x190b   : > { %v13127_v14 = vpop.eup %13126  ;;  %11967 = vmatprep.mubr.msk.f32.mxu0 %vm2436_vm2, %v7737_v55  ;;  %v12504_v55 = vpack.c.bf16 %v7159_v8, %v7158_v51 }
0x190c   : > { %v13129_v6 = vpop.eup %13128  ;;  %11968 = vmatmul.mubr.msk.f32.gmra.mrb[94].mxu0 %vm2436_vm2, %v7739_v29  ;;  %v7743_v11 = vmul.f32 %v13127_v14, %v13111_v47  ;;  %v8009_v29 = vmul.f32 %v10754_v45, %v15945_v21  ;;  %v10755_v14 = vld [vmem:[#allocation19 + $0x4] ss:$0 sm:$0xff] }
0x190d   : > { %v7741_v53 = vmul.f32 %v13129_v6, %v13113_v38 }
0x190e   : > { %v8016_v6 = vadd.f32 %v10755_v14, %v8009_v29  ;;  %v10762_v29 = vld [vmem:[#allocation25 + $0x1] ss:$0 sm:$0xff] }
0x190f   : > { %11970 = vmatprep.mubr.msk.f32.mxu0 %vm2436_vm2, %v7741_v53  ;;  %v10750_v53 = vld [vmem:[#allocation28] ss:$0 sm:$0xff] }
0x1910   : > { %11971 = vmatmul.mubr.msk.f32.gmra.mrb[96].mxu0 %vm2436_vm2, %v7743_v11 }
0x1911   : > { %11992 = vmatprep.mubr.msk.f32.mxu0 %vm13997_vm1, %v13998_v39 }
0x19d7   : > { %v11963_v41 = vpop.f32.mrb[90].mxu0 }
0x19d8   : > { %v7874_v40 = vmul.f32 %v16002_v4, %v11963_v41  ;;  %v7834_v13 = vpop.f32.mrb[91].mxu0 }
0x19d9   : > { %v7873_v62 = vmul.f32 %v16006_v60, %v7834_v13 }
0x19da   : > { %v7882_v25 = vsel %vm1426_vm0, %v7874_v40, 0.0 }
0x19db   : > { %v7881_v27 = vsel %vm1426_vm0, %v7873_v62, 0.0  ;;  %v11966_v32 = vpop.f32.mrb[92].mxu0 }
0x19dc   : > { %v7883_v31 = vadd.f32 %v7882_v25, %v7881_v27  ;;  %v7844_v52 = vpop.f32.mrb[93].mxu0  ;;  %v7876_v24 = vmul.f32 %v16012_v0, %v11966_v32  ;;  %v7141_v32 = vld [vmem:[%s16432_s2 + $0x20] sm:$0xff] }
0x19dd   : > { %v7875_v19 = vmul.f32 %v16016_v5, %v7844_v52 }
0x19de   : > { %v7886_v57 = vsel %vm1426_vm0, %v7876_v24, 0.0  ;;  %v7143_v24 = vld [vmem:[%s16432_s2 + $0x30] sm:$0xff] }
0x19df   : > { %v7884_v49 = vsel %vm1426_vm0, %v7875_v19, 0.0  ;;  %v11969_v7 = vpop.f32.mrb[94].mxu0  ;;  %v7144_v19 = vld [vmem:[%s16432_s2 + $0x38] sm:$0xff] }
0x19e0   : > { %v7885_v33 = vadd.f32 %v7884_v49, %v7883_v31  ;;  %v7854_v22 = vpop.f32.mrb[95].mxu0  ;;  %v7878_v48 = vmul.f32 %v16022_v35, %v11969_v7  ;;  %v7142_v31 = vld [vmem:[%s16432_s2 + $0x28] sm:$0xff]  ;;  %v12498_v49 = vpack.c.bf16 %v7144_v19, %v7143_v24 }
0x19e1   : > { %v7877_v47 = vmul.f32 %v16026_v23, %v7854_v22  ;;  %v12495_v52 = vpack.c.bf16 %v7142_v31, %v7141_v32 }
0x19e2   : > { %v7887_v38 = vadd.f32 %v7886_v57, %v7885_v33  ;;  %v7890_v9 = vsel %vm1426_vm0, %v7878_v48, 0.0  ;;  %v10752_v48 = vld [vmem:[#allocation18 + $0x3] ss:$0 sm:$0xff] }
0x19e3   : > { %v7888_v46 = vsel %vm1426_vm0, %v7877_v47, 0.0  ;;  %v11972_v44 = vpop.f32.mrb[96].mxu0  ;;  %12496 = vmatpush3.bf16.msra.mxu0 %v12495_v52 }
0x19e4   : > { %v7889_v16 = vadd.f32 %v7888_v46, %v7887_v38  ;;  %v7864_v2 = vpop.f32.mrb[97].mxu0  ;;  %v7880_v58 = vmul.f32 %v16032_v42, %v11972_v44  ;;  %12497 = vmatprep.subr.bf16.mxu0 %v13996_v30  ;;  %v7171_v38 = vld [vmem:[#allocation24 + $0x20] sm:$0xff]  ;;  %v7172_v46 = vld [vmem:[#allocation24 + $0x28] sm:$0xff]  ;;  %v10753_v44 = vld [vmem:[#allocation19 + $0x3] ss:$0 sm:$0xff] }
0x19e5   : > { %v7879_v28 = vmul.f32 %v16036_v43, %v7864_v2  ;;  %v12507_v2 = vpack.c.bf16 %v7172_v46, %v7171_v38 }
0x19e6   : > { %v7891_v34 = vadd.f32 %v7890_v9, %v7889_v16  ;;  %v7894_v54 = vsel %vm1426_vm0, %v7880_v58, 0.0  ;;  %v7173_v58 = vld [vmem:[#allocation24 + $0x30] sm:$0xff] }
0x19e7   : > { %v7892_v1 = vsel %vm1426_vm0, %v7879_v28, 0.0  ;;  %12499 = vmatpush3.bf16.msra.mxu0 %v12498_v49  ;;  %v7174_v28 = vld [vmem:[#allocation24 + $0x38] sm:$0xff] }
0x19e8   : > { %v7893_v10 = vadd.f32 %v7892_v1, %v7891_v34  ;;  %12506 = vmatprep.subr.bf16.mxu0 %v13996_v30  ;;  %v10756_v34 = vld [vmem:[#allocation18 + $0x5] ss:$0 sm:$0xff]  ;;  %v12510_v56 = vpack.c.bf16 %v7174_v28, %v7173_v58  ;;  %v10757_v1 = vld [vmem:[#allocation19 + $0x5] ss:$0 sm:$0xff] }
0x19e9   : > { %v8023_v61 = vmul.f32 %v10756_v34, %v15934_v36 }
0x19ea   : > { %v7895_v50 = vadd.f32 %v7894_v54, %v7893_v10  ;;  %v10758_v54 = vld [vmem:[#allocation21 + $0x1] ss:$0 sm:$0xff] }
0x19eb   : > { %v8030_v10 = vadd.f32 %v10757_v1, %v8023_v61 }
0x19ec   : > { %11982 = vmatmul.mubr.msk.f32.vlgmr.msra.gmra.mrb[92].mxu1 %vm1426_vm0, %v7895_v50 }
0x19ed   : > { %12502 = vmatpush3.bf16.msra.mxu1 %v12501_v17  ;;  %12003 = vmatprep.mubr.msk.f32.mxu1 %vm13997_vm1, %v13998_v39 }
0x19ee   : > { %12503 = vmatprep.subr.bf16.mxu1 %v13996_v30 }
0x19f1   : > { %12505 = vmatpush3.bf16.msra.mxu1 %v12504_v55 }
0x19f4   : > { %12004 = vmatmul.mubr.msk.f32.vlgmr.msra.gmra.mrb[94].mxu1 %vm1426_vm0, %v8016_v6 }
0x1abf   : > { %v7971_v11 = vpop.f32.mrb[92].mxu1 }
0x1ac0   : > { %v7972_v3 = vadd.f32 %v10750_v53, %v7971_v11  ;;  %v11983_v26 = vpop.f32.mrb[93].mxu1 }
0x1ac2   : > { %v16052_v59 = vadd.f32 %v7972_v3, %v15919_v18 }
0x1ac4   : > { %v7976_v15 = vsel %vm1426_vm0, %v16052_v59, 0.0 }
0x1ac5   : > { %7977 = vadd.xlane.f32.xlu0 %v7976_v15 }
0x1ac7   : > { %v8185_v20 = vpop.f32.mrb[94].mxu1 }
0x1ac8   : > { %v8186_v41 = vadd.f32 %v10760_v12, %v8185_v20  ;;  %v12005_v40 = vpop.f32.mrb[95].mxu1 }
0x1aca   : > { %12017 = vmatprep.subr.msk.mxu1 %vm1426_vm0, %v8186_v41 }
0x1acb   : > { %12018 = vmatpush3.xpose.msk.msra.mxu1 %vm1426_vm0, %v8186_v41 }
0x1acc   : > { %12512 = vmatprep.subr.bf16.mxu1 %v13996_v30 }
0x1b52   : > { %v16059_v18 = vpop.xlane.xlu0 %7977 }
0x1b53   : > { %v7979_v13 = vmul.f32 0.03125, %v16059_v18 }
0x1b55   : > { %v7980_v62 = vsub.f32 %v16052_v59, %v7979_v13 }
0x1b57   : > { %v7981_v25 = vmul.f32 %v7980_v62, %v7980_v62 }
0x1b59   : > { %v7982_v27 = vsel %vm1426_vm0, %v7981_v25, 0.0 }
0x1b5a   : > { %7983 = vadd.xlane.f32.xlu1 %v7982_v27 }
0x1be7   : > { %v7984_v7 = vpop.xlane.xlu1 %7983 }
0x1be8   : > { %v7985_v33 = vmul.f32 0.03125, %v7984_v7 }
0x1bea   : > { %v7986_v22 = vadd.f32 1e-06, %v7985_v33 }
0x1bec   : > { %13130 = vrsqrt.f32 %v7986_v22 }
0x1bf6   : > { %v13131_v57 = vpop.eup %13130 }
0x1bf7   : > { %v16070_v47 = vmul.f32 %v13131_v57, %v7980_v62 }
0x1bf9   : > { %v7995_v16 = vmul.f32 %v10752_v48, %v16070_v47 }
0x1bfb   : > { %v8002_v9 = vadd.f32 %v10753_v44, %v7995_v16 }
0x1bfd   : > { %11993 = vmatmul.mubr.msk.f32.vlgmr.msra.gmra.mrb[98].mxu0 %vm1426_vm0, %v8002_v9 }
0x1bfe   : > { %12508 = vmatpush3.bf16.msra.mxu0 %v12507_v2  ;;  %12014 = vmatprep.mubr.msk.f32.mxu0 %vm13997_vm1, %v13998_v39 }
0x1bff   : > { %12509 = vmatprep.subr.bf16.mxu0 %v13996_v30 }
0x1c02   : > { %12511 = vmatpush3.bf16.msra.mxu0 %v12510_v56 }
0x1c05   : > { %12015 = vmatmul.mubr.msk.f32.vlgmr.msra.gmra.mrb[100].mxu0 %vm1426_vm0, %v8030_v10 }
0x1cd0   : > { %v8106_v17 = vpop.f32.mrb[98].mxu0 }
0x1cd1   : > { %v8107_v50 = vadd.f32 %v10758_v54, %v8106_v17  ;;  %v11994_v51 = vpop.f32.mrb[99].mxu0 }
0x1cd3   : > { %v8268_v8 = vmul.f32 0.5, %v8107_v50 }
0x1cd5   : > { %v8269_v45 = vmul.f32 %v16006_v60, %v8268_v8  ;;  %v8270_v55 = vmul.f32 %v16002_v4, %v8268_v8  ;;  %v8271_v14 = vmul.f32 %v16016_v5, %v8268_v8  ;;  %v8272_v11 = vmul.f32 %v16012_v0, %v8268_v8 }
0x1cd6   : > { %v8273_v3 = vmul.f32 %v16026_v23, %v8268_v8  ;;  %v8274_v26 = vmul.f32 %v16022_v35, %v8268_v8  ;;  %v8275_v15 = vmul.f32 %v16036_v43, %v8268_v8  ;;  %v8276_v12 = vmul.f32 %v16032_v42, %v8268_v8 }
0x1cd7   : > { %12019 = vmatprep.mubr.msk.f32.mxu1 %vm1426_vm0, %v8269_v45 }
0x1cd8   : > { %v8264_v36 = vpop.f32.mrb[100].mxu0  ;;  %12020 = vmatmul.mubr.msk.f32.vlgmr.msra.gmra.mrb[96].mxu1 %vm1426_vm0, %v8270_v55 }
0x1cd9   : > { %v8265_v6 = vadd.f32 %v10762_v29, %v8264_v36  ;;  %v12016_v53 = vpop.f32.mrb[101].mxu0  ;;  %12022 = vmatprep.mubr.msk.f32.mxu1 %vm1426_vm0, %v8271_v14 }
0x1cdb   : > { %12031 = vmatprep.subr.mxu0 %v8265_v6 }
0x1cdc   : > { %12032 = vmatpush3.msra.mxu0 %v8265_v6  ;;  %12023 = vmatmul.mubr.msk.f32.gmra.mrb[98].mxu1 %vm1426_vm0, %v8272_v11 }
0x1cdd   : > { %12025 = vmatprep.mubr.msk.f32.mxu1 %vm1426_vm0, %v8273_v3  ;;  %12518 = vmatprep.subr.bf16.mxu0 %v13996_v30 }
0x1ce0   : > { %12026 = vmatmul.mubr.msk.f32.gmra.mrb[100].mxu1 %vm1426_vm0, %v8274_v26 }
0x1ce1   : > { %12028 = vmatprep.mubr.msk.f32.mxu1 %vm1426_vm0, %v8275_v15 }
0x1ce4   : > { %12029 = vmatmul.mubr.msk.f32.gmra.mrb[102].mxu1 %vm1426_vm0, %v8276_v12 }
0x1ce5   : > { %12053 = vmatprep.mubr.msk.f32.mxu1 %vm13997_vm1, %v13998_v39 }
0x1dab   : > { %v12021_v20 = vpop.f32.mrb[96].mxu1 }
0x1dac   : > { %v8370_v41 = vpop.f32.mrb[97].mxu1  ;;  %v8412_v40 = vsel %vm2436_vm2, %v12021_v20, -inf }
0x1dad   : > { %8413 = vmax.xlane.f32.xlu1 %v8412_v40  ;;  %v8409_v13 = vsel %vm2436_vm2, %v8370_v41, -inf }
0x1dae   : > { %8410 = vmax.xlane.f32.xlu0 %v8409_v13 }
0x1daf   : > { %v12024_v62 = vpop.f32.mrb[98].mxu1 }
0x1db0   : > { %v8380_v25 = vpop.f32.mrb[99].mxu1  ;;  %v8418_v27 = vsel %vm2436_vm2, %v12024_v62, -inf }
0x1db1   : > { %8419 = vmax.xlane.f32.xlu1 %v8418_v27  ;;  %v8415_v32 = vsel %vm2436_vm2, %v8380_v25, -inf }
0x1db2   : > { %8416 = vmax.xlane.f32.xlu0 %v8415_v32 }
0x1db3   : > { %v12027_v31 = vpop.f32.mrb[100].mxu1 }
0x1db4   : > { %v8390_v52 = vpop.f32.mrb[101].mxu1  ;;  %v8424_v24 = vsel %vm2436_vm2, %v12027_v31, -inf }
0x1db5   : > { %8425 = vmax.xlane.f32.xlu1 %v8424_v24  ;;  %v8421_v19 = vsel %vm2436_vm2, %v8390_v52, -inf }
0x1db6   : > { %8422 = vmax.xlane.f32.xlu0 %v8421_v19 }
0x1db7   : > { %v12030_v49 = vpop.f32.mrb[102].mxu1 }
0x1db8   : > { %v8400_v7 = vpop.f32.mrb[103].mxu1  ;;  %v8430_v33 = vsel %vm2436_vm2, %v12030_v49, -inf }
0x1db9   : > { %8431 = vmax.xlane.f32.xlu1 %v8430_v33  ;;  %v8427_v22 = vsel %vm2436_vm2, %v8400_v7, -inf  ;;  %v7145_v33 = vld [vmem:[%s16432_s2 + $0x40] sm:$0xff] }
0x1dba   : > { %8428 = vmax.xlane.f32.xlu0 %v8427_v22  ;;  %v7146_v22 = vld [vmem:[%s16432_s2 + $0x48] sm:$0xff] }
0x1e3a   : > { %v8414_v57 = vpop.xlane.xlu1 %8413 }
0x1e3b   : > { %v8434_v48 = vsub.f32 %v12021_v20, %v8414_v57  ;;  %v8411_v38 = vpop.xlane.xlu0 %8410 }
0x1e3c   : > { %v8433_v46 = vsub.f32 %v8370_v41, %v8411_v38 }
0x1e3d   : > { %v8443_v44 = vmul.f32 1.442695, %v8434_v48 }
0x1e3e   : > { %v8441_v16 = vmul.f32 1.442695, %v8433_v46  ;;  %v8420_v2 = vpop.xlane.xlu1 %8419 }
0x1e3f   : > { %13132 = vpow2.f32 %v8443_v44  ;;  %v8436_v9 = vsub.f32 %v12024_v62, %v8420_v2  ;;  %v8417_v58 = vpop.xlane.xlu0 %8416 }
0x1e40   : > { %13134 = vpow2.f32 %v8441_v16  ;;  %v8435_v28 = vsub.f32 %v8380_v25, %v8417_v58  ;;  %v12519_v16 = vpack.c.bf16 %v7146_v22, %v7145_v33  ;;  %v7148_v58 = vld [vmem:[%s16432_s2 + $0x58] sm:$0xff] }
0x1e41   : > { %v8447_v34 = vmul.f32 1.442695, %v8436_v9  ;;  %v7147_v9 = vld [vmem:[%s16432_s2 + $0x50] sm:$0xff] }
0x1e42   : > { %v8445_v56 = vmul.f32 1.442695, %v8435_v28  ;;  %v8426_v61 = vpop.xlane.xlu1 %8425 }
0x1e43   : > { %13136 = vpow2.f32 %v8447_v34  ;;  %v8438_v1 = vsub.f32 %v12027_v31, %v8426_v61  ;;  %v8423_v10 = vpop.xlane.xlu0 %8422  ;;  %v12522_v61 = vpack.c.bf16 %v7148_v58, %v7147_v9 }
0x1e44   : > { %13138 = vpow2.f32 %v8445_v56  ;;  %v8437_v54 = vsub.f32 %v8390_v52, %v8423_v10 }
0x1e45   : > { %v8451_v17 = vmul.f32 1.442695, %v8438_v1 }
0x1e46   : > { %v8449_v50 = vmul.f32 1.442695, %v8437_v54  ;;  %v8432_v51 = vpop.xlane.xlu1 %8431 }
0x1e47   : > { %13140 = vpow2.f32 %v8451_v17  ;;  %v8440_v8 = vsub.f32 %v12030_v49, %v8432_v51  ;;  %v8429_v45 = vpop.xlane.xlu0 %8428 }
0x1e48   : > { %13142 = vpow2.f32 %v8449_v50  ;;  %v8439_v55 = vsub.f32 %v8400_v7, %v8429_v45 }
0x1e49   : > { %v13133_v29 = vpop.eup %13132  ;;  %v8455_v14 = vmul.f32 1.442695, %v8440_v8  ;;  %v10783_v8 = vld [vmem:[#allocation18 + $0x6] ss:$0 sm:$0xff] }
0x1e4a   : > { %v13135_v36 = vpop.eup %13134  ;;  %v8453_v6 = vmul.f32 1.442695, %v8439_v55  ;;  %v8460_v53 = vsel %vm2436_vm2, %v13133_v29, 0.0 }
0x1e4b   : > { %13144 = vpow2.f32 %v8455_v14  ;;  %8461 = vadd.xlane.f32.xlu1 %v8460_v53  ;;  %v8457_v11 = vsel %vm2436_vm2, %v13135_v36, 0.0  ;;  %v10784_v53 = vld [vmem:[#allocation19 + $0x6] ss:$0 sm:$0xff] }
0x1e4c   : > { %13146 = vpow2.f32 %v8453_v6  ;;  %8458 = vadd.xlane.f32.xlu0 %v8457_v11  ;;  %v7176_v6 = vld [vmem:[#allocation24 + $0x48] sm:$0xff] }
0x1e4d   : > { %v13137_v3 = vpop.eup %13136 }
0x1e4e   : > { %v13139_v26 = vpop.eup %13138  ;;  %v8466_v15 = vsel %vm2436_vm2, %v13137_v3, 0.0 }
0x1e4f   : > { %8467 = vadd.xlane.f32.xlu1 %v8466_v15  ;;  %v8463_v12 = vsel %vm2436_vm2, %v13139_v26, 0.0  ;;  %v7178_v15 = vld [vmem:[#allocation24 + $0x58] sm:$0xff] }
0x1e50   : > { %8464 = vadd.xlane.f32.xlu0 %v8463_v12  ;;  %v10787_v12 = vld [vmem:[#allocation18 + $0x8] ss:$0 sm:$0xff] }
0x1e51   : > { %v13141_v20 = vpop.eup %13140 }
0x1e52   : > { %v13143_v41 = vpop.eup %13142  ;;  %v8472_v40 = vsel %vm2436_vm2, %v13141_v20, 0.0 }
0x1e53   : > { %8473 = vadd.xlane.f32.xlu1 %v8472_v40  ;;  %v8469_v13 = vsel %vm2436_vm2, %v13143_v41, 0.0 }
0x1e54   : > { %8470 = vadd.xlane.f32.xlu0 %v8469_v13  ;;  %v7186_v13 = vld [vmem:[#allocation27 + $0x20] sm:$0xff] }
0x1e55   : > { %v13145_v62 = vpop.eup %13144 }
0x1e56   : > { %v13147_v25 = vpop.eup %13146  ;;  %v8478_v27 = vsel %vm2436_vm2, %v13145_v62, 0.0 }
0x1e57   : > { %8479 = vadd.xlane.f32.xlu1 %v8478_v27  ;;  %v8475_v32 = vsel %vm2436_vm2, %v13147_v25, 0.0  ;;  %v7188_v27 = vld [vmem:[#allocation27 + $0x30] sm:$0xff] }
0x1e58   : > { %8476 = vadd.xlane.f32.xlu0 %v8475_v32  ;;  %v7189_v32 = vld [vmem:[#allocation27 + $0x38] sm:$0xff] }
0x1ed8   : > { %v8462_v31 = vpop.xlane.xlu1 %8461 }
0x1ed9   : > { %13148 = vrcp.f32 %v8462_v31  ;;  %v8459_v52 = vpop.xlane.xlu0 %8458  ;;  %v12516_v31 = vpack.c.bf16 %v7189_v32, %v7188_v27  ;;  %v7160_v32 = vld [vmem:[%s16433_s23 + $0x40] sm:$0xff] }
0x1eda   : > { %13150 = vrcp.f32 %v8459_v52 }
0x1edc   : > { %v8468_v24 = vpop.xlane.xlu1 %8467 }
0x1edd   : > { %13152 = vrcp.f32 %v8468_v24  ;;  %v8465_v19 = vpop.xlane.xlu0 %8464 }
0x1ede   : > { %13154 = vrcp.f32 %v8465_v19 }
0x1ee0   : > { %v8474_v49 = vpop.xlane.xlu1 %8473 }
0x1ee1   : > { %13156 = vrcp.f32 %v8474_v49  ;;  %v8471_v7 = vpop.xlane.xlu0 %8470 }
0x1ee2   : > { %13158 = vrcp.f32 %v8471_v7 }
0x1ee3   : > { %v13149_v57 = vpop.eup %13148 }
0x1ee4   : > { %v13151_v48 = vpop.eup %13150  ;;  %v8480_v38 = vpop.xlane.xlu1 %8479  ;;  %v8484_v2 = vmul.f32 %v13149_v57, %v13133_v29  ;;  %v8735_v29 = vmul.f32 %v10783_v8, %v16070_v47 }
0x1ee5   : > { %13160 = vrcp.f32 %v8480_v38  ;;  %v8477_v46 = vpop.xlane.xlu0 %8476  ;;  %v8482_v44 = vmul.f32 %v13151_v48, %v13135_v36  ;;  %v7175_v36 = vld [vmem:[#allocation24 + $0x40] sm:$0xff] }
0x1ee6   : > { %13162 = vrcp.f32 %v8477_v46  ;;  %v12531_v11 = vpack.c.bf16 %v7176_v6, %v7175_v36  ;;  %v10793_v6 = vld [vmem:[#allocation25 + $0x2] ss:$0 sm:$0xff] }
0x1ee7   : > { %v13153_v28 = vpop.eup %13152  ;;  %12033 = vmatprep.mubr.msk.f32.mxu0 %vm2436_vm2, %v8482_v44 }
0x1ee8   : > { %v13155_v34 = vpop.eup %13154  ;;  %12034 = vmatmul.mubr.msk.f32.vlgmr.msra.gmra.mrb[102].mxu0 %vm2436_vm2, %v8484_v2  ;;  %v8488_v1 = vmul.f32 %v13153_v28, %v13137_v3  ;;  %v8742_v3 = vadd.f32 %v10784_v53, %v8735_v29 }
0x1ee9   : > { %v8486_v56 = vmul.f32 %v13155_v34, %v13139_v26  ;;  %12520 = vmatpush3.bf16.msra.mxu0 %v12519_v16  ;;  %v7177_v26 = vld [vmem:[#allocation24 + $0x50] sm:$0xff] }
0x1eea   : > { %12521 = vmatprep.subr.bf16.mxu0 %v13996_v30  ;;  %v12534_v47 = vpack.c.bf16 %v7178_v15, %v7177_v26  ;;  %v10781_v26 = vld [vmem:[#allocation28 + $0x1] ss:$0 sm:$0xff] }
0x1eeb   : > { %v13157_v10 = vpop.eup %13156  ;;  %12036 = vmatprep.mubr.msk.f32.mxu0 %vm2436_vm2, %v8486_v56 }
0x1eec   : > { %v13159_v54 = vpop.eup %13158  ;;  %12037 = vmatmul.mubr.msk.f32.gmra.mrb[104].mxu0 %vm2436_vm2, %v8488_v1  ;;  %v8492_v50 = vmul.f32 %v13157_v10, %v13141_v20  ;;  %v8776_v20 = vmul.f32 %v10787_v12, %v15945_v21 }
0x1eed   : > { %v8490_v17 = vmul.f32 %v13159_v54, %v13143_v41  ;;  %12523 = vmatpush3.bf16.msra.mxu0 %v12522_v61  ;;  %v10788_v41 = vld [vmem:[#allocation19 + $0x8] ss:$0 sm:$0xff] }
0x1eee   : > { %12530 = vmatprep.subr.bf16.mxu0 %v13996_v30  ;;  %v8783_v40 = vadd.f32 %v10788_v41, %v8776_v20 }
0x1eef   : > { %v13161_v51 = vpop.eup %13160  ;;  %12039 = vmatprep.mubr.msk.f32.mxu0 %vm2436_vm2, %v8490_v17 }
0x1ef0   : > { %v13163_v45 = vpop.eup %13162  ;;  %12040 = vmatmul.mubr.msk.f32.gmra.mrb[106].mxu0 %vm2436_vm2, %v8492_v50  ;;  %v8496_v14 = vmul.f32 %v13161_v51, %v13145_v62  ;;  %v7187_v62 = vld [vmem:[#allocation27 + $0x28] sm:$0xff] }
0x1ef1   : > { %v8494_v55 = vmul.f32 %v13163_v45, %v13147_v25  ;;  %v12513_v25 = vpack.c.bf16 %v7187_v62, %v7186_v13 }
0x1ef3   : > { %12042 = vmatprep.mubr.msk.f32.mxu0 %vm2436_vm2, %v8494_v55  ;;  %12514 = vmatpush3.bf16.msra.mxu1 %v12513_v25 }
0x1ef4   : > { %12043 = vmatmul.mubr.msk.f32.gmra.mrb[108].mxu0 %vm2436_vm2, %v8496_v14  ;;  %12515 = vmatprep.subr.bf16.mxu1 %v13996_v30 }
0x1ef5   : > { %12064 = vmatprep.mubr.msk.f32.mxu0 %vm13997_vm1, %v13998_v39 }
0x1ef7   : > { %12517 = vmatpush3.bf16.msra.mxu1 %v12516_v31  ;;  %v7161_v31 = vld [vmem:[%s16433_s23 + $0x48] sm:$0xff] }
0x1ef8   : > { %12065 = vmatmul.mubr.msk.f32.vlgmr.msra.gmra.mrb[110].mxu0 %vm1426_vm0, %v8742_v3  ;;  %12524 = vmatprep.subr.bf16.mxu1 %v13996_v30 }
0x1ef9   : > { %12532 = vmatpush3.bf16.msra.mxu0 %v12531_v11  ;;  %12086 = vmatprep.mubr.msk.f32.mxu0 %vm13997_vm1, %v13998_v39 }
0x1efa   : > { %12533 = vmatprep.subr.bf16.mxu0 %v13996_v30 }
0x1efd   : > { %12535 = vmatpush3.bf16.msra.mxu0 %v12534_v47 }
0x1f00   : > { %12087 = vmatmul.mubr.msk.f32.vlgmr.msra.gmra.mrb[112].mxu0 %vm1426_vm0, %v8783_v40 }
0x1fbb   : > { %v12035_v52 = vpop.f32.mrb[102].mxu0 }
0x1fbc   : > { %v8627_v21 = vmul.f32 %v16002_v4, %v12035_v52  ;;  %v8587_v24 = vpop.f32.mrb[103].mxu0  ;;  %v12525_v52 = vpack.c.bf16 %v7161_v31, %v7160_v32 }
0x1fbd   : > { %v8626_v19 = vmul.f32 %v16006_v60, %v8587_v24 }
0x1fbe   : > { %v8635_v49 = vsel %vm1426_vm0, %v8627_v21, 0.0  ;;  %v7163_v21 = vld [vmem:[%s16433_s23 + $0x58] sm:$0xff] }
0x1fbf   : > { %v8634_v7 = vsel %vm1426_vm0, %v8626_v19, 0.0  ;;  %v12038_v33 = vpop.f32.mrb[104].mxu0 }
0x1fc0   : > { %v8636_v22 = vadd.f32 %v8635_v49, %v8634_v7  ;;  %v8597_v57 = vpop.f32.mrb[105].mxu0  ;;  %v8629_v48 = vmul.f32 %v16012_v0, %v12038_v33  ;;  %v10789_v33 = vld [vmem:[#allocation21 + $0x2] ss:$0 sm:$0xff] }
0x1fc1   : > { %v8628_v38 = vmul.f32 %v16016_v5, %v8597_v57 }
0x1fc2   : > { %v8639_v9 = vsel %vm1426_vm0, %v8629_v48, 0.0  ;;  %v10785_v48 = vld [vmem:[#allocation18 + $0x7] ss:$0 sm:$0xff] }
0x1fc3   : > { %v8637_v46 = vsel %vm1426_vm0, %v8628_v38, 0.0  ;;  %v12041_v44 = vpop.f32.mrb[106].mxu0 }
0x1fc4   : > { %v8638_v16 = vadd.f32 %v8637_v46, %v8636_v22  ;;  %v8607_v2 = vpop.f32.mrb[107].mxu0  ;;  %v8631_v58 = vmul.f32 %v16022_v35, %v12041_v44  ;;  %v10786_v44 = vld [vmem:[#allocation19 + $0x7] ss:$0 sm:$0xff] }
0x1fc5   : > { %v8630_v28 = vmul.f32 %v16026_v23, %v8607_v2 }
0x1fc6   : > { %v8640_v34 = vadd.f32 %v8639_v9, %v8638_v16  ;;  %v8643_v54 = vsel %vm1426_vm0, %v8631_v58, 0.0  ;;  %v10791_v58 = vld [vmem:[#allocation22 + $0x2] ss:$0 sm:$0xff] }
0x1fc7   : > { %v8641_v56 = vsel %vm1426_vm0, %v8630_v28, 0.0  ;;  %v12044_v61 = vpop.f32.mrb[108].mxu0 }
0x1fc8   : > { %v8642_v1 = vadd.f32 %v8641_v56, %v8640_v34  ;;  %v8617_v10 = vpop.f32.mrb[109].mxu0  ;;  %v8633_v17 = vmul.f32 %v16032_v42, %v12044_v61 }
0x1fc9   : > { %v8632_v50 = vmul.f32 %v16036_v43, %v8617_v10 }
0x1fca   : > { %v8644_v51 = vadd.f32 %v8643_v54, %v8642_v1  ;;  %v8647_v14 = vsel %vm1426_vm0, %v8633_v17, 0.0 }
0x1fcb   : > { %v8645_v8 = vsel %vm1426_vm0, %v8632_v50, 0.0  ;;  %v8859_v45 = vpop.f32.mrb[110].mxu0 }
0x1fcc   : > { %v8646_v55 = vadd.f32 %v8645_v8, %v8644_v51  ;;  %v12066_v29 = vpop.f32.mrb[111].mxu0  ;;  %v8860_v22 = vadd.f32 %v10789_v33, %v8859_v45 }
0x1fce   : > { %v8648_v36 = vadd.f32 %v8647_v14, %v8646_v55  ;;  %v9021_v46 = vmul.f32 0.5, %v8860_v22 }
0x1fd0   : > { %12054 = vmatmul.mubr.msk.f32.vlgmr.msra.gmra.mrb[104].mxu1 %vm1426_vm0, %v8648_v36  ;;  %v9022_v9 = vmul.f32 %v16006_v60, %v9021_v46  ;;  %v9023_v61 = vmul.f32 %v16002_v4, %v9021_v46  ;;  %v9024_v1 = vmul.f32 %v16016_v5, %v9021_v46  ;;  %v9025_v60 = vmul.f32 %v16012_v0, %v9021_v46 }
0x1fd1   : > { %12075 = vmatprep.mubr.msk.f32.mxu1 %vm13997_vm1, %v13998_v39  ;;  %12526 = vmatpush3.bf16.msra.mxu1 %v12525_v52  ;;  %v9026_v10 = vmul.f32 %v16026_v23, %v9021_v46  ;;  %v9027_v54 = vmul.f32 %v16022_v35, %v9021_v46  ;;  %v9028_v4 = vmul.f32 %v16036_v43, %v9021_v46 }
0x1fd2   : > { %12527 = vmatprep.subr.bf16.mxu1 %v13996_v30  ;;  %v9029_v5 = vmul.f32 %v16032_v42, %v9021_v46 }
0x1fd3   : > { %v9017_v53 = vpop.f32.mrb[112].mxu0 }
0x1fd4   : > { %v9018_v11 = vadd.f32 %v10793_v6, %v9017_v53  ;;  %v12088_v3 = vpop.f32.mrb[113].mxu0 }
0x1fd6   : > { %12103 = vmatprep.subr.mxu0 %v9018_v11 }
0x1fd7   : > { %12104 = vmatpush3.msra.mxu0 %v9018_v11 }
0x1fd8   : > { %12542 = vmatprep.subr.bf16.mxu0 %v13996_v30 }
0x20a3   : > { %v8724_v15 = vpop.f32.mrb[104].mxu1 }
0x20a4   : > { %v8725_v12 = vadd.f32 %v10781_v26, %v8724_v15  ;;  %v12055_v47 = vpop.f32.mrb[105].mxu1 }
0x20a6   : > { %v16160_v20 = vadd.f32 %v8725_v12, %v15908_v63  ;;  %v7162_v63 = vld [vmem:[%s16433_s23 + $0x50] sm:$0xff] }
0x20a7   : > { %v12528_v24 = vpack.c.bf16 %v7163_v21, %v7162_v63 }
0x20a8   : > { %v8743_v41 = vsel %vm1426_vm0, %v16160_v20, 0.0 }
0x20a9   : > { %8744 = vadd.xlane.f32.xlu0 %v8743_v41  ;;  %12529 = vmatpush3.bf16.msra.mxu1 %v12528_v24 }
0x2136   : > { %v16164_v40 = vpop.xlane.xlu0 %8744 }
0x2137   : > { %v8746_v13 = vmul.f32 0.03125, %v16164_v40 }
0x2139   : > { %v8747_v62 = vsub.f32 %v16160_v20, %v8746_v13 }
0x213b   : > { %v8748_v25 = vmul.f32 %v8747_v62, %v8747_v62 }
0x213d   : > { %v8749_v27 = vsel %vm1426_vm0, %v8748_v25, 0.0 }
0x213e   : > { %8750 = vadd.xlane.f32.xlu1 %v8749_v27 }
0x21cb   : > { %v8751_v19 = vpop.xlane.xlu1 %8750 }
0x21cc   : > { %v8752_v49 = vmul.f32 0.03125, %v8751_v19 }
0x21ce   : > { %v8753_v7 = vadd.f32 1e-06, %v8752_v49 }
0x21d0   : > { %13164 = vrsqrt.f32 %v8753_v7 }
0x21da   : > { %v13165_v57 = vpop.eup %13164 }
0x21db   : > { %v8755_v38 = vmul.f32 %v13165_v57, %v8747_v62 }
0x21dd   : > { %v8762_v16 = vmul.f32 %v10785_v48, %v8755_v38 }
0x21df   : > { %v8769_v2 = vadd.f32 %v10786_v44, %v8762_v16 }
0x21e1   : > { %12076 = vmatmul.mubr.msk.f32.vlgmr.msra.gmra.mrb[106].mxu1 %vm1426_vm0, %v8769_v2 }
0x21e2   : > { %12091 = vmatprep.mubr.msk.f32.mxu1 %vm1426_vm0, %v9022_v9 }
0x22b4   : > { %v8938_v28 = vpop.f32.mrb[106].mxu1 }
0x22b5   : > { %v8939_v34 = vadd.f32 %v10791_v58, %v8938_v28  ;;  %v12077_v56 = vpop.f32.mrb[107].mxu1 }
0x22b7   : > { %12089 = vmatprep.subr.msk.mxu1 %vm1426_vm0, %v8939_v34 }
0x22b8   : > { %12090 = vmatpush3.xpose.msk.msra.mxu1 %vm1426_vm0, %v8939_v34 }
0x22b9   : > { %12536 = vmatprep.subr.bf16.mxu1 %v13996_v30 }
0x22bb   : > { %12092 = vmatmul.mubr.msk.f32.vlgmr.msra.gmra.mrb[108].mxu1 %vm1426_vm0, %v9023_v61 }
0x22bc   : > { %12094 = vmatprep.mubr.msk.f32.mxu1 %vm1426_vm0, %v9024_v1 }
0x22bf   : > { %12095 = vmatmul.mubr.msk.f32.gmra.mrb[110].mxu1 %vm1426_vm0, %v9025_v60 }
0x22c0   : > { %12097 = vmatprep.mubr.msk.f32.mxu1 %vm1426_vm0, %v9026_v10 }
0x22c3   : > { %12098 = vmatmul.mubr.msk.f32.gmra.mrb[112].mxu1 %vm1426_vm0, %v9027_v54 }
0x22c4   : > { %12100 = vmatprep.mubr.msk.f32.mxu1 %vm1426_vm0, %v9028_v4 }
0x22c7   : > { %12101 = vmatmul.mubr.msk.f32.gmra.mrb[114].mxu1 %vm1426_vm0, %v9029_v5 }
0x22c8   : > { %12125 = vmatprep.mubr.msk.f32.mxu1 %vm13997_vm1, %v13998_v39 }
0x238e   : > { %v12093_v0 = vpop.f32.mrb[108].mxu1 }
0x238f   : > { %v9123_v23 = vpop.f32.mrb[109].mxu1  ;;  %v9165_v17 = vsel %vm2436_vm2, %v12093_v0, -inf }
0x2390   : > { %9166 = vmax.xlane.f32.xlu1 %v9165_v17  ;;  %v9162_v35 = vsel %vm2436_vm2, %v9123_v23, -inf }
0x2391   : > { %9163 = vmax.xlane.f32.xlu0 %v9162_v35 }
0x2392   : > { %v12096_v43 = vpop.f32.mrb[110].mxu1 }
0x2393   : > { %v9133_v50 = vpop.f32.mrb[111].mxu1  ;;  %v9171_v51 = vsel %vm2436_vm2, %v12096_v43, -inf }
0x2394   : > { %9172 = vmax.xlane.f32.xlu1 %v9171_v51  ;;  %v9168_v42 = vsel %vm2436_vm2, %v9133_v50, -inf }
0x2395   : > { %9169 = vmax.xlane.f32.xlu0 %v9168_v42 }
0x2396   : > { %v12099_v8 = vpop.f32.mrb[112].mxu1 }
0x2397   : > { %v9143_v45 = vpop.f32.mrb[113].mxu1  ;;  %v9177_v55 = vsel %vm2436_vm2, %v12099_v8, -inf }
0x2398   : > { %9178 = vmax.xlane.f32.xlu1 %v9177_v55  ;;  %v9174_v29 = vsel %vm2436_vm2, %v9143_v45, -inf }
0x2399   : > { %9175 = vmax.xlane.f32.xlu0 %v9174_v29 }
0x239a   : > { %v12102_v14 = vpop.f32.mrb[114].mxu1 }
0x239b   : > { %v9153_v36 = vpop.f32.mrb[115].mxu1  ;;  %v9183_v6 = vsel %vm2436_vm2, %v12102_v14, -inf }
0x239c   : > { %9184 = vmax.xlane.f32.xlu1 %v9183_v6  ;;  %v9180_v53 = vsel %vm2436_vm2, %v9153_v36, -inf }
0x239d   : > { %9181 = vmax.xlane.f32.xlu0 %v9180_v53 }
0x241d   : > { %v9167_v11 = vpop.xlane.xlu1 %9166 }
0x241e   : > { %v9187_v3 = vsub.f32 %v12093_v0, %v9167_v11  ;;  %v9164_v26 = vpop.xlane.xlu0 %9163 }
0x241f   : > { %v9186_v15 = vsub.f32 %v9123_v23, %v9164_v26 }
0x2420   : > { %v9196_v12 = vmul.f32 1.442695, %v9187_v3 }
0x2421   : > { %v9194_v47 = vmul.f32 1.442695, %v9186_v15  ;;  %v9173_v41 = vpop.xlane.xlu1 %9172 }
0x2422   : > { %13166 = vpow2.f32 %v9196_v12  ;;  %v9189_v13 = vsub.f32 %v12096_v43, %v9173_v41  ;;  %v9170_v62 = vpop.xlane.xlu0 %9169 }
0x2423   : > { %13168 = vpow2.f32 %v9194_v47  ;;  %v9188_v25 = vsub.f32 %v9133_v50, %v9170_v62  ;;  %v7191_v62 = vld [vmem:[#allocation27 + $0x48] sm:$0xff] }
0x2424   : > { %v9200_v27 = vmul.f32 1.442695, %v9189_v13  ;;  %v7190_v13 = vld [vmem:[#allocation27 + $0x40] sm:$0xff] }
0x2425   : > { %v9198_v32 = vmul.f32 1.442695, %v9188_v25  ;;  %v9179_v31 = vpop.xlane.xlu1 %9178  ;;  %v12537_v25 = vpack.c.bf16 %v7191_v62, %v7190_v13 }
0x2426   : > { %13170 = vpow2.f32 %v9200_v27  ;;  %v9191_v52 = vsub.f32 %v12099_v8, %v9179_v31  ;;  %v9176_v63 = vpop.xlane.xlu0 %9175  ;;  %v7192_v27 = vld [vmem:[#allocation27 + $0x50] sm:$0xff] }
0x2427   : > { %13172 = vpow2.f32 %v9198_v32  ;;  %v9190_v21 = vsub.f32 %v9143_v45, %v9176_v63  ;;  %12538 = vmatpush3.bf16.msra.mxu1 %v12537_v25  ;;  %v7193_v32 = vld [vmem:[#allocation27 + $0x58] sm:$0xff]  ;;  %v13226_v63 = vld [vmem:[%s16428_s8 + $0x1] ss:$0 sm:$0xff] }
0x2428   : > { %v9204_v24 = vmul.f32 1.442695, %v9191_v52  ;;  %12539 = vmatprep.subr.bf16.mxu1 %v13996_v30  ;;  %v12540_v31 = vpack.c.bf16 %v7193_v32, %v7192_v27 }
0x2429   : > { %v9202_v19 = vmul.f32 1.442695, %v9190_v21  ;;  %v9185_v49 = vpop.xlane.xlu1 %9184 }
0x242a   : > { %13174 = vpow2.f32 %v9204_v24  ;;  %v9193_v7 = vsub.f32 %v12102_v14, %v9185_v49  ;;  %v9182_v33 = vpop.xlane.xlu0 %9181 }
0x242b   : > { %13176 = vpow2.f32 %v9202_v19  ;;  %v9192_v22 = vsub.f32 %v9153_v36, %v9182_v33  ;;  %12541 = vmatpush3.bf16.msra.mxu1 %v12540_v31  ;;  %v13227_v19 = vld [vmem:[%s16428_s8] ss:$0 sm:$0xff]  ;;  %v9564_v31 = vld [vmem:[#allocation33 + $0x28] sm:$0xff] }
0x242c   : > { %v13167_v57 = vpop.eup %13166  ;;  %v9208_v48 = vmul.f32 1.442695, %v9193_v7  ;;  %12548 = vmatprep.subr.bf16.mxu1 %v13996_v30 }
0x242d   : > { %v13169_v38 = vpop.eup %13168  ;;  %v9206_v46 = vmul.f32 1.442695, %v9192_v22  ;;  %v9213_v44 = vsel %vm2436_vm2, %v13167_v57, 0.0 }
0x242e   : > { %13178 = vpow2.f32 %v9208_v48  ;;  %9214 = vadd.xlane.f32.xlu1 %v9213_v44  ;;  %v9210_v16 = vsel %vm2436_vm2, %v13169_v38, 0.0  ;;  %v13229_v44 = vld [vmem:[%s16428_s8 + $0x2] ss:$0 sm:$0xff] }
0x242f   : > { %13180 = vpow2.f32 %v9206_v46  ;;  %9211 = vadd.xlane.f32.xlu0 %v9210_v16 }
0x2430   : > { %v13171_v2 = vpop.eup %13170 }
0x2431   : > { %v13173_v9 = vpop.eup %13172  ;;  %v9219_v58 = vsel %vm2436_vm2, %v13171_v2, 0.0 }
0x2432   : > { %9220 = vadd.xlane.f32.xlu1 %v9219_v58  ;;  %v9216_v28 = vsel %vm2436_vm2, %v13173_v9, 0.0 }
0x2433   : > { %9217 = vadd.xlane.f32.xlu0 %v9216_v28 }
0x2434   : > { %v13175_v34 = vpop.eup %13174 }
0x2435   : > { %v13177_v56 = vpop.eup %13176  ;;  %v9225_v61 = vsel %vm2436_vm2, %v13175_v34, 0.0 }
0x2436   : > { %9226 = vadd.xlane.f32.xlu1 %v9225_v61  ;;  %v9222_v1 = vsel %vm2436_vm2, %v13177_v56, 0.0 }
0x2437   : > { %9223 = vadd.xlane.f32.xlu0 %v9222_v1  ;;  %v13231_v1 = vld [vmem:[%s16428_s8 + $0x4] ss:$0 sm:$0xff] }
0x2438   : > { %v13179_v60 = vpop.eup %13178 }
0x2439   : > { %v13181_v10 = vpop.eup %13180  ;;  %v9231_v54 = vsel %vm2436_vm2, %v13179_v60, 0.0 }
0x243a   : > { %9232 = vadd.xlane.f32.xlu1 %v9231_v54  ;;  %v9228_v4 = vsel %vm2436_vm2, %v13181_v10, 0.0 }
0x243b   : > { %9229 = vadd.xlane.f32.xlu0 %v9228_v4 }
0x24bb   : > { %v9215_v5 = vpop.xlane.xlu1 %9214 }
0x24bc   : > { %13182 = vrcp.f32 %v9215_v5  ;;  %v9212_v0 = vpop.xlane.xlu0 %9211 }
0x24bd   : > { %13184 = vrcp.f32 %v9212_v0 }
0x24bf   : > { %v9221_v23 = vpop.xlane.xlu1 %9220 }
0x24c0   : > { %13186 = vrcp.f32 %v9221_v23  ;;  %v9218_v17 = vpop.xlane.xlu0 %9217 }
0x24c1   : > { %13188 = vrcp.f32 %v9218_v17  ;;  %v13232_v17 = vld [vmem:[%s16428_s8 + $0x7] ss:$0 sm:$0xff] }
0x24c3   : > { %v9227_v35 = vpop.xlane.xlu1 %9226 }
0x24c4   : > { %13190 = vrcp.f32 %v9227_v35  ;;  %v9224_v43 = vpop.xlane.xlu0 %9223 }
0x24c5   : > { %13192 = vrcp.f32 %v9224_v43  ;;  %v13233_v43 = vld [vmem:[%s16428_s8 + $0x6] ss:$0 sm:$0xff] }
0x24c6   : > { %v13183_v50 = vpop.eup %13182 }
0x24c7   : > { %v13185_v51 = vpop.eup %13184  ;;  %v9233_v42 = vpop.xlane.xlu1 %9232  ;;  %v9237_v55 = vmul.f32 %v13183_v50, %v13167_v57 }
0x24c8   : > { %13194 = vrcp.f32 %v9233_v42  ;;  %v9230_v8 = vpop.xlane.xlu0 %9229  ;;  %v9235_v45 = vmul.f32 %v13185_v51, %v13169_v38  ;;  %v13228_v38 = vld [vmem:[%s16428_s8 + $0x3] ss:$0 sm:$0xff] }
0x24c9   : > { %13196 = vrcp.f32 %v9230_v8 }
0x24ca   : > { %v13187_v29 = vpop.eup %13186  ;;  %12105 = vmatprep.mubr.msk.f32.mxu0 %vm2436_vm2, %v9235_v45 }
0x24cb   : > { %v13189_v14 = vpop.eup %13188  ;;  %12106 = vmatmul.mubr.msk.f32.vlgmr.msra.gmra.mrb[114].mxu0 %vm2436_vm2, %v9237_v55  ;;  %v9241_v6 = vmul.f32 %v13187_v29, %v13171_v2  ;;  %v10812_v29 = vld [vmem:[#allocation28 + $0x2] ss:$0 sm:$0xff] }
0x24cc   : > { %v9239_v36 = vmul.f32 %v13189_v14, %v13173_v9 }
0x24ce   : > { %v13191_v53 = vpop.eup %13190  ;;  %12108 = vmatprep.mubr.msk.f32.mxu0 %vm2436_vm2, %v9239_v36 }
0x24cf   : > { %v13193_v11 = vpop.eup %13192  ;;  %12109 = vmatmul.mubr.msk.f32.gmra.mrb[116].mxu0 %vm2436_vm2, %v9241_v6  ;;  %v9245_v26 = vmul.f32 %v13191_v53, %v13175_v34 }
0x24d0   : > { %v9243_v3 = vmul.f32 %v13193_v11, %v13177_v56  ;;  %v13230_v56 = vld [vmem:[%s16428_s8 + $0x5] ss:$0 sm:$0xff] }
0x24d2   : > { %v13195_v15 = vpop.eup %13194  ;;  %12111 = vmatprep.mubr.msk.f32.mxu0 %vm2436_vm2, %v9243_v3  ;;  %v9491_v3 = vadd.f32 %v16164_v40, %v16059_v18  ;;  %v9563_v40 = vld [vmem:[#allocation33 + $0x20] sm:$0xff] }
0x24d3   : > { %v13197_v12 = vpop.eup %13196  ;;  %12112 = vmatmul.mubr.msk.f32.gmra.mrb[118].mxu0 %vm2436_vm2, %v9245_v26  ;;  %v9249_v41 = vmul.f32 %v13195_v15, %v13179_v60 }
0x24d4   : > { %v9247_v47 = vmul.f32 %v13197_v12, %v13181_v10 }
0x24d6   : > { %12114 = vmatprep.mubr.msk.f32.mxu0 %vm2436_vm2, %v9247_v47 }
0x24d7   : > { %12115 = vmatmul.mubr.msk.f32.gmra.mrb[120].mxu0 %vm2436_vm2, %v9249_v41 }
0x24d8   : > { %12136 = vmatprep.mubr.msk.f32.mxu0 %vm13997_vm1, %v13998_v39 }
0x259e   : > { %v12107_v52 = vpop.f32.mrb[114].mxu0 }
0x259f   : > { %v9380_v21 = vmul.f32 %v13226_v63, %v12107_v52  ;;  %v9340_v24 = vpop.f32.mrb[115].mxu0  ;;  %v9559_v52 = vld [vmem:[#allocation33] sm:$0xff]  ;;  %v12543_v63 = vpack.c.bf16 %v9564_v31, %v9563_v40  ;;  %v9578_v40 = vld [vmem:[%s14172_s4 + $0x30] sm:$0xff]  ;;  %v9579_v31 = vld [vmem:[%s14172_s4 + $0x38] sm:$0xff] }
0x25a0   : > { %v9379_v49 = vmul.f32 %v13227_v19, %v9340_v24  ;;  %v9565_v24 = vld [vmem:[#allocation33 + $0x30] sm:$0xff]  ;;  %v9566_v19 = vld [vmem:[#allocation33 + $0x38] sm:$0xff] }
0x25a1   : > { %v9388_v7 = vsel %vm1426_vm0, %v9380_v21, 0.0  ;;  %v9560_v21 = vld [vmem:[#allocation33 + $0x8] sm:$0xff]  ;;  %12544 = vmatpush3.bf16.msra.mxu0 %v12543_v63 }
0x25a2   : > { %v9387_v33 = vsel %vm1426_vm0, %v9379_v49, 0.0  ;;  %v12110_v22 = vpop.f32.mrb[116].mxu0  ;;  %v12549_v49 = vpack.c.bf16 %v9560_v21, %v9559_v52  ;;  %12545 = vmatprep.subr.bf16.mxu0 %v13996_v30  ;;  %v12570_v52 = vpack.c.bf16 %v9579_v31, %v9578_v40  ;;  %v9586_v63 = vld [vmem:[%s14172_s4 + $0x70] sm:$0xff]  ;;  %v9587_v21 = vld [vmem:[%s14172_s4 + $0x78] sm:$0xff] }
0x25a3   : > { %v9389_v57 = vadd.f32 %v9388_v7, %v9387_v33  ;;  %v9350_v48 = vpop.f32.mrb[117].mxu0  ;;  %v9382_v46 = vmul.f32 %v13228_v38, %v12110_v22  ;;  %v9561_v7 = vld [vmem:[#allocation33 + $0x10] sm:$0xff]  ;;  %v9562_v33 = vld [vmem:[#allocation33 + $0x18] sm:$0xff]  ;;  %v12546_v22 = vpack.c.bf16 %v9566_v19, %v9565_v24  ;;  %v12582_v24 = vpack.c.bf16 %v9587_v21, %v9586_v63 }
0x25a4   : > { %v9381_v16 = vmul.f32 %v13229_v44, %v9350_v48 }
0x25a5   : > { %v9392_v34 = vsel %vm1426_vm0, %v9382_v46, 0.0  ;;  %12547 = vmatpush3.bf16.msra.mxu0 %v12546_v22 }
0x25a6   : > { %v9390_v2 = vsel %vm1426_vm0, %v9381_v16, 0.0  ;;  %v12113_v9 = vpop.f32.mrb[118].mxu0  ;;  %12554 = vmatprep.subr.bf16.mxu0 %v13996_v30 }
0x25a7   : > { %v9391_v58 = vadd.f32 %v9390_v2, %v9389_v57  ;;  %v9360_v28 = vpop.f32.mrb[119].mxu0  ;;  %v9384_v61 = vmul.f32 %v13230_v56, %v12113_v9  ;;  %v12552_v57 = vpack.c.bf16 %v9562_v33, %v9561_v7 }
0x25a8   : > { %v9383_v60 = vmul.f32 %v13231_v1, %v9360_v28  ;;  %v10815_v28 = vld [vmem:[#allocation30 + $0x1] ss:$0 sm:$0xff]  ;;  %v9567_v1 = vld [vmem:[#allocation33 + $0x40] sm:$0xff] }
0x25a9   : > { %v9393_v10 = vadd.f32 %v9392_v34, %v9391_v58  ;;  %v9396_v23 = vsel %vm1426_vm0, %v9384_v61, 0.0  ;;  %v10814_v34 = vld [vmem:[#allocation30] ss:$0 sm:$0xff] }
0x25aa   : > { %v9394_v54 = vsel %vm1426_vm0, %v9383_v60, 0.0  ;;  %v12116_v4 = vpop.f32.mrb[120].mxu0  ;;  %v9568_v60 = vld [vmem:[#allocation33 + $0x48] sm:$0xff] }
0x25ab   : > { %v9395_v5 = vadd.f32 %v9394_v54, %v9393_v10  ;;  %v9370_v0 = vpop.f32.mrb[121].mxu0  ;;  %v9386_v35 = vmul.f32 %v13232_v17, %v12116_v4  ;;  %v10818_v10 = vld [vmem:[#allocation31 + $0x1] ss:$0 sm:$0xff]  ;;  %v10817_v54 = vld [vmem:[#allocation31] ss:$0 sm:$0xff] }
0x25ac   : > { %v9385_v50 = vmul.f32 %v13233_v43, %v9370_v0  ;;  %v12555_v0 = vpack.c.bf16 %v9568_v60, %v9567_v1  ;;  %v9570_v43 = vld [vmem:[#allocation33 + $0x58] sm:$0xff]  ;;  %v9590_v1 = vld [vmem:[%s14172_s4 + $0x90] sm:$0xff] }
0x25ad   : > { %v9397_v51 = vadd.f32 %v9396_v23, %v9395_v5  ;;  %v9400_v45 = vsel %vm1426_vm0, %v9386_v35, 0.0  ;;  %v9569_v35 = vld [vmem:[#allocation33 + $0x50] sm:$0xff] }
0x25ae   : > { %v9398_v42 = vsel %vm1426_vm0, %v9385_v50, 0.0  ;;  %v9591_v60 = vld [vmem:[%s14172_s4 + $0x98] sm:$0xff] }
0x25af   : > { %v9399_v8 = vadd.f32 %v9398_v42, %v9397_v51  ;;  %v10816_v51 = vld [vmem:[#allocation30 + $0x2] ss:$0 sm:$0xff]  ;;  %v12558_v42 = vpack.c.bf16 %v9570_v43, %v9569_v35  ;;  %v10828_v35 = vld [vmem:[#allocation36 + $0x1] ss:$0 sm:$0xff] }
0x25b1   : > { %v9401_v55 = vadd.f32 %v9400_v45, %v9399_v8  ;;  %v10819_v45 = vld [vmem:[#allocation31 + $0x2] ss:$0 sm:$0xff] }
0x25b3   : > { %12126 = vmatmul.mubr.msk.f32.vlgmr.msra.gmra.mrb[116].mxu1 %vm1426_vm0, %v9401_v55 }
0x25b4   : > { %12147 = vmatprep.mubr.msk.f32.mxu1 %vm13997_vm1, %v13998_v39  ;;  %12550 = vmatpush3.bf16.msra.mxu1 %v12549_v49 }
0x25b5   : > { %12551 = vmatprep.subr.bf16.mxu1 %v13996_v30 }
0x25b8   : > { %12553 = vmatpush3.bf16.msra.mxu1 %v12552_v57  ;;  %v10823_v57 = vld [vmem:[#allocation34] ss:$0 sm:$0xff] }
0x25b9   : > { %12560 = vmatprep.subr.bf16.mxu1 %v13996_v30 }
0x2686   : > { %v9477_v14 = vpop.f32.mrb[116].mxu1 }
0x2687   : > { %v9478_v36 = vadd.f32 %v10812_v29, %v9477_v14  ;;  %v12127_v6 = vpop.f32.mrb[117].mxu1  ;;  %v9572_v29 = vld [vmem:[%s14172_s4] sm:$0xff]  ;;  %v9573_v14 = vld [vmem:[%s14172_s4 + $0x8] sm:$0xff] }
0x2688   : > { %v9580_v6 = vld [vmem:[%s14172_s4 + $0x40] sm:$0xff] }
0x2689   : > { %v16244_v53 = vadd.f32 %v9478_v36, %v15913_v37  ;;  %v12561_v36 = vpack.c.bf16 %v9573_v14, %v9572_v29 }
0x268b   : > { %v9488_v11 = vsel %vm1426_vm0, %v16244_v53, 0.0 }
0x268c   : > { %9489 = vadd.xlane.f32.xlu0 %v9488_v11  ;;  %v9581_v11 = vld [vmem:[%s14172_s4 + $0x48] sm:$0xff] }
0x2719   : > { %v9490_v26 = vpop.xlane.xlu0 %9489 }
0x271a   : > { %v9492_v15 = vadd.f32 %v9491_v3, %v9490_v26  ;;  %v12573_v3 = vpack.c.bf16 %v9581_v11, %v9580_v6  ;;  %v9574_v26 = vld [vmem:[%s14172_s4 + $0x10] sm:$0xff] }
0x271c   : > { %v9493_v12 = vmul.f32 0.010416667, %v9492_v15  ;;  %v9575_v15 = vld [vmem:[%s14172_s4 + $0x18] sm:$0xff] }
0x271e   : > { %v9494_v47 = vsub.f32 %v16052_v59, %v9493_v12  ;;  %v9495_v41 = vsub.f32 %v16160_v20, %v9493_v12  ;;  %v9496_v13 = vsub.f32 %v16244_v53, %v9493_v12  ;;  %v12564_v12 = vpack.c.bf16 %v9575_v15, %v9574_v26 }
0x2720   : > { %v9498_v62 = vmul.f32 %v9495_v41, %v9495_v41  ;;  %v9497_v25 = vmul.f32 %v9494_v47, %v9494_v47  ;;  %v9499_v32 = vmul.f32 %v9496_v13, %v9496_v13 }
0x2722   : > { %v9503_v37 = vsel %vm1426_vm0, %v9498_v62, 0.0  ;;  %v9500_v27 = vsel %vm1426_vm0, %v9497_v25, 0.0  ;;  %v9506_v18 = vsel %vm1426_vm0, %v9499_v32, 0.0  ;;  %v9576_v62 = vld [vmem:[%s14172_s4 + $0x20] sm:$0xff]  ;;  %v9577_v25 = vld [vmem:[%s14172_s4 + $0x28] sm:$0xff] }
0x2723   : > { %9504 = vadd.xlane.f32.xlu0 %v9503_v37  ;;  %9501 = vadd.xlane.f32.xlu1 %v9500_v27  ;;  %v12567_v37 = vpack.c.bf16 %v9577_v25, %v9576_v62  ;;  %v9584_v27 = vld [vmem:[%s14172_s4 + $0x60] sm:$0xff]  ;;  %v9585_v32 = vld [vmem:[%s14172_s4 + $0x68] sm:$0xff] }
0x2727   : > { %9507 = vadd.xlane.f32.xlu1 %v9506_v18  ;;  %v12579_v18 = vpack.c.bf16 %v9585_v32, %v9584_v27 }
0x27b0   : > { %v9505_v48 = vpop.xlane.xlu0 %9504  ;;  %v9502_v38 = vpop.xlane.xlu1 %9501 }
0x27b1   : > { %v9509_v46 = vadd.f32 %v9505_v48, %v9502_v38 }
0x27b4   : > { %v9508_v44 = vpop.xlane.xlu1 %9507 }
0x27b5   : > { %v9510_v16 = vadd.f32 %v9509_v46, %v9508_v44 }
0x27b7   : > { %v9511_v2 = vmul.f32 0.010416667, %v9510_v16 }
0x27b9   : > { %v9512_v9 = vadd.f32 1e-06, %v9511_v2  ;;  %v9588_v2 = vld [vmem:[%s14172_s4 + $0x80] sm:$0xff] }
0x27bb   : > { %13198 = vrsqrt.f32 %v9512_v9  ;;  %v9589_v9 = vld [vmem:[%s14172_s4 + $0x88] sm:$0xff] }
0x27c5   : > { %v13199_v58 = vpop.eup %13198 }
0x27c6   : > { %v9515_v56 = vmul.f32 %v13199_v58, %v9495_v41  ;;  %v9514_v61 = vmul.f32 %v13199_v58, %v9494_v47  ;;  %v9516_v50 = vmul.f32 %v13199_v58, %v9496_v13  ;;  %v9582_v47 = vld [vmem:[%s14172_s4 + $0x50] sm:$0xff]  ;;  %v9583_v41 = vld [vmem:[%s14172_s4 + $0x58] sm:$0xff] }
0x27c7   : > { %v12576_v13 = vpack.c.bf16 %v9583_v41, %v9582_v47 }
0x27c8   : > { %v9536_v4 = vmul.f32 %v10815_v28, %v9515_v56  ;;  %v9535_v5 = vmul.f32 %v10814_v34, %v9514_v61  ;;  %v9537_v8 = vmul.f32 %v10816_v51, %v9516_v50  ;;  %v12585_v56 = vpack.c.bf16 %v9589_v9, %v9588_v2 }
0x27ca   : > { %v9557_v23 = vadd.f32 %v10818_v10, %v9536_v4  ;;  %v9556_v17 = vadd.f32 %v10817_v54, %v9535_v5  ;;  %v9558_v55 = vadd.f32 %v10819_v45, %v9537_v8  ;;  %v12588_v10 = vpack.c.bf16 %v9591_v60, %v9590_v1  ;;  %v9592_v54 = vld [vmem:[%s14172_s4 + $0xa0] sm:$0xff]  ;;  %v9593_v4 = vld [vmem:[%s14172_s4 + $0xa8] sm:$0xff] }
0x27cb   : > { %v12591_v5 = vpack.c.bf16 %v9593_v4, %v9592_v54 }
0x27cc   : > { %12137 = vmatmul.mubr.msk.f32.vlgmr.msra.gmra.mrb[122].mxu0 %vm1426_vm0, %v9557_v23  ;;  %12148 = vmatmul.mubr.msk.f32.vlgmr.msra.gmra.mrb[118].mxu1 %vm1426_vm0, %v9556_v17  ;;  %v9595_v23 = vld [vmem:[%s14172_s4 + $0xb8] sm:$0xff] }
0x27cd   : > { %12556 = vmatpush3.bf16.msra.mxu0 %v12555_v0  ;;  %12158 = vmatprep.mubr.msk.f32.mxu0 %vm13997_vm1, %v13998_v39  ;;  %v9594_v0 = vld [vmem:[%s14172_s4 + $0xb0] sm:$0xff] }
0x27ce   : > { %12557 = vmatprep.subr.bf16.mxu0 %v13996_v30  ;;  %12177 = vmatprep.mubr.msk.f32.mxu1 %vm13997_vm1, %v13998_v39  ;;  %v12594_v17 = vpack.c.bf16 %v9595_v23, %v9594_v0 }
0x27cf   : > { %12562 = vmatpush3.bf16.msra.mxu1 %v12561_v36 }
0x27d0   : > { %12563 = vmatprep.subr.bf16.mxu1 %v13996_v30 }
0x27d1   : > { %12559 = vmatpush3.bf16.msra.mxu0 %v12558_v42 }
0x27d2   : > { %12572 = vmatprep.subr.bf16.mxu0 %v13996_v30 }
0x27d3   : > { %12565 = vmatpush3.bf16.msra.mxu1 %v12564_v12 }
0x27d4   : > { %12159 = vmatmul.mubr.msk.f32.vlgmr.msra.gmra.mrb[124].mxu0 %vm1426_vm0, %v9558_v55  ;;  %12566 = vmatprep.subr.bf16.mxu1 %v13996_v30 }
0x27d5   : > { %12196 = vmatprep.mubr.msk.f32.mxu0 %vm13997_vm1, %v13998_v39  ;;  %12574 = vmatpush3.bf16.msra.mxu0 %v12573_v3 }
0x27d6   : > { %12575 = vmatprep.subr.bf16.mxu0 %v13996_v30 }
0x27d7   : > { %12568 = vmatpush3.bf16.msra.mxu1 %v12567_v37 }
0x27d8   : > { %12569 = vmatprep.subr.bf16.mxu1 %v13996_v30 }
0x27d9   : > { %12577 = vmatpush3.bf16.msra.mxu0 %v12576_v13 }
0x27da   : > { %12578 = vmatprep.subr.bf16.mxu0 %v13996_v30 }
0x27db   : > { %12571 = vmatpush3.bf16.msra.mxu1 %v12570_v52 }
0x27dc   : > { %12584 = vmatprep.subr.bf16.mxu1 %v13996_v30 }
0x27dd   : > { %12580 = vmatpush3.bf16.msra.mxu0 %v12579_v18 }
0x27de   : > { %12581 = vmatprep.subr.bf16.mxu0 %v13996_v30 }
0x27e1   : > { %12583 = vmatpush3.bf16.msra.mxu0 %v12582_v24 }
0x289f   : > { %v9668_v19 = vpop.f32.mrb[122].mxu0  ;;  %v9741_v49 = vpop.f32.mrb[118].mxu1 }
0x28a0   : > { %v9742_v7 = vadd.f32 %v9741_v49, %v9668_v19  ;;  %v12138_v33 = vpop.f32.mrb[123].mxu0  ;;  %v12149_v22 = vpop.f32.mrb[119].mxu1 }
0x28a7   : > { %v9814_v48 = vpop.f32.mrb[124].mxu0 }
0x28a8   : > { %v9818_v38 = vadd.f32 %v9814_v48, %v9742_v7  ;;  %v12160_v46 = vpop.f32.mrb[125].mxu0 }
0x28aa   : > { %v9825_v44 = vadd.f32 %v10823_v57, %v9818_v38 }
0x28ac   : > { %v9827_v16 = vmul.f32 0.70710677, %v9825_v44  ;;  %v9826_v28 = vmul.f32 0.5, %v9825_v44 }
0x28ae   : > { %13200 = verf.f32 %v9827_v16 }
0x28b8   : > { %v13201_v58 = vpop.eup %13200 }
0x28b9   : > { %v9829_v34 = vadd.f32 1.0, %v13201_v58 }
0x28bb   : > { %v9830_v61 = vmul.f32 %v9829_v34, %v9826_v28 }
0x28bd   : > { %12178 = vmatmul.mubr.msk.f32.vlgmr.msra.gmra.mrb[120].mxu1 %vm4050_vm3, %v9830_v61  ;;  %12197 = vmatmul.mubr.msk.f32.vlgmr.msra.gmra.mrb[126].mxu0 %vm4050_vm3, %v9830_v61 }
0x28be   : > { %12586 = vmatpush3.bf16.msra.mxu1 %v12585_v56  ;;  %12215 = vmatprep.mubr.msk.f32.mxu1 %vm13997_vm1, %v13998_v39  ;;  %v10827_v39 = vld [vmem:[#allocation36] ss:$0 sm:$0xff] }
0x28bf   : > { %12587 = vmatprep.subr.bf16.mxu1 %v13996_v30 }
0x28c2   : > { %12589 = vmatpush3.bf16.msra.mxu1 %v12588_v10 }
0x28c3   : > { %12590 = vmatprep.subr.bf16.mxu1 %v13996_v30 }
0x28c6   : > { %12592 = vmatpush3.bf16.msra.mxu1 %v12591_v5 }
0x28c7   : > { %12593 = vmatprep.subr.bf16.mxu1 %v13996_v30  ;;  %v10829_v30 = vld [vmem:[#allocation36 + $0x2] ss:$0 sm:$0xff] }
0x28ca   : > { %12595 = vmatpush3.bf16.msra.mxu1 %v12594_v17 }
0x28cd   : > { %12216 = vmatmul.mubr.msk.f32.vlgmr.msra.gmra.mrb[122].mxu1 %vm4050_vm3, %v9830_v61 }
0x2990   : > { %v9900_v43 = vpop.f32.mrb[120].mxu1  ;;  %v9970_v50 = vpop.f32.mrb[126].mxu0 }
0x2991   : > { %v10062_v51 = vadd.f32 %v10827_v39, %v9900_v43  ;;  %v10063_v42 = vadd.f32 %v10828_v35, %v9970_v50  ;;  %v12179_v8 = vpop.f32.mrb[121].mxu1  ;;  %v12198_v45 = vpop.f32.mrb[127].mxu0 }
0x2993   : > { %v10065_v55 = vadd.f32 %v10062_v51, %v16052_v59  ;;  %v10066_v29 = vadd.f32 %v10063_v42, %v16160_v20 }
0x2995   : > { %10068 = vst.msk [vmem:[%s1402_s11] sm:$0xff] %vm1426_vm0, %v10065_v55  ;;  %10069 = vst.msk [vmem:[%s1402_s11 + $0x8] sm:$0xff] %vm1426_vm0, %v10066_v29 }
0x29a0   : > { %v10040_v14 = vpop.f32.mrb[122].mxu1 }
0x29a1   : > { %v10064_v36 = vadd.f32 %v10829_v30, %v10040_v14  ;;  %v12217_v6 = vpop.f32.mrb[123].mxu1 }
0x29a3   : > { %v10067_v11 = vadd.f32 %v10064_v36, %v16244_v53 }
0x29a5   : > { %10070 = vst.msk [vmem:[%s1402_s11 + $0x10] sm:$0xff] %vm1426_vm0, %v10067_v11 }
0x29a6 PF: > { %s93_s22 = sadd.s32 1, %s13932_s22  }
0x29a7   : > { %p90_p1 = scmp.ge.s32.totalorder %s93_s22, 4  }
0x29a9   :  { %92 = sbr.rel (!%p90_p1) target bundleno = 74 (0x4a), region = 334 }
0x29b0   :  { %10092 = vsyncpa [#allocation3], 1 }
0x29b1   :  { %10094 = vsyncpa [#allocation3 + $0x1], 1 }
0x29b2   :  { %10095 = vsyncpa [#allocation5], 1 }
0x29b3   :  { %10096 = vsyncpa [#allocation8], 1 }
0x29b4   :  { %10097 = vsyncpa [#allocation11], 1 }
0x29b5   :  { %10098 = vsyncpa [#allocation14], 1 }
0x29b6   :  { %10099 = vsyncpa [#allocation17], 1 }
0x29b7   :  { %10100 = vsyncpa [#allocation20], 1 }
0x29b8   :  { %10101 = vsyncpa [#allocation23], 1 }
0x29b9   :  { %10102 = vsyncpa [#allocation26], 1 }
0x29ba   :  { %10103 = vsyncpa [#allocation29], 1 }
0x29bb   :  { %10104 = vsyncpa [#allocation32], 1 }
0x29bc   :  { %10105 = vsyncpa [#allocation35], 1 }

</bundles_post_ra>
